<compile_context>
chip_gen: v6e
topology: v6e:2x2x1
jax: 0.10.0
libtpu: 0.0.40
codegen_flags: <defaults>
</compile_context>

<pallas_src>
import functools
import math

import numpy as np
import jax
import jax.numpy as jnp
from jax import lax
from jax.experimental import pallas as pl
from jax.experimental.pallas import tpu as pltpu


# ----------------------------- in-kernel math -----------------------------

def _erf(x):
    # Abramowitz & Stegun 7.1.26, |err| < 1.5e-7; matches torch.nn.GELU()'s
    # exact (erf-based) formulation within f32 tolerance.
    p = 0.3275911
    a1, a2, a3, a4, a5 = (0.254829592, -0.284496736, 1.421413741,
                          -1.453152027, 1.061405429)
    s = jnp.where(x >= 0.0, 1.0, -1.0)
    ax = jnp.abs(x)
    t = 1.0 / (1.0 + p * ax)
    poly = ((((a5 * t + a4) * t + a3) * t + a2) * t + a1) * t
    return s * (1.0 - poly * jnp.exp(-ax * ax))


def _gelu_exact(x):
    return 0.5 * x * (1.0 + _erf(x * 0.7071067811865476))


def _attn_mlp_block(qkv, mask, wm_ref, v_ref):
    """Attention (per-image via additive mask) + proj + residual + LN2 + MLP."""
    q = qkv[:, 0:32]          # attention scale already folded into q columns
    k = qkv[:, 32:64]
    v = qkv[:, 64:96]

    logits = lax.dot_general(q, k, (((1,), (1,)), ((), ())),
                             preferred_element_type=jnp.float32) + mask
    logits = logits - jnp.max(logits, axis=-1, keepdims=True)
    p = jnp.exp(logits)

    # Normalize AFTER p@v: [v | 1] gives av and the row-sum in one MXU push.
    ones_col = jnp.ones((v.shape[0], 1), jnp.float32)
    av_l = jnp.dot(p, jnp.concatenate([v, ones_col], axis=-1),
                   preferred_element_type=jnp.float32)            # (M, 33)
    attn = av_l[:, 0:32] * pl.reciprocal(av_l[:, 32:33], approx=True)

    proj = jnp.dot(attn, wm_ref[0:32, :],
                   preferred_element_type=jnp.float32) + v_ref[0:1, :]
    y = v + proj                                                   # v.squeeze(1) + proj

    # norm2 + MLP (32-wide, centered LN)
    g2 = v_ref[1:2, :]
    b2 = v_ref[2:3, :]
    mu = jnp.mean(y, axis=-1, keepdims=True)
    var = jnp.mean(jnp.square(y - mu), axis=-1, keepdims=True)
    yn = (y - mu) * lax.rsqrt(var + 1e-5) * g2 + b2
    h = jnp.dot(yn, wm_ref[32:64, :],
                preferred_element_type=jnp.float32) + v_ref[3:4, :]
    h = _gelu_exact(h)
    h = jnp.dot(h, wm_ref[64:96, :],
                preferred_element_type=jnp.float32) + v_ref[4:5, :]
    return y + h


def _unfold_ln_qkv(y, sel_ref, wg_ref, aux_ref):
    """Fused 3x3-unfold -> LayerNorm -> QKV for one stage.

    The 288-wide unfolded token matrix u (kernel-position-major feature order)
    is never materialized: u @ (diag(g) Wqkv) is computed as
    sum_k (S_k @ y) @ Wg_k, and u's LN statistics are accumulated from the same
    nine 32-lane selection products.
    """
    d_true = 9 * y.shape[-1]
    inv_d = 1.0 / float(d_true)
    raw = None
    acc = None
    acc_sq = None
    for k in range(9):
        part = jnp.dot(sel_ref[k], y, preferred_element_type=jnp.float32)
        term = jnp.dot(part, wg_ref[k * 32:(k + 1) * 32, :],
                       preferred_element_type=jnp.float32)
        if raw is None:
            raw, acc, acc_sq = term, part, part * part
        else:
            raw = raw + term
            acc = acc + part
            acc_sq = acc_sq + part * part
    mu = jnp.sum(acc, axis=-1, keepdims=True) * inv_d
    ex2 = jnp.sum(acc_sq, axis=-1, keepdims=True) * inv_d
    var = jnp.maximum(ex2 - mu * mu, 0.0)
    inv_s = lax.rsqrt(var + 1e-5)
    # qkv = inv_s * (u@Wg - mu * colsum(Wg)) + b@W   (LN gain/bias pre-folded)
    return (raw - mu * aux_ref[0:1, :]) * inv_s + aux_ref[1:2, :]


# ------------------------------ fused kernel -------------------------------

def _pre_unfold_kernel(x0_ref, ftmask_ref,
                       sel2_ref, sel3_ref, sel4_ref,
                       mask1_ref, mask2_ref, mask3_ref,
                       wg1_ref, aux1_ref, wm1_ref, v1_ref,
                       wg2_ref, aux2_ref, wm2_ref, v2_ref,
                       wg3_ref, aux3_ref, wm3_ref, v3_ref,
                       lw_ref, lb_ref,
                       o_ref, *, d1_true):
    x0 = x0_ref[...]                                   # (Bblk*L1, d1p), zero-padded lanes
    inv_d1 = 1.0 / float(d1_true)

    # ---- stage 1: folded LN1 + QKV.  Column 96 of wg1 is a true-dim mask
    # column, so the row-sum (for mu) comes out of the same MXU matmul.
    w1 = wg1_ref[...]                                  # (d1p, 97)
    raw = jnp.dot(x0, w1, preferred_element_type=jnp.float32)     # (M1, 97)
    mu = raw[:, 96:97] * inv_d1
    xc = x0 - mu
    # centered variance over the TRUE 196 features (pads masked out).
    var = jnp.sum(jnp.square(xc) * ftmask_ref[...],
                  axis=-1, keepdims=True) * inv_d1
    inv_s = lax.rsqrt(var + 1e-5)
    qkv1 = (raw[:, 0:96] - mu * aux1_ref[0:1, :]) * inv_s + aux1_ref[1:2, :]
    y1 = _attn_mlp_block(qkv1, mask1_ref[...], wm1_ref, v1_ref)

    # ---- stage 2 / 3: folded 3x3 unfold + LN1 + QKV, then attention/MLP.
    qkv2 = _unfold_ln_qkv(y1, sel2_ref, wg2_ref, aux2_ref)
    y2 = _attn_mlp_block(qkv2, mask2_ref[...], wm2_ref, v2_ref)
    qkv3 = _unfold_ln_qkv(y2, sel3_ref, wg3_ref, aux3_ref)
    y3 = _attn_mlp_block(qkv3, mask3_ref[...], wm3_ref, v3_ref)

    # ---- final: folded 3x3 unfold + Linear (lane-dense 256-wide output).
    out = None
    for k in range(9):
        part = jnp.dot(sel4_ref[k], y3, preferred_element_type=jnp.float32)
        term = jnp.dot(part, lw_ref[k * 32:(k + 1) * 32, :],
                       preferred_element_type=jnp.float32)
        out = term if out is None else out + term
    o_ref[...] = out + lb_ref[...]


# --------------------------- parameter preparation --------------------------
# Permutation mapping the kernel's unfold feature order (k*32 + c) to PyTorch
# nn.Unfold's order (c*9 + k) for the 32-channel, 3x3 stages.
_PERM_3X3 = np.array([c * 9 + k for k in range(9) for c in range(32)], np.int32)


def prepare_params(params, input_dim):
    """One-time weight prep (outside the per-forward path):
    transpose to (in, out), fuse QKV, fold the attention scale into the q
    columns and LayerNorm-1 gain/bias into the QKV weight, permute 288-wide
    input dims to the kernel's unfold ordering, zero-pad stage 1 to a lane
    multiple, append stage-1's true-dim ones column, and pack small tensors."""
    d1 = input_dim * 49
    d1p = ((d1 + 127) // 128) * 128

    def prep_stage(p, d, dpad, permute, aug):
        scale = float(d) ** -0.5                    # num_heads=1 -> dim**-0.5
        w = jnp.transpose(p["wqkv"]).astype(jnp.float32)          # (d, 96)
        colscale = jnp.concatenate(
            [jnp.full((32,), scale, jnp.float32), jnp.ones((64,), jnp.float32)])
        w = w * colscale[None, :]
        g1 = p["ln1_g"].reshape(-1).astype(jnp.float32)
        b1 = p["ln1_b"].reshape(-1).astype(jnp.float32)
        if permute:
            w = w[_PERM_3X3, :]
            g1 = g1[_PERM_3X3]
            b1 = b1[_PERM_3X3]
        bfold = jnp.dot(b1[None, :], w)                            # (1, 96)
        wg = w * g1[:, None]                                       # diag(g) @ W
        colsum = jnp.sum(wg, axis=0, keepdims=True)                # (1, 96)
        if dpad != d:
            wg = jnp.pad(wg, ((0, dpad - d), (0, 0)))
        if aug:   # append the true-dim mask column -> row sums via the MXU
            maskcol = (jnp.arange(dpad) < d).astype(jnp.float32)[:, None]
            wg = jnp.concatenate([wg, maskcol], axis=1)            # (dpad, 97)
        aux = jnp.concatenate([colsum, bfold], axis=0)             # (2, 96)
        wm = jnp.concatenate([jnp.transpose(p["wproj"]),
                              jnp.transpose(p["w1"]),
                              jnp.transpose(p["w2"])], axis=0)     # (96, 32)
        vrows = jnp.concatenate(
            [p["bproj"].reshape(1, -1), p["ln2_g"].reshape(1, -1),
             p["ln2_b"].reshape(1, -1), p["b1"].reshape(1, -1),
             p["b2"].reshape(1, -1)], axis=0).astype(jnp.float32)  # (5, 32)
        return {"wg": wg, "aux": aux, "wm": wm, "v": vrows}

    stages = [
        prep_stage(params["att1"], d1, d1p, permute=False, aug=True),
        prep_stage(params["att2"], 288, 288, permute=True, aug=False),
        prep_stage(params["att3"], 288, 288, permute=True, aug=False),
    ]
    lin_w = jnp.transpose(params["lin_w"]).astype(jnp.float32)[_PERM_3X3, :]
    lin_b = params["lin_b"].reshape(1, -1).astype(jnp.float32)
    return {"stages": stages, "lin_w": lin_w, "lin_b": lin_b}


# -------------------------- constant matrix builders -------------------------

def _selection_3x3(s, bblk):
    """One-hot row-selection (9, bblk*(s-2)^2, bblk*s^2) for a block-diagonal
    (multi-image) 3x3/s1/p0 unfold; kernel offset k = i*3 + j."""
    ow = s - 2
    sel = np.zeros((9, ow * ow, s * s), np.float32)
    for i in range(3):
        for j in range(3):
            k = i * 3 + j
            for p in range(ow):
                for q in range(ow):
                    sel[k, p * ow + q, (p + i) * s + (q + j)] = 1.0
    if bblk > 1:
        eye = np.eye(bblk, dtype=np.float32)
        sel = np.stack([np.kron(eye, sel[k]) for k in range(9)], axis=0)
    return jnp.asarray(sel)


def _block_attn_mask(n, bblk):
    """Additive attention mask (bblk*n, bblk*n): 0 within an image, -1e30 across."""
    m = np.kron(1.0 - np.eye(bblk, dtype=np.float32),
                np.full((n, n), -1e30, dtype=np.float32))
    return jnp.asarray(m)


# ------------------------------ unfold (glue) -------------------------------
# TODO(synk): the first 7x7/s4/p2 im2col gather of the NCHW input is pure data
# movement and stays as plain-JAX glue feeding the fused kernel.

def _unfold_tokens(x, k, stride, padding):
    B, C, H, W = x.shape
    xp = jnp.pad(x, ((0, 0), (0, 0), (padding, padding), (padding, padding)))
    Hp, Wp = H + 2 * padding, W + 2 * padding
    oh = (Hp - k) // stride + 1
    ow = (Wp - k) // stride + 1
    cols = []
    for i in range(k):
        for j in range(k):
            cols.append(xp[:, :, i:i + stride * oh:stride,
                           j:j + stride * ow:stride])        # (B, C, oh, ow)
    st = jnp.stack(cols, axis=2)                             # (B, C, k*k, oh, ow)
    st = st.reshape(B, C * k * k, oh * ow)                   # torch unfold order
    return jnp.transpose(st, (0, 2, 1))                      # (B, L, C*k*k)


# ------------------------------ full forward --------------------------------

def _choose_block_batch(batch):
    # Batch as many images per grid step as possible (cap 8) while keeping at
    # least 2 grid steps so v7x's two TensorCores both get work.
    best = 1
    for bb in range(1, min(8, batch) + 1):
        if batch % bb == 0 and batch // bb >= 2:
            best = bb
    return best


def pre_unfold_local(src, prep, block_batch=None):
    B, C, H, W = src.shape
    d1 = C * 49
    d1p = prep["stages"][0]["wg"].shape[0]
    dout = prep["lin_w"].shape[1]

    x0 = _unfold_tokens(src, 7, 4, 2)                        # (B, L1, d1)
    x0 = jnp.pad(x0, ((0, 0), (0, 0), (0, d1p - d1)))        # lane-align to 128

    L1 = x0.shape[1]
    s1 = math.isqrt(L1)
    assert s1 * s1 == L1, "token count must be a perfect square"
    s2, s3, s4 = s1 - 2, s1 - 4, s1 - 6
    L2, L3, L4 = s2 * s2, s3 * s3, s4 * s4

    bblk = _choose_block_batch(B) if block_batch is None else block_batch
    assert B % bblk == 0, "block_batch must divide the batch"
    nb = B // bblk
    x0 = x0.reshape(nb, bblk * L1, d1p)                      # image-major stacking

    ftmask = jnp.asarray((np.arange(d1p) < d1).astype(np.float32)[None, :])
    const_in = [ftmask,
                _selection_3x3(s1, bblk), _selection_3x3(s2, bblk),
                _selection_3x3(s3, bblk),
                _block_attn_mask(L1, bblk), _block_attn_mask(L2, bblk),
                _block_attn_mask(L3, bblk)]
    for st in prep["stages"]:
        const_in += [st["wg"], st["aux"], st["wm"], st["v"]]
    const_in += [prep["lin_w"], prep["lin_b"]]

    def full(shape):
        nd = len(shape)
        return pl.BlockSpec(shape, lambda b, _nd=nd: (0,) * _nd)

    in_specs = [pl.BlockSpec((None, bblk * L1, d1p), lambda b: (b, 0, 0))]
    in_specs += [full(a.shape) for a in const_in]

    kern = functools.partial(_pre_unfold_kernel, d1_true=d1)
    out = pl.pallas_call(
        kern,
        out_shape=jax.ShapeDtypeStruct((nb, bblk * L4, dout), jnp.float32),
        grid=(nb,),
        in_specs=in_specs,
        out_specs=pl.BlockSpec((None, bblk * L4, dout), lambda b: (b, 0, 0)),
        compiler_params=pltpu.CompilerParams(
            dimension_semantics=("parallel",)),
    )(x0, *const_in)
    return out.reshape(B, L4, dout)


# --------------------------- pure-JAX f32 reference --------------------------

def _tt_ref(x, p):
    dim = x.shape[-1]
    mu = jnp.mean(x, -1, keepdims=True)
    var = jnp.mean((x - mu) ** 2, -1, keepdims=True)
    xn = (x - mu) * lax.rsqrt(var + 1e-5) * p["ln1_g"] + p["ln1_b"]
    qkv = xn @ jnp.transpose(p["wqkv"])
    q, k, v = qkv[..., 0:32], qkv[..., 32:64], qkv[..., 64:96]
    attn = jnp.einsum("bnd,bmd->bnm", q * (float(dim) ** -0.5), k)
    attn = jax.nn.softmax(attn, axis=-1)
    xo = jnp.einsum("bnm,bmd->bnd", attn, v)
    xo = xo @ jnp.transpose(p["wproj"]) + p["bproj"]
    xo = v + xo
    mu2 = jnp.mean(xo, -1, keepdims=True)
    var2 = jnp.mean((xo - mu2) ** 2, -1, keepdims=True)
    yn = (xo - mu2) * lax.rsqrt(var2 + 1e-5) * p["ln2_g"] + p["ln2_b"]
    h = yn @ jnp.transpose(p["w1"]) + p["b1"]
    h = jax.nn.gelu(h, approximate=False)
    h = h @ jnp.transpose(p["w2"]) + p["b2"]
    return xo + h


def pre_unfold_ref(src, params):
    def refold(x):
        B, L, C = x.shape
        s = math.isqrt(L)
        img = jnp.transpose(x, (0, 2, 1)).reshape(B, C, s, s)
        return _unfold_tokens(img, 3, 1, 0)

    x1 = _tt_ref(_unfold_tokens(src, 7, 4, 2), params["att1"])
    x2 = _tt_ref(refold(x1), params["att2"])
    x3 = _tt_ref(refold(x2), params["att3"])
    return refold(x3) @ jnp.transpose(params["lin_w"]) + params["lin_b"]


# ------------------------------ params init ---------------------------------

def make_tt_params(key, dim, in_dim=32):
    ks = jax.random.split(key, 11)
    f32 = jnp.float32

    def rnd(k, shape, s=0.02):
        return s * jax.random.normal(k, shape, f32)

    return {
        "ln1_g": 1.0 + rnd(ks[0], (1, dim), 0.1),
        "ln1_b": rnd(ks[1], (1, dim), 0.1),
        "wqkv": rnd(ks[2], (3 * in_dim, dim)),          # no bias (qkv_bias=False)
        "wproj": rnd(ks[3], (in_dim, in_dim)),
        "bproj": rnd(ks[4], (1, in_dim)),
        "ln2_g": 1.0 + rnd(ks[5], (1, in_dim), 0.1),
        "ln2_b": rnd(ks[6], (1, in_dim), 0.1),
        "w1": rnd(ks[7], (in_dim, in_dim)),
        "b1": rnd(ks[8], (1, in_dim)),
        "w2": rnd(ks[9], (in_dim, in_dim)),
        "b2": rnd(ks[10], (1, in_dim)),
    }


if __name__ == "__main__":
    key = jax.random.PRNGKey(0)
    k_in, k1, k2, k3, k4, k5 = jax.random.split(key, 6)

    # B, C, H, W chosen so the unfold chain yields perfect-square token counts:
    # 31 -> side 8 (7x7 s4 p2) -> 6 -> 4 -> 2  => final seq len 4.
    B, C, H, W = 4, 4, 31, 31
    src = jax.random.normal(k_in, (B, C, H, W), jnp.float32)

    params = {
        "att1": make_tt_params(k1, C * 7 * 7, 32),
        "att2": make_tt_params(k2, 32 * 3 * 3, 32),
        "att3": make_tt_params(k3, 32 * 3 * 3, 32),
        "lin_w": 0.02 * jax.random.normal(k4, (256, 32 * 3 * 3), jnp.float32),
        "lin_b": 0.02 * jax.random.normal(k5, (256,), jnp.float32),
    }

    prep = prepare_params(params, C)                  # one-time weight prep
    fwd = jax.jit(pre_unfold_local)
    ref_fn = jax.jit(pre_unfold_ref)

    # batched path: 2 images per grid step, grid=(2,)
    out = jax.block_until_ready(fwd(src, prep))
    ref = jax.block_until_ready(ref_fn(src, params))
    assert out.shape == (B, 4, 256), out.shape
    assert bool(jnp.all(jnp.isfinite(out)))
    np.testing.assert_allclose(np.asarray(out), np.asarray(ref),
                               atol=5e-3, rtol=0.0)

    # single-image-per-step path (B=2 -> bblk=1, grid=(2,))
    out2 = jax.block_until_ready(fwd(src[:2], prep))
    np.testing.assert_allclose(np.asarray(out2), np.asarray(ref)[:2],
                               atol=5e-3, rtol=0.0)

    print("KERNEL_OK")
</pallas_src>

<mosaic_0001>
module attributes {stable_mosaic.version = 11 : i64} {
  func.func @_pre_unfold_kernel(%arg0: i32, %arg1: memref<1x128x256xf32, #tpu.memory_space<vmem>>, %arg2: memref<1x256xf32, #tpu.memory_space<vmem>>, %arg3: memref<9x72x128xf32, #tpu.memory_space<vmem>>, %arg4: memref<9x32x72xf32, #tpu.memory_space<vmem>>, %arg5: memref<9x8x32xf32, #tpu.memory_space<vmem>>, %arg6: memref<128x128xf32, #tpu.memory_space<vmem>>, %arg7: memref<72x72xf32, #tpu.memory_space<vmem>>, %arg8: memref<32x32xf32, #tpu.memory_space<vmem>>, %arg9: memref<256x97xf32, #tpu.memory_space<vmem>>, %arg10: memref<2x96xf32, #tpu.memory_space<vmem>>, %arg11: memref<96x32xf32, #tpu.memory_space<vmem>>, %arg12: memref<5x32xf32, #tpu.memory_space<vmem>>, %arg13: memref<288x96xf32, #tpu.memory_space<vmem>>, %arg14: memref<2x96xf32, #tpu.memory_space<vmem>>, %arg15: memref<96x32xf32, #tpu.memory_space<vmem>>, %arg16: memref<5x32xf32, #tpu.memory_space<vmem>>, %arg17: memref<288x96xf32, #tpu.memory_space<vmem>>, %arg18: memref<2x96xf32, #tpu.memory_space<vmem>>, %arg19: memref<96x32xf32, #tpu.memory_space<vmem>>, %arg20: memref<5x32xf32, #tpu.memory_space<vmem>>, %arg21: memref<288x256xf32, #tpu.memory_space<vmem>>, %arg22: memref<1x256xf32, #tpu.memory_space<vmem>>, %arg23: memref<1x8x256xf32, #tpu.memory_space<vmem>>) attributes {dimension_semantics = [#tpu.dimension_semantics<parallel>], iteration_bounds = array<i64: 2>, scalar_prefetch = 0 : i64, scratch_operands = 0 : i64, tpu.core_type = #tpu.core_type<tc>, window_params = [{transform_indices = @transform_0, window_bounds = array<i64: 1, 128, 256>}, {pipeline_mode = #tpu.pipeline_mode<synchronous>, transform_indices = @transform_1, window_bounds = array<i64: 1, 256>}, {pipeline_mode = #tpu.pipeline_mode<synchronous>, transform_indices = @transform_2, window_bounds = array<i64: 9, 72, 128>}, {pipeline_mode = #tpu.pipeline_mode<synchronous>, transform_indices = @transform_3, window_bounds = array<i64: 9, 32, 72>}, {pipeline_mode = #tpu.pipeline_mode<synchronous>, transform_indices = @transform_4, window_bounds = array<i64: 9, 8, 32>}, {pipeline_mode = #tpu.pipeline_mode<synchronous>, transform_indices = @transform_5, window_bounds = array<i64: 128, 128>}, {pipeline_mode = #tpu.pipeline_mode<synchronous>, transform_indices = @transform_6, window_bounds = array<i64: 72, 72>}, {pipeline_mode = #tpu.pipeline_mode<synchronous>, transform_indices = @transform_7, window_bounds = array<i64: 32, 32>}, {pipeline_mode = #tpu.pipeline_mode<synchronous>, transform_indices = @transform_8, window_bounds = array<i64: 256, 97>}, {pipeline_mode = #tpu.pipeline_mode<synchronous>, transform_indices = @transform_9, window_bounds = array<i64: 2, 96>}, {pipeline_mode = #tpu.pipeline_mode<synchronous>, transform_indices = @transform_10, window_bounds = array<i64: 96, 32>}, {pipeline_mode = #tpu.pipeline_mode<synchronous>, transform_indices = @transform_11, window_bounds = array<i64: 5, 32>}, {pipeline_mode = #tpu.pipeline_mode<synchronous>, transform_indices = @transform_12, window_bounds = array<i64: 288, 96>}, {pipeline_mode = #tpu.pipeline_mode<synchronous>, transform_indices = @transform_13, window_bounds = array<i64: 2, 96>}, {pipeline_mode = #tpu.pipeline_mode<synchronous>, transform_indices = @transform_14, window_bounds = array<i64: 96, 32>}, {pipeline_mode = #tpu.pipeline_mode<synchronous>, transform_indices = @transform_15, window_bounds = array<i64: 5, 32>}, {pipeline_mode = #tpu.pipeline_mode<synchronous>, transform_indices = @transform_16, window_bounds = array<i64: 288, 96>}, {pipeline_mode = #tpu.pipeline_mode<synchronous>, transform_indices = @transform_17, window_bounds = array<i64: 2, 96>}, {pipeline_mode = #tpu.pipeline_mode<synchronous>, transform_indices = @transform_18, window_bounds = array<i64: 96, 32>}, {pipeline_mode = #tpu.pipeline_mode<synchronous>, transform_indices = @transform_19, window_bounds = array<i64: 5, 32>}, {pipeline_mode = #tpu.pipeline_mode<synchronous>, transform_indices = @transform_20, window_bounds = array<i64: 288, 256>}, {pipeline_mode = #tpu.pipeline_mode<synchronous>, transform_indices = @transform_21, window_bounds = array<i64: 1, 256>}, {transform_indices = @transform_22, window_bounds = array<i64: 1, 8, 256>}]} {
    %c0 = arith.constant 0 : index
    %c0_0 = arith.constant 0 : index
    %c0_1 = arith.constant 0 : index
    %0 = vector.load %arg1[%c0, %c0_0, %c0_1] : memref<1x128x256xf32, #tpu.memory_space<vmem>>, vector<1x128x256xf32>
    %1 = vector.shape_cast %0 : vector<1x128x256xf32> to vector<128x256xf32>
    %c0_2 = arith.constant 0 : index
    %c0_3 = arith.constant 0 : index
    %2 = vector.load %arg9[%c0_2, %c0_3] : memref<256x97xf32, #tpu.memory_space<vmem>>, vector<256x97xf32>
    %cst = arith.constant dense<0.000000e+00> : vector<128x97xf32>
    %3 = tpu.matmul %1, %2, %cst {dimension_numbers = #tpu.dot_dimension_numbers<[1], [0], [0], [1], [0, 0, 1, 1], [], []>} : vector<128x256xf32>, vector<256x97xf32>, vector<128x97xf32> -> vector<128x97xf32>
    %4 = vector.extract_strided_slice %3 {offsets = [0, 96], sizes = [128, 1], strides = [1, 1]} : vector<128x97xf32> to vector<128x1xf32>
    %cst_4 = arith.constant 0.00510204071 : f32
    %5 = vector.broadcast %cst_4 : f32 to vector<128x1xf32>
    %6 = arith.mulf %4, %5 : vector<128x1xf32>
    %7 = vector.broadcast %6 : vector<128x1xf32> to vector<128x256xf32>
    %8 = arith.subf %1, %7 : vector<128x256xf32>
    %9 = arith.mulf %8, %8 : vector<128x256xf32>
    %c0_5 = arith.constant 0 : index
    %c0_6 = arith.constant 0 : index
    %10 = vector.load %arg2[%c0_5, %c0_6] : memref<1x256xf32, #tpu.memory_space<vmem>>, vector<1x256xf32>
    %11 = vector.broadcast %10 : vector<1x256xf32> to vector<128x256xf32>
    %12 = arith.mulf %9, %11 : vector<128x256xf32>
    %cst_7 = arith.constant dense<0.000000e+00> : vector<128xf32>
    %13 = vector.multi_reduction <add>, %12, %cst_7 [1] : vector<128x256xf32> to vector<128xf32>
    %14 = vector.shape_cast %13 : vector<128xf32> to vector<128x1xf32>
    %cst_8 = arith.constant 0.00510204071 : f32
    %15 = vector.broadcast %cst_8 : f32 to vector<128x1xf32>
    %16 = arith.mulf %14, %15 : vector<128x1xf32>
    %cst_9 = arith.constant 9.99999974E-6 : f32
    %17 = vector.broadcast %cst_9 : f32 to vector<128x1xf32>
    %18 = arith.addf %16, %17 : vector<128x1xf32>
    %19 = math.rsqrt %18 : vector<128x1xf32>
    %20 = vector.extract_strided_slice %3 {offsets = [0, 0], sizes = [128, 96], strides = [1, 1]} : vector<128x97xf32> to vector<128x96xf32>
    %c0_10 = arith.constant 0 : index
    %c0_11 = arith.constant 0 : index
    %21 = vector.load %arg10[%c0_10, %c0_11] : memref<2x96xf32, #tpu.memory_space<vmem>>, vector<1x96xf32>
    %22 = vector.broadcast %6 : vector<128x1xf32> to vector<128x96xf32>
    %23 = vector.broadcast %21 : vector<1x96xf32> to vector<128x96xf32>
    %24 = arith.mulf %22, %23 : vector<128x96xf32>
    %25 = arith.subf %20, %24 : vector<128x96xf32>
    %26 = vector.broadcast %19 : vector<128x1xf32> to vector<128x96xf32>
    %27 = arith.mulf %25, %26 : vector<128x96xf32>
    %c1 = arith.constant 1 : index
    %c0_12 = arith.constant 0 : index
    %28 = vector.load %arg10[%c1, %c0_12] : memref<2x96xf32, #tpu.memory_space<vmem>>, vector<1x96xf32>
    %29 = vector.broadcast %28 : vector<1x96xf32> to vector<128x96xf32>
    %30 = arith.addf %27, %29 : vector<128x96xf32>
    %c0_13 = arith.constant 0 : index
    %c0_14 = arith.constant 0 : index
    %31 = vector.load %arg6[%c0_13, %c0_14] : memref<128x128xf32, #tpu.memory_space<vmem>>, vector<128x128xf32>
    %32 = vector.extract_strided_slice %30 {offsets = [0, 0], sizes = [128, 32], strides = [1, 1]} : vector<128x96xf32> to vector<128x32xf32>
    %33 = vector.extract_strided_slice %30 {offsets = [0, 32], sizes = [128, 32], strides = [1, 1]} : vector<128x96xf32> to vector<128x32xf32>
    %34 = vector.extract_strided_slice %30 {offsets = [0, 64], sizes = [128, 32], strides = [1, 1]} : vector<128x96xf32> to vector<128x32xf32>
    %cst_15 = arith.constant dense<0.000000e+00> : vector<128x128xf32>
    %35 = tpu.matmul %32, %33, %cst_15 {dimension_numbers = #tpu.dot_dimension_numbers<[1], [1], [0], [0], [0, 0, 1, 0], [], []>} : vector<128x32xf32>, vector<128x32xf32>, vector<128x128xf32> -> vector<128x128xf32>
    %36 = arith.addf %35, %31 : vector<128x128xf32>
    %cst_16 = arith.constant dense<0xFF800000> : vector<128xf32>
    %37 = vector.multi_reduction <maximumf>, %36, %cst_16 [1] : vector<128x128xf32> to vector<128xf32>
    %38 = vector.shape_cast %37 : vector<128xf32> to vector<128x1xf32>
    %39 = vector.broadcast %38 : vector<128x1xf32> to vector<128x128xf32>
    %40 = arith.subf %36, %39 : vector<128x128xf32>
    %41 = math.exp %40 : vector<128x128xf32>
    %cst_17 = arith.constant 1.000000e+00 : f32
    %42 = vector.broadcast %cst_17 : f32 to vector<128x1xf32>
    %43 = tpu.concatenate %34, %42 in 1 : vector<128x32xf32>, vector<128x1xf32> -> vector<128x33xf32>
    %cst_18 = arith.constant dense<0.000000e+00> : vector<128x33xf32>
    %44 = tpu.matmul %41, %43, %cst_18 {dimension_numbers = #tpu.dot_dimension_numbers<[1], [0], [0], [1], [0, 0, 1, 1], [], []>} : vector<128x128xf32>, vector<128x33xf32>, vector<128x33xf32> -> vector<128x33xf32>
    %45 = vector.extract_strided_slice %44 {offsets = [0, 0], sizes = [128, 32], strides = [1, 1]} : vector<128x33xf32> to vector<128x32xf32>
    %46 = vector.extract_strided_slice %44 {offsets = [0, 32], sizes = [128, 1], strides = [1, 1]} : vector<128x33xf32> to vector<128x1xf32>
    %47 = tpu.reciprocal %46 {approx = true} : vector<128x1xf32> -> vector<128x1xf32>
    %48 = vector.broadcast %47 : vector<128x1xf32> to vector<128x32xf32>
    %49 = arith.mulf %45, %48 : vector<128x32xf32>
    %c0_19 = arith.constant 0 : index
    %c0_20 = arith.constant 0 : index
    %50 = vector.load %arg11[%c0_19, %c0_20] : memref<96x32xf32, #tpu.memory_space<vmem>>, vector<32x32xf32>
    %cst_21 = arith.constant dense<0.000000e+00> : vector<128x32xf32>
    %51 = tpu.matmul %49, %50, %cst_21 {dimension_numbers = #tpu.dot_dimension_numbers<[1], [0], [0], [1], [0, 0, 1, 1], [], []>} : vector<128x32xf32>, vector<32x32xf32>, vector<128x32xf32> -> vector<128x32xf32>
    %c0_22 = arith.constant 0 : index
    %c0_23 = arith.constant 0 : index
    %52 = vector.load %arg12[%c0_22, %c0_23] : memref<5x32xf32, #tpu.memory_space<vmem>>, vector<1x32xf32>
    %53 = vector.broadcast %52 : vector<1x32xf32> to vector<128x32xf32>
    %54 = arith.addf %51, %53 : vector<128x32xf32>
    %55 = arith.addf %34, %54 : vector<128x32xf32>
    %c1_24 = arith.constant 1 : index
    %c0_25 = arith.constant 0 : index
    %56 = vector.load %arg12[%c1_24, %c0_25] : memref<5x32xf32, #tpu.memory_space<vmem>>, vector<1x32xf32>
    %c2 = arith.constant 2 : index
    %c0_26 = arith.constant 0 : index
    %57 = vector.load %arg12[%c2, %c0_26] : memref<5x32xf32, #tpu.memory_space<vmem>>, vector<1x32xf32>
    %cst_27 = arith.constant dense<0.000000e+00> : vector<128xf32>
    %58 = vector.multi_reduction <add>, %55, %cst_27 [1] : vector<128x32xf32> to vector<128xf32>
    %59 = vector.shape_cast %58 : vector<128xf32> to vector<128x1xf32>
    %cst_28 = arith.constant 3.200000e+01 : f32
    %60 = vector.broadcast %cst_28 : f32 to vector<128x1xf32>
    %61 = arith.divf %59, %60 : vector<128x1xf32>
    %62 = vector.broadcast %61 : vector<128x1xf32> to vector<128x32xf32>
    %63 = arith.subf %55, %62 : vector<128x32xf32>
    %64 = arith.mulf %63, %63 : vector<128x32xf32>
    %cst_29 = arith.constant dense<0.000000e+00> : vector<128xf32>
    %65 = vector.multi_reduction <add>, %64, %cst_29 [1] : vector<128x32xf32> to vector<128xf32>
    %66 = vector.shape_cast %65 : vector<128xf32> to vector<128x1xf32>
    %cst_30 = arith.constant 3.200000e+01 : f32
    %67 = vector.broadcast %cst_30 : f32 to vector<128x1xf32>
    %68 = arith.divf %66, %67 : vector<128x1xf32>
    %69 = vector.broadcast %61 : vector<128x1xf32> to vector<128x32xf32>
    %70 = arith.subf %55, %69 : vector<128x32xf32>
    %cst_31 = arith.constant 9.99999974E-6 : f32
    %71 = vector.broadcast %cst_31 : f32 to vector<128x1xf32>
    %72 = arith.addf %68, %71 : vector<128x1xf32>
    %73 = math.rsqrt %72 : vector<128x1xf32>
    %74 = vector.broadcast %73 : vector<128x1xf32> to vector<128x32xf32>
    %75 = arith.mulf %70, %74 : vector<128x32xf32>
    %76 = vector.broadcast %56 : vector<1x32xf32> to vector<128x32xf32>
    %77 = arith.mulf %75, %76 : vector<128x32xf32>
    %78 = vector.broadcast %57 : vector<1x32xf32> to vector<128x32xf32>
    %79 = arith.addf %77, %78 : vector<128x32xf32>
    %c32 = arith.constant 32 : index
    %c0_32 = arith.constant 0 : index
    %80 = vector.load %arg11[%c32, %c0_32] : memref<96x32xf32, #tpu.memory_space<vmem>>, vector<32x32xf32>
    %cst_33 = arith.constant dense<0.000000e+00> : vector<128x32xf32>
    %81 = tpu.matmul %79, %80, %cst_33 {dimension_numbers = #tpu.dot_dimension_numbers<[1], [0], [0], [1], [0, 0, 1, 1], [], []>} : vector<128x32xf32>, vector<32x32xf32>, vector<128x32xf32> -> vector<128x32xf32>
    %c3 = arith.constant 3 : index
    %c0_34 = arith.constant 0 : index
    %82 = vector.load %arg12[%c3, %c0_34] : memref<5x32xf32, #tpu.memory_space<vmem>>, vector<1x32xf32>
    %83 = vector.broadcast %82 : vector<1x32xf32> to vector<128x32xf32>
    %84 = arith.addf %81, %83 : vector<128x32xf32>
    %cst_35 = arith.constant 5.000000e-01 : f32
    %85 = vector.broadcast %cst_35 : f32 to vector<128x32xf32>
    %86 = arith.mulf %85, %84 : vector<128x32xf32>
    %cst_36 = arith.constant 0.707106769 : f32
    %87 = vector.broadcast %cst_36 : f32 to vector<128x32xf32>
    %88 = arith.mulf %84, %87 : vector<128x32xf32>
    %cst_37 = arith.constant 0.000000e+00 : f32
    %89 = vector.broadcast %cst_37 : f32 to vector<128x32xf32>
    %90 = arith.cmpf oge, %88, %89 : vector<128x32xf32>
    %cst_38 = arith.constant 1.000000e+00 : f32
    %cst_39 = arith.constant -1.000000e+00 : f32
    %91 = vector.broadcast %cst_38 : f32 to vector<128x32xf32>
    %92 = vector.broadcast %cst_39 : f32 to vector<128x32xf32>
    %93 = arith.select %90, %91, %92 : vector<128x32xi1>, vector<128x32xf32>
    %94 = math.absf %88 : vector<128x32xf32>
    %cst_40 = arith.constant 0.327591091 : f32
    %95 = vector.broadcast %cst_40 : f32 to vector<128x32xf32>
    %96 = arith.mulf %95, %94 : vector<128x32xf32>
    %cst_41 = arith.constant 1.000000e+00 : f32
    %97 = vector.broadcast %cst_41 : f32 to vector<128x32xf32>
    %98 = arith.addf %97, %96 : vector<128x32xf32>
    %cst_42 = arith.constant 1.000000e+00 : f32
    %99 = vector.broadcast %cst_42 : f32 to vector<128x32xf32>
    %100 = arith.divf %99, %98 : vector<128x32xf32>
    %cst_43 = arith.constant 1.06140542 : f32
    %101 = vector.broadcast %cst_43 : f32 to vector<128x32xf32>
    %102 = arith.mulf %101, %100 : vector<128x32xf32>
    %cst_44 = arith.constant -1.45315206 : f32
    %103 = vector.broadcast %cst_44 : f32 to vector<128x32xf32>
    %104 = arith.addf %102, %103 : vector<128x32xf32>
    %105 = arith.mulf %104, %100 : vector<128x32xf32>
    %cst_45 = arith.constant 1.42141378 : f32
    %106 = vector.broadcast %cst_45 : f32 to vector<128x32xf32>
    %107 = arith.addf %105, %106 : vector<128x32xf32>
    %108 = arith.mulf %107, %100 : vector<128x32xf32>
    %cst_46 = arith.constant -0.284496725 : f32
    %109 = vector.broadcast %cst_46 : f32 to vector<128x32xf32>
    %110 = arith.addf %108, %109 : vector<128x32xf32>
    %111 = arith.mulf %110, %100 : vector<128x32xf32>
    %cst_47 = arith.constant 0.254829586 : f32
    %112 = vector.broadcast %cst_47 : f32 to vector<128x32xf32>
    %113 = arith.addf %111, %112 : vector<128x32xf32>
    %114 = arith.mulf %113, %100 : vector<128x32xf32>
    %cst_48 = arith.constant 0.000000e+00 : f32
    %115 = vector.broadcast %cst_48 : f32 to vector<128x32xf32>
    %116 = arith.subf %115, %94 : vector<128x32xf32>
    %117 = arith.mulf %116, %94 : vector<128x32xf32>
    %118 = math.exp %117 : vector<128x32xf32>
    %119 = arith.mulf %114, %118 : vector<128x32xf32>
    %cst_49 = arith.constant 1.000000e+00 : f32
    %120 = vector.broadcast %cst_49 : f32 to vector<128x32xf32>
    %121 = arith.subf %120, %119 : vector<128x32xf32>
    %122 = arith.mulf %93, %121 : vector<128x32xf32>
    %cst_50 = arith.constant 1.000000e+00 : f32
    %123 = vector.broadcast %cst_50 : f32 to vector<128x32xf32>
    %124 = arith.addf %123, %122 : vector<128x32xf32>
    %125 = arith.mulf %86, %124 : vector<128x32xf32>
    %c64 = arith.constant 64 : index
    %c0_51 = arith.constant 0 : index
    %126 = vector.load %arg11[%c64, %c0_51] : memref<96x32xf32, #tpu.memory_space<vmem>>, vector<32x32xf32>
    %cst_52 = arith.constant dense<0.000000e+00> : vector<128x32xf32>
    %127 = tpu.matmul %125, %126, %cst_52 {dimension_numbers = #tpu.dot_dimension_numbers<[1], [0], [0], [1], [0, 0, 1, 1], [], []>} : vector<128x32xf32>, vector<32x32xf32>, vector<128x32xf32> -> vector<128x32xf32>
    %c4 = arith.constant 4 : index
    %c0_53 = arith.constant 0 : index
    %128 = vector.load %arg12[%c4, %c0_53] : memref<5x32xf32, #tpu.memory_space<vmem>>, vector<1x32xf32>
    %129 = vector.broadcast %128 : vector<1x32xf32> to vector<128x32xf32>
    %130 = arith.addf %127, %129 : vector<128x32xf32>
    %131 = arith.addf %55, %130 : vector<128x32xf32>
    %c0_54 = arith.constant 0 : index
    %c0_55 = arith.constant 0 : index
    %c0_56 = arith.constant 0 : index
    %132 = vector.load %arg3[%c0_54, %c0_55, %c0_56] : memref<9x72x128xf32, #tpu.memory_space<vmem>>, vector<1x72x128xf32>
    %133 = vector.shape_cast %132 : vector<1x72x128xf32> to vector<72x128xf32>
    %cst_57 = arith.constant dense<0.000000e+00> : vector<72x32xf32>
    %134 = tpu.matmul %133, %131, %cst_57 {dimension_numbers = #tpu.dot_dimension_numbers<[1], [0], [0], [1], [0, 0, 1, 1], [], []>} : vector<72x128xf32>, vector<128x32xf32>, vector<72x32xf32> -> vector<72x32xf32>
    %c0_58 = arith.constant 0 : index
    %c0_59 = arith.constant 0 : index
    %135 = vector.load %arg13[%c0_58, %c0_59] : memref<288x96xf32, #tpu.memory_space<vmem>>, vector<32x96xf32>
    %cst_60 = arith.constant dense<0.000000e+00> : vector<72x96xf32>
    %136 = tpu.matmul %134, %135, %cst_60 {dimension_numbers = #tpu.dot_dimension_numbers<[1], [0], [0], [1], [0, 0, 1, 1], [], []>} : vector<72x32xf32>, vector<32x96xf32>, vector<72x96xf32> -> vector<72x96xf32>
    %137 = arith.mulf %134, %134 : vector<72x32xf32>
    %c1_61 = arith.constant 1 : index
    %c0_62 = arith.constant 0 : index
    %c0_63 = arith.constant 0 : index
    %138 = vector.load %arg3[%c1_61, %c0_62, %c0_63] : memref<9x72x128xf32, #tpu.memory_space<vmem>>, vector<1x72x128xf32>
    %139 = vector.shape_cast %138 : vector<1x72x128xf32> to vector<72x128xf32>
    %cst_64 = arith.constant dense<0.000000e+00> : vector<72x32xf32>
    %140 = tpu.matmul %139, %131, %cst_64 {dimension_numbers = #tpu.dot_dimension_numbers<[1], [0], [0], [1], [0, 0, 1, 1], [], []>} : vector<72x128xf32>, vector<128x32xf32>, vector<72x32xf32> -> vector<72x32xf32>
    %c32_65 = arith.constant 32 : index
    %c0_66 = arith.constant 0 : index
    %141 = vector.load %arg13[%c32_65, %c0_66] : memref<288x96xf32, #tpu.memory_space<vmem>>, vector<32x96xf32>
    %cst_67 = arith.constant dense<0.000000e+00> : vector<72x96xf32>
    %142 = tpu.matmul %140, %141, %cst_67 {dimension_numbers = #tpu.dot_dimension_numbers<[1], [0], [0], [1], [0, 0, 1, 1], [], []>} : vector<72x32xf32>, vector<32x96xf32>, vector<72x96xf32> -> vector<72x96xf32>
    %143 = arith.addf %136, %142 : vector<72x96xf32>
    %144 = arith.addf %134, %140 : vector<72x32xf32>
    %145 = arith.mulf %140, %140 : vector<72x32xf32>
    %146 = arith.addf %137, %145 : vector<72x32xf32>
    %c2_68 = arith.constant 2 : index
    %c0_69 = arith.constant 0 : index
    %c0_70 = arith.constant 0 : index
    %147 = vector.load %arg3[%c2_68, %c0_69, %c0_70] : memref<9x72x128xf32, #tpu.memory_space<vmem>>, vector<1x72x128xf32>
    %148 = vector.shape_cast %147 : vector<1x72x128xf32> to vector<72x128xf32>
    %cst_71 = arith.constant dense<0.000000e+00> : vector<72x32xf32>
    %149 = tpu.matmul %148, %131, %cst_71 {dimension_numbers = #tpu.dot_dimension_numbers<[1], [0], [0], [1], [0, 0, 1, 1], [], []>} : vector<72x128xf32>, vector<128x32xf32>, vector<72x32xf32> -> vector<72x32xf32>
    %c64_72 = arith.constant 64 : index
    %c0_73 = arith.constant 0 : index
    %150 = vector.load %arg13[%c64_72, %c0_73] : memref<288x96xf32, #tpu.memory_space<vmem>>, vector<32x96xf32>
    %cst_74 = arith.constant dense<0.000000e+00> : vector<72x96xf32>
    %151 = tpu.matmul %149, %150, %cst_74 {dimension_numbers = #tpu.dot_dimension_numbers<[1], [0], [0], [1], [0, 0, 1, 1], [], []>} : vector<72x32xf32>, vector<32x96xf32>, vector<72x96xf32> -> vector<72x96xf32>
    %152 = arith.addf %143, %151 : vector<72x96xf32>
    %153 = arith.addf %144, %149 : vector<72x32xf32>
    %154 = arith.mulf %149, %149 : vector<72x32xf32>
    %155 = arith.addf %146, %154 : vector<72x32xf32>
    %c3_75 = arith.constant 3 : index
    %c0_76 = arith.constant 0 : index
    %c0_77 = arith.constant 0 : index
    %156 = vector.load %arg3[%c3_75, %c0_76, %c0_77] : memref<9x72x128xf32, #tpu.memory_space<vmem>>, vector<1x72x128xf32>
    %157 = vector.shape_cast %156 : vector<1x72x128xf32> to vector<72x128xf32>
    %cst_78 = arith.constant dense<0.000000e+00> : vector<72x32xf32>
    %158 = tpu.matmul %157, %131, %cst_78 {dimension_numbers = #tpu.dot_dimension_numbers<[1], [0], [0], [1], [0, 0, 1, 1], [], []>} : vector<72x128xf32>, vector<128x32xf32>, vector<72x32xf32> -> vector<72x32xf32>
    %c96 = arith.constant 96 : index
    %c0_79 = arith.constant 0 : index
    %159 = vector.load %arg13[%c96, %c0_79] : memref<288x96xf32, #tpu.memory_space<vmem>>, vector<32x96xf32>
    %cst_80 = arith.constant dense<0.000000e+00> : vector<72x96xf32>
    %160 = tpu.matmul %158, %159, %cst_80 {dimension_numbers = #tpu.dot_dimension_numbers<[1], [0], [0], [1], [0, 0, 1, 1], [], []>} : vector<72x32xf32>, vector<32x96xf32>, vector<72x96xf32> -> vector<72x96xf32>
    %161 = arith.addf %152, %160 : vector<72x96xf32>
    %162 = arith.addf %153, %158 : vector<72x32xf32>
    %163 = arith.mulf %158, %158 : vector<72x32xf32>
    %164 = arith.addf %155, %163 : vector<72x32xf32>
    %c4_81 = arith.constant 4 : index
    %c0_82 = arith.constant 0 : index
    %c0_83 = arith.constant 0 : index
    %165 = vector.load %arg3[%c4_81, %c0_82, %c0_83] : memref<9x72x128xf32, #tpu.memory_space<vmem>>, vector<1x72x128xf32>
    %166 = vector.shape_cast %165 : vector<1x72x128xf32> to vector<72x128xf32>
    %cst_84 = arith.constant dense<0.000000e+00> : vector<72x32xf32>
    %167 = tpu.matmul %166, %131, %cst_84 {dimension_numbers = #tpu.dot_dimension_numbers<[1], [0], [0], [1], [0, 0, 1, 1], [], []>} : vector<72x128xf32>, vector<128x32xf32>, vector<72x32xf32> -> vector<72x32xf32>
    %c128 = arith.constant 128 : index
    %c0_85 = arith.constant 0 : index
    %168 = vector.load %arg13[%c128, %c0_85] : memref<288x96xf32, #tpu.memory_space<vmem>>, vector<32x96xf32>
    %cst_86 = arith.constant dense<0.000000e+00> : vector<72x96xf32>
    %169 = tpu.matmul %167, %168, %cst_86 {dimension_numbers = #tpu.dot_dimension_numbers<[1], [0], [0], [1], [0, 0, 1, 1], [], []>} : vector<72x32xf32>, vector<32x96xf32>, vector<72x96xf32> -> vector<72x96xf32>
    %170 = arith.addf %161, %169 : vector<72x96xf32>
    %171 = arith.addf %162, %167 : vector<72x32xf32>
    %172 = arith.mulf %167, %167 : vector<72x32xf32>
    %173 = arith.addf %164, %172 : vector<72x32xf32>
    %c5 = arith.constant 5 : index
    %c0_87 = arith.constant 0 : index
    %c0_88 = arith.constant 0 : index
    %174 = vector.load %arg3[%c5, %c0_87, %c0_88] : memref<9x72x128xf32, #tpu.memory_space<vmem>>, vector<1x72x128xf32>
    %175 = vector.shape_cast %174 : vector<1x72x128xf32> to vector<72x128xf32>
    %cst_89 = arith.constant dense<0.000000e+00> : vector<72x32xf32>
    %176 = tpu.matmul %175, %131, %cst_89 {dimension_numbers = #tpu.dot_dimension_numbers<[1], [0], [0], [1], [0, 0, 1, 1], [], []>} : vector<72x128xf32>, vector<128x32xf32>, vector<72x32xf32> -> vector<72x32xf32>
    %c160 = arith.constant 160 : index
    %c0_90 = arith.constant 0 : index
    %177 = vector.load %arg13[%c160, %c0_90] : memref<288x96xf32, #tpu.memory_space<vmem>>, vector<32x96xf32>
    %cst_91 = arith.constant dense<0.000000e+00> : vector<72x96xf32>
    %178 = tpu.matmul %176, %177, %cst_91 {dimension_numbers = #tpu.dot_dimension_numbers<[1], [0], [0], [1], [0, 0, 1, 1], [], []>} : vector<72x32xf32>, vector<32x96xf32>, vector<72x96xf32> -> vector<72x96xf32>
    %179 = arith.addf %170, %178 : vector<72x96xf32>
    %180 = arith.addf %171, %176 : vector<72x32xf32>
    %181 = arith.mulf %176, %176 : vector<72x32xf32>
    %182 = arith.addf %173, %181 : vector<72x32xf32>
    %c6 = arith.constant 6 : index
    %c0_92 = arith.constant 0 : index
    %c0_93 = arith.constant 0 : index
    %183 = vector.load %arg3[%c6, %c0_92, %c0_93] : memref<9x72x128xf32, #tpu.memory_space<vmem>>, vector<1x72x128xf32>
    %184 = vector.shape_cast %183 : vector<1x72x128xf32> to vector<72x128xf32>
    %cst_94 = arith.constant dense<0.000000e+00> : vector<72x32xf32>
    %185 = tpu.matmul %184, %131, %cst_94 {dimension_numbers = #tpu.dot_dimension_numbers<[1], [0], [0], [1], [0, 0, 1, 1], [], []>} : vector<72x128xf32>, vector<128x32xf32>, vector<72x32xf32> -> vector<72x32xf32>
    %c192 = arith.constant 192 : index
    %c0_95 = arith.constant 0 : index
    %186 = vector.load %arg13[%c192, %c0_95] : memref<288x96xf32, #tpu.memory_space<vmem>>, vector<32x96xf32>
    %cst_96 = arith.constant dense<0.000000e+00> : vector<72x96xf32>
    %187 = tpu.matmul %185, %186, %cst_96 {dimension_numbers = #tpu.dot_dimension_numbers<[1], [0], [0], [1], [0, 0, 1, 1], [], []>} : vector<72x32xf32>, vector<32x96xf32>, vector<72x96xf32> -> vector<72x96xf32>
    %188 = arith.addf %179, %187 : vector<72x96xf32>
    %189 = arith.addf %180, %185 : vector<72x32xf32>
    %190 = arith.mulf %185, %185 : vector<72x32xf32>
    %191 = arith.addf %182, %190 : vector<72x32xf32>
    %c7 = arith.constant 7 : index
    %c0_97 = arith.constant 0 : index
    %c0_98 = arith.constant 0 : index
    %192 = vector.load %arg3[%c7, %c0_97, %c0_98] : memref<9x72x128xf32, #tpu.memory_space<vmem>>, vector<1x72x128xf32>
    %193 = vector.shape_cast %192 : vector<1x72x128xf32> to vector<72x128xf32>
    %cst_99 = arith.constant dense<0.000000e+00> : vector<72x32xf32>
    %194 = tpu.matmul %193, %131, %cst_99 {dimension_numbers = #tpu.dot_dimension_numbers<[1], [0], [0], [1], [0, 0, 1, 1], [], []>} : vector<72x128xf32>, vector<128x32xf32>, vector<72x32xf32> -> vector<72x32xf32>
    %c224 = arith.constant 224 : index
    %c0_100 = arith.constant 0 : index
    %195 = vector.load %arg13[%c224, %c0_100] : memref<288x96xf32, #tpu.memory_space<vmem>>, vector<32x96xf32>
    %cst_101 = arith.constant dense<0.000000e+00> : vector<72x96xf32>
    %196 = tpu.matmul %194, %195, %cst_101 {dimension_numbers = #tpu.dot_dimension_numbers<[1], [0], [0], [1], [0, 0, 1, 1], [], []>} : vector<72x32xf32>, vector<32x96xf32>, vector<72x96xf32> -> vector<72x96xf32>
    %197 = arith.addf %188, %196 : vector<72x96xf32>
    %198 = arith.addf %189, %194 : vector<72x32xf32>
    %199 = arith.mulf %194, %194 : vector<72x32xf32>
    %200 = arith.addf %191, %199 : vector<72x32xf32>
    %c8 = arith.constant 8 : index
    %c0_102 = arith.constant 0 : index
    %c0_103 = arith.constant 0 : index
    %201 = vector.load %arg3[%c8, %c0_102, %c0_103] : memref<9x72x128xf32, #tpu.memory_space<vmem>>, vector<1x72x128xf32>
    %202 = vector.shape_cast %201 : vector<1x72x128xf32> to vector<72x128xf32>
    %cst_104 = arith.constant dense<0.000000e+00> : vector<72x32xf32>
    %203 = tpu.matmul %202, %131, %cst_104 {dimension_numbers = #tpu.dot_dimension_numbers<[1], [0], [0], [1], [0, 0, 1, 1], [], []>} : vector<72x128xf32>, vector<128x32xf32>, vector<72x32xf32> -> vector<72x32xf32>
    %c256 = arith.constant 256 : index
    %c0_105 = arith.constant 0 : index
    %204 = vector.load %arg13[%c256, %c0_105] : memref<288x96xf32, #tpu.memory_space<vmem>>, vector<32x96xf32>
    %cst_106 = arith.constant dense<0.000000e+00> : vector<72x96xf32>
    %205 = tpu.matmul %203, %204, %cst_106 {dimension_numbers = #tpu.dot_dimension_numbers<[1], [0], [0], [1], [0, 0, 1, 1], [], []>} : vector<72x32xf32>, vector<32x96xf32>, vector<72x96xf32> -> vector<72x96xf32>
    %206 = arith.addf %197, %205 : vector<72x96xf32>
    %207 = arith.addf %198, %203 : vector<72x32xf32>
    %208 = arith.mulf %203, %203 : vector<72x32xf32>
    %209 = arith.addf %200, %208 : vector<72x32xf32>
    %cst_107 = arith.constant dense<0.000000e+00> : vector<72xf32>
    %210 = vector.multi_reduction <add>, %207, %cst_107 [1] : vector<72x32xf32> to vector<72xf32>
    %211 = vector.shape_cast %210 : vector<72xf32> to vector<72x1xf32>
    %cst_108 = arith.constant 0.00347222225 : f32
    %212 = vector.broadcast %cst_108 : f32 to vector<72x1xf32>
    %213 = arith.mulf %211, %212 : vector<72x1xf32>
    %cst_109 = arith.constant dense<0.000000e+00> : vector<72xf32>
    %214 = vector.multi_reduction <add>, %209, %cst_109 [1] : vector<72x32xf32> to vector<72xf32>
    %215 = vector.shape_cast %214 : vector<72xf32> to vector<72x1xf32>
    %cst_110 = arith.constant 0.00347222225 : f32
    %216 = vector.broadcast %cst_110 : f32 to vector<72x1xf32>
    %217 = arith.mulf %215, %216 : vector<72x1xf32>
    %218 = arith.mulf %213, %213 : vector<72x1xf32>
    %219 = arith.subf %217, %218 : vector<72x1xf32>
    %cst_111 = arith.constant 0.000000e+00 : f32
    %220 = vector.broadcast %cst_111 : f32 to vector<72x1xf32>
    %221 = arith.maximumf %219, %220 : vector<72x1xf32>
    %cst_112 = arith.constant 9.99999974E-6 : f32
    %222 = vector.broadcast %cst_112 : f32 to vector<72x1xf32>
    %223 = arith.addf %221, %222 : vector<72x1xf32>
    %224 = math.rsqrt %223 : vector<72x1xf32>
    %c0_113 = arith.constant 0 : index
    %c0_114 = arith.constant 0 : index
    %225 = vector.load %arg14[%c0_113, %c0_114] : memref<2x96xf32, #tpu.memory_space<vmem>>, vector<1x96xf32>
    %226 = vector.broadcast %213 : vector<72x1xf32> to vector<72x96xf32>
    %227 = vector.broadcast %225 : vector<1x96xf32> to vector<72x96xf32>
    %228 = arith.mulf %226, %227 : vector<72x96xf32>
    %229 = arith.subf %206, %228 : vector<72x96xf32>
    %230 = vector.broadcast %224 : vector<72x1xf32> to vector<72x96xf32>
    %231 = arith.mulf %229, %230 : vector<72x96xf32>
    %c1_115 = arith.constant 1 : index
    %c0_116 = arith.constant 0 : index
    %232 = vector.load %arg14[%c1_115, %c0_116] : memref<2x96xf32, #tpu.memory_space<vmem>>, vector<1x96xf32>
    %233 = vector.broadcast %232 : vector<1x96xf32> to vector<72x96xf32>
    %234 = arith.addf %231, %233 : vector<72x96xf32>
    %c0_117 = arith.constant 0 : index
    %c0_118 = arith.constant 0 : index
    %235 = vector.load %arg7[%c0_117, %c0_118] : memref<72x72xf32, #tpu.memory_space<vmem>>, vector<72x72xf32>
    %236 = vector.extract_strided_slice %234 {offsets = [0, 0], sizes = [72, 32], strides = [1, 1]} : vector<72x96xf32> to vector<72x32xf32>
    %237 = vector.extract_strided_slice %234 {offsets = [0, 32], sizes = [72, 32], strides = [1, 1]} : vector<72x96xf32> to vector<72x32xf32>
    %238 = vector.extract_strided_slice %234 {offsets = [0, 64], sizes = [72, 32], strides = [1, 1]} : vector<72x96xf32> to vector<72x32xf32>
    %cst_119 = arith.constant dense<0.000000e+00> : vector<72x72xf32>
    %239 = tpu.matmul %236, %237, %cst_119 {dimension_numbers = #tpu.dot_dimension_numbers<[1], [1], [0], [0], [0, 0, 1, 0], [], []>} : vector<72x32xf32>, vector<72x32xf32>, vector<72x72xf32> -> vector<72x72xf32>
    %240 = arith.addf %239, %235 : vector<72x72xf32>
    %cst_120 = arith.constant dense<0xFF800000> : vector<72xf32>
    %241 = vector.multi_reduction <maximumf>, %240, %cst_120 [1] : vector<72x72xf32> to vector<72xf32>
    %242 = vector.shape_cast %241 : vector<72xf32> to vector<72x1xf32>
    %243 = vector.broadcast %242 : vector<72x1xf32> to vector<72x72xf32>
    %244 = arith.subf %240, %243 : vector<72x72xf32>
    %245 = math.exp %244 : vector<72x72xf32>
    %cst_121 = arith.constant 1.000000e+00 : f32
    %246 = vector.broadcast %cst_121 : f32 to vector<72x1xf32>
    %247 = tpu.concatenate %238, %246 in 1 : vector<72x32xf32>, vector<72x1xf32> -> vector<72x33xf32>
    %cst_122 = arith.constant dense<0.000000e+00> : vector<72x33xf32>
    %248 = tpu.matmul %245, %247, %cst_122 {dimension_numbers = #tpu.dot_dimension_numbers<[1], [0], [0], [1], [0, 0, 1, 1], [], []>} : vector<72x72xf32>, vector<72x33xf32>, vector<72x33xf32> -> vector<72x33xf32>
    %249 = vector.extract_strided_slice %248 {offsets = [0, 0], sizes = [72, 32], strides = [1, 1]} : vector<72x33xf32> to vector<72x32xf32>
    %250 = vector.extract_strided_slice %248 {offsets = [0, 32], sizes = [72, 1], strides = [1, 1]} : vector<72x33xf32> to vector<72x1xf32>
    %251 = tpu.reciprocal %250 {approx = true} : vector<72x1xf32> -> vector<72x1xf32>
    %252 = vector.broadcast %251 : vector<72x1xf32> to vector<72x32xf32>
    %253 = arith.mulf %249, %252 : vector<72x32xf32>
    %c0_123 = arith.constant 0 : index
    %c0_124 = arith.constant 0 : index
    %254 = vector.load %arg15[%c0_123, %c0_124] : memref<96x32xf32, #tpu.memory_space<vmem>>, vector<32x32xf32>
    %cst_125 = arith.constant dense<0.000000e+00> : vector<72x32xf32>
    %255 = tpu.matmul %253, %254, %cst_125 {dimension_numbers = #tpu.dot_dimension_numbers<[1], [0], [0], [1], [0, 0, 1, 1], [], []>} : vector<72x32xf32>, vector<32x32xf32>, vector<72x32xf32> -> vector<72x32xf32>
    %c0_126 = arith.constant 0 : index
    %c0_127 = arith.constant 0 : index
    %256 = vector.load %arg16[%c0_126, %c0_127] : memref<5x32xf32, #tpu.memory_space<vmem>>, vector<1x32xf32>
    %257 = vector.broadcast %256 : vector<1x32xf32> to vector<72x32xf32>
    %258 = arith.addf %255, %257 : vector<72x32xf32>
    %259 = arith.addf %238, %258 : vector<72x32xf32>
    %c1_128 = arith.constant 1 : index
    %c0_129 = arith.constant 0 : index
    %260 = vector.load %arg16[%c1_128, %c0_129] : memref<5x32xf32, #tpu.memory_space<vmem>>, vector<1x32xf32>
    %c2_130 = arith.constant 2 : index
    %c0_131 = arith.constant 0 : index
    %261 = vector.load %arg16[%c2_130, %c0_131] : memref<5x32xf32, #tpu.memory_space<vmem>>, vector<1x32xf32>
    %cst_132 = arith.constant dense<0.000000e+00> : vector<72xf32>
    %262 = vector.multi_reduction <add>, %259, %cst_132 [1] : vector<72x32xf32> to vector<72xf32>
    %263 = vector.shape_cast %262 : vector<72xf32> to vector<72x1xf32>
    %cst_133 = arith.constant 3.200000e+01 : f32
    %264 = vector.broadcast %cst_133 : f32 to vector<72x1xf32>
    %265 = arith.divf %263, %264 : vector<72x1xf32>
    %266 = vector.broadcast %265 : vector<72x1xf32> to vector<72x32xf32>
    %267 = arith.subf %259, %266 : vector<72x32xf32>
    %268 = arith.mulf %267, %267 : vector<72x32xf32>
    %cst_134 = arith.constant dense<0.000000e+00> : vector<72xf32>
    %269 = vector.multi_reduction <add>, %268, %cst_134 [1] : vector<72x32xf32> to vector<72xf32>
    %270 = vector.shape_cast %269 : vector<72xf32> to vector<72x1xf32>
    %cst_135 = arith.constant 3.200000e+01 : f32
    %271 = vector.broadcast %cst_135 : f32 to vector<72x1xf32>
    %272 = arith.divf %270, %271 : vector<72x1xf32>
    %273 = vector.broadcast %265 : vector<72x1xf32> to vector<72x32xf32>
    %274 = arith.subf %259, %273 : vector<72x32xf32>
    %cst_136 = arith.constant 9.99999974E-6 : f32
    %275 = vector.broadcast %cst_136 : f32 to vector<72x1xf32>
    %276 = arith.addf %272, %275 : vector<72x1xf32>
    %277 = math.rsqrt %276 : vector<72x1xf32>
    %278 = vector.broadcast %277 : vector<72x1xf32> to vector<72x32xf32>
    %279 = arith.mulf %274, %278 : vector<72x32xf32>
    %280 = vector.broadcast %260 : vector<1x32xf32> to vector<72x32xf32>
    %281 = arith.mulf %279, %280 : vector<72x32xf32>
    %282 = vector.broadcast %261 : vector<1x32xf32> to vector<72x32xf32>
    %283 = arith.addf %281, %282 : vector<72x32xf32>
    %c32_137 = arith.constant 32 : index
    %c0_138 = arith.constant 0 : index
    %284 = vector.load %arg15[%c32_137, %c0_138] : memref<96x32xf32, #tpu.memory_space<vmem>>, vector<32x32xf32>
    %cst_139 = arith.constant dense<0.000000e+00> : vector<72x32xf32>
    %285 = tpu.matmul %283, %284, %cst_139 {dimension_numbers = #tpu.dot_dimension_numbers<[1], [0], [0], [1], [0, 0, 1, 1], [], []>} : vector<72x32xf32>, vector<32x32xf32>, vector<72x32xf32> -> vector<72x32xf32>
    %c3_140 = arith.constant 3 : index
    %c0_141 = arith.constant 0 : index
    %286 = vector.load %arg16[%c3_140, %c0_141] : memref<5x32xf32, #tpu.memory_space<vmem>>, vector<1x32xf32>
    %287 = vector.broadcast %286 : vector<1x32xf32> to vector<72x32xf32>
    %288 = arith.addf %285, %287 : vector<72x32xf32>
    %cst_142 = arith.constant 5.000000e-01 : f32
    %289 = vector.broadcast %cst_142 : f32 to vector<72x32xf32>
    %290 = arith.mulf %289, %288 : vector<72x32xf32>
    %cst_143 = arith.constant 0.707106769 : f32
    %291 = vector.broadcast %cst_143 : f32 to vector<72x32xf32>
    %292 = arith.mulf %288, %291 : vector<72x32xf32>
    %cst_144 = arith.constant 0.000000e+00 : f32
    %293 = vector.broadcast %cst_144 : f32 to vector<72x32xf32>
    %294 = arith.cmpf oge, %292, %293 : vector<72x32xf32>
    %cst_145 = arith.constant 1.000000e+00 : f32
    %cst_146 = arith.constant -1.000000e+00 : f32
    %295 = vector.broadcast %cst_145 : f32 to vector<72x32xf32>
    %296 = vector.broadcast %cst_146 : f32 to vector<72x32xf32>
    %297 = arith.select %294, %295, %296 : vector<72x32xi1>, vector<72x32xf32>
    %298 = math.absf %292 : vector<72x32xf32>
    %cst_147 = arith.constant 0.327591091 : f32
    %299 = vector.broadcast %cst_147 : f32 to vector<72x32xf32>
    %300 = arith.mulf %299, %298 : vector<72x32xf32>
    %cst_148 = arith.constant 1.000000e+00 : f32
    %301 = vector.broadcast %cst_148 : f32 to vector<72x32xf32>
    %302 = arith.addf %301, %300 : vector<72x32xf32>
    %cst_149 = arith.constant 1.000000e+00 : f32
    %303 = vector.broadcast %cst_149 : f32 to vector<72x32xf32>
    %304 = arith.divf %303, %302 : vector<72x32xf32>
    %cst_150 = arith.constant 1.06140542 : f32
    %305 = vector.broadcast %cst_150 : f32 to vector<72x32xf32>
    %306 = arith.mulf %305, %304 : vector<72x32xf32>
    %cst_151 = arith.constant -1.45315206 : f32
    %307 = vector.broadcast %cst_151 : f32 to vector<72x32xf32>
    %308 = arith.addf %306, %307 : vector<72x32xf32>
    %309 = arith.mulf %308, %304 : vector<72x32xf32>
    %cst_152 = arith.constant 1.42141378 : f32
    %310 = vector.broadcast %cst_152 : f32 to vector<72x32xf32>
    %311 = arith.addf %309, %310 : vector<72x32xf32>
    %312 = arith.mulf %311, %304 : vector<72x32xf32>
    %cst_153 = arith.constant -0.284496725 : f32
    %313 = vector.broadcast %cst_153 : f32 to vector<72x32xf32>
    %314 = arith.addf %312, %313 : vector<72x32xf32>
    %315 = arith.mulf %314, %304 : vector<72x32xf32>
    %cst_154 = arith.constant 0.254829586 : f32
    %316 = vector.broadcast %cst_154 : f32 to vector<72x32xf32>
    %317 = arith.addf %315, %316 : vector<72x32xf32>
    %318 = arith.mulf %317, %304 : vector<72x32xf32>
    %cst_155 = arith.constant 0.000000e+00 : f32
    %319 = vector.broadcast %cst_155 : f32 to vector<72x32xf32>
    %320 = arith.subf %319, %298 : vector<72x32xf32>
    %321 = arith.mulf %320, %298 : vector<72x32xf32>
    %322 = math.exp %321 : vector<72x32xf32>
    %323 = arith.mulf %318, %322 : vector<72x32xf32>
    %cst_156 = arith.constant 1.000000e+00 : f32
    %324 = vector.broadcast %cst_156 : f32 to vector<72x32xf32>
    %325 = arith.subf %324, %323 : vector<72x32xf32>
    %326 = arith.mulf %297, %325 : vector<72x32xf32>
    %cst_157 = arith.constant 1.000000e+00 : f32
    %327 = vector.broadcast %cst_157 : f32 to vector<72x32xf32>
    %328 = arith.addf %327, %326 : vector<72x32xf32>
    %329 = arith.mulf %290, %328 : vector<72x32xf32>
    %c64_158 = arith.constant 64 : index
    %c0_159 = arith.constant 0 : index
    %330 = vector.load %arg15[%c64_158, %c0_159] : memref<96x32xf32, #tpu.memory_space<vmem>>, vector<32x32xf32>
    %cst_160 = arith.constant dense<0.000000e+00> : vector<72x32xf32>
    %331 = tpu.matmul %329, %330, %cst_160 {dimension_numbers = #tpu.dot_dimension_numbers<[1], [0], [0], [1], [0, 0, 1, 1], [], []>} : vector<72x32xf32>, vector<32x32xf32>, vector<72x32xf32> -> vector<72x32xf32>
    %c4_161 = arith.constant 4 : index
    %c0_162 = arith.constant 0 : index
    %332 = vector.load %arg16[%c4_161, %c0_162] : memref<5x32xf32, #tpu.memory_space<vmem>>, vector<1x32xf32>
    %333 = vector.broadcast %332 : vector<1x32xf32> to vector<72x32xf32>
    %334 = arith.addf %331, %333 : vector<72x32xf32>
    %335 = arith.addf %259, %334 : vector<72x32xf32>
    %c0_163 = arith.constant 0 : index
    %c0_164 = arith.constant 0 : index
    %c0_165 = arith.constant 0 : index
    %336 = vector.load %arg4[%c0_163, %c0_164, %c0_165] : memref<9x32x72xf32, #tpu.memory_space<vmem>>, vector<1x32x72xf32>
    %337 = vector.shape_cast %336 : vector<1x32x72xf32> to vector<32x72xf32>
    %cst_166 = arith.constant dense<0.000000e+00> : vector<32x32xf32>
    %338 = tpu.matmul %337, %335, %cst_166 {dimension_numbers = #tpu.dot_dimension_numbers<[1], [0], [0], [1], [0, 0, 1, 1], [], []>} : vector<32x72xf32>, vector<72x32xf32>, vector<32x32xf32> -> vector<32x32xf32>
    %c0_167 = arith.constant 0 : index
    %c0_168 = arith.constant 0 : index
    %339 = vector.load %arg17[%c0_167, %c0_168] : memref<288x96xf32, #tpu.memory_space<vmem>>, vector<32x96xf32>
    %cst_169 = arith.constant dense<0.000000e+00> : vector<32x96xf32>
    %340 = tpu.matmul %338, %339, %cst_169 {dimension_numbers = #tpu.dot_dimension_numbers<[1], [0], [0], [1], [0, 0, 1, 1], [], []>} : vector<32x32xf32>, vector<32x96xf32>, vector<32x96xf32> -> vector<32x96xf32>
    %341 = arith.mulf %338, %338 : vector<32x32xf32>
    %c1_170 = arith.constant 1 : index
    %c0_171 = arith.constant 0 : index
    %c0_172 = arith.constant 0 : index
    %342 = vector.load %arg4[%c1_170, %c0_171, %c0_172] : memref<9x32x72xf32, #tpu.memory_space<vmem>>, vector<1x32x72xf32>
    %343 = vector.shape_cast %342 : vector<1x32x72xf32> to vector<32x72xf32>
    %cst_173 = arith.constant dense<0.000000e+00> : vector<32x32xf32>
    %344 = tpu.matmul %343, %335, %cst_173 {dimension_numbers = #tpu.dot_dimension_numbers<[1], [0], [0], [1], [0, 0, 1, 1], [], []>} : vector<32x72xf32>, vector<72x32xf32>, vector<32x32xf32> -> vector<32x32xf32>
    %c32_174 = arith.constant 32 : index
    %c0_175 = arith.constant 0 : index
    %345 = vector.load %arg17[%c32_174, %c0_175] : memref<288x96xf32, #tpu.memory_space<vmem>>, vector<32x96xf32>
    %cst_176 = arith.constant dense<0.000000e+00> : vector<32x96xf32>
    %346 = tpu.matmul %344, %345, %cst_176 {dimension_numbers = #tpu.dot_dimension_numbers<[1], [0], [0], [1], [0, 0, 1, 1], [], []>} : vector<32x32xf32>, vector<32x96xf32>, vector<32x96xf32> -> vector<32x96xf32>
    %347 = arith.addf %340, %346 : vector<32x96xf32>
    %348 = arith.addf %338, %344 : vector<32x32xf32>
    %349 = arith.mulf %344, %344 : vector<32x32xf32>
    %350 = arith.addf %341, %349 : vector<32x32xf32>
    %c2_177 = arith.constant 2 : index
    %c0_178 = arith.constant 0 : index
    %c0_179 = arith.constant 0 : index
    %351 = vector.load %arg4[%c2_177, %c0_178, %c0_179] : memref<9x32x72xf32, #tpu.memory_space<vmem>>, vector<1x32x72xf32>
    %352 = vector.shape_cast %351 : vector<1x32x72xf32> to vector<32x72xf32>
    %cst_180 = arith.constant dense<0.000000e+00> : vector<32x32xf32>
    %353 = tpu.matmul %352, %335, %cst_180 {dimension_numbers = #tpu.dot_dimension_numbers<[1], [0], [0], [1], [0, 0, 1, 1], [], []>} : vector<32x72xf32>, vector<72x32xf32>, vector<32x32xf32> -> vector<32x32xf32>
    %c64_181 = arith.constant 64 : index
    %c0_182 = arith.constant 0 : index
    %354 = vector.load %arg17[%c64_181, %c0_182] : memref<288x96xf32, #tpu.memory_space<vmem>>, vector<32x96xf32>
    %cst_183 = arith.constant dense<0.000000e+00> : vector<32x96xf32>
    %355 = tpu.matmul %353, %354, %cst_183 {dimension_numbers = #tpu.dot_dimension_numbers<[1], [0], [0], [1], [0, 0, 1, 1], [], []>} : vector<32x32xf32>, vector<32x96xf32>, vector<32x96xf32> -> vector<32x96xf32>
    %356 = arith.addf %347, %355 : vector<32x96xf32>
    %357 = arith.addf %348, %353 : vector<32x32xf32>
    %358 = arith.mulf %353, %353 : vector<32x32xf32>
    %359 = arith.addf %350, %358 : vector<32x32xf32>
    %c3_184 = arith.constant 3 : index
    %c0_185 = arith.constant 0 : index
    %c0_186 = arith.constant 0 : index
    %360 = vector.load %arg4[%c3_184, %c0_185, %c0_186] : memref<9x32x72xf32, #tpu.memory_space<vmem>>, vector<1x32x72xf32>
    %361 = vector.shape_cast %360 : vector<1x32x72xf32> to vector<32x72xf32>
    %cst_187 = arith.constant dense<0.000000e+00> : vector<32x32xf32>
    %362 = tpu.matmul %361, %335, %cst_187 {dimension_numbers = #tpu.dot_dimension_numbers<[1], [0], [0], [1], [0, 0, 1, 1], [], []>} : vector<32x72xf32>, vector<72x32xf32>, vector<32x32xf32> -> vector<32x32xf32>
    %c96_188 = arith.constant 96 : index
    %c0_189 = arith.constant 0 : index
    %363 = vector.load %arg17[%c96_188, %c0_189] : memref<288x96xf32, #tpu.memory_space<vmem>>, vector<32x96xf32>
    %cst_190 = arith.constant dense<0.000000e+00> : vector<32x96xf32>
    %364 = tpu.matmul %362, %363, %cst_190 {dimension_numbers = #tpu.dot_dimension_numbers<[1], [0], [0], [1], [0, 0, 1, 1], [], []>} : vector<32x32xf32>, vector<32x96xf32>, vector<32x96xf32> -> vector<32x96xf32>
    %365 = arith.addf %356, %364 : vector<32x96xf32>
    %366 = arith.addf %357, %362 : vector<32x32xf32>
    %367 = arith.mulf %362, %362 : vector<32x32xf32>
    %368 = arith.addf %359, %367 : vector<32x32xf32>
    %c4_191 = arith.constant 4 : index
    %c0_192 = arith.constant 0 : index
    %c0_193 = arith.constant 0 : index
    %369 = vector.load %arg4[%c4_191, %c0_192, %c0_193] : memref<9x32x72xf32, #tpu.memory_space<vmem>>, vector<1x32x72xf32>
    %370 = vector.shape_cast %369 : vector<1x32x72xf32> to vector<32x72xf32>
    %cst_194 = arith.constant dense<0.000000e+00> : vector<32x32xf32>
    %371 = tpu.matmul %370, %335, %cst_194 {dimension_numbers = #tpu.dot_dimension_numbers<[1], [0], [0], [1], [0, 0, 1, 1], [], []>} : vector<32x72xf32>, vector<72x32xf32>, vector<32x32xf32> -> vector<32x32xf32>
    %c128_195 = arith.constant 128 : index
    %c0_196 = arith.constant 0 : index
    %372 = vector.load %arg17[%c128_195, %c0_196] : memref<288x96xf32, #tpu.memory_space<vmem>>, vector<32x96xf32>
    %cst_197 = arith.constant dense<0.000000e+00> : vector<32x96xf32>
    %373 = tpu.matmul %371, %372, %cst_197 {dimension_numbers = #tpu.dot_dimension_numbers<[1], [0], [0], [1], [0, 0, 1, 1], [], []>} : vector<32x32xf32>, vector<32x96xf32>, vector<32x96xf32> -> vector<32x96xf32>
    %374 = arith.addf %365, %373 : vector<32x96xf32>
    %375 = arith.addf %366, %371 : vector<32x32xf32>
    %376 = arith.mulf %371, %371 : vector<32x32xf32>
    %377 = arith.addf %368, %376 : vector<32x32xf32>
    %c5_198 = arith.constant 5 : index
    %c0_199 = arith.constant 0 : index
    %c0_200 = arith.constant 0 : index
    %378 = vector.load %arg4[%c5_198, %c0_199, %c0_200] : memref<9x32x72xf32, #tpu.memory_space<vmem>>, vector<1x32x72xf32>
    %379 = vector.shape_cast %378 : vector<1x32x72xf32> to vector<32x72xf32>
    %cst_201 = arith.constant dense<0.000000e+00> : vector<32x32xf32>
    %380 = tpu.matmul %379, %335, %cst_201 {dimension_numbers = #tpu.dot_dimension_numbers<[1], [0], [0], [1], [0, 0, 1, 1], [], []>} : vector<32x72xf32>, vector<72x32xf32>, vector<32x32xf32> -> vector<32x32xf32>
    %c160_202 = arith.constant 160 : index
    %c0_203 = arith.constant 0 : index
    %381 = vector.load %arg17[%c160_202, %c0_203] : memref<288x96xf32, #tpu.memory_space<vmem>>, vector<32x96xf32>
    %cst_204 = arith.constant dense<0.000000e+00> : vector<32x96xf32>
    %382 = tpu.matmul %380, %381, %cst_204 {dimension_numbers = #tpu.dot_dimension_numbers<[1], [0], [0], [1], [0, 0, 1, 1], [], []>} : vector<32x32xf32>, vector<32x96xf32>, vector<32x96xf32> -> vector<32x96xf32>
    %383 = arith.addf %374, %382 : vector<32x96xf32>
    %384 = arith.addf %375, %380 : vector<32x32xf32>
    %385 = arith.mulf %380, %380 : vector<32x32xf32>
    %386 = arith.addf %377, %385 : vector<32x32xf32>
    %c6_205 = arith.constant 6 : index
    %c0_206 = arith.constant 0 : index
    %c0_207 = arith.constant 0 : index
    %387 = vector.load %arg4[%c6_205, %c0_206, %c0_207] : memref<9x32x72xf32, #tpu.memory_space<vmem>>, vector<1x32x72xf32>
    %388 = vector.shape_cast %387 : vector<1x32x72xf32> to vector<32x72xf32>
    %cst_208 = arith.constant dense<0.000000e+00> : vector<32x32xf32>
    %389 = tpu.matmul %388, %335, %cst_208 {dimension_numbers = #tpu.dot_dimension_numbers<[1], [0], [0], [1], [0, 0, 1, 1], [], []>} : vector<32x72xf32>, vector<72x32xf32>, vector<32x32xf32> -> vector<32x32xf32>
    %c192_209 = arith.constant 192 : index
    %c0_210 = arith.constant 0 : index
    %390 = vector.load %arg17[%c192_209, %c0_210] : memref<288x96xf32, #tpu.memory_space<vmem>>, vector<32x96xf32>
    %cst_211 = arith.constant dense<0.000000e+00> : vector<32x96xf32>
    %391 = tpu.matmul %389, %390, %cst_211 {dimension_numbers = #tpu.dot_dimension_numbers<[1], [0], [0], [1], [0, 0, 1, 1], [], []>} : vector<32x32xf32>, vector<32x96xf32>, vector<32x96xf32> -> vector<32x96xf32>
    %392 = arith.addf %383, %391 : vector<32x96xf32>
    %393 = arith.addf %384, %389 : vector<32x32xf32>
    %394 = arith.mulf %389, %389 : vector<32x32xf32>
    %395 = arith.addf %386, %394 : vector<32x32xf32>
    %c7_212 = arith.constant 7 : index
    %c0_213 = arith.constant 0 : index
    %c0_214 = arith.constant 0 : index
    %396 = vector.load %arg4[%c7_212, %c0_213, %c0_214] : memref<9x32x72xf32, #tpu.memory_space<vmem>>, vector<1x32x72xf32>
    %397 = vector.shape_cast %396 : vector<1x32x72xf32> to vector<32x72xf32>
    %cst_215 = arith.constant dense<0.000000e+00> : vector<32x32xf32>
    %398 = tpu.matmul %397, %335, %cst_215 {dimension_numbers = #tpu.dot_dimension_numbers<[1], [0], [0], [1], [0, 0, 1, 1], [], []>} : vector<32x72xf32>, vector<72x32xf32>, vector<32x32xf32> -> vector<32x32xf32>
    %c224_216 = arith.constant 224 : index
    %c0_217 = arith.constant 0 : index
    %399 = vector.load %arg17[%c224_216, %c0_217] : memref<288x96xf32, #tpu.memory_space<vmem>>, vector<32x96xf32>
    %cst_218 = arith.constant dense<0.000000e+00> : vector<32x96xf32>
    %400 = tpu.matmul %398, %399, %cst_218 {dimension_numbers = #tpu.dot_dimension_numbers<[1], [0], [0], [1], [0, 0, 1, 1], [], []>} : vector<32x32xf32>, vector<32x96xf32>, vector<32x96xf32> -> vector<32x96xf32>
    %401 = arith.addf %392, %400 : vector<32x96xf32>
    %402 = arith.addf %393, %398 : vector<32x32xf32>
    %403 = arith.mulf %398, %398 : vector<32x32xf32>
    %404 = arith.addf %395, %403 : vector<32x32xf32>
    %c8_219 = arith.constant 8 : index
    %c0_220 = arith.constant 0 : index
    %c0_221 = arith.constant 0 : index
    %405 = vector.load %arg4[%c8_219, %c0_220, %c0_221] : memref<9x32x72xf32, #tpu.memory_space<vmem>>, vector<1x32x72xf32>
    %406 = vector.shape_cast %405 : vector<1x32x72xf32> to vector<32x72xf32>
    %cst_222 = arith.constant dense<0.000000e+00> : vector<32x32xf32>
    %407 = tpu.matmul %406, %335, %cst_222 {dimension_numbers = #tpu.dot_dimension_numbers<[1], [0], [0], [1], [0, 0, 1, 1], [], []>} : vector<32x72xf32>, vector<72x32xf32>, vector<32x32xf32> -> vector<32x32xf32>
    %c256_223 = arith.constant 256 : index
    %c0_224 = arith.constant 0 : index
    %408 = vector.load %arg17[%c256_223, %c0_224] : memref<288x96xf32, #tpu.memory_space<vmem>>, vector<32x96xf32>
    %cst_225 = arith.constant dense<0.000000e+00> : vector<32x96xf32>
    %409 = tpu.matmul %407, %408, %cst_225 {dimension_numbers = #tpu.dot_dimension_numbers<[1], [0], [0], [1], [0, 0, 1, 1], [], []>} : vector<32x32xf32>, vector<32x96xf32>, vector<32x96xf32> -> vector<32x96xf32>
    %410 = arith.addf %401, %409 : vector<32x96xf32>
    %411 = arith.addf %402, %407 : vector<32x32xf32>
    %412 = arith.mulf %407, %407 : vector<32x32xf32>
    %413 = arith.addf %404, %412 : vector<32x32xf32>
    %cst_226 = arith.constant dense<0.000000e+00> : vector<32xf32>
    %414 = vector.multi_reduction <add>, %411, %cst_226 [1] : vector<32x32xf32> to vector<32xf32>
    %415 = vector.shape_cast %414 : vector<32xf32> to vector<32x1xf32>
    %cst_227 = arith.constant 0.00347222225 : f32
    %416 = vector.broadcast %cst_227 : f32 to vector<32x1xf32>
    %417 = arith.mulf %415, %416 : vector<32x1xf32>
    %cst_228 = arith.constant dense<0.000000e+00> : vector<32xf32>
    %418 = vector.multi_reduction <add>, %413, %cst_228 [1] : vector<32x32xf32> to vector<32xf32>
    %419 = vector.shape_cast %418 : vector<32xf32> to vector<32x1xf32>
    %cst_229 = arith.constant 0.00347222225 : f32
    %420 = vector.broadcast %cst_229 : f32 to vector<32x1xf32>
    %421 = arith.mulf %419, %420 : vector<32x1xf32>
    %422 = arith.mulf %417, %417 : vector<32x1xf32>
    %423 = arith.subf %421, %422 : vector<32x1xf32>
    %cst_230 = arith.constant 0.000000e+00 : f32
    %424 = vector.broadcast %cst_230 : f32 to vector<32x1xf32>
    %425 = arith.maximumf %423, %424 : vector<32x1xf32>
    %cst_231 = arith.constant 9.99999974E-6 : f32
    %426 = vector.broadcast %cst_231 : f32 to vector<32x1xf32>
    %427 = arith.addf %425, %426 : vector<32x1xf32>
    %428 = math.rsqrt %427 : vector<32x1xf32>
    %c0_232 = arith.constant 0 : index
    %c0_233 = arith.constant 0 : index
    %429 = vector.load %arg18[%c0_232, %c0_233] : memref<2x96xf32, #tpu.memory_space<vmem>>, vector<1x96xf32>
    %430 = vector.broadcast %417 : vector<32x1xf32> to vector<32x96xf32>
    %431 = vector.broadcast %429 : vector<1x96xf32> to vector<32x96xf32>
    %432 = arith.mulf %430, %431 : vector<32x96xf32>
    %433 = arith.subf %410, %432 : vector<32x96xf32>
    %434 = vector.broadcast %428 : vector<32x1xf32> to vector<32x96xf32>
    %435 = arith.mulf %433, %434 : vector<32x96xf32>
    %c1_234 = arith.constant 1 : index
    %c0_235 = arith.constant 0 : index
    %436 = vector.load %arg18[%c1_234, %c0_235] : memref<2x96xf32, #tpu.memory_space<vmem>>, vector<1x96xf32>
    %437 = vector.broadcast %436 : vector<1x96xf32> to vector<32x96xf32>
    %438 = arith.addf %435, %437 : vector<32x96xf32>
    %c0_236 = arith.constant 0 : index
    %c0_237 = arith.constant 0 : index
    %439 = vector.load %arg8[%c0_236, %c0_237] : memref<32x32xf32, #tpu.memory_space<vmem>>, vector<32x32xf32>
    %440 = vector.extract_strided_slice %438 {offsets = [0, 0], sizes = [32, 32], strides = [1, 1]} : vector<32x96xf32> to vector<32x32xf32>
    %441 = vector.extract_strided_slice %438 {offsets = [0, 32], sizes = [32, 32], strides = [1, 1]} : vector<32x96xf32> to vector<32x32xf32>
    %442 = vector.extract_strided_slice %438 {offsets = [0, 64], sizes = [32, 32], strides = [1, 1]} : vector<32x96xf32> to vector<32x32xf32>
    %cst_238 = arith.constant dense<0.000000e+00> : vector<32x32xf32>
    %443 = tpu.matmul %440, %441, %cst_238 {dimension_numbers = #tpu.dot_dimension_numbers<[1], [1], [0], [0], [0, 0, 1, 0], [], []>} : vector<32x32xf32>, vector<32x32xf32>, vector<32x32xf32> -> vector<32x32xf32>
    %444 = arith.addf %443, %439 : vector<32x32xf32>
    %cst_239 = arith.constant dense<0xFF800000> : vector<32xf32>
    %445 = vector.multi_reduction <maximumf>, %444, %cst_239 [1] : vector<32x32xf32> to vector<32xf32>
    %446 = vector.shape_cast %445 : vector<32xf32> to vector<32x1xf32>
    %447 = vector.broadcast %446 : vector<32x1xf32> to vector<32x32xf32>
    %448 = arith.subf %444, %447 : vector<32x32xf32>
    %449 = math.exp %448 : vector<32x32xf32>
    %cst_240 = arith.constant 1.000000e+00 : f32
    %450 = vector.broadcast %cst_240 : f32 to vector<32x1xf32>
    %451 = tpu.concatenate %442, %450 in 1 : vector<32x32xf32>, vector<32x1xf32> -> vector<32x33xf32>
    %cst_241 = arith.constant dense<0.000000e+00> : vector<32x33xf32>
    %452 = tpu.matmul %449, %451, %cst_241 {dimension_numbers = #tpu.dot_dimension_numbers<[1], [0], [0], [1], [0, 0, 1, 1], [], []>} : vector<32x32xf32>, vector<32x33xf32>, vector<32x33xf32> -> vector<32x33xf32>
    %453 = vector.extract_strided_slice %452 {offsets = [0, 0], sizes = [32, 32], strides = [1, 1]} : vector<32x33xf32> to vector<32x32xf32>
    %454 = vector.extract_strided_slice %452 {offsets = [0, 32], sizes = [32, 1], strides = [1, 1]} : vector<32x33xf32> to vector<32x1xf32>
    %455 = tpu.reciprocal %454 {approx = true} : vector<32x1xf32> -> vector<32x1xf32>
    %456 = vector.broadcast %455 : vector<32x1xf32> to vector<32x32xf32>
    %457 = arith.mulf %453, %456 : vector<32x32xf32>
    %c0_242 = arith.constant 0 : index
    %c0_243 = arith.constant 0 : index
    %458 = vector.load %arg19[%c0_242, %c0_243] : memref<96x32xf32, #tpu.memory_space<vmem>>, vector<32x32xf32>
    %cst_244 = arith.constant dense<0.000000e+00> : vector<32x32xf32>
    %459 = tpu.matmul %457, %458, %cst_244 {dimension_numbers = #tpu.dot_dimension_numbers<[1], [0], [0], [1], [0, 0, 1, 1], [], []>} : vector<32x32xf32>, vector<32x32xf32>, vector<32x32xf32> -> vector<32x32xf32>
    %c0_245 = arith.constant 0 : index
    %c0_246 = arith.constant 0 : index
    %460 = vector.load %arg20[%c0_245, %c0_246] : memref<5x32xf32, #tpu.memory_space<vmem>>, vector<1x32xf32>
    %461 = vector.broadcast %460 : vector<1x32xf32> to vector<32x32xf32>
    %462 = arith.addf %459, %461 : vector<32x32xf32>
    %463 = arith.addf %442, %462 : vector<32x32xf32>
    %c1_247 = arith.constant 1 : index
    %c0_248 = arith.constant 0 : index
    %464 = vector.load %arg20[%c1_247, %c0_248] : memref<5x32xf32, #tpu.memory_space<vmem>>, vector<1x32xf32>
    %c2_249 = arith.constant 2 : index
    %c0_250 = arith.constant 0 : index
    %465 = vector.load %arg20[%c2_249, %c0_250] : memref<5x32xf32, #tpu.memory_space<vmem>>, vector<1x32xf32>
    %cst_251 = arith.constant dense<0.000000e+00> : vector<32xf32>
    %466 = vector.multi_reduction <add>, %463, %cst_251 [1] : vector<32x32xf32> to vector<32xf32>
    %467 = vector.shape_cast %466 : vector<32xf32> to vector<32x1xf32>
    %cst_252 = arith.constant 3.200000e+01 : f32
    %468 = vector.broadcast %cst_252 : f32 to vector<32x1xf32>
    %469 = arith.divf %467, %468 : vector<32x1xf32>
    %470 = vector.broadcast %469 : vector<32x1xf32> to vector<32x32xf32>
    %471 = arith.subf %463, %470 : vector<32x32xf32>
    %472 = arith.mulf %471, %471 : vector<32x32xf32>
    %cst_253 = arith.constant dense<0.000000e+00> : vector<32xf32>
    %473 = vector.multi_reduction <add>, %472, %cst_253 [1] : vector<32x32xf32> to vector<32xf32>
    %474 = vector.shape_cast %473 : vector<32xf32> to vector<32x1xf32>
    %cst_254 = arith.constant 3.200000e+01 : f32
    %475 = vector.broadcast %cst_254 : f32 to vector<32x1xf32>
    %476 = arith.divf %474, %475 : vector<32x1xf32>
    %477 = vector.broadcast %469 : vector<32x1xf32> to vector<32x32xf32>
    %478 = arith.subf %463, %477 : vector<32x32xf32>
    %cst_255 = arith.constant 9.99999974E-6 : f32
    %479 = vector.broadcast %cst_255 : f32 to vector<32x1xf32>
    %480 = arith.addf %476, %479 : vector<32x1xf32>
    %481 = math.rsqrt %480 : vector<32x1xf32>
    %482 = vector.broadcast %481 : vector<32x1xf32> to vector<32x32xf32>
    %483 = arith.mulf %478, %482 : vector<32x32xf32>
    %484 = vector.broadcast %464 : vector<1x32xf32> to vector<32x32xf32>
    %485 = arith.mulf %483, %484 : vector<32x32xf32>
    %486 = vector.broadcast %465 : vector<1x32xf32> to vector<32x32xf32>
    %487 = arith.addf %485, %486 : vector<32x32xf32>
    %c32_256 = arith.constant 32 : index
    %c0_257 = arith.constant 0 : index
    %488 = vector.load %arg19[%c32_256, %c0_257] : memref<96x32xf32, #tpu.memory_space<vmem>>, vector<32x32xf32>
    %cst_258 = arith.constant dense<0.000000e+00> : vector<32x32xf32>
    %489 = tpu.matmul %487, %488, %cst_258 {dimension_numbers = #tpu.dot_dimension_numbers<[1], [0], [0], [1], [0, 0, 1, 1], [], []>} : vector<32x32xf32>, vector<32x32xf32>, vector<32x32xf32> -> vector<32x32xf32>
    %c3_259 = arith.constant 3 : index
    %c0_260 = arith.constant 0 : index
    %490 = vector.load %arg20[%c3_259, %c0_260] : memref<5x32xf32, #tpu.memory_space<vmem>>, vector<1x32xf32>
    %491 = vector.broadcast %490 : vector<1x32xf32> to vector<32x32xf32>
    %492 = arith.addf %489, %491 : vector<32x32xf32>
    %cst_261 = arith.constant 5.000000e-01 : f32
    %493 = vector.broadcast %cst_261 : f32 to vector<32x32xf32>
    %494 = arith.mulf %493, %492 : vector<32x32xf32>
    %cst_262 = arith.constant 0.707106769 : f32
    %495 = vector.broadcast %cst_262 : f32 to vector<32x32xf32>
    %496 = arith.mulf %492, %495 : vector<32x32xf32>
    %cst_263 = arith.constant 0.000000e+00 : f32
    %497 = vector.broadcast %cst_263 : f32 to vector<32x32xf32>
    %498 = arith.cmpf oge, %496, %497 : vector<32x32xf32>
    %cst_264 = arith.constant 1.000000e+00 : f32
    %cst_265 = arith.constant -1.000000e+00 : f32
    %499 = vector.broadcast %cst_264 : f32 to vector<32x32xf32>
    %500 = vector.broadcast %cst_265 : f32 to vector<32x32xf32>
    %501 = arith.select %498, %499, %500 : vector<32x32xi1>, vector<32x32xf32>
    %502 = math.absf %496 : vector<32x32xf32>
    %cst_266 = arith.constant 0.327591091 : f32
    %503 = vector.broadcast %cst_266 : f32 to vector<32x32xf32>
    %504 = arith.mulf %503, %502 : vector<32x32xf32>
    %cst_267 = arith.constant 1.000000e+00 : f32
    %505 = vector.broadcast %cst_267 : f32 to vector<32x32xf32>
    %506 = arith.addf %505, %504 : vector<32x32xf32>
    %cst_268 = arith.constant 1.000000e+00 : f32
    %507 = vector.broadcast %cst_268 : f32 to vector<32x32xf32>
    %508 = arith.divf %507, %506 : vector<32x32xf32>
    %cst_269 = arith.constant 1.06140542 : f32
    %509 = vector.broadcast %cst_269 : f32 to vector<32x32xf32>
    %510 = arith.mulf %509, %508 : vector<32x32xf32>
    %cst_270 = arith.constant -1.45315206 : f32
    %511 = vector.broadcast %cst_270 : f32 to vector<32x32xf32>
    %512 = arith.addf %510, %511 : vector<32x32xf32>
    %513 = arith.mulf %512, %508 : vector<32x32xf32>
    %cst_271 = arith.constant 1.42141378 : f32
    %514 = vector.broadcast %cst_271 : f32 to vector<32x32xf32>
    %515 = arith.addf %513, %514 : vector<32x32xf32>
    %516 = arith.mulf %515, %508 : vector<32x32xf32>
    %cst_272 = arith.constant -0.284496725 : f32
    %517 = vector.broadcast %cst_272 : f32 to vector<32x32xf32>
    %518 = arith.addf %516, %517 : vector<32x32xf32>
    %519 = arith.mulf %518, %508 : vector<32x32xf32>
    %cst_273 = arith.constant 0.254829586 : f32
    %520 = vector.broadcast %cst_273 : f32 to vector<32x32xf32>
    %521 = arith.addf %519, %520 : vector<32x32xf32>
    %522 = arith.mulf %521, %508 : vector<32x32xf32>
    %cst_274 = arith.constant 0.000000e+00 : f32
    %523 = vector.broadcast %cst_274 : f32 to vector<32x32xf32>
    %524 = arith.subf %523, %502 : vector<32x32xf32>
    %525 = arith.mulf %524, %502 : vector<32x32xf32>
    %526 = math.exp %525 : vector<32x32xf32>
    %527 = arith.mulf %522, %526 : vector<32x32xf32>
    %cst_275 = arith.constant 1.000000e+00 : f32
    %528 = vector.broadcast %cst_275 : f32 to vector<32x32xf32>
    %529 = arith.subf %528, %527 : vector<32x32xf32>
    %530 = arith.mulf %501, %529 : vector<32x32xf32>
    %cst_276 = arith.constant 1.000000e+00 : f32
    %531 = vector.broadcast %cst_276 : f32 to vector<32x32xf32>
    %532 = arith.addf %531, %530 : vector<32x32xf32>
    %533 = arith.mulf %494, %532 : vector<32x32xf32>
    %c64_277 = arith.constant 64 : index
    %c0_278 = arith.constant 0 : index
    %534 = vector.load %arg19[%c64_277, %c0_278] : memref<96x32xf32, #tpu.memory_space<vmem>>, vector<32x32xf32>
    %cst_279 = arith.constant dense<0.000000e+00> : vector<32x32xf32>
    %535 = tpu.matmul %533, %534, %cst_279 {dimension_numbers = #tpu.dot_dimension_numbers<[1], [0], [0], [1], [0, 0, 1, 1], [], []>} : vector<32x32xf32>, vector<32x32xf32>, vector<32x32xf32> -> vector<32x32xf32>
    %c4_280 = arith.constant 4 : index
    %c0_281 = arith.constant 0 : index
    %536 = vector.load %arg20[%c4_280, %c0_281] : memref<5x32xf32, #tpu.memory_space<vmem>>, vector<1x32xf32>
    %537 = vector.broadcast %536 : vector<1x32xf32> to vector<32x32xf32>
    %538 = arith.addf %535, %537 : vector<32x32xf32>
    %539 = arith.addf %463, %538 : vector<32x32xf32>
    %c0_282 = arith.constant 0 : index
    %c0_283 = arith.constant 0 : index
    %c0_284 = arith.constant 0 : index
    %540 = vector.load %arg5[%c0_282, %c0_283, %c0_284] : memref<9x8x32xf32, #tpu.memory_space<vmem>>, vector<1x8x32xf32>
    %541 = vector.shape_cast %540 : vector<1x8x32xf32> to vector<8x32xf32>
    %cst_285 = arith.constant dense<0.000000e+00> : vector<8x32xf32>
    %542 = tpu.matmul %541, %539, %cst_285 {dimension_numbers = #tpu.dot_dimension_numbers<[1], [0], [0], [1], [0, 0, 1, 1], [], []>} : vector<8x32xf32>, vector<32x32xf32>, vector<8x32xf32> -> vector<8x32xf32>
    %c0_286 = arith.constant 0 : index
    %c0_287 = arith.constant 0 : index
    %543 = vector.load %arg21[%c0_286, %c0_287] : memref<288x256xf32, #tpu.memory_space<vmem>>, vector<32x256xf32>
    %cst_288 = arith.constant dense<0.000000e+00> : vector<8x256xf32>
    %544 = tpu.matmul %542, %543, %cst_288 {dimension_numbers = #tpu.dot_dimension_numbers<[1], [0], [0], [1], [0, 0, 1, 1], [], []>} : vector<8x32xf32>, vector<32x256xf32>, vector<8x256xf32> -> vector<8x256xf32>
    %c1_289 = arith.constant 1 : index
    %c0_290 = arith.constant 0 : index
    %c0_291 = arith.constant 0 : index
    %545 = vector.load %arg5[%c1_289, %c0_290, %c0_291] : memref<9x8x32xf32, #tpu.memory_space<vmem>>, vector<1x8x32xf32>
    %546 = vector.shape_cast %545 : vector<1x8x32xf32> to vector<8x32xf32>
    %cst_292 = arith.constant dense<0.000000e+00> : vector<8x32xf32>
    %547 = tpu.matmul %546, %539, %cst_292 {dimension_numbers = #tpu.dot_dimension_numbers<[1], [0], [0], [1], [0, 0, 1, 1], [], []>} : vector<8x32xf32>, vector<32x32xf32>, vector<8x32xf32> -> vector<8x32xf32>
    %c32_293 = arith.constant 32 : index
    %c0_294 = arith.constant 0 : index
    %548 = vector.load %arg21[%c32_293, %c0_294] : memref<288x256xf32, #tpu.memory_space<vmem>>, vector<32x256xf32>
    %cst_295 = arith.constant dense<0.000000e+00> : vector<8x256xf32>
    %549 = tpu.matmul %547, %548, %cst_295 {dimension_numbers = #tpu.dot_dimension_numbers<[1], [0], [0], [1], [0, 0, 1, 1], [], []>} : vector<8x32xf32>, vector<32x256xf32>, vector<8x256xf32> -> vector<8x256xf32>
    %550 = arith.addf %544, %549 : vector<8x256xf32>
    %c2_296 = arith.constant 2 : index
    %c0_297 = arith.constant 0 : index
    %c0_298 = arith.constant 0 : index
    %551 = vector.load %arg5[%c2_296, %c0_297, %c0_298] : memref<9x8x32xf32, #tpu.memory_space<vmem>>, vector<1x8x32xf32>
    %552 = vector.shape_cast %551 : vector<1x8x32xf32> to vector<8x32xf32>
    %cst_299 = arith.constant dense<0.000000e+00> : vector<8x32xf32>
    %553 = tpu.matmul %552, %539, %cst_299 {dimension_numbers = #tpu.dot_dimension_numbers<[1], [0], [0], [1], [0, 0, 1, 1], [], []>} : vector<8x32xf32>, vector<32x32xf32>, vector<8x32xf32> -> vector<8x32xf32>
    %c64_300 = arith.constant 64 : index
    %c0_301 = arith.constant 0 : index
    %554 = vector.load %arg21[%c64_300, %c0_301] : memref<288x256xf32, #tpu.memory_space<vmem>>, vector<32x256xf32>
    %cst_302 = arith.constant dense<0.000000e+00> : vector<8x256xf32>
    %555 = tpu.matmul %553, %554, %cst_302 {dimension_numbers = #tpu.dot_dimension_numbers<[1], [0], [0], [1], [0, 0, 1, 1], [], []>} : vector<8x32xf32>, vector<32x256xf32>, vector<8x256xf32> -> vector<8x256xf32>
    %556 = arith.addf %550, %555 : vector<8x256xf32>
    %c3_303 = arith.constant 3 : index
    %c0_304 = arith.constant 0 : index
    %c0_305 = arith.constant 0 : index
    %557 = vector.load %arg5[%c3_303, %c0_304, %c0_305] : memref<9x8x32xf32, #tpu.memory_space<vmem>>, vector<1x8x32xf32>
    %558 = vector.shape_cast %557 : vector<1x8x32xf32> to vector<8x32xf32>
    %cst_306 = arith.constant dense<0.000000e+00> : vector<8x32xf32>
    %559 = tpu.matmul %558, %539, %cst_306 {dimension_numbers = #tpu.dot_dimension_numbers<[1], [0], [0], [1], [0, 0, 1, 1], [], []>} : vector<8x32xf32>, vector<32x32xf32>, vector<8x32xf32> -> vector<8x32xf32>
    %c96_307 = arith.constant 96 : index
    %c0_308 = arith.constant 0 : index
    %560 = vector.load %arg21[%c96_307, %c0_308] : memref<288x256xf32, #tpu.memory_space<vmem>>, vector<32x256xf32>
    %cst_309 = arith.constant dense<0.000000e+00> : vector<8x256xf32>
    %561 = tpu.matmul %559, %560, %cst_309 {dimension_numbers = #tpu.dot_dimension_numbers<[1], [0], [0], [1], [0, 0, 1, 1], [], []>} : vector<8x32xf32>, vector<32x256xf32>, vector<8x256xf32> -> vector<8x256xf32>
    %562 = arith.addf %556, %561 : vector<8x256xf32>
    %c4_310 = arith.constant 4 : index
    %c0_311 = arith.constant 0 : index
    %c0_312 = arith.constant 0 : index
    %563 = vector.load %arg5[%c4_310, %c0_311, %c0_312] : memref<9x8x32xf32, #tpu.memory_space<vmem>>, vector<1x8x32xf32>
    %564 = vector.shape_cast %563 : vector<1x8x32xf32> to vector<8x32xf32>
    %cst_313 = arith.constant dense<0.000000e+00> : vector<8x32xf32>
    %565 = tpu.matmul %564, %539, %cst_313 {dimension_numbers = #tpu.dot_dimension_numbers<[1], [0], [0], [1], [0, 0, 1, 1], [], []>} : vector<8x32xf32>, vector<32x32xf32>, vector<8x32xf32> -> vector<8x32xf32>
    %c128_314 = arith.constant 128 : index
    %c0_315 = arith.constant 0 : index
    %566 = vector.load %arg21[%c128_314, %c0_315] : memref<288x256xf32, #tpu.memory_space<vmem>>, vector<32x256xf32>
    %cst_316 = arith.constant dense<0.000000e+00> : vector<8x256xf32>
    %567 = tpu.matmul %565, %566, %cst_316 {dimension_numbers = #tpu.dot_dimension_numbers<[1], [0], [0], [1], [0, 0, 1, 1], [], []>} : vector<8x32xf32>, vector<32x256xf32>, vector<8x256xf32> -> vector<8x256xf32>
    %568 = arith.addf %562, %567 : vector<8x256xf32>
    %c5_317 = arith.constant 5 : index
    %c0_318 = arith.constant 0 : index
    %c0_319 = arith.constant 0 : index
    %569 = vector.load %arg5[%c5_317, %c0_318, %c0_319] : memref<9x8x32xf32, #tpu.memory_space<vmem>>, vector<1x8x32xf32>
    %570 = vector.shape_cast %569 : vector<1x8x32xf32> to vector<8x32xf32>
    %cst_320 = arith.constant dense<0.000000e+00> : vector<8x32xf32>
    %571 = tpu.matmul %570, %539, %cst_320 {dimension_numbers = #tpu.dot_dimension_numbers<[1], [0], [0], [1], [0, 0, 1, 1], [], []>} : vector<8x32xf32>, vector<32x32xf32>, vector<8x32xf32> -> vector<8x32xf32>
    %c160_321 = arith.constant 160 : index
    %c0_322 = arith.constant 0 : index
    %572 = vector.load %arg21[%c160_321, %c0_322] : memref<288x256xf32, #tpu.memory_space<vmem>>, vector<32x256xf32>
    %cst_323 = arith.constant dense<0.000000e+00> : vector<8x256xf32>
    %573 = tpu.matmul %571, %572, %cst_323 {dimension_numbers = #tpu.dot_dimension_numbers<[1], [0], [0], [1], [0, 0, 1, 1], [], []>} : vector<8x32xf32>, vector<32x256xf32>, vector<8x256xf32> -> vector<8x256xf32>
    %574 = arith.addf %568, %573 : vector<8x256xf32>
    %c6_324 = arith.constant 6 : index
    %c0_325 = arith.constant 0 : index
    %c0_326 = arith.constant 0 : index
    %575 = vector.load %arg5[%c6_324, %c0_325, %c0_326] : memref<9x8x32xf32, #tpu.memory_space<vmem>>, vector<1x8x32xf32>
    %576 = vector.shape_cast %575 : vector<1x8x32xf32> to vector<8x32xf32>
    %cst_327 = arith.constant dense<0.000000e+00> : vector<8x32xf32>
    %577 = tpu.matmul %576, %539, %cst_327 {dimension_numbers = #tpu.dot_dimension_numbers<[1], [0], [0], [1], [0, 0, 1, 1], [], []>} : vector<8x32xf32>, vector<32x32xf32>, vector<8x32xf32> -> vector<8x32xf32>
    %c192_328 = arith.constant 192 : index
    %c0_329 = arith.constant 0 : index
    %578 = vector.load %arg21[%c192_328, %c0_329] : memref<288x256xf32, #tpu.memory_space<vmem>>, vector<32x256xf32>
    %cst_330 = arith.constant dense<0.000000e+00> : vector<8x256xf32>
    %579 = tpu.matmul %577, %578, %cst_330 {dimension_numbers = #tpu.dot_dimension_numbers<[1], [0], [0], [1], [0, 0, 1, 1], [], []>} : vector<8x32xf32>, vector<32x256xf32>, vector<8x256xf32> -> vector<8x256xf32>
    %580 = arith.addf %574, %579 : vector<8x256xf32>
    %c7_331 = arith.constant 7 : index
    %c0_332 = arith.constant 0 : index
    %c0_333 = arith.constant 0 : index
    %581 = vector.load %arg5[%c7_331, %c0_332, %c0_333] : memref<9x8x32xf32, #tpu.memory_space<vmem>>, vector<1x8x32xf32>
    %582 = vector.shape_cast %581 : vector<1x8x32xf32> to vector<8x32xf32>
    %cst_334 = arith.constant dense<0.000000e+00> : vector<8x32xf32>
    %583 = tpu.matmul %582, %539, %cst_334 {dimension_numbers = #tpu.dot_dimension_numbers<[1], [0], [0], [1], [0, 0, 1, 1], [], []>} : vector<8x32xf32>, vector<32x32xf32>, vector<8x32xf32> -> vector<8x32xf32>
    %c224_335 = arith.constant 224 : index
    %c0_336 = arith.constant 0 : index
    %584 = vector.load %arg21[%c224_335, %c0_336] : memref<288x256xf32, #tpu.memory_space<vmem>>, vector<32x256xf32>
    %cst_337 = arith.constant dense<0.000000e+00> : vector<8x256xf32>
    %585 = tpu.matmul %583, %584, %cst_337 {dimension_numbers = #tpu.dot_dimension_numbers<[1], [0], [0], [1], [0, 0, 1, 1], [], []>} : vector<8x32xf32>, vector<32x256xf32>, vector<8x256xf32> -> vector<8x256xf32>
    %586 = arith.addf %580, %585 : vector<8x256xf32>
    %c8_338 = arith.constant 8 : index
    %c0_339 = arith.constant 0 : index
    %c0_340 = arith.constant 0 : index
    %587 = vector.load %arg5[%c8_338, %c0_339, %c0_340] : memref<9x8x32xf32, #tpu.memory_space<vmem>>, vector<1x8x32xf32>
    %588 = vector.shape_cast %587 : vector<1x8x32xf32> to vector<8x32xf32>
    %cst_341 = arith.constant dense<0.000000e+00> : vector<8x32xf32>
    %589 = tpu.matmul %588, %539, %cst_341 {dimension_numbers = #tpu.dot_dimension_numbers<[1], [0], [0], [1], [0, 0, 1, 1], [], []>} : vector<8x32xf32>, vector<32x32xf32>, vector<8x32xf32> -> vector<8x32xf32>
    %c256_342 = arith.constant 256 : index
    %c0_343 = arith.constant 0 : index
    %590 = vector.load %arg21[%c256_342, %c0_343] : memref<288x256xf32, #tpu.memory_space<vmem>>, vector<32x256xf32>
    %cst_344 = arith.constant dense<0.000000e+00> : vector<8x256xf32>
    %591 = tpu.matmul %589, %590, %cst_344 {dimension_numbers = #tpu.dot_dimension_numbers<[1], [0], [0], [1], [0, 0, 1, 1], [], []>} : vector<8x32xf32>, vector<32x256xf32>, vector<8x256xf32> -> vector<8x256xf32>
    %592 = arith.addf %586, %591 : vector<8x256xf32>
    %c0_345 = arith.constant 0 : index
    %c0_346 = arith.constant 0 : index
    %593 = vector.load %arg22[%c0_345, %c0_346] : memref<1x256xf32, #tpu.memory_space<vmem>>, vector<1x256xf32>
    %594 = vector.broadcast %593 : vector<1x256xf32> to vector<8x256xf32>
    %595 = arith.addf %592, %594 : vector<8x256xf32>
    %c0_347 = arith.constant 0 : index
    %c0_348 = arith.constant 0 : index
    %c0_349 = arith.constant 0 : index
    %596 = vector.load %arg23[%c0_347, %c0_348, %c0_349] : memref<1x8x256xf32, #tpu.memory_space<vmem>>, vector<1x8x256xf32>
    %597 = vector.shape_cast %596 : vector<1x8x256xf32> to vector<8x256xf32>
    %598 = vector.shape_cast %595 : vector<8x256xf32> to vector<1x8x256xf32>
    tpu.vector_store %arg23[%c0_347, %c0_348, %c0_349], %598 {strides = array<i32>} : memref<1x8x256xf32, #tpu.memory_space<vmem>>, vector<1x8x256xf32>,
    return
  }
  func.func @transform_0(%arg0: i32) -> (i32, i32, i32) {
    %c0_i32 = arith.constant 0 : i32
    %c0_i32_0 = arith.constant 0 : i32
    %c0_i32_1 = arith.constant 0 : i32
    return %arg0, %c0_i32, %c0_i32_0 : i32, i32, i32
  }
  func.func @transform_1(%arg0: i32) -> (i32, i32) {
    %c0_i32 = arith.constant 0 : i32
    %c0_i32_0 = arith.constant 0 : i32
    %c0_i32_1 = arith.constant 0 : i32
    return %c0_i32, %c0_i32_0 : i32, i32
  }
  func.func @transform_2(%arg0: i32) -> (i32, i32, i32) {
    %c0_i32 = arith.constant 0 : i32
    %c0_i32_0 = arith.constant 0 : i32
    %c0_i32_1 = arith.constant 0 : i32
    %c0_i32_2 = arith.constant 0 : i32
    return %c0_i32, %c0_i32_0, %c0_i32_1 : i32, i32, i32
  }
  func.func @transform_3(%arg0: i32) -> (i32, i32, i32) {
    %c0_i32 = arith.constant 0 : i32
    %c0_i32_0 = arith.constant 0 : i32
    %c0_i32_1 = arith.constant 0 : i32
    %c0_i32_2 = arith.constant 0 : i32
    return %c0_i32, %c0_i32_0, %c0_i32_1 : i32, i32, i32
  }
  func.func @transform_4(%arg0: i32) -> (i32, i32, i32) {
    %c0_i32 = arith.constant 0 : i32
    %c0_i32_0 = arith.constant 0 : i32
    %c0_i32_1 = arith.constant 0 : i32
    %c0_i32_2 = arith.constant 0 : i32
    return %c0_i32, %c0_i32_0, %c0_i32_1 : i32, i32, i32
  }
  func.func @transform_5(%arg0: i32) -> (i32, i32) {
    %c0_i32 = arith.constant 0 : i32
    %c0_i32_0 = arith.constant 0 : i32
    %c0_i32_1 = arith.constant 0 : i32
    return %c0_i32, %c0_i32_0 : i32, i32
  }
  func.func @transform_6(%arg0: i32) -> (i32, i32) {
    %c0_i32 = arith.constant 0 : i32
    %c0_i32_0 = arith.constant 0 : i32
    %c0_i32_1 = arith.constant 0 : i32
    return %c0_i32, %c0_i32_0 : i32, i32
  }
  func.func @transform_7(%arg0: i32) -> (i32, i32) {
    %c0_i32 = arith.constant 0 : i32
    %c0_i32_0 = arith.constant 0 : i32
    %c0_i32_1 = arith.constant 0 : i32
    return %c0_i32, %c0_i32_0 : i32, i32
  }
  func.func @transform_8(%arg0: i32) -> (i32, i32) {
    %c0_i32 = arith.constant 0 : i32
    %c0_i32_0 = arith.constant 0 : i32
    %c0_i32_1 = arith.constant 0 : i32
    return %c0_i32, %c0_i32_0 : i32, i32
  }
  func.func @transform_9(%arg0: i32) -> (i32, i32) {
    %c0_i32 = arith.constant 0 : i32
    %c0_i32_0 = arith.constant 0 : i32
    %c0_i32_1 = arith.constant 0 : i32
    return %c0_i32, %c0_i32_0 : i32, i32
  }
  func.func @transform_10(%arg0: i32) -> (i32, i32) {
    %c0_i32 = arith.constant 0 : i32
    %c0_i32_0 = arith.constant 0 : i32
    %c0_i32_1 = arith.constant 0 : i32
    return %c0_i32, %c0_i32_0 : i32, i32
  }
  func.func @transform_11(%arg0: i32) -> (i32, i32) {
    %c0_i32 = arith.constant 0 : i32
    %c0_i32_0 = arith.constant 0 : i32
    %c0_i32_1 = arith.constant 0 : i32
    return %c0_i32, %c0_i32_0 : i32, i32
  }
  func.func @transform_12(%arg0: i32) -> (i32, i32) {
    %c0_i32 = arith.constant 0 : i32
    %c0_i32_0 = arith.constant 0 : i32
    %c0_i32_1 = arith.constant 0 : i32
    return %c0_i32, %c0_i32_0 : i32, i32
  }
  func.func @transform_13(%arg0: i32) -> (i32, i32) {
    %c0_i32 = arith.constant 0 : i32
    %c0_i32_0 = arith.constant 0 : i32
    %c0_i32_1 = arith.constant 0 : i32
    return %c0_i32, %c0_i32_0 : i32, i32
  }
  func.func @transform_14(%arg0: i32) -> (i32, i32) {
    %c0_i32 = arith.constant 0 : i32
    %c0_i32_0 = arith.constant 0 : i32
    %c0_i32_1 = arith.constant 0 : i32
    return %c0_i32, %c0_i32_0 : i32, i32
  }
  func.func @transform_15(%arg0: i32) -> (i32, i32) {
    %c0_i32 = arith.constant 0 : i32
    %c0_i32_0 = arith.constant 0 : i32
    %c0_i32_1 = arith.constant 0 : i32
    return %c0_i32, %c0_i32_0 : i32, i32
  }
  func.func @transform_16(%arg0: i32) -> (i32, i32) {
    %c0_i32 = arith.constant 0 : i32
    %c0_i32_0 = arith.constant 0 : i32
    %c0_i32_1 = arith.constant 0 : i32
    return %c0_i32, %c0_i32_0 : i32, i32
  }
  func.func @transform_17(%arg0: i32) -> (i32, i32) {
    %c0_i32 = arith.constant 0 : i32
    %c0_i32_0 = arith.constant 0 : i32
    %c0_i32_1 = arith.constant 0 : i32
    return %c0_i32, %c0_i32_0 : i32, i32
  }
  func.func @transform_18(%arg0: i32) -> (i32, i32) {
    %c0_i32 = arith.constant 0 : i32
    %c0_i32_0 = arith.constant 0 : i32
    %c0_i32_1 = arith.constant 0 : i32
    return %c0_i32, %c0_i32_0 : i32, i32
  }
  func.func @transform_19(%arg0: i32) -> (i32, i32) {
    %c0_i32 = arith.constant 0 : i32
    %c0_i32_0 = arith.constant 0 : i32
    %c0_i32_1 = arith.constant 0 : i32
    return %c0_i32, %c0_i32_0 : i32, i32
  }
  func.func @transform_20(%arg0: i32) -> (i32, i32) {
    %c0_i32 = arith.constant 0 : i32
    %c0_i32_0 = arith.constant 0 : i32
    %c0_i32_1 = arith.constant 0 : i32
    return %c0_i32, %c0_i32_0 : i32, i32
  }
  func.func @transform_21(%arg0: i32) -> (i32, i32) {
    %c0_i32 = arith.constant 0 : i32
    %c0_i32_0 = arith.constant 0 : i32
    %c0_i32_1 = arith.constant 0 : i32
    return %c0_i32, %c0_i32_0 : i32, i32
  }
  func.func @transform_22(%arg0: i32) -> (i32, i32, i32) {
    %c0_i32 = arith.constant 0 : i32
    %c0_i32_0 = arith.constant 0 : i32
    %c0_i32_1 = arith.constant 0 : i32
    return %arg0, %c0_i32, %c0_i32_0 : i32, i32, i32
  }
}

</mosaic_0001>

<bundles_post_ra>
// kernel: pre_unfold_local.1
= control target key start
LH: loop header
LB: loop body
LE: loop exit
PB: predicated region body
PF: predicated region fallthrough
CT: control target
= control target key end

     0   :  { %s21296_s0 = inlined_call_operand.vmem [shape: f32[2,128,256], index: 0, kind: input, shape index: {}]   ;;  %s21297_s1 = inlined_call_operand.vmem [shape: f32[1,256], index: 1, kind: input, shape index: {}]   ;;  %s21298_s2 = inlined_call_operand.vmem [shape: f32[9,72,128], index: 2, kind: input, shape index: {}]   ;;  %s21299_s3 = inlined_call_operand.vmem [shape: f32[9,32,72], index: 3, kind: input, shape index: {}]   ;;  %s21300_s4 = inlined_call_operand.vmem [shape: f32[9,8,32], index: 4, kind: input, shape index: {}]   ;;  %s21301_s5 = inlined_call_operand.vmem [shape: f32[128,128], index: 5, kind: input, shape index: {}]   ;;  %s21302_s6 = inlined_call_operand.vmem [shape: f32[72,72], index: 6, kind: input, shape index: {}]   ;;  %s21303_s7 = inlined_call_operand.vmem [shape: f32[32,32], index: 7, kind: input, shape index: {}]   ;;  %s21304_s8 = inlined_call_operand.vmem [shape: f32[256,97], index: 8, kind: input, shape index: {}]   ;;  %s21305_s9 = inlined_call_operand.vmem [shape: f32[2,96], index: 9, kind: input, shape index: {}]   ;;  %s21306_s10 = inlined_call_operand.vmem [shape: f32[96,32], index: 10, kind: input, shape index: {}]   ;;  %s21307_s11 = inlined_call_operand.vmem [shape: f32[5,32], index: 11, kind: input, shape index: {}]   ;;  %s21308_s12 = inlined_call_operand.vmem [shape: f32[288,96], index: 12, kind: input, shape index: {}]   ;;  %s21309_s13 = inlined_call_operand.vmem [shape: f32[2,96], index: 13, kind: input, shape index: {}]   ;;  %s21310_s14 = inlined_call_operand.vmem [shape: f32[96,32], index: 14, kind: input, shape index: {}]   ;;  %s21311_s15 = inlined_call_operand.vmem [shape: f32[5,32], index: 15, kind: input, shape index: {}]   ;;  %s21312_s16 = inlined_call_operand.vmem [shape: f32[288,96], index: 16, kind: input, shape index: {}]   ;;  %s21313_s17 = inlined_call_operand.vmem [shape: f32[2,96], index: 17, kind: input, shape index: {}]   ;;  %s21314_s18 = inlined_call_operand.vmem [shape: f32[96,32], index: 18, kind: input, shape index: {}]   ;;  %s21315_s19 = inlined_call_operand.vmem [shape: f32[5,32], index: 19, kind: input, shape index: {}]   ;;  %s21316_s20 = inlined_call_operand.vmem [shape: f32[288,256], index: 20, kind: input, shape index: {}]   ;;  %s21317_s21 = inlined_call_operand.vmem [shape: f32[1,256], index: 21, kind: input, shape index: {}]   ;;  %s21318_s22 = inlined_call_operand.vmem [shape: f32[2,8,256], index: 22, kind: output, shape index: {}]  }
   0x1   :  { %21345 = sst [smem:[#allocation10_spill]] %s21296_s0 }
   0x2   :  { %21346 = sst [smem:[#allocation11_spill]] %s21297_s1 }
   0x3   :  { %21347 = sst [smem:[#allocation12_spill]] %s21298_s2 }
   0x4   :  { %21348 = sst [smem:[#allocation13_spill]] %s21299_s3  ;;  %s15983_s3 = smov 0  }
   0x5   :  { %21349 = sst [smem:[#allocation14_spill]] %s21300_s4 }
   0x6   :  { %21350 = sst [smem:[#allocation15_spill]] %s21301_s5 }
   0x7   :  { %21351 = sst [smem:[#allocation16_spill]] %s21302_s6 }
   0x8   :  { %21352 = sst [smem:[#allocation17_spill]] %s21303_s7 }
   0x9 LB: > { %s12356_s28 = sadd.s32 4294967295, %s15859_s3   ;;  %p12360_p0 = scmp.ge.s32.totalorder %s15859_s3, 1  ;;  %s15859_s3 = sphi %s15983_s3, %s32_s3  }
   0xa   : > { %p612_p1 = scmp.lt.s32.totalorder %s15859_s3, 3 }
   0xc   : > { %p613_p2 = pnand %p12360_p0, %p612_p1 }
   0xe   : > { %616 = sbr.rel (%p613_p2) target bundleno = 11395 (0x2c83), region = 108 }
  0x13   : > { %v747_v0 = vld [vmem:[%s21304_s8 + $0xf8] sm:$0xff]  ;;  %v746_v2 = vld [vmem:[%s21304_s8 + $0xf0] sm:$0xff]  ;;  %p674_p3 = scmp.lt.s32.totalorder %s12356_s28, 1  ;;  %v745_v4 = vld [vmem:[%s21304_s8 + $0xe8] sm:$0xff]  ;;  %s21353_s26 = sld [smem:[#allocation10_spill]]  ;;  %vm1331_vm0 = vcmask 261120  }
  0x14   : > { %v731_v1 = vld [vmem:[%s21304_s8 + $0x78] sm:$0xff]  ;;  %12831 = vmatprep.subr.mxu0 %v747_v0  ;;  %v730_v3 = vld [vmem:[%s21304_s8 + $0x70] sm:$0xff]  ;;  %v729_v5 = vld [vmem:[%s21304_s8 + $0x68] sm:$0xff]  ;;  %v15861_v0 = vmov 96   ;;  %s21362_s6 = sld [smem:[#allocation11_spill]]  ;;  %s15862_s4 = smov 96  }
  0x15   : > { %12832 = vmatpush3.msra.mxu0 %v731_v1  ;;  %s21392_s28 = smov (!%p674_p3, %s12356_s28), 1  ;;  %v744_v6 = vld [vmem:[%s21304_s8 + $0xe0] sm:$0xff]  ;;  %v743_v8 = vld [vmem:[%s21304_s8 + $0xd8] sm:$0xff]  ;;  %v742_v10 = vld [vmem:[%s21304_s8 + $0xd0] sm:$0xff]  ;;  %15502 = vset.pattern.permute.xlu1 %v15861_v0  ;;  %s21342_s0 = smov 64  }
  0x16   : > { %12833 = vmatprep.subr.mxu0 %v746_v2  ;;  %s12829_s30 = sshll.u32 %s21392_s28, 8  ;;  %v728_v7 = vld [vmem:[%s21304_s8 + $0x60] sm:$0xff]  ;;  %v727_v9 = vld [vmem:[%s21304_s8 + $0x58] sm:$0xff]  ;;  %v726_v11 = vld [vmem:[%s21304_s8 + $0x50] sm:$0xff]  ;;  %15501 = vset.pattern.permute.xlu0 %v15861_v0  ;;  %s21382_s27 = sld [smem:[#allocation12_spill]] }
  0x17   : > { %12834 = vmatpush3.msra.mxu0 %v730_v3  ;;  %v741_v12 = vld [vmem:[%s21304_s8 + $0xc8] sm:$0xff]  ;;  %v740_v15 = vld [vmem:[%s21304_s8 + $0xc0] sm:$0xff]  ;;  %v739_v17 = vld [vmem:[%s21304_s8 + $0xb8] sm:$0xff]  ;;  %s21384_s29 = sld [smem:[#allocation13_spill]] }
  0x18   : > { %12835 = vmatprep.subr.mxu0 %v745_v4  ;;  %v725_v14 = vld [vmem:[%s21304_s8 + $0x48] sm:$0xff]  ;;  %v724_v16 = vld [vmem:[%s21304_s8 + $0x40] sm:$0xff]  ;;  %v723_v18 = vld [vmem:[%s21304_s8 + $0x38] sm:$0xff]  ;;  %s21386_s7 = sld [smem:[#allocation17_spill]] }
  0x19   : > { %12836 = vmatpush3.msra.mxu0 %v729_v5  ;;  %s16027_s2 = scalar_lea.vmem %s21353_s26, %s12829_s30  ;;  %v738_v19 = vld [vmem:[%s21304_s8 + $0xb0] sm:$0xff]  ;;  %v737_v21 = vld [vmem:[%s21304_s8 + $0xa8] sm:$0xff]  ;;  %v736_v23 = vld [vmem:[%s21304_s8 + $0xa0] sm:$0xff]  ;;  %s21370_s30 = sld [smem:[#allocation15_spill]] }
  0x1a   : > { %12837 = vmatprep.subr.mxu0 %v744_v6  ;;  %v16039_v13 = vld [vmem:[%s16027_s2 + $0x8] sm:$0xff]  ;;  %v722_v20 = vld [vmem:[%s21304_s8 + $0x30] sm:$0xff]  ;;  %v720_v24 = vld [vmem:[%s21304_s8 + $0x20] sm:$0xff]  ;;  %s21387_s26 = sld [smem:[#allocation14_spill]] }
  0x1b   : > { %12838 = vmatpush3.msra.mxu0 %v728_v7  ;;  %21354 = vst [vmem:[#allocation2_spill] sm:$0xff] %v16039_v13  ;;  %812 = vmatprep.mubr.f32.mxu0 %v16039_v13  ;;  %v721_v22 = vld [vmem:[%s21304_s8 + $0x28] sm:$0xff]  ;;  %v735_v25 = vld [vmem:[%s21304_s8 + $0x98] sm:$0xff]  ;;  %v734_v27 = vld [vmem:[%s21304_s8 + $0x90] sm:$0xff] }
  0x1c   : > { %12839 = vmatprep.subr.mxu0 %v743_v8  ;;  %v719_v26 = vld [vmem:[%s21304_s8 + $0x18] sm:$0xff]  ;;  %v718_v28 = vld [vmem:[%s21304_s8 + $0x10] sm:$0xff]  ;;  %v733_v29 = vld [vmem:[%s21304_s8 + $0x88] sm:$0xff] }
  0x1d   : > { %12840 = vmatpush3.msra.mxu0 %v727_v9  ;;  %v717_v30 = vld [vmem:[%s21304_s8 + $0x8] sm:$0xff]  ;;  %v732_v31 = vld [vmem:[%s21304_s8 + $0x80] sm:$0xff]  ;;  %v16103_v34 = vld [vmem:[%s16027_s2 + $0x18] sm:$0xff] }
  0x1e   : > { %12841 = vmatprep.subr.mxu0 %v742_v10  ;;  %v716_v32 = vld [vmem:[%s21304_s8] sm:$0xff]  ;;  %21356 = vst [vmem:[#allocation4_spill] sm:$0xff] %v16103_v34  ;;  %v16108_v35 = vld [vmem:[%s16027_s2 + $0x10] sm:$0xff]  ;;  %v16111_v36 = vld [vmem:[%s16027_s2 + $0x28] sm:$0xff] }
  0x1f   : > { %12842 = vmatpush3.msra.mxu0 %v726_v11  ;;  %v16100_v33 = vld [vmem:[%s16027_s2] sm:$0xff]  ;;  %21357 = vst [vmem:[#allocation5_spill] sm:$0xff] %v16108_v35  ;;  %21358 = vst [vmem:[#allocation6_spill] sm:$0xff] %v16111_v36  ;;  %v16119_v38 = vld [vmem:[%s16027_s2 + $0x38] sm:$0xff] }
  0x20   : > { %12843 = vmatprep.subr.mxu0 %v741_v12  ;;  %21355 = vst [vmem:[#allocation3_spill] sm:$0xff] %v16100_v33  ;;  %v16116_v37 = vld [vmem:[%s16027_s2 + $0x20] sm:$0xff]  ;;  %21359 = vst [vmem:[#allocation7_spill] sm:$0xff] %v16119_v38  ;;  %v16124_v39 = vld [vmem:[%s16027_s2 + $0x30] sm:$0xff] }
  0x21   : > { %12844 = vmatpush3.msra.mxu0 %v725_v14  ;;  %21360 = vst [vmem:[#allocation8_spill] sm:$0xff] %v16124_v39  ;;  %v16127_v40 = vld [vmem:[%s16027_s2 + $0x48] sm:$0xff]  ;;  %v16132_v41 = vld [vmem:[%s16027_s2 + $0x40] sm:$0xff]  ;;  %v16135_v42 = vld [vmem:[%s16027_s2 + $0x58] sm:$0xff] }
  0x22   : > { %12845 = vmatprep.subr.mxu0 %v740_v15  ;;  %v16140_v43 = vld [vmem:[%s16027_s2 + $0x50] sm:$0xff]  ;;  %v16143_v44 = vld [vmem:[%s16027_s2 + $0x68] sm:$0xff]  ;;  %v16148_v45 = vld [vmem:[%s16027_s2 + $0x60] sm:$0xff] }
  0x23   : > { %12846 = vmatpush3.msra.mxu0 %v724_v16  ;;  %v16151_v46 = vld [vmem:[%s16027_s2 + $0x78] sm:$0xff]  ;;  %v16156_v47 = vld [vmem:[%s16027_s2 + $0x70] sm:$0xff]  ;;  %v16159_v48 = vld [vmem:[%s16027_s2 + $0x88] sm:$0xff] }
  0x24   : > { %12847 = vmatprep.subr.mxu0 %v739_v17  ;;  %v16164_v49 = vld [vmem:[%s16027_s2 + $0x80] sm:$0xff]  ;;  %v16167_v50 = vld [vmem:[%s16027_s2 + $0x98] sm:$0xff]  ;;  %v16172_v51 = vld [vmem:[%s16027_s2 + $0x90] sm:$0xff] }
  0x25   : > { %12848 = vmatpush3.msra.mxu0 %v723_v18  ;;  %v16175_v52 = vld [vmem:[%s16027_s2 + $0xa8] sm:$0xff]  ;;  %v16180_v53 = vld [vmem:[%s16027_s2 + $0xa0] sm:$0xff]  ;;  %v16183_v54 = vld [vmem:[%s16027_s2 + $0xb8] sm:$0xff] }
  0x26   : > { %12849 = vmatprep.subr.mxu0 %v738_v19  ;;  %v16188_v55 = vld [vmem:[%s16027_s2 + $0xb0] sm:$0xff]  ;;  %v16191_v56 = vld [vmem:[%s16027_s2 + $0xc8] sm:$0xff]  ;;  %v16196_v57 = vld [vmem:[%s16027_s2 + $0xc0] sm:$0xff] }
  0x27   : > { %12850 = vmatpush3.msra.mxu0 %v722_v20  ;;  %v16199_v58 = vld [vmem:[%s16027_s2 + $0xd8] sm:$0xff]  ;;  %v16204_v59 = vld [vmem:[%s16027_s2 + $0xd0] sm:$0xff]  ;;  %v16207_v60 = vld [vmem:[%s16027_s2 + $0xe8] sm:$0xff] }
  0x28   : > { %12851 = vmatprep.subr.mxu0 %v737_v21  ;;  %v16212_v61 = vld [vmem:[%s16027_s2 + $0xe0] sm:$0xff]  ;;  %v16215_v62 = vld [vmem:[%s16027_s2 + $0xf8] sm:$0xff]  ;;  %v16220_v63 = vld [vmem:[%s16027_s2 + $0xf0] sm:$0xff]  ;;  %s21383_s2 = sld [smem:[#allocation16_spill]] }
  0x29   : > { %12852 = vmatpush3.msra.mxu0 %v721_v22 }
  0x2a   : > { %12853 = vmatprep.subr.mxu0 %v736_v23 }
  0x2b   : > { %12854 = vmatpush3.msra.mxu0 %v720_v24 }
  0x2c   : > { %12855 = vmatprep.subr.mxu0 %v735_v25 }
  0x2d   : > { %12856 = vmatpush3.msra.mxu0 %v719_v26 }
  0x2e   : > { %12857 = vmatprep.subr.mxu0 %v734_v27 }
  0x2f   : > { %12858 = vmatpush3.msra.mxu0 %v718_v28 }
  0x30   : > { %12859 = vmatprep.subr.mxu0 %v733_v29 }
  0x31   : > { %12860 = vmatpush3.msra.mxu0 %v717_v30 }
  0x32   : > { %12861 = vmatprep.subr.mxu0 %v732_v31 }
  0x33   : > { %12862 = vmatpush3.msra.mxu0 %v716_v32 }
  0x34   : > { %813 = vmatmul.mubr.f32.vlgmr.msra.gmra.mxu0 %v16100_v33 }
  0x35   : > { %817 = vmatprep.mubr.f32.mxu0 %v16103_v34 }
  0x38   : > { %818 = vmatmul.mubr.f32.gmra.mxu0 %v16108_v35 }
  0x39   : > { %822 = vmatprep.mubr.f32.mxu0 %v16111_v36 }
  0x3c   : > { %823 = vmatmul.mubr.f32.gmra.mxu0 %v16116_v37 }
  0x3d   : > { %827 = vmatprep.mubr.f32.mxu0 %v16119_v38 }
  0x40   : > { %828 = vmatmul.mubr.f32.gmra.mxu0 %v16124_v39 }
  0x41   : > { %832 = vmatprep.mubr.f32.mxu0 %v16127_v40 }
  0x44   : > { %833 = vmatmul.mubr.f32.gmra.mxu0 %v16132_v41 }
  0x45   : > { %837 = vmatprep.mubr.f32.mxu0 %v16135_v42 }
  0x48   : > { %838 = vmatmul.mubr.f32.gmra.mxu0 %v16140_v43 }
  0x49   : > { %842 = vmatprep.mubr.f32.mxu0 %v16143_v44 }
  0x4c   : > { %843 = vmatmul.mubr.f32.gmra.mxu0 %v16148_v45 }
  0x4d   : > { %847 = vmatprep.mubr.f32.mxu0 %v16151_v46 }
  0x50   : > { %848 = vmatmul.mubr.f32.gmra.mxu0 %v16156_v47 }
  0x51   : > { %852 = vmatprep.mubr.f32.mxu0 %v16159_v48 }
  0x54   : > { %853 = vmatmul.mubr.f32.gmra.mxu0 %v16164_v49 }
  0x55   : > { %857 = vmatprep.mubr.f32.mxu0 %v16167_v50 }
  0x58   : > { %858 = vmatmul.mubr.f32.gmra.mxu0 %v16172_v51 }
  0x59   : > { %862 = vmatprep.mubr.f32.mxu0 %v16175_v52 }
  0x5c   : > { %863 = vmatmul.mubr.f32.gmra.mxu0 %v16180_v53 }
  0x5d   : > { %867 = vmatprep.mubr.f32.mxu0 %v16183_v54 }
  0x60   : > { %868 = vmatmul.mubr.f32.gmra.mxu0 %v16188_v55 }
  0x61   : > { %872 = vmatprep.mubr.f32.mxu0 %v16191_v56 }
  0x64   : > { %873 = vmatmul.mubr.f32.gmra.mxu0 %v16196_v57 }
  0x65   : > { %877 = vmatprep.mubr.f32.mxu0 %v16199_v58 }
  0x68   : > { %878 = vmatmul.mubr.f32.gmra.mxu0 %v16204_v59 }
  0x69   : > { %882 = vmatprep.mubr.f32.mxu0 %v16207_v60 }
  0x6c   : > { %883 = vmatmul.mubr.f32.gmra.mxu0 %v16212_v61 }
  0x6d   : > { %887 = vmatprep.mubr.f32.mxu0 %v16215_v62 }
  0x70   : > { %888 = vmatmul.mubr.f32.gmra.mxu0 %v16220_v63 }
  0xf4   : > { %v16223_v1 = vpop.f32.mrf.mxu0 }
  0xf6   : > { %v16225_v2 = vpop.f32.mrf.mxu0 }
  0xf8   : > { %v16227_v3 = vpop.f32.mrf.mxu0 }
  0xfa   : > { %v16229_v4 = vpop.f32.mrf.mxu0 }
  0xfc   : > { %v12869_v5 = vpop.f32.mrf.mxu0 }
  0xfe   : > { %v12870_v6 = vpop.f32.mrf.mxu0 }
 0x100   : > { %v16231_v7 = vpop.f32.mrf.mxu0 }
 0x102   : > { %v16233_v8 = vpop.f32.mrf.mxu0 }
 0x104   : > { %v12875_v9 = vpop.f32.mrf.mxu0 }
 0x106   : > { %v12876_v10 = vpop.f32.mrf.mxu0 }
 0x108   : > { %v12878_v11 = vpop.f32.mrf.mxu0 }
 0x10a   : > { %v12879_v12 = vpop.f32.mrf.mxu0 }
 0x10c   : > { %v12881_v14 = vpop.f32.mrf.mxu0 }
 0x10e   : > { %v12882_v15 = vpop.f32.mrf.mxu0 }
 0x110   : > { %v12884_v16 = vpop.f32.mrf.mxu0 }
 0x112   : > { %v12885_v17 = vpop.f32.mrf.mxu0 }
 0x114   : > { %v12887_v18 = vpop.f32.mrf.mxu0 }
 0x116   : > { %v12888_v19 = vpop.f32.mrf.mxu0 }
 0x117   : > { %v16245_v36 = vadd.f32 %v12888_v19, %v12887_v18  ;;  %v16266_v19 = vadd.f32 %v12885_v17, %v12884_v16 }
 0x118   : > { %v12890_v20 = vpop.f32.mrf.mxu0 }
 0x11a   : > { %v12891_v21 = vpop.f32.mrf.mxu0 }
 0x11c   : > { %v12893_v22 = vpop.f32.mrf.mxu0 }
 0x11e   : > { %v12894_v23 = vpop.f32.mrf.mxu0 }
 0x11f   : > { %v16240_v13 = vadd.f32 %v12894_v23, %v12893_v22  ;;  %v901_v22 = vmul.f32 0.0051020407, %v16245_v36 }
 0x120   : > { %v12896_v24 = vpop.f32.mrf.mxu0 }
 0x122   : > { %v12897_v25 = vpop.f32.mrf.mxu0 }
 0x123   : > { %v16254_v23 = vadd.f32 %v12897_v25, %v12896_v24 }
 0x124   : > { %v12899_v26 = vpop.f32.mrf.mxu0 }
 0x125   : > { %v904_v18 = vmul.f32 0.0051020407, %v16254_v23 }
 0x126   : > { %v12900_v27 = vpop.f32.mrf.mxu0 }
 0x127   : > { %v16237_v32 = vadd.f32 %v12900_v27, %v12899_v26  ;;  %v16251_v27 = vadd.f32 %v12882_v15, %v12881_v14  ;;  %v16263_v14 = vadd.f32 %v12870_v6, %v12869_v5  ;;  %v16280_v6 = vadd.f32 %v16233_v8, %v16231_v7 }
 0x128   : > { %v12902_v28 = vpop.f32.mrf.mxu0 }
 0x129   : > { %v905_v33 = vmul.f32 0.0051020407, %v16237_v32 }
 0x12a   : > { %v12903_v29 = vpop.f32.mrf.mxu0 }
 0x12b   : > { %v16235_v30 = vadd.f32 %v12903_v29, %v12902_v28  ;;  %v903_v28 = vmul.f32 0.0051020407, %v16240_v13 }
 0x12c   : > { %v12905_v31 = vpop.f32.mrf.mxu0 }
 0x12d   : > { %v906_v0 = vmul.f32 0.0051020407, %v16235_v30 }
 0x12e   : > { %v12906_v34 = vpop.f32.mrf.mxu0 }
 0x12f   : > { %976 = vperm.xlu1 %15502, %v906_v0   ;;  %v16248_v29 = vadd.f32 %v12906_v34, %v12905_v31  ;;  %v16260_v34 = vadd.f32 %v12891_v21, %v12890_v20  ;;  %v16274_v20 = vadd.f32 %v12879_v12, %v12878_v11  ;;  %v900_v21 = vmul.f32 0.0051020407, %v16266_v19 }
 0x130   : > { %v12908_v35 = vpop.f32.mrf.mxu0  ;;  %v1055_v12 = vlaneseq }
 0x131   : > { %v902_v24 = vmul.f32 0.0051020407, %v16260_v34  ;;  %v898_v16 = vmul.f32 0.0051020407, %v16274_v20 }
 0x132   : > { %v12909_v38 = vpop.f32.mrf.mxu0  ;;  %v16291_v25 = vshrl.u32 %v1055_v12, 7 }
 0x133   : > { %v16243_v39 = vadd.f32 %v12909_v38, %v12908_v35  ;;  %971 = vperm.xlu1 %15502, %v905_v33   ;;  %v907_v35 = vmul.f32 0.0051020407, %v16248_v29  ;;  %v16257_v33 = vadd.f32 %v12876_v10, %v12875_v9  ;;  %v899_v38 = vmul.f32 0.0051020407, %v16251_v27 }
 0x134   : > { %v16271_v9 = vadd.f32 %v16225_v2, %v16223_v1  ;;  %v895_v10 = vmul.f32 0.0051020407, %v16263_v14  ;;  %v16285_v1 = vadd.f32 %v16229_v4, %v16227_v3  ;;  %v896_v2 = vmul.f32 0.0051020407, %v16280_v6  ;;  %21361 = vst [vmem:[#allocation9_spill] sm:$0xff] %v16291_v25 }
 0x135   : > { %v908_v26 = vmul.f32 0.0051020407, %v16243_v39  ;;  %v897_v15 = vmul.f32 0.0051020407, %v16257_v33  ;;  %v21332_v31 = vsub.s32 0, %v16291_v25 }
 0x136   : > { %v893_v5 = vmul.f32 0.0051020407, %v16271_v9  ;;  %v894_v11 = vmul.f32 0.0051020407, %v16285_v1 }
 0x137   : > { %986 = vperm.xlu0 %15501, %v908_v26   ;;  %961 = vperm.xlu1 %15502, %v903_v28   ;;  %v1053_v28 = vld [vmem:[%s21362_s6] sm:$0x3]  ;;  %v21331_v26 = vsub.s32 1, %v16291_v25  ;;  %s21385_s6 = smov 64  }
 0x13b   : > { %981 = vperm.xlu0 %15501, %v907_v35   ;;  %951 = vperm.xlu1 %15502, %v901_v22  }
 0x13f   : > { %966 = vperm.xlu0 %15501, %v904_v18   ;;  %941 = vperm.xlu1 %15502, %v899_v38  }
 0x143   : > { %956 = vperm.xlu0 %15501, %v902_v24   ;;  %931 = vperm.xlu1 %15502, %v897_v15  }
 0x147   : > { %946 = vperm.xlu0 %15501, %v900_v21   ;;  %921 = vperm.xlu1 %15502, %v895_v10  }
 0x14b   : > { %936 = vperm.xlu0 %15501, %v898_v16   ;;  %911 = vperm.xlu1 %15502, %v893_v5  }
 0x14f   : > { %926 = vperm.xlu0 %15501, %v896_v2  }
 0x153   : > { %916 = vperm.xlu0 %15501, %v894_v11  }
 0x1aa   : > { %v16289_v17 = vpop.permute.xlu1 %976 }
 0x1ab   : > { %v1015_v8 = vsub.f32 %v16204_v59, %v16289_v17  ;;  %v1016_v3 = vsub.f32 %v16199_v58, %v16289_v17  ;;  %v16314_v58 = vrot.slane %v1053_v28, %v21332_v31 }
 0x1ad   : > { %v1047_v18 = vmul.f32 %v1015_v8, %v1015_v8 }
 0x1ae   : > { %v16293_v7 = vpop.permute.xlu1 %971 }
 0x1af   : > { %v1013_v15 = vsub.f32 %v16196_v57, %v16293_v7  ;;  %v1014_v24 = vsub.f32 %v16191_v56, %v16293_v7  ;;  %v1091_v12 = vmul.f32 %v16314_v58, %v1047_v18 }
 0x1b2   : > { %v16300_v4 = vpop.permute.xlu0 %986  ;;  %v16302_v0 = vpop.permute.xlu1 %961 }
 0x1b3   : > { %v1019_v22 = vsub.f32 %v16220_v63, %v16300_v4  ;;  %v1020_v59 = vsub.f32 %v16215_v62, %v16300_v4  ;;  %v16326_v62 = vrot.slane %v1053_v28, %v21331_v26  ;;  %v1048_v63 = vmul.f32 %v1016_v3, %v1016_v3 }
 0x1b4   : > { %v1009_v5 = vsub.f32 %v16180_v53, %v16302_v0  ;;  %v1010_v16 = vsub.f32 %v16175_v52, %v16302_v0 }
 0x1b5   : > { %v1051_v35 = vmul.f32 %v1019_v22, %v1019_v22  ;;  %v1052_v38 = vmul.f32 %v1020_v59, %v1020_v59  ;;  %v1092_v52 = vmul.f32 %v16326_v62, %v1048_v63  ;;  %v1045_v59 = vmul.f32 %v1013_v15, %v1013_v15 }
 0x1b6   : > { %v16320_v10 = vpop.permute.xlu0 %981  ;;  %v16322_v21 = vpop.permute.xlu1 %951  ;;  %v1042_v26 = vmul.f32 %v1010_v16, %v1010_v16 }
 0x1b7   : > { %v1017_v57 = vsub.f32 %v16212_v61, %v16320_v10  ;;  %v1018_v56 = vsub.f32 %v16207_v60, %v16320_v10  ;;  %v1095_v2 = vmul.f32 %v16314_v58, %v1051_v35  ;;  %v1096_v11 = vmul.f32 %v16326_v62, %v1052_v38 }
 0x1b8   : > { %v1046_v61 = vmul.f32 %v1014_v24, %v1014_v24  ;;  %v1041_v38 = vmul.f32 %v1009_v5, %v1009_v5  ;;  %v1005_v18 = vsub.f32 %v16164_v49, %v16322_v21  ;;  %v1006_v15 = vsub.f32 %v16159_v48, %v16322_v21 }
 0x1b9   : > { %v1049_v8 = vmul.f32 %v1017_v57, %v1017_v57  ;;  %v1050_v3 = vmul.f32 %v1018_v56, %v1018_v56  ;;  %v1142_v22 = vadd.f32 %v1096_v11, %v1095_v2  ;;  %v1089_v16 = vmul.f32 %v16314_v58, %v1045_v59 }
 0x1ba   : > { %v16339_v28 = vpop.permute.xlu0 %966  ;;  %v16341_v53 = vpop.permute.xlu1 %941  ;;  %v1090_v49 = vmul.f32 %v16326_v62, %v1046_v61  ;;  %v1085_v48 = vmul.f32 %v16314_v58, %v1041_v38 }
 0x1bb   : > { %v1011_v60 = vsub.f32 %v16188_v55, %v16339_v28  ;;  %v1012_v35 = vsub.f32 %v16183_v54, %v16339_v28  ;;  %1143 = vadd.xlane.f32.xlu0 %v1142_v22  ;;  %v1093_v57 = vmul.f32 %v16314_v58, %v1049_v8  ;;  %v1094_v56 = vmul.f32 %v16326_v62, %v1050_v3 }
 0x1bc   : > { %v1136_v54 = vadd.f32 %v1092_v52, %v1091_v12  ;;  %v1086_v3 = vmul.f32 %v16326_v62, %v1042_v26  ;;  %v1001_v22 = vsub.f32 %v16148_v45, %v16341_v53  ;;  %v1037_v52 = vmul.f32 %v1005_v18, %v1005_v18 }
 0x1bd   : > { %v1043_v24 = vmul.f32 %v1011_v60, %v1011_v60  ;;  %v1044_v63 = vmul.f32 %v1012_v35, %v1012_v35  ;;  %v1139_v5 = vadd.f32 %v1094_v56, %v1093_v57  ;;  %v1133_v38 = vadd.f32 %v1090_v49, %v1089_v16 }
 0x1be   : > { %v16354_v2 = vpop.permute.xlu0 %956  ;;  %v16356_v55 = vpop.permute.xlu1 %931  ;;  %v1127_v56 = vadd.f32 %v1086_v3, %v1085_v48 }
 0x1bf   : > { %v1007_v11 = vsub.f32 %v16172_v51, %v16354_v2  ;;  %v1008_v8 = vsub.f32 %v16167_v50, %v16354_v2  ;;  %1137 = vadd.xlane.f32.xlu0 %v1136_v54  ;;  %1140 = vadd.xlane.f32.xlu1 %v1139_v5  ;;  %v1087_v12 = vmul.f32 %v16314_v58, %v1043_v24 }
 0x1c0   : > { %v1088_v59 = vmul.f32 %v16326_v62, %v1044_v63  ;;  %v1038_v51 = vmul.f32 %v1006_v15, %v1006_v15  ;;  %v1002_v50 = vsub.f32 %v16143_v44, %v16341_v53  ;;  %v1081_v15 = vmul.f32 %v16314_v58, %v1037_v52 }
 0x1c1   : > { %v1039_v61 = vmul.f32 %v1007_v11, %v1007_v11  ;;  %v1040_v60 = vmul.f32 %v1008_v8, %v1008_v8  ;;  %v1033_v5 = vmul.f32 %v1001_v22, %v1001_v22  ;;  %v21363_v22 = vld [vmem:[#allocation6_spill] sm:$0xff] }
 0x1c2   : > { %v16372_v35 = vpop.permute.xlu0 %946  ;;  %v16378_v57 = vpop.permute.xlu1 %921  ;;  %v1130_v18 = vadd.f32 %v1088_v59, %v1087_v12  ;;  %v1082_v63 = vmul.f32 %v16326_v62, %v1038_v51  ;;  %v1034_v11 = vmul.f32 %v1002_v50, %v1002_v50 }
 0x1c3   : > { %v1003_v26 = vsub.f32 %v16156_v47, %v16372_v35  ;;  %v1004_v45 = vsub.f32 %v16151_v46, %v16372_v35  ;;  %1134 = vadd.xlane.f32.xlu0 %v1133_v38  ;;  %v1083_v24 = vmul.f32 %v16314_v58, %v1039_v61  ;;  %v1084_v44 = vmul.f32 %v16326_v62, %v1040_v60 }
 0x1c4   : > { %v997_v47 = vsub.f32 %v16132_v41, %v16356_v55  ;;  %v998_v46 = vsub.f32 %v16127_v40, %v16356_v55  ;;  %1131 = vadd.xlane.f32.xlu1 %v1130_v18  ;;  %v993_v3 = vsub.f32 %v16116_v37, %v16378_v57  ;;  %v994_v41 = vsub.f32 %v21363_v22, %v16378_v57  ;;  %v21365_v18 = vld [vmem:[#allocation7_spill] sm:$0xff] }
 0x1c5   : > { %v1035_v54 = vmul.f32 %v1003_v26, %v1003_v26  ;;  %v1036_v49 = vmul.f32 %v1004_v45, %v1004_v45  ;;  %v1124_v12 = vadd.f32 %v1084_v44, %v1083_v24  ;;  %v1121_v59 = vadd.f32 %v1082_v63, %v1081_v15  ;;  %v21364_v26 = vld [vmem:[#allocation8_spill] sm:$0xff]  ;;  %v21366_v15 = vld [vmem:[#allocation3_spill] sm:$0xff]  ;;  %v21367_v63 = vld [vmem:[#allocation2_spill] sm:$0xff] }
 0x1c6   : > { %v16388_v16 = vpop.permute.xlu0 %936  ;;  %v16399_v52 = vpop.permute.xlu1 %911  ;;  %v1078_v37 = vmul.f32 %v16326_v62, %v1034_v11  ;;  %v1029_v50 = vmul.f32 %v997_v47, %v997_v47  ;;  %v1030_v38 = vmul.f32 %v998_v46, %v998_v46 }
 0x1c7   : > { %v999_v8 = vsub.f32 %v16140_v43, %v16388_v16  ;;  %v1000_v48 = vsub.f32 %v16135_v42, %v16388_v16  ;;  %1128 = vadd.xlane.f32.xlu0 %v1127_v56  ;;  %v1079_v40 = vmul.f32 %v16314_v58, %v1035_v54  ;;  %v1080_v61 = vmul.f32 %v16326_v62, %v1036_v49 }
 0x1c8   : > { %v1077_v43 = vmul.f32 %v16314_v58, %v1033_v5  ;;  %1125 = vadd.xlane.f32.xlu1 %v1124_v12  ;;  %v989_v44 = vsub.f32 %v21366_v15, %v16399_v52  ;;  %v990_v54 = vsub.f32 %v21367_v63, %v16399_v52  ;;  %v1073_v47 = vmul.f32 %v16314_v58, %v1029_v50 }
 0x1c9   : > { %v1031_v60 = vmul.f32 %v999_v8, %v999_v8  ;;  %v1032_v51 = vmul.f32 %v1000_v48, %v1000_v48  ;;  %v1118_v24 = vadd.f32 %v1080_v61, %v1079_v40  ;;  %v1074_v46 = vmul.f32 %v16326_v62, %v1030_v38 }
 0x1ca   : > { %v16403_v42 = vpop.permute.xlu0 %926  ;;  %v1115_v22 = vadd.f32 %v1078_v37, %v1077_v43  ;;  %v1025_v40 = vmul.f32 %v993_v3, %v993_v3  ;;  %v1026_v61 = vmul.f32 %v994_v41, %v994_v41  ;;  %v1022_v37 = vmul.f32 %v990_v54, %v990_v54 }
 0x1cb   : > { %v995_v45 = vsub.f32 %v21364_v26, %v16403_v42  ;;  %v996_v56 = vsub.f32 %v21365_v18, %v16403_v42  ;;  %1122 = vadd.xlane.f32.xlu0 %v1121_v59  ;;  %v1075_v5 = vmul.f32 %v16314_v58, %v1031_v60  ;;  %v1076_v49 = vmul.f32 %v16326_v62, %v1032_v51  ;;  %v21368_v26 = vld [vmem:[#allocation5_spill] sm:$0xff]  ;;  %v21369_v60 = vld [vmem:[#allocation4_spill] sm:$0xff] }
 0x1cc   : > { %1119 = vadd.xlane.f32.xlu1 %v1118_v24  ;;  %v1109_v38 = vadd.f32 %v1074_v46, %v1073_v47  ;;  %v1021_v24 = vmul.f32 %v989_v44, %v989_v44  ;;  %v1069_v3 = vmul.f32 %v16314_v58, %v1025_v40  ;;  %v1070_v41 = vmul.f32 %v16326_v62, %v1026_v61 }
 0x1cd   : > { %v1027_v11 = vmul.f32 %v995_v45, %v995_v45  ;;  %v1028_v8 = vmul.f32 %v996_v56, %v996_v56  ;;  %v1112_v12 = vadd.f32 %v1076_v49, %v1075_v5  ;;  %v1066_v46 = vmul.f32 %v16326_v62, %v1022_v37 }
 0x1ce   : > { %v16418_v48 = vpop.permute.xlu0 %916  ;;  %v1103_v5 = vadd.f32 %v1070_v41, %v1069_v3  ;;  %v1065_v47 = vmul.f32 %v16314_v58, %v1021_v24 }
 0x1cf   : > { %v991_v59 = vsub.f32 %v21368_v26, %v16418_v48  ;;  %v992_v18 = vsub.f32 %v21369_v60, %v16418_v48  ;;  %v1071_v51 = vmul.f32 %v16314_v58, %v1027_v11  ;;  %1116 = vadd.xlane.f32.xlu0 %v1115_v22  ;;  %v1072_v50 = vmul.f32 %v16326_v62, %v1028_v8 }
 0x1d0   : > { %1113 = vadd.xlane.f32.xlu1 %v1112_v12  ;;  %v1097_v44 = vadd.f32 %v1066_v46, %v1065_v47 }
 0x1d1   : > { %v1023_v45 = vmul.f32 %v991_v59, %v991_v59  ;;  %v1024_v56 = vmul.f32 %v992_v18, %v992_v18  ;;  %v1106_v43 = vadd.f32 %v1072_v50, %v1071_v51  ;;  %v16435_v50 = vld [vmem:[%s21305_s9] ss:$0 sm:$0xff] }
 0x1d2   : > { %v1211_v37 = vmul.f32 %v16435_v50, %v16289_v17 }
 0x1d3   : > { %v1067_v15 = vmul.f32 %v16314_v58, %v1023_v45  ;;  %v1068_v63 = vmul.f32 %v16326_v62, %v1024_v56  ;;  %1110 = vadd.xlane.f32.xlu0 %v1109_v38  ;;  %v1213_v45 = vmul.f32 %v16435_v50, %v16300_v4  ;;  %v1212_v4 = vmul.f32 %v16435_v50, %v16320_v10 }
 0x1d4   : > { %1107 = vadd.xlane.f32.xlu1 %v1106_v43 }
 0x1d5   : > { %v1100_v49 = vadd.f32 %v1068_v63, %v1067_v15  ;;  %v1229_v63 = vsub.f32 %v16243_v39, %v1213_v45  ;;  %v1210_v39 = vmul.f32 %v16435_v50, %v16293_v7 }
 0x1d7   : > { %1104 = vadd.xlane.f32.xlu0 %v1103_v5  ;;  %v1226_v7 = vsub.f32 %v16237_v32, %v1210_v39 }
 0x1d8   : > { %1101 = vadd.xlane.f32.xlu1 %v1100_v49 }
 0x1db   : > { %1098 = vadd.xlane.f32.xlu0 %v1097_v44  ;;  %v16447_v44 = vld [vmem:[%s21305_s9 + $0x1] ss:$0 sm:$0xff] }
 0x244   : > { %v1144_v11 = vpop.xlane.xlu0 %1143 }
 0x245   : > { %v1160_v8 = vmul.f32 0.0051020407, %v1144_v11 }
 0x247   : > { %v1176_v22 = vadd.f32 1e-05, %v1160_v8 }
 0x248   : > { %v1138_v54 = vpop.xlane.xlu0 %1137  ;;  %v1141_v12 = vpop.xlane.xlu1 %1140 }
 0x249   : > { %15505 = vrsqrt.f32 %v1176_v22  ;;  %v1158_v40 = vmul.f32 0.0051020407, %v1138_v54  ;;  %v1159_v61 = vmul.f32 0.0051020407, %v1141_v12  ;;  %v1227_v22 = vsub.f32 %v16235_v30, %v1211_v37 }
 0x24b   : > { %v1174_v26 = vadd.f32 1e-05, %v1158_v40  ;;  %v1175_v59 = vadd.f32 1e-05, %v1159_v61 }
 0x24c   : > { %v1135_v60 = vpop.xlane.xlu0 %1134 }
 0x24d   : > { %15507 = vrsqrt.f32 %v1174_v26  ;;  %v1157_v18 = vmul.f32 0.0051020407, %v1135_v60  ;;  %v1132_v58 = vpop.xlane.xlu1 %1131  ;;  %v1228_v26 = vsub.f32 %v16248_v29, %v1212_v4 }
 0x24e   : > { %15509 = vrsqrt.f32 %v1175_v59  ;;  %v1156_v51 = vmul.f32 0.0051020407, %v1132_v58 }
 0x24f   : > { %v1173_v62 = vadd.f32 1e-05, %v1157_v18 }
 0x250   : > { %v1129_v38 = vpop.xlane.xlu0 %1128  ;;  %v1172_v56 = vadd.f32 1e-05, %v1156_v51  ;;  %v1209_v51 = vmul.f32 %v16435_v50, %v16339_v28 }
 0x251   : > { %15511 = vrsqrt.f32 %v1173_v62  ;;  %v1155_v24 = vmul.f32 0.0051020407, %v1129_v38  ;;  %v1126_v43 = vpop.xlane.xlu1 %1125  ;;  %v1208_v62 = vmul.f32 %v16435_v50, %v16302_v0 }
 0x252   : > { %15513 = vrsqrt.f32 %v1172_v56  ;;  %v1154_v41 = vmul.f32 0.0051020407, %v1126_v43 }
 0x253   : > { %v1171_v3 = vadd.f32 1e-05, %v1155_v24 }
 0x254   : > { %v1123_v15 = vpop.xlane.xlu0 %1122  ;;  %v1170_v5 = vadd.f32 1e-05, %v1154_v41 }
 0x255   : > { %15515 = vrsqrt.f32 %v1171_v3  ;;  %v1153_v49 = vmul.f32 0.0051020407, %v1123_v15  ;;  %v1120_v46 = vpop.xlane.xlu1 %1119  ;;  %v1224_v15 = vsub.f32 %v16240_v13, %v1208_v62  ;;  %v1205_v13 = vmul.f32 %v16435_v50, %v16372_v35 }
 0x256   : > { %v15506_v47 = vpop.eup %15505  ;;  %15517 = vrsqrt.f32 %v1170_v5  ;;  %v1152_v8 = vmul.f32 0.0051020407, %v1120_v46  ;;  %v1225_v5 = vsub.f32 %v16254_v23, %v1209_v51 }
 0x257   : > { %v1169_v11 = vadd.f32 1e-05, %v1153_v49  ;;  %v1245_v17 = vmul.f32 %v15506_v47, %v1229_v63  ;;  %v1206_v63 = vmul.f32 %v16435_v50, %v16322_v21  ;;  %v1207_v49 = vmul.f32 %v16435_v50, %v16354_v2 }
 0x258   : > { %v1117_v54 = vpop.xlane.xlu0 %1116  ;;  %v1168_v12 = vadd.f32 1e-05, %v1152_v8 }
 0x259   : > { %15519 = vrsqrt.f32 %v1169_v11  ;;  %v1151_v40 = vmul.f32 0.0051020407, %v1117_v54  ;;  %v16453_v10 = vadd.f32 %v16447_v44, %v1245_v17  ;;  %v1114_v59 = vpop.xlane.xlu1 %1113  ;;  %v1222_v54 = vsub.f32 %v16245_v36, %v1206_v63 }
 0x25a   : > { %v15508_v61 = vpop.eup %15507  ;;  %15521 = vrsqrt.f32 %v1168_v12  ;;  %v1150_v58 = vmul.f32 0.0051020407, %v1114_v59  ;;  %v1204_v12 = vmul.f32 %v16435_v50, %v16341_v53 }
 0x25b   : > { %v15510_v60 = vpop.eup %15509  ;;  %v1167_v18 = vadd.f32 1e-05, %v1151_v40  ;;  %1329 = vrot.lane.b32.xlu1 %v16453_v10, %s15862_s4  ;;  %v1243_v30 = vmul.f32 %v15508_v61, %v1227_v22  ;;  %v1223_v40 = vsub.f32 %v16260_v34, %v1207_v49  ;;  %v1203_v34 = vmul.f32 %v16435_v50, %v16388_v16 }
 0x25c   : > { %v1111_v38 = vpop.xlane.xlu0 %1110  ;;  %v1244_v29 = vmul.f32 %v15510_v60, %v1228_v26  ;;  %v1166_v45 = vadd.f32 1e-05, %v1150_v58  ;;  %v1221_v58 = vsub.f32 %v16266_v19, %v1205_v13  ;;  %v1220_v62 = vsub.f32 %v16251_v27, %v1204_v12 }
 0x25d   : > { %15523 = vrsqrt.f32 %v1167_v18  ;;  %v1149_v56 = vmul.f32 0.0051020407, %v1111_v38  ;;  %v16464_v24 = vadd.f32 %v16447_v44, %v1243_v30  ;;  %v1108_v3 = vpop.xlane.xlu1 %1107  ;;  %v1202_v19 = vmul.f32 %v16435_v50, %v16356_v55 }
 0x25e   : > { %v15512_v43 = vpop.eup %15511  ;;  %v16467_v41 = vadd.f32 %v16447_v44, %v1244_v29  ;;  %15525 = vrsqrt.f32 %v1166_v45  ;;  %v1148_v37 = vmul.f32 0.0051020407, %v1108_v3  ;;  %v1219_v45 = vsub.f32 %v16274_v20, %v1203_v34 }
 0x25f   : > { %v1165_v32 = vadd.f32 1e-05, %v1149_v56  ;;  %1325 = vrot.lane.b32.xlu1 %v16464_v24, %s15862_s4  ;;  %v1242_v0 = vmul.f32 %v15512_v43, %v1226_v7  ;;  %v15514_v28 = vpop.eup %15513  ;;  %v1201_v27 = vmul.f32 %v16435_v50, %v16403_v42  ;;  %v1218_v3 = vsub.f32 %v16257_v33, %v1202_v19 }
 0x260   : > { %1327 = vrot.lane.b32.xlu0 %v16467_v41, %s15862_s4  ;;  %v1105_v47 = vpop.xlane.xlu0 %1104  ;;  %v1164_v4 = vadd.f32 1e-05, %v1148_v37  ;;  %v1241_v17 = vmul.f32 %v15514_v28, %v1225_v5  ;;  %v1199_v28 = vmul.f32 %v16435_v50, %v16418_v48  ;;  %v1198_v5 = vmul.f32 %v16435_v50, %v16399_v52 }
 0x261   : > { %15527 = vrsqrt.f32 %v1165_v32  ;;  %v1147_v46 = vmul.f32 0.0051020407, %v1105_v47  ;;  %v16480_v11 = vadd.f32 %v16447_v44, %v1242_v0  ;;  %v1102_v21 = vpop.xlane.xlu1 %1101  ;;  %v1200_v32 = vmul.f32 %v16435_v50, %v16378_v57 }
 0x262   : > { %v15516_v8 = vpop.eup %15515  ;;  %15529 = vrsqrt.f32 %v1164_v4  ;;  %v1146_v22 = vmul.f32 0.0051020407, %v1102_v21  ;;  %v16491_v61 = vadd.f32 %v16447_v44, %v1241_v17  ;;  %v1217_v42 = vsub.f32 %v16280_v6, %v1201_v27 }
 0x263   : > { %v1163_v23 = vadd.f32 1e-05, %v1147_v46  ;;  %1323 = vrot.lane.b32.xlu1 %v16480_v11, %s15862_s4  ;;  %v1240_v2 = vmul.f32 %v15516_v8, %v1224_v15  ;;  %v15518_v39 = vpop.eup %15517  ;;  %v1216_v63 = vsub.f32 %v16263_v14, %v1200_v32  ;;  %v1215_v48 = vsub.f32 %v16285_v1, %v1199_v28 }
 0x264   : > { %v1099_v35 = vpop.xlane.xlu0 %1098  ;;  %v1162_v26 = vadd.f32 1e-05, %v1146_v22  ;;  %1321 = vrot.lane.b32.xlu0 %v16491_v61, %s15862_s4  ;;  %v1239_v36 = vmul.f32 %v15518_v39, %v1223_v40  ;;  %v1214_v52 = vsub.f32 %v16271_v9, %v1198_v5 }
 0x265   : > { %15531 = vrsqrt.f32 %v1163_v23  ;;  %v1145_v59 = vmul.f32 0.0051020407, %v1099_v35  ;;  %v16494_v60 = vadd.f32 %v16447_v44, %v1240_v2 }
 0x266   : > { %v15520_v18 = vpop.eup %15519  ;;  %15533 = vrsqrt.f32 %v1162_v26  ;;  %v16505_v51 = vadd.f32 %v16447_v44, %v1239_v36 }
 0x267   : > { %v1161_v53 = vadd.f32 1e-05, %v1145_v59  ;;  %1319 = vrot.lane.b32.xlu1 %v16494_v60, %s15862_s4  ;;  %v1238_v30 = vmul.f32 %v15520_v18, %v1222_v54  ;;  %v15522_v7 = vpop.eup %15521 }
 0x268   : > { %v1237_v16 = vmul.f32 %v15522_v7, %v1221_v58  ;;  %1317 = vrot.lane.b32.xlu0 %v16505_v51, %s15862_s4 }
 0x269   : > { %15535 = vrsqrt.f32 %v1161_v53  ;;  %v16510_v38 = vadd.f32 %v16447_v44, %v1238_v30 }
 0x26a   : > { %v15524_v29 = vpop.eup %15523  ;;  %v16520_v56 = vadd.f32 %v16447_v44, %v1237_v16 }
 0x26b   : > { %1315 = vrot.lane.b32.xlu1 %v16510_v38, %s15862_s4  ;;  %v1236_v55 = vmul.f32 %v15524_v29, %v1220_v62  ;;  %v15526_v43 = vpop.eup %15525 }
 0x26c   : > { %v1235_v20 = vmul.f32 %v15526_v43, %v1219_v45  ;;  %1313 = vrot.lane.b32.xlu0 %v16520_v56, %s15862_s4 }
 0x26d   : > { %v16526_v37 = vadd.f32 %v16447_v44, %v1236_v55 }
 0x26e   : > { %v15528_v0 = vpop.eup %15527  ;;  %v16536_v33 = vadd.f32 %v16447_v44, %v1235_v20 }
 0x26f   : > { %1311 = vrot.lane.b32.xlu1 %v16526_v37, %s15862_s4  ;;  %v1234_v57 = vmul.f32 %v15528_v0, %v1218_v3  ;;  %v15530_v15 = vpop.eup %15529 }
 0x270   : > { %v1233_v6 = vmul.f32 %v15530_v15, %v1217_v42  ;;  %1309 = vrot.lane.b32.xlu0 %v16536_v33, %s15862_s4 }
 0x271   : > { %v16542_v49 = vadd.f32 %v16447_v44, %v1234_v57 }
 0x272   : > { %v15532_v47 = vpop.eup %15531  ;;  %v16550_v4 = vadd.f32 %v16447_v44, %v1233_v6 }
 0x273   : > { %1307 = vrot.lane.b32.xlu1 %v16542_v49, %s15862_s4  ;;  %v1232_v14 = vmul.f32 %v15532_v47, %v1216_v63  ;;  %v15534_v46 = vpop.eup %15533 }
 0x274   : > { %v1231_v8 = vmul.f32 %v15534_v46, %v1215_v48  ;;  %1305 = vrot.lane.b32.xlu0 %v16550_v4, %s15862_s4 }
 0x275   : > { %v16554_v50 = vadd.f32 %v16447_v44, %v1232_v14 }
 0x276   : > { %v15536_v13 = vpop.eup %15535  ;;  %v16561_v1 = vadd.f32 %v16447_v44, %v1231_v8 }
 0x277   : > { %1303 = vrot.lane.b32.xlu1 %v16554_v50, %s15862_s4  ;;  %v1230_v21 = vmul.f32 %v15536_v13, %v1214_v52  ;;  %v1268_v13 = vld [vmem:[%s21370_s30 + $0x8] sm:$0xff] }
 0x278   : > { %1301 = vrot.lane.b32.xlu0 %v16561_v1, %s15862_s4 }
 0x279   : > { %v16564_v17 = vadd.f32 %v16447_v44, %v1230_v21 }
 0x27b   : > { %1299 = vrot.lane.b32.xlu1 %v16564_v17, %s15862_s4  ;;  %13758 = vmatprep.mubr.msk.f32.mxu1 %vm1331_vm0, %v16564_v17 }
 0x27c   : > { %1649 = vrot.lane.b32.xlu0 %v16467_v41, %s21342_s0 }
 0x27f   : > { %1647 = vrot.lane.b32.xlu1 %v16464_v24, %s21342_s0 }
 0x280   : > { %1645 = vrot.lane.b32.xlu0 %v16480_v11, %s21342_s0 }
 0x283   : > { %1641 = vrot.lane.b32.xlu1 %v16494_v60, %s21342_s0 }
 0x284   : > { %1643 = vrot.lane.b32.xlu0 %v16491_v61, %s21342_s0 }
 0x287   : > { %1635 = vrot.lane.b32.xlu1 %v16520_v56, %s21342_s0 }
 0x288   : > { %1639 = vrot.lane.b32.xlu0 %v16505_v51, %s21342_s0 }
 0x28b   : > { %1631 = vrot.lane.b32.xlu1 %v16536_v33, %s21342_s0 }
 0x28c   : > { %1637 = vrot.lane.b32.xlu0 %v16510_v38, %s21342_s0 }
 0x28f   : > { %1627 = vrot.lane.b32.xlu1 %v16550_v4, %s21342_s0 }
 0x290   : > { %1633 = vrot.lane.b32.xlu0 %v16526_v37, %s21342_s0 }
 0x294   : > { %1629 = vrot.lane.b32.xlu0 %v16542_v49, %s21342_s0 }
 0x298   : > { %1625 = vrot.lane.b32.xlu0 %v16554_v50, %s21342_s0 }
 0x29c   : > { %1651 = vrot.lane.b32.xlu0 %v16453_v10, %s21342_s0 }
 0x2cd   : > { %v1330_v9 = vpop.permute.xlu1 %1329 }
 0x2ce   : > { %13726 = vmatprep.subr.msk.mxu1 %vm1331_vm0, %v1330_v9 }
 0x2cf   : > { %13727 = vmatpush3.xpose.msk.msra.mxu1 %vm1331_vm0, %v1330_v9  ;;  %v1267_v9 = vld [vmem:[%s21370_s30] sm:$0xff] }
 0x2d1   : > { %v1326_v23 = vpop.permute.xlu1 %1325 }
 0x2d2   : > { %v1328_v44 = vpop.permute.xlu0 %1327 }
 0x2d3   : > { %13728 = vmatprep.subr.msk.mxu1 %vm1331_vm0, %v1328_v44 }
 0x2d4   : > { %13729 = vmatpush3.xpose.msk.msra.mxu1 %vm1331_vm0, %v1328_v44 }
 0x2d5   : > { %13730 = vmatprep.subr.msk.mxu1 %vm1331_vm0, %v1326_v23  ;;  %v1324_v2 = vpop.permute.xlu1 %1323 }
 0x2d6   : > { %v1322_v22 = vpop.permute.xlu0 %1321 }
 0x2d8   : > { %13731 = vmatpush3.xpose.msk.msra.mxu1 %vm1331_vm0, %v1326_v23 }
 0x2d9   : > { %13732 = vmatprep.subr.msk.mxu1 %vm1331_vm0, %v1324_v2  ;;  %v1320_v54 = vpop.permute.xlu1 %1319 }
 0x2da   : > { %v1318_v39 = vpop.permute.xlu0 %1317 }
 0x2dc   : > { %13733 = vmatpush3.xpose.msk.msra.mxu1 %vm1331_vm0, %v1324_v2  ;;  %v1270_v2 = vld [vmem:[%s21370_s30 + $0x18] sm:$0xff] }
 0x2dd   : > { %13734 = vmatprep.subr.msk.mxu1 %vm1331_vm0, %v1322_v22  ;;  %v1316_v35 = vpop.permute.xlu1 %1315 }
 0x2de   : > { %v1314_v12 = vpop.permute.xlu0 %1313 }
 0x2e0   : > { %13735 = vmatpush3.xpose.msk.msra.mxu1 %vm1331_vm0, %v1322_v22 }
 0x2e1   : > { %13736 = vmatprep.subr.msk.mxu1 %vm1331_vm0, %v1320_v54  ;;  %v1312_v18 = vpop.permute.xlu1 %1311 }
 0x2e2   : > { %v1310_v40 = vpop.permute.xlu0 %1309 }
 0x2e4   : > { %13737 = vmatpush3.xpose.msk.msra.mxu1 %vm1331_vm0, %v1320_v54  ;;  %v1269_v54 = vld [vmem:[%s21370_s30 + $0x10] sm:$0xff] }
 0x2e5   : > { %13738 = vmatprep.subr.msk.mxu1 %vm1331_vm0, %v1318_v39  ;;  %v1308_v34 = vpop.permute.xlu1 %1307 }
 0x2e6   : > { %v1306_v26 = vpop.permute.xlu0 %1305 }
 0x2e8   : > { %13739 = vmatpush3.xpose.msk.msra.mxu1 %vm1331_vm0, %v1318_v39 }
 0x2e9   : > { %13740 = vmatprep.subr.msk.mxu1 %vm1331_vm0, %v1316_v35  ;;  %v1304_v7 = vpop.permute.xlu1 %1303 }
 0x2ea   : > { %v1302_v59 = vpop.permute.xlu0 %1301 }
 0x2ec   : > { %13741 = vmatpush3.xpose.msk.msra.mxu1 %vm1331_vm0, %v1316_v35 }
 0x2ed   : > { %13742 = vmatprep.subr.msk.mxu1 %vm1331_vm0, %v1314_v12  ;;  %v1300_v16 = vpop.permute.xlu1 %1299 }
 0x2ee   : > { %v1650_v58 = vpop.permute.xlu0 %1649 }
 0x2ef   : > { %v1683_v3 = vsel %vm1331_vm0, %v1650_v58, 1.0 }
 0x2f0   : > { %13743 = vmatpush3.xpose.msk.msra.mxu1 %vm1331_vm0, %v1314_v12 }
 0x2f1   : > { %13744 = vmatprep.subr.msk.mxu1 %vm1331_vm0, %v1312_v18  ;;  %v1648_v27 = vpop.permute.xlu1 %1647 }
 0x2f2   : > { %v1646_v36 = vpop.permute.xlu0 %1645  ;;  %v1682_v20 = vsel %vm1331_vm0, %v1648_v27, 1.0 }
 0x2f3   : > { %v1681_v0 = vsel %vm1331_vm0, %v1646_v36, 1.0 }
 0x2f4   : > { %13745 = vmatpush3.xpose.msk.msra.mxu1 %vm1331_vm0, %v1312_v18 }
 0x2f5   : > { %13746 = vmatprep.subr.msk.mxu1 %vm1331_vm0, %v1310_v40  ;;  %v1642_v32 = vpop.permute.xlu1 %1641 }
 0x2f6   : > { %v1644_v53 = vpop.permute.xlu0 %1643  ;;  %v1679_v57 = vsel %vm1331_vm0, %v1642_v32, 1.0  ;;  %v1280_v32 = vld [vmem:[%s21370_s30 + $0x68] sm:$0xff] }
 0x2f7   : > { %v1680_v42 = vsel %vm1331_vm0, %v1644_v53, 1.0 }
 0x2f8   : > { %13747 = vmatpush3.xpose.msk.msra.mxu1 %vm1331_vm0, %v1310_v40 }
 0x2f9   : > { %13748 = vmatprep.subr.msk.mxu1 %vm1331_vm0, %v1308_v34  ;;  %v1636_v28 = vpop.permute.xlu1 %1635 }
 0x2fa   : > { %v1640_v30 = vpop.permute.xlu0 %1639  ;;  %v1676_v6 = vsel %vm1331_vm0, %v1636_v28, 1.0 }
 0x2fb   : > { %v1678_v15 = vsel %vm1331_vm0, %v1640_v30, 1.0 }
 0x2fc   : > { %13749 = vmatpush3.xpose.msk.msra.mxu1 %vm1331_vm0, %v1308_v34  ;;  %v1271_v34 = vld [vmem:[%s21370_s30 + $0x20] sm:$0xff] }
 0x2fd   : > { %13750 = vmatprep.subr.msk.mxu1 %vm1331_vm0, %v1306_v26  ;;  %v1632_v5 = vpop.permute.xlu1 %1631 }
 0x2fe   : > { %v1638_v62 = vpop.permute.xlu0 %1637  ;;  %v1674_v48 = vsel %vm1331_vm0, %v1632_v5, 1.0  ;;  %v1277_v5 = vld [vmem:[%s21370_s30 + $0x50] sm:$0xff] }
 0x2ff   : > { %v1677_v63 = vsel %vm1331_vm0, %v1638_v62, 1.0 }
 0x300   : > { %13751 = vmatpush3.xpose.msk.msra.mxu1 %vm1331_vm0, %v1306_v26  ;;  %v1272_v26 = vld [vmem:[%s21370_s30 + $0x28] sm:$0xff] }
 0x301   : > { %13752 = vmatprep.subr.msk.mxu1 %vm1331_vm0, %v1304_v7  ;;  %v1628_v14 = vpop.permute.xlu1 %1627 }
 0x302   : > { %v1634_v19 = vpop.permute.xlu0 %1633  ;;  %v1672_v52 = vsel %vm1331_vm0, %v1628_v14, 1.0 }
 0x303   : > { %v1675_v47 = vsel %vm1331_vm0, %v1634_v19, 1.0 }
 0x304   : > { %13753 = vmatpush3.xpose.msk.msra.mxu1 %vm1331_vm0, %v1304_v7  ;;  %v1274_v7 = vld [vmem:[%s21370_s30 + $0x38] sm:$0xff] }
 0x305   : > { %13754 = vmatprep.subr.msk.mxu1 %vm1331_vm0, %v1302_v59 }
 0x306   : > { %v1630_v29 = vpop.permute.xlu0 %1629 }
 0x307   : > { %v1673_v46 = vsel %vm1331_vm0, %v1630_v29, 1.0  ;;  %v1276_v29 = vld [vmem:[%s21370_s30 + $0x48] sm:$0xff] }
 0x308   : > { %13755 = vmatpush3.xpose.msk.msra.mxu1 %vm1331_vm0, %v1302_v59 }
 0x309   : > { %13756 = vmatprep.subr.msk.mxu1 %vm1331_vm0, %v1300_v16 }
 0x30a   : > { %v1626_v45 = vpop.permute.xlu0 %1625 }
 0x30b   : > { %v1671_v8 = vsel %vm1331_vm0, %v1626_v45, 1.0 }
 0x30c   : > { %13757 = vmatpush3.xpose.msk.msra.mxu1 %vm1331_vm0, %v1300_v16 }
 0x30e   : > { %v1652_v55 = vpop.permute.xlu0 %1651 }
 0x30f   : > { %13759 = vmatmul.mubr.msk.f32.vlgmr.msra.gmra.mxu1 %vm1331_vm0, %v16561_v1  ;;  %v1684_v43 = vsel %vm1331_vm0, %v1652_v55, 1.0  ;;  %v1278_v55 = vld [vmem:[%s21370_s30 + $0x58] sm:$0xff] }
 0x310   : > { %13761 = vmatprep.mubr.msk.f32.mxu1 %vm1331_vm0, %v16554_v50  ;;  %13782 = vmatprep.subr.mxu0 %v1684_v43 }
 0x311   : > { %13783 = vmatpush3.msra.mxu0 %v1684_v43 }
 0x312   : > { %13784 = vmatprep.subr.mxu0 %v1683_v3 }
 0x313   : > { %13762 = vmatmul.mubr.msk.f32.gmra.mxu1 %vm1331_vm0, %v16550_v4  ;;  %13785 = vmatpush3.msra.mxu0 %v1683_v3 }
 0x314   : > { %13764 = vmatprep.mubr.msk.f32.mxu1 %vm1331_vm0, %v16542_v49  ;;  %13786 = vmatprep.subr.mxu0 %v1682_v20 }
 0x315   : > { %13787 = vmatpush3.msra.mxu0 %v1682_v20 }
 0x316   : > { %13788 = vmatprep.subr.mxu0 %v1681_v0 }
 0x317   : > { %13765 = vmatmul.mubr.msk.f32.gmra.mxu1 %vm1331_vm0, %v16536_v33  ;;  %13789 = vmatpush3.msra.mxu0 %v1681_v0 }
 0x318   : > { %13767 = vmatprep.mubr.msk.f32.mxu1 %vm1331_vm0, %v16526_v37  ;;  %13790 = vmatprep.subr.mxu0 %v1680_v42 }
 0x319   : > { %13791 = vmatpush3.msra.mxu0 %v1680_v42  ;;  %v1273_v42 = vld [vmem:[%s21370_s30 + $0x30] sm:$0xff] }
 0x31a   : > { %13792 = vmatprep.subr.mxu0 %v1679_v57 }
 0x31b   : > { %13768 = vmatmul.mubr.msk.f32.gmra.mxu1 %vm1331_vm0, %v16520_v56  ;;  %13793 = vmatpush3.msra.mxu0 %v1679_v57  ;;  %v1275_v57 = vld [vmem:[%s21370_s30 + $0x40] sm:$0xff] }
 0x31c   : > { %13770 = vmatprep.mubr.msk.f32.mxu1 %vm1331_vm0, %v16510_v38  ;;  %13794 = vmatprep.subr.mxu0 %v1678_v15 }
 0x31d   : > { %13795 = vmatpush3.msra.mxu0 %v1678_v15 }
 0x31e   : > { %13796 = vmatprep.subr.mxu0 %v1677_v63 }
 0x31f   : > { %13771 = vmatmul.mubr.msk.f32.gmra.mxu1 %vm1331_vm0, %v16505_v51  ;;  %13797 = vmatpush3.msra.mxu0 %v1677_v63 }
 0x320   : > { %13773 = vmatprep.mubr.msk.f32.mxu1 %vm1331_vm0, %v16494_v60  ;;  %13798 = vmatprep.subr.mxu0 %v1676_v6 }
 0x321   : > { %13799 = vmatpush3.msra.mxu0 %v1676_v6 }
 0x322   : > { %13800 = vmatprep.subr.mxu0 %v1675_v47 }
 0x323   : > { %13774 = vmatmul.mubr.msk.f32.gmra.mxu1 %vm1331_vm0, %v16491_v61  ;;  %13801 = vmatpush3.msra.mxu0 %v1675_v47 }
 0x324   : > { %13776 = vmatprep.mubr.msk.f32.mxu1 %vm1331_vm0, %v16480_v11  ;;  %13802 = vmatprep.subr.mxu0 %v1674_v48 }
 0x325   : > { %13803 = vmatpush3.msra.mxu0 %v1674_v48  ;;  %v1279_v48 = vld [vmem:[%s21370_s30 + $0x60] sm:$0xff] }
 0x326   : > { %13804 = vmatprep.subr.mxu0 %v1673_v46 }
 0x327   : > { %13777 = vmatmul.mubr.msk.f32.gmra.mxu1 %vm1331_vm0, %v16464_v24  ;;  %13805 = vmatpush3.msra.mxu0 %v1673_v46 }
 0x328   : > { %13779 = vmatprep.mubr.msk.f32.mxu1 %vm1331_vm0, %v16467_v41  ;;  %13806 = vmatprep.subr.mxu0 %v1672_v52 }
 0x329   : > { %13807 = vmatpush3.msra.mxu0 %v1672_v52  ;;  %v1281_v52 = vld [vmem:[%s21370_s30 + $0x70] sm:$0xff] }
 0x32a   : > { %13808 = vmatprep.subr.mxu0 %v1671_v8 }
 0x32b   : > { %13780 = vmatmul.mubr.msk.f32.gmra.mxu1 %vm1331_vm0, %v16453_v10  ;;  %13809 = vmatpush3.msra.mxu0 %v1671_v8 }
 0x3cf   : > { %v13760_v21 = vpop.f32.mrf.mxu1 }
 0x3d0   : > { %v16682_v44 = vadd.f32 %v13760_v21, %v1268_v13  ;;  %v1282_v13 = vld [vmem:[%s21370_s30 + $0x78] sm:$0xff] }
 0x3d1   : > { %v1462_v23 = vpop.f32.mrf.mxu1 }
 0x3d2   : > { %1543 = vmax.xlane.f32.xlu0 %v16682_v44  ;;  %v16685_v22 = vadd.f32 %v1462_v23, %v1267_v9 }
 0x3d3   : > { %v13763_v39 = vpop.f32.mrf.mxu1 }
 0x3d4   : > { %1541 = vmax.xlane.f32.xlu1 %v16685_v22  ;;  %v16694_v40 = vadd.f32 %v13763_v39, %v1270_v2 }
 0x3d5   : > { %v1472_v12 = vpop.f32.mrf.mxu1 }
 0x3d6   : > { %v16696_v35 = vadd.f32 %v1472_v12, %v1269_v54 }
 0x3d7   : > { %v13766_v59 = vpop.f32.mrf.mxu1 }
 0x3d8   : > { %1545 = vmax.xlane.f32.xlu0 %v16696_v35  ;;  %1547 = vmax.xlane.f32.xlu1 %v16694_v40  ;;  %v16703_v58 = vadd.f32 %v13766_v59, %v1272_v26 }
 0x3d9   : > { %v1482_v18 = vpop.f32.mrf.mxu1 }
 0x3da   : > { %v16709_v30 = vadd.f32 %v1482_v18, %v1271_v34 }
 0x3db   : > { %v13769_v36 = vpop.f32.mrf.mxu1 }
 0x3dc   : > { %1551 = vmax.xlane.f32.xlu0 %v16703_v58  ;;  %v16715_v16 = vadd.f32 %v13769_v36, %v1274_v7 }
 0x3dd   : > { %v1492_v53 = vpop.f32.mrf.mxu1 }
 0x3de   : > { %v16743_v28 = vadd.f32 %v1492_v53, %v1273_v42 }
 0x3df   : > { %v13772_v62 = vpop.f32.mrf.mxu1 }
 0x3e0   : > { %1549 = vmax.xlane.f32.xlu0 %v16709_v30  ;;  %v16721_v27 = vadd.f32 %v13772_v62, %v1276_v29 }
 0x3e1   : > { %v1502_v19 = vpop.f32.mrf.mxu1 }
 0x3e2   : > { %v16749_v15 = vadd.f32 %v1502_v19, %v1275_v57 }
 0x3e3   : > { %v13775_v45 = vpop.f32.mrf.mxu1 }
 0x3e4   : > { %1555 = vmax.xlane.f32.xlu0 %v16715_v16  ;;  %v16729_v3 = vadd.f32 %v13775_v45, %v1278_v55 }
 0x3e5   : > { %v1512_v43 = vpop.f32.mrf.mxu1 }
 0x3e6   : > { %v16755_v6 = vadd.f32 %v1512_v43, %v1277_v5 }
 0x3e7   : > { %v13778_v20 = vpop.f32.mrf.mxu1 }
 0x3e8   : > { %1559 = vmax.xlane.f32.xlu0 %v16721_v27  ;;  %v16735_v0 = vadd.f32 %v13778_v20, %v1280_v32 }
 0x3e9   : > { %1623 = vrot.lane.b32.xlu1 %v16561_v1, %s21342_s0  ;;  %v1522_v63 = vpop.f32.mrf.mxu1 }
 0x3ea   : > { %v16761_v14 = vadd.f32 %v1522_v63, %v1279_v48 }
 0x3eb   : > { %v13781_v47 = vpop.f32.mrf.mxu1 }
 0x3ec   : > { %1563 = vmax.xlane.f32.xlu0 %v16729_v3  ;;  %v16773_v21 = vadd.f32 %v13781_v47, %v1282_v13 }
 0x3ed   : > { %v1532_v46 = vpop.f32.mrf.mxu1 }
 0x3ee   : > { %v16767_v8 = vadd.f32 %v1532_v46, %v1281_v52 }
 0x3f0   : > { %1567 = vmax.xlane.f32.xlu0 %v16735_v0 }
 0x406   : > { %1621 = vrot.lane.b32.xlu0 %v16564_v17, %s21342_s0 }
 0x40d   : > { %1553 = vmax.xlane.f32.xlu1 %v16743_v28 }
 0x411   : > { %1557 = vmax.xlane.f32.xlu1 %v16749_v15 }
 0x415   : > { %1561 = vmax.xlane.f32.xlu1 %v16755_v6 }
 0x419   : > { %1565 = vmax.xlane.f32.xlu1 %v16761_v14 }
 0x41d   : > { %1569 = vmax.xlane.f32.xlu1 %v16767_v8 }
 0x425   : > { %1571 = vmax.xlane.f32.xlu0 %v16773_v21 }
 0x45b   : > { %v1544_v9 = vpop.xlane.xlu0 %1543 }
 0x45c   : > { %v1574_v34 = vsub.f32 %v16682_v44, %v1544_v9 }
 0x45d   : > { %v1542_v23 = vpop.xlane.xlu1 %1541 }
 0x45e   : > { %v1573_v2 = vsub.f32 %v16685_v22, %v1542_v23  ;;  %v1591_v19 = vmul.f32 1.442695, %v1574_v34 }
 0x460   : > { %v1589_v39 = vmul.f32 1.442695, %v1573_v2 }
 0x461   : > { %v1546_v54 = vpop.xlane.xlu0 %1545  ;;  %v1548_v12 = vpop.xlane.xlu1 %1547 }
 0x462   : > { %15537 = vpow2.f32 %v1589_v39  ;;  %v1575_v53 = vsub.f32 %v16696_v35, %v1546_v54  ;;  %v1576_v22 = vsub.f32 %v16694_v40, %v1548_v12 }
 0x463   : > { %15539 = vpow2.f32 %v1591_v19 }
 0x464   : > { %v1593_v29 = vmul.f32 1.442695, %v1575_v53  ;;  %v1595_v43 = vmul.f32 1.442695, %v1576_v22 }
 0x465   : > { %v1552_v26 = vpop.xlane.xlu0 %1551  ;;  %v1624_v59 = vpop.permute.xlu1 %1623 }
 0x466   : > { %v1670_v18 = vsel %vm1331_vm0, %v1624_v59, 1.0  ;;  %v1578_v32 = vsub.f32 %v16703_v58, %v1552_v26  ;;  %15541 = vpow2.f32 %v1593_v29 }
 0x467   : > { %13810 = vmatprep.subr.mxu0 %v1670_v18  ;;  %15543 = vpow2.f32 %v1595_v43 }
 0x468   : > { %13811 = vmatpush3.msra.mxu0 %v1670_v18  ;;  %v1599_v44 = vmul.f32 1.442695, %v1578_v32 }
 0x469   : > { %v1550_v36 = vpop.xlane.xlu0 %1549 }
 0x46a   : > { %v1577_v45 = vsub.f32 %v16709_v30, %v1550_v36 }
 0x46c   : > { %v1597_v20 = vmul.f32 1.442695, %v1577_v45 }
 0x46d   : > { %v1556_v7 = vpop.xlane.xlu0 %1555 }
 0x46e   : > { %15545 = vpow2.f32 %v1597_v20  ;;  %v1580_v48 = vsub.f32 %v16715_v16, %v1556_v7 }
 0x46f   : > { %v15538_v62 = vpop.eup %15537  ;;  %15547 = vpow2.f32 %v1599_v44  ;;  %v15864_v44 = vmov 32  }
 0x470   : > { %13814 = vmatprep.mubr.f32.mxu0 %v15538_v62  ;;  %v15540_v63 = vpop.eup %15539  ;;  %v1603_v13 = vmul.f32 1.442695, %v1580_v48  ;;  %15503 = vset.pattern.permute.xlu1 %v15864_v44 }
 0x471   : > { %v1560_v55 = vpop.xlane.xlu0 %1559  ;;  %15504 = vset.pattern.permute.xlu0 %v15864_v44 }
 0x472   : > { %v1582_v9 = vsub.f32 %v16721_v27, %v1560_v55 }
 0x473   : > { %v15542_v30 = vpop.eup %15541 }
 0x474   : > { %v15544_v5 = vpop.eup %15543  ;;  %v1607_v54 = vmul.f32 1.442695, %v1582_v9 }
 0x475   : > { %v1564_v42 = vpop.xlane.xlu0 %1563 }
 0x476   : > { %v1584_v12 = vsub.f32 %v16729_v3, %v1564_v42 }
 0x478   : > { %v1611_v18 = vmul.f32 1.442695, %v1584_v12 }
 0x479   : > { %v1568_v35 = vpop.xlane.xlu0 %1567 }
 0x47b   : > { %v15546_v47 = vpop.eup %15545 }
 0x47c   : > { %v15548_v58 = vpop.eup %15547 }
 0x47d   : > { %v1622_v57 = vpop.permute.xlu0 %1621 }
 0x47e   : > { %v1669_v40 = vsel %vm1331_vm0, %v1622_v57, 1.0 }
 0x47f   : > { %13812 = vmatprep.subr.mxu0 %v1669_v40 }
 0x480   : > { %13813 = vmatpush3.msra.mxu0 %v1669_v40 }
 0x481   : > { %13815 = vmatmul.mubr.f32.vlgmr.msra.gmra.mxu0 %v15540_v63 }
 0x482   : > { %13817 = vmatprep.mubr.f32.mxu0 %v15542_v30 }
 0x485   : > { %13818 = vmatmul.mubr.f32.gmra.mxu0 %v15544_v5  ;;  %v1944_v5 = vld [vmem:[%s21306_s10 + $0x10] sm:$0xff] }
 0x486   : > { %13820 = vmatprep.mubr.f32.mxu0 %v15546_v47  ;;  %v1943_v47 = vld [vmem:[%s21306_s10 + $0x8] sm:$0xff] }
 0x489   : > { %13821 = vmatmul.mubr.f32.gmra.mxu0 %v15548_v58 }
 0x496   : > { %v1554_v46 = vpop.xlane.xlu1 %1553 }
 0x497   : > { %v1579_v52 = vsub.f32 %v16743_v28, %v1554_v46  ;;  %v1586_v28 = vsub.f32 %v16735_v0, %v1568_v35  ;;  %v1942_v46 = vld [vmem:[%s21306_s10] sm:$0xff] }
 0x499   : > { %v1601_v23 = vmul.f32 1.442695, %v1579_v52 }
 0x49a   : > { %v1558_v2 = vpop.xlane.xlu1 %1557 }
 0x49b   : > { %15549 = vpow2.f32 %v1601_v23  ;;  %v1581_v39 = vsub.f32 %v16749_v15, %v1558_v2  ;;  %v1615_v15 = vmul.f32 1.442695, %v1586_v28 }
 0x49c   : > { %15551 = vpow2.f32 %v1603_v13 }
 0x49d   : > { %v1605_v26 = vmul.f32 1.442695, %v1581_v39 }
 0x49e   : > { %v1562_v59 = vpop.xlane.xlu1 %1561 }
 0x49f   : > { %15553 = vpow2.f32 %v1605_v26  ;;  %v1583_v16 = vsub.f32 %v16755_v6, %v1562_v59 }
 0x4a0   : > { %15555 = vpow2.f32 %v1607_v54 }
 0x4a1   : > { %v1609_v36 = vmul.f32 1.442695, %v1583_v16 }
 0x4a2   : > { %v1566_v27 = vpop.xlane.xlu1 %1565 }
 0x4a3   : > { %15557 = vpow2.f32 %v1609_v36  ;;  %v1585_v34 = vsub.f32 %v16761_v14, %v1566_v27 }
 0x4a4   : > { %15559 = vpow2.f32 %v1611_v18 }
 0x4a5   : > { %v1613_v53 = vmul.f32 1.442695, %v1585_v34 }
 0x4a6   : > { %v1570_v7 = vpop.xlane.xlu1 %1569 }
 0x4a7   : > { %15561 = vpow2.f32 %v1613_v53  ;;  %v1587_v3 = vsub.f32 %v16767_v8, %v1570_v7 }
 0x4a8   : > { %v15550_v62 = vpop.eup %15549  ;;  %15563 = vpow2.f32 %v1615_v15 }
 0x4a9   : > { %v15552_v19 = vpop.eup %15551  ;;  %v1617_v6 = vmul.f32 1.442695, %v1587_v3  ;;  %13823 = vmatprep.mubr.f32.mxu0 %v15550_v62 }
 0x4aa   : > { %13824 = vmatmul.mubr.f32.gmra.mxu0 %v15552_v19 }
 0x4ab   : > { %15565 = vpow2.f32 %v1617_v6 }
 0x4ac   : > { %v15554_v0 = vpop.eup %15553 }
 0x4ad   : > { %v15556_v22 = vpop.eup %15555  ;;  %13826 = vmatprep.mubr.f32.mxu0 %v15554_v0 }
 0x4ae   : > { %v1572_v29 = vpop.xlane.xlu0 %1571  ;;  %13827 = vmatmul.mubr.f32.gmra.mxu0 %v15556_v22 }
 0x4af   : > { %v1588_v14 = vsub.f32 %v16773_v21, %v1572_v29  ;;  %v1945_v21 = vld [vmem:[%s21306_s10 + $0x18] sm:$0xff] }
 0x4b0   : > { %v15558_v45 = vpop.eup %15557  ;;  %13838 = vmatprep.subr.mxu1 %v1945_v21 }
 0x4b1   : > { %v15560_v55 = vpop.eup %15559  ;;  %v1619_v43 = vmul.f32 1.442695, %v1588_v14  ;;  %13829 = vmatprep.mubr.f32.mxu0 %v15558_v45  ;;  %13839 = vmatpush3.msra.mxu1 %v1945_v21 }
 0x4b2   : > { %13830 = vmatmul.mubr.f32.gmra.mxu0 %v15560_v55  ;;  %13840 = vmatprep.subr.mxu1 %v1944_v5 }
 0x4b3   : > { %15567 = vpow2.f32 %v1619_v43  ;;  %13841 = vmatpush3.msra.mxu1 %v1944_v5 }
 0x4b4   : > { %v15562_v8 = vpop.eup %15561  ;;  %13842 = vmatprep.subr.mxu1 %v1943_v47 }
 0x4b5   : > { %v15564_v32 = vpop.eup %15563  ;;  %13832 = vmatprep.mubr.f32.mxu0 %v15562_v8  ;;  %13843 = vmatpush3.msra.mxu1 %v1943_v47 }
 0x4b6   : > { %13833 = vmatmul.mubr.f32.gmra.mxu0 %v15564_v32  ;;  %13844 = vmatprep.subr.mxu1 %v1942_v46 }
 0x4b7   : > { %13845 = vmatpush3.msra.mxu1 %v1942_v46 }
 0x4b8   : > { %v15566_v20 = vpop.eup %15565 }
 0x4b9   : > { %13835 = vmatprep.mubr.f32.mxu0 %v15566_v20 }
 0x4c0   : > { %v15568_v42 = vpop.eup %15567 }
 0x4c1   : > { %13836 = vmatmul.mubr.f32.gmra.mxu0 %v15568_v42 }
 0x541   : > { %v16797_v35 = vpop.f32.mrf.mxu0 }
 0x542   : > { %15569 = vrcp.f32 %v16797_v35 }
 0x543   : > { %v16800_v57 = vpop.f32.mrf.mxu0 }
 0x544   : > { %15571 = vrcp.f32 %v16800_v57 }
 0x545   : > { %v16802_v40 = vpop.f32.mrf.mxu0 }
 0x547   : > { %v16805_v63 = vpop.f32.mrf.mxu0 }
 0x548   : > { %15573 = vrcp.f32 %v16805_v63 }
 0x549   : > { %15575 = vrcp.f32 %v16802_v40  ;;  %v16809_v30 = vpop.f32.mrf.mxu0 }
 0x54a   : > { %15577 = vrcp.f32 %v16809_v30 }
 0x54b   : > { %v16818_v48 = vpop.f32.mrf.mxu0 }
 0x54c   : > { %15579 = vrcp.f32 %v16818_v48 }
 0x54f   : > { %v15570_v58 = vpop.eup %15569 }
 0x550   : > { %1853 = vperm.xlu1 %15503, %v15570_v58  }
 0x551   : > { %v15572_v52 = vpop.eup %15571 }
 0x554   : > { %1848 = vperm.xlu1 %15503, %v15572_v52  }
 0x555   : > { %v15574_v13 = vpop.eup %15573 }
 0x556   : > { %1858 = vperm.xlu0 %15504, %v15574_v13   ;;  %v15576_v9 = vpop.eup %15575 }
 0x557   : > { %v15578_v23 = vpop.eup %15577 }
 0x558   : > { %1863 = vperm.xlu1 %15503, %v15576_v9  }
 0x559   : > { %v15580_v2 = vpop.eup %15579 }
 0x55c   : > { %1873 = vperm.xlu1 %15503, %v15578_v23  }
 0x560   : > { %1868 = vperm.xlu1 %15503, %v15580_v2  }
 0x56a   : > { %v13825_v39 = vpop.f32.mrf.mxu0 }
 0x56b   : > { %15581 = vrcp.f32 %v13825_v39 }
 0x56c   : > { %v1781_v54 = vpop.f32.mrf.mxu0 }
 0x56d   : > { %15583 = vrcp.f32 %v1781_v54 }
 0x56e   : > { %v16824_v12 = vpop.f32.mrf.mxu0 }
 0x56f   : > { %15585 = vrcp.f32 %v16824_v12 }
 0x570   : > { %v1791_v26 = vpop.f32.mrf.mxu0 }
 0x571   : > { %15587 = vrcp.f32 %v1791_v26 }
 0x572   : > { %v16827_v59 = vpop.f32.mrf.mxu0 }
 0x573   : > { %15589 = vrcp.f32 %v16827_v59 }
 0x574   : > { %v16829_v16 = vpop.f32.mrf.mxu0 }
 0x575   : > { %15591 = vrcp.f32 %v16829_v16 }
 0x576   : > { %v16832_v28 = vpop.f32.mrf.mxu0 }
 0x578   : > { %v15582_v18 = vpop.eup %15581  ;;  %v1811_v27 = vpop.f32.mrf.mxu0 }
 0x579   : > { %1883 = vperm.xlu1 %15503, %v15582_v18   ;;  %15593 = vrcp.f32 %v1811_v27  ;;  %v12399_v18 = vld [vmem:[%s21307_s11] ss:$0 sm:$0xff] }
 0x57a   : > { %v15584_v36 = vpop.eup %15583 }
 0x57c   : > { %v15586_v34 = vpop.eup %15585 }
 0x57d   : > { %1878 = vperm.xlu1 %15503, %v15584_v36  }
 0x57e   : > { %v15588_v7 = vpop.eup %15587 }
 0x580   : > { %v15590_v3 = vpop.eup %15589 }
 0x581   : > { %1893 = vperm.xlu1 %15503, %v15586_v34   ;;  %v16835_v15 = vpop.f32.mrf.mxu0 }
 0x582   : > { %v15592_v62 = vpop.eup %15591 }
 0x583   : > { %v1821_v53 = vpop.f32.mrf.mxu0 }
 0x584   : > { %15595 = vrcp.f32 %v1821_v53 }
 0x585   : > { %1888 = vperm.xlu1 %15503, %v15588_v7   ;;  %15597 = vrcp.f32 %v16832_v28 }
 0x586   : > { %15599 = vrcp.f32 %v16835_v15  ;;  %v15594_v19 = vpop.eup %15593 }
 0x589   : > { %1903 = vperm.xlu1 %15503, %v15590_v3  }
 0x58d   : > { %1898 = vperm.xlu1 %15503, %v15592_v62  }
 0x591   : > { %v15596_v6 = vpop.eup %15595  ;;  %1908 = vperm.xlu1 %15503, %v15594_v19  }
 0x592   : > { %1918 = vperm.xlu0 %15504, %v15596_v6   ;;  %v15598_v0 = vpop.eup %15597 }
 0x593   : > { %v15600_v22 = vpop.eup %15599 }
 0x595   : > { %1913 = vperm.xlu1 %15503, %v15598_v0  }
 0x599   : > { %1923 = vperm.xlu1 %15503, %v15600_v22  }
 0x5cb   : > { %v1854_v29 = vpop.permute.xlu1 %1853 }
 0x5cc   : > { %v1927_v55 = vmul.f32 %v16797_v35, %v1854_v29 }
 0x5cf   : > { %v1849_v14 = vpop.permute.xlu1 %1848 }
 0x5d0   : > { %v1926_v45 = vmul.f32 %v1849_v14, %v16800_v57 }
 0x5d1   : > { %v1859_v43 = vpop.permute.xlu0 %1858 }
 0x5d2   : > { %v1928_v8 = vmul.f32 %v1859_v43, %v16805_v63  ;;  %13846 = vmatprep.mubr.msk.f32.mxu1 %vm1331_vm0, %v1926_v45 }
 0x5d3   : > { %13847 = vmatmul.mubr.msk.f32.vlgmr.msra.gmra.mxu1 %vm1331_vm0, %v1927_v55  ;;  %v1864_v32 = vpop.permute.xlu1 %1863 }
 0x5d4   : > { %v1929_v20 = vmul.f32 %v16802_v40, %v1864_v32  ;;  %13849 = vmatprep.mubr.msk.f32.mxu1 %vm1331_vm0, %v1928_v8 }
 0x5d7   : > { %13850 = vmatmul.mubr.msk.f32.gmra.mxu1 %vm1331_vm0, %v1929_v20  ;;  %v1874_v42 = vpop.permute.xlu1 %1873 }
 0x5d8   : > { %v1931_v35 = vmul.f32 %v16809_v30, %v1874_v42 }
 0x5db   : > { %v1869_v44 = vpop.permute.xlu1 %1868 }
 0x5dc   : > { %v1930_v21 = vmul.f32 %v1869_v44, %v16818_v48 }
 0x5de   : > { %13852 = vmatprep.mubr.msk.f32.mxu1 %vm1331_vm0, %v1930_v21 }
 0x5df   : > { %13853 = vmatmul.mubr.msk.f32.gmra.mxu1 %vm1331_vm0, %v1931_v35 }
 0x5f4   : > { %v1884_v57 = vpop.permute.xlu1 %1883 }
 0x5f5   : > { %v1933_v47 = vmul.f32 %v13825_v39, %v1884_v57 }
 0x5f8   : > { %v1879_v63 = vpop.permute.xlu1 %1878 }
 0x5f9   : > { %v1932_v5 = vmul.f32 %v1879_v63, %v1781_v54 }
 0x5fb   : > { %13855 = vmatprep.mubr.msk.f32.mxu1 %vm1331_vm0, %v1932_v5 }
 0x5fc   : > { %13856 = vmatmul.mubr.msk.f32.gmra.mxu1 %vm1331_vm0, %v1933_v47  ;;  %v1894_v40 = vpop.permute.xlu1 %1893 }
 0x5fd   : > { %v1935_v52 = vmul.f32 %v16824_v12, %v1894_v40 }
 0x600   : > { %v1889_v58 = vpop.permute.xlu1 %1888 }
 0x601   : > { %v1934_v46 = vmul.f32 %v1889_v58, %v1791_v26 }
 0x603   : > { %13858 = vmatprep.mubr.msk.f32.mxu1 %vm1331_vm0, %v1934_v46 }
 0x604   : > { %13859 = vmatmul.mubr.msk.f32.gmra.mxu1 %vm1331_vm0, %v1935_v52  ;;  %v1904_v30 = vpop.permute.xlu1 %1903 }
 0x605   : > { %v1937_v9 = vmul.f32 %v16827_v59, %v1904_v30 }
 0x608   : > { %v1899_v48 = vpop.permute.xlu1 %1898 }
 0x609   : > { %v1936_v13 = vmul.f32 %v1899_v48, %v16829_v16 }
 0x60b   : > { %13861 = vmatprep.mubr.msk.f32.mxu1 %vm1331_vm0, %v1936_v13 }
 0x60c   : > { %13862 = vmatmul.mubr.msk.f32.gmra.mxu1 %vm1331_vm0, %v1937_v9  ;;  %v1909_v23 = vpop.permute.xlu1 %1908 }
 0x60d   : > { %v1938_v2 = vmul.f32 %v1909_v23, %v1811_v27  ;;  %v1919_v39 = vpop.permute.xlu0 %1918 }
 0x60e   : > { %v1940_v26 = vmul.f32 %v1919_v39, %v1821_v53 }
 0x60f   : > { %13864 = vmatprep.mubr.msk.f32.mxu1 %vm1331_vm0, %v1938_v2 }
 0x610   : > { %v1914_v54 = vpop.permute.xlu1 %1913 }
 0x611   : > { %v1939_v12 = vmul.f32 %v16832_v28, %v1914_v54 }
 0x613   : > { %13865 = vmatmul.mubr.msk.f32.gmra.mxu1 %vm1331_vm0, %v1939_v12 }
 0x614   : > { %13867 = vmatprep.mubr.msk.f32.mxu1 %vm1331_vm0, %v1940_v26  ;;  %v1924_v16 = vpop.permute.xlu1 %1923 }
 0x615   : > { %v1941_v59 = vmul.f32 %v16835_v15, %v1924_v16 }
 0x617   : > { %13868 = vmatmul.mubr.msk.f32.gmra.mxu1 %vm1331_vm0, %v1941_v59 }
 0x693   : > { %v13848_v36 = vpop.f32.mrf.mxu1 }
 0x694   : > { %v2071_v27 = vadd.f32 %v13848_v36, %v12399_v18 }
 0x695   : > { %v2065_v34 = vpop.f32.mrf.mxu1 }
 0x696   : > { %v2066_v7 = vadd.f32 %v12399_v18, %v2065_v34  ;;  %2162 = vrot.lane.b32.xlu1 %v2071_v27, %s21342_s0 }
 0x697   : > { %v13851_v28 = vpop.f32.mrf.mxu1 }
 0x698   : > { %v2081_v53 = vadd.f32 %v13851_v28, %v12399_v18  ;;  %2160 = vrot.lane.b32.xlu0 %v2066_v7, %s21342_s0 }
 0x699   : > { %v2075_v3 = vpop.f32.mrf.mxu1 }
 0x69a   : > { %v2076_v62 = vadd.f32 %v12399_v18, %v2075_v3  ;;  %2166 = vrot.lane.b32.xlu1 %v2081_v53, %s21342_s0 }
 0x69c   : > { %2164 = vrot.lane.b32.xlu0 %v2076_v62, %s21342_s0 }
 0x69f   : > { %v13854_v15 = vpop.f32.mrf.mxu1 }
 0x6a0   : > { %v2091_v19 = vadd.f32 %v13854_v15, %v12399_v18 }
 0x6a1   : > { %v2085_v6 = vpop.f32.mrf.mxu1 }
 0x6a2   : > { %v2086_v0 = vadd.f32 %v12399_v18, %v2085_v6  ;;  %2170 = vrot.lane.b32.xlu1 %v2091_v19, %s21342_s0 }
 0x6a4   : > { %2168 = vrot.lane.b32.xlu0 %v2086_v0, %s21342_s0 }
 0x6bc   : > { %v13857_v22 = vpop.f32.mrf.mxu1 }
 0x6bd   : > { %v2101_v29 = vadd.f32 %v13857_v22, %v12399_v18 }
 0x6be   : > { %v2095_v14 = vpop.f32.mrf.mxu1 }
 0x6bf   : > { %v2096_v45 = vadd.f32 %v12399_v18, %v2095_v14  ;;  %2174 = vrot.lane.b32.xlu1 %v2101_v29, %s21342_s0 }
 0x6c1   : > { %2172 = vrot.lane.b32.xlu0 %v2096_v45, %s21342_s0 }
 0x6c4   : > { %v13860_v55 = vpop.f32.mrf.mxu1 }
 0x6c5   : > { %v2111_v43 = vadd.f32 %v13860_v55, %v12399_v18 }
 0x6c6   : > { %v2105_v8 = vpop.f32.mrf.mxu1 }
 0x6c7   : > { %v2106_v32 = vadd.f32 %v12399_v18, %v2105_v8  ;;  %2178 = vrot.lane.b32.xlu1 %v2111_v43, %s21342_s0 }
 0x6c9   : > { %2176 = vrot.lane.b32.xlu0 %v2106_v32, %s21342_s0 }
 0x6cc   : > { %v13863_v20 = vpop.f32.mrf.mxu1 }
 0x6cd   : > { %v2121_v42 = vadd.f32 %v13863_v20, %v12399_v18 }
 0x6ce   : > { %v2115_v44 = vpop.f32.mrf.mxu1 }
 0x6cf   : > { %v2116_v21 = vadd.f32 %v12399_v18, %v2115_v44  ;;  %2182 = vrot.lane.b32.xlu1 %v2121_v42, %s21342_s0 }
 0x6d1   : > { %2180 = vrot.lane.b32.xlu0 %v2116_v21, %s21342_s0 }
 0x6d3   : > { %v13866_v35 = vpop.f32.mrf.mxu1 }
 0x6d4   : > { %v2131_v57 = vadd.f32 %v13866_v35, %v12399_v18 }
 0x6d5   : > { %v2125_v63 = vpop.f32.mrf.mxu1 }
 0x6d6   : > { %v2126_v5 = vadd.f32 %v12399_v18, %v2125_v63  ;;  %2186 = vrot.lane.b32.xlu1 %v2131_v57, %s21342_s0 }
 0x6d7   : > { %v13869_v47 = vpop.f32.mrf.mxu1 }
 0x6d8   : > { %v2141_v40 = vadd.f32 %v13869_v47, %v12399_v18  ;;  %2184 = vrot.lane.b32.xlu0 %v2126_v5, %s21342_s0 }
 0x6d9   : > { %v2135_v58 = vpop.f32.mrf.mxu1 }
 0x6da   : > { %v2136_v46 = vadd.f32 %v12399_v18, %v2135_v58  ;;  %2190 = vrot.lane.b32.xlu1 %v2141_v40, %s21342_s0 }
 0x6dc   : > { %2188 = vrot.lane.b32.xlu0 %v2136_v46, %s21342_s0 }
 0x708   : > { %v2163_v52 = vpop.permute.xlu1 %2162 }
 0x709   : > { %v16886_v30 = vadd.f32 %v2163_v52, %v16561_v1 }
 0x70a   : > { %v2161_v48 = vpop.permute.xlu0 %2160 }
 0x70b   : > { %21371 = vst [vmem:[#allocation6_spill] sm:$0xff] %v16886_v30  ;;  %v16889_v13 = vadd.f32 %v2161_v48, %v16564_v17  ;;  %2244 = vrot.lane.b32.xlu1 %v16886_v30, %s21342_s0 }
 0x70c   : > { %v2167_v9 = vpop.permute.xlu1 %2166 }
 0x70d   : > { %21372 = vst [vmem:[#allocation8_spill] sm:$0xff] %v16889_v13  ;;  %v16894_v23 = vadd.f32 %v2167_v9, %v16550_v4  ;;  %2242 = vrot.lane.b32.xlu0 %v16889_v13, %s21342_s0 }
 0x70e   : > { %v2165_v2 = vpop.permute.xlu0 %2164 }
 0x70f   : > { %21373 = vst [vmem:[#allocation7_spill] sm:$0xff] %v16894_v23  ;;  %v16899_v39 = vadd.f32 %v2165_v2, %v16554_v50  ;;  %2248 = vrot.lane.b32.xlu1 %v16894_v23, %s21342_s0 }
 0x711   : > { %21374 = vst [vmem:[#allocation3_spill] sm:$0xff] %v16899_v39  ;;  %2246 = vrot.lane.b32.xlu0 %v16899_v39, %s21342_s0 }
 0x714   : > { %v2171_v1 = vpop.permute.xlu1 %2170 }
 0x715   : > { %v16906_v17 = vadd.f32 %v2171_v1, %v16536_v33 }
 0x716   : > { %v2169_v54 = vpop.permute.xlu0 %2168 }
 0x717   : > { %v16909_v4 = vadd.f32 %v2169_v54, %v16542_v49  ;;  %2252 = vrot.lane.b32.xlu1 %v16906_v17, %s21342_s0 }
 0x719   : > { %21375 = vst [vmem:[#allocation2_spill] sm:$0xff] %v16909_v4  ;;  %2250 = vrot.lane.b32.xlu0 %v16909_v4, %s21342_s0 }
 0x731   : > { %v2175_v50 = vpop.permute.xlu1 %2174 }
 0x732   : > { %v16916_v12 = vadd.f32 %v2175_v50, %v16520_v56 }
 0x733   : > { %v2173_v26 = vpop.permute.xlu0 %2172 }
 0x734   : > { %v16919_v16 = vadd.f32 %v2173_v26, %v16526_v37  ;;  %2256 = vrot.lane.b32.xlu1 %v16916_v12, %s21342_s0 }
 0x736   : > { %2254 = vrot.lane.b32.xlu0 %v16919_v16, %s21342_s0 }
 0x739   : > { %v2179_v33 = vpop.permute.xlu1 %2178 }
 0x73a   : > { %v16926_v49 = vadd.f32 %v2179_v33, %v16505_v51 }
 0x73b   : > { %v2177_v59 = vpop.permute.xlu0 %2176 }
 0x73c   : > { %v16929_v18 = vadd.f32 %v2177_v59, %v16510_v38  ;;  %2260 = vrot.lane.b32.xlu1 %v16926_v49, %s21342_s0 }
 0x73e   : > { %2258 = vrot.lane.b32.xlu0 %v16929_v18, %s21342_s0 }
 0x741   : > { %v2183_v56 = vpop.permute.xlu1 %2182 }
 0x742   : > { %v16936_v37 = vadd.f32 %v2183_v56, %v16491_v61 }
 0x743   : > { %v2181_v36 = vpop.permute.xlu0 %2180 }
 0x744   : > { %v16939_v27 = vadd.f32 %v2181_v36, %v16494_v60  ;;  %2264 = vrot.lane.b32.xlu1 %v16936_v37, %s21342_s0 }
 0x746   : > { %2262 = vrot.lane.b32.xlu0 %v16939_v27, %s21342_s0 }
 0x748   : > { %v2187_v51 = vpop.permute.xlu1 %2186 }
 0x749   : > { %v16946_v38 = vadd.f32 %v2187_v51, %v16464_v24 }
 0x74a   : > { %v2185_v34 = vpop.permute.xlu0 %2184 }
 0x74b   : > { %v16949_v7 = vadd.f32 %v2185_v34, %v16480_v11  ;;  %2268 = vrot.lane.b32.xlu1 %v16946_v38, %s21342_s0 }
 0x74c   : > { %v2191_v61 = vpop.permute.xlu1 %2190 }
 0x74d   : > { %v16954_v60 = vadd.f32 %v2191_v61, %v16453_v10  ;;  %2266 = vrot.lane.b32.xlu0 %v16949_v7, %s21342_s0 }
 0x74e   : > { %v2189_v28 = vpop.permute.xlu0 %2188 }
 0x74f   : > { %v16959_v53 = vadd.f32 %v2189_v28, %v16467_v41  ;;  %2272 = vrot.lane.b32.xlu1 %v16954_v60, %s21342_s0 }
 0x751   : > { %2270 = vrot.lane.b32.xlu0 %v16959_v53, %s21342_s0 }
 0x77d   : > { %v2245_v24 = vpop.permute.xlu1 %2244 }
 0x77e   : > { %v2293_v11 = vsel %vm1331_vm0, %v2245_v24, 0.0 }
 0x77f   : > { %v2243_v3 = vpop.permute.xlu0 %2242  ;;  %2294 = vadd.xlane.f32.xlu1 %v2293_v11 }
 0x780   : > { %v2290_v10 = vsel %vm1331_vm0, %v2243_v3, 0.0 }
 0x781   : > { %2291 = vadd.xlane.f32.xlu0 %v2290_v10  ;;  %v2249_v19 = vpop.permute.xlu1 %2248 }
 0x782   : > { %v2299_v41 = vsel %vm1331_vm0, %v2249_v19, 0.0 }
 0x783   : > { %v2247_v62 = vpop.permute.xlu0 %2246 }
 0x784   : > { %v2296_v15 = vsel %vm1331_vm0, %v2247_v62, 0.0 }
 0x785   : > { %2297 = vadd.xlane.f32.xlu0 %v2296_v15 }
 0x789   : > { %2300 = vadd.xlane.f32.xlu0 %v2299_v41  ;;  %v2253_v6 = vpop.permute.xlu1 %2252 }
 0x78a   : > { %v2305_v29 = vsel %vm1331_vm0, %v2253_v6, 0.0 }
 0x78b   : > { %v2251_v0 = vpop.permute.xlu0 %2250 }
 0x78c   : > { %v2302_v22 = vsel %vm1331_vm0, %v2251_v0, 0.0 }
 0x78d   : > { %2303 = vadd.xlane.f32.xlu1 %v2302_v22  ;;  %2306 = vadd.xlane.f32.xlu0 %v2305_v29 }
 0x7a6   : > { %v2257_v14 = vpop.permute.xlu1 %2256 }
 0x7a7   : > { %v2311_v45 = vsel %vm1331_vm0, %v2257_v14, 0.0 }
 0x7a8   : > { %v2255_v55 = vpop.permute.xlu0 %2254  ;;  %2312 = vadd.xlane.f32.xlu0 %v2311_v45 }
 0x7a9   : > { %v2308_v43 = vsel %vm1331_vm0, %v2255_v55, 0.0 }
 0x7aa   : > { %2309 = vadd.xlane.f32.xlu1 %v2308_v43 }
 0x7ae   : > { %v2261_v8 = vpop.permute.xlu1 %2260 }
 0x7af   : > { %v2317_v32 = vsel %vm1331_vm0, %v2261_v8, 0.0 }
 0x7b0   : > { %v2259_v20 = vpop.permute.xlu0 %2258  ;;  %2318 = vadd.xlane.f32.xlu0 %v2317_v32 }
 0x7b1   : > { %v2314_v42 = vsel %vm1331_vm0, %v2259_v20, 0.0 }
 0x7b2   : > { %2315 = vadd.xlane.f32.xlu1 %v2314_v42 }
 0x7b6   : > { %v2265_v44 = vpop.permute.xlu1 %2264 }
 0x7b7   : > { %v2323_v21 = vsel %vm1331_vm0, %v2265_v44, 0.0 }
 0x7b8   : > { %v2263_v35 = vpop.permute.xlu0 %2262  ;;  %2324 = vadd.xlane.f32.xlu0 %v2323_v21 }
 0x7b9   : > { %v2320_v57 = vsel %vm1331_vm0, %v2263_v35, 0.0 }
 0x7ba   : > { %2321 = vadd.xlane.f32.xlu1 %v2320_v57 }
 0x7bd   : > { %v2269_v63 = vpop.permute.xlu1 %2268 }
 0x7be   : > { %v2329_v5 = vsel %vm1331_vm0, %v2269_v63, 0.0 }
 0x7bf   : > { %v2267_v47 = vpop.permute.xlu0 %2266  ;;  %2330 = vadd.xlane.f32.xlu0 %v2329_v5 }
 0x7c0   : > { %v2326_v40 = vsel %vm1331_vm0, %v2267_v47, 0.0 }
 0x7c1   : > { %2327 = vadd.xlane.f32.xlu1 %v2326_v40  ;;  %v2273_v58 = vpop.permute.xlu1 %2272 }
 0x7c2   : > { %v2335_v46 = vsel %vm1331_vm0, %v2273_v58, 0.0 }
 0x7c3   : > { %v2271_v52 = vpop.permute.xlu0 %2270  ;;  %2336 = vadd.xlane.f32.xlu0 %v2335_v46 }
 0x7c4   : > { %v2332_v48 = vsel %vm1331_vm0, %v2271_v52, 0.0 }
 0x7c5   : > { %2333 = vadd.xlane.f32.xlu1 %v2332_v48 }
 0x808   : > { %v2295_v9 = vpop.xlane.xlu1 %2294 }
 0x809   : > { %v2340_v2 = vmul.f32 0.03125, %v2295_v9 }
 0x80a   : > { %v2292_v1 = vpop.xlane.xlu0 %2291 }
 0x80b   : > { %v16982_v54 = vsub.f32 %v16886_v30, %v2340_v2  ;;  %v2339_v50 = vmul.f32 0.03125, %v2292_v1 }
 0x80d   : > { %v2372_v26 = vmul.f32 %v16982_v54, %v16982_v54  ;;  %v16987_v33 = vsub.f32 %v16889_v13, %v2339_v50 }
 0x80e   : > { %v2298_v59 = vpop.xlane.xlu0 %2297 }
 0x80f   : > { %v2371_v56 = vmul.f32 %v16987_v33, %v16987_v33  ;;  %2405 = vrot.lane.b32.xlu0 %v2372_v26, %s21342_s0  ;;  %v2341_v51 = vmul.f32 0.03125, %v2298_v59 }
 0x811   : > { %2403 = vrot.lane.b32.xlu1 %v2371_v56, %s21342_s0  ;;  %v16997_v11 = vsub.f32 %v16899_v39, %v2341_v51 }
 0x812   : > { %v2301_v36 = vpop.xlane.xlu0 %2300 }
 0x813   : > { %v2342_v34 = vmul.f32 0.03125, %v2301_v36  ;;  %v2373_v19 = vmul.f32 %v16997_v11, %v16997_v11 }
 0x815   : > { %v16994_v61 = vsub.f32 %v16894_v23, %v2342_v34 }
 0x816   : > { %v2307_v28 = vpop.xlane.xlu0 %2306  ;;  %v2304_v24 = vpop.xlane.xlu1 %2303 }
 0x817   : > { %v2374_v3 = vmul.f32 %v16994_v61, %v16994_v61  ;;  %v2344_v10 = vmul.f32 0.03125, %v2307_v28  ;;  %v2343_v62 = vmul.f32 0.03125, %v2304_v24 }
 0x819   : > { %v17002_v15 = vsub.f32 %v16909_v4, %v2343_v62  ;;  %2409 = vrot.lane.b32.xlu1 %v2374_v3, %s21342_s0  ;;  %v17008_v41 = vsub.f32 %v16906_v17, %v2344_v10 }
 0x81b   : > { %v2375_v6 = vmul.f32 %v17002_v15, %v17002_v15  ;;  %v2376_v0 = vmul.f32 %v17008_v41, %v17008_v41 }
 0x81d   : > { %2407 = vrot.lane.b32.xlu1 %v2373_v19, %s21342_s0  ;;  %2411 = vrot.lane.b32.xlu0 %v2375_v6, %s21342_s0 }
 0x821   : > { %2413 = vrot.lane.b32.xlu1 %v2376_v0, %s21342_s0 }
 0x831   : > { %v2313_v22 = vpop.xlane.xlu0 %2312 }
 0x832   : > { %v2346_v29 = vmul.f32 0.03125, %v2313_v22 }
 0x833   : > { %v2310_v14 = vpop.xlane.xlu1 %2309 }
 0x834   : > { %v17018_v45 = vsub.f32 %v16916_v12, %v2346_v29  ;;  %v2345_v55 = vmul.f32 0.03125, %v2310_v14 }
 0x836   : > { %v2378_v43 = vmul.f32 %v17018_v45, %v17018_v45  ;;  %v17023_v8 = vsub.f32 %v16919_v16, %v2345_v55 }
 0x838   : > { %v2377_v32 = vmul.f32 %v17023_v8, %v17023_v8  ;;  %2417 = vrot.lane.b32.xlu1 %v2378_v43, %s21342_s0 }
 0x839   : > { %v2319_v20 = vpop.xlane.xlu0 %2318 }
 0x83a   : > { %v2348_v42 = vmul.f32 0.03125, %v2319_v20  ;;  %2415 = vrot.lane.b32.xlu0 %v2377_v32, %s21342_s0 }
 0x83b   : > { %v2316_v44 = vpop.xlane.xlu1 %2315 }
 0x83c   : > { %v17030_v21 = vsub.f32 %v16926_v49, %v2348_v42  ;;  %v2347_v35 = vmul.f32 0.03125, %v2316_v44 }
 0x83e   : > { %v2380_v57 = vmul.f32 %v17030_v21, %v17030_v21  ;;  %v17035_v63 = vsub.f32 %v16929_v18, %v2347_v35 }
 0x840   : > { %v2379_v5 = vmul.f32 %v17035_v63, %v17035_v63  ;;  %2421 = vrot.lane.b32.xlu1 %v2380_v57, %s21342_s0 }
 0x841   : > { %v2325_v47 = vpop.xlane.xlu0 %2324 }
 0x842   : > { %v2350_v40 = vmul.f32 0.03125, %v2325_v47  ;;  %2419 = vrot.lane.b32.xlu0 %v2379_v5, %s21342_s0 }
 0x843   : > { %v2322_v58 = vpop.xlane.xlu1 %2321 }
 0x844   : > { %v17042_v46 = vsub.f32 %v16936_v37, %v2350_v40  ;;  %v2349_v52 = vmul.f32 0.03125, %v2322_v58 }
 0x846   : > { %v2382_v48 = vmul.f32 %v17042_v46, %v17042_v46  ;;  %v17047_v9 = vsub.f32 %v16939_v27, %v2349_v52 }
 0x848   : > { %v2381_v2 = vmul.f32 %v17047_v9, %v17047_v9  ;;  %2425 = vrot.lane.b32.xlu1 %v2382_v48, %s21342_s0  ;;  %v2331_v1 = vpop.xlane.xlu0 %2330 }
 0x849   : > { %v2352_v50 = vmul.f32 0.03125, %v2331_v1 }
 0x84a   : > { %2423 = vrot.lane.b32.xlu0 %v2381_v2, %s21342_s0  ;;  %v2328_v26 = vpop.xlane.xlu1 %2327 }
 0x84b   : > { %v17054_v59 = vsub.f32 %v16946_v38, %v2352_v50  ;;  %v2351_v56 = vmul.f32 0.03125, %v2328_v26 }
 0x84c   : > { %v2337_v36 = vpop.xlane.xlu0 %2336 }
 0x84d   : > { %v2384_v51 = vmul.f32 %v17054_v59, %v17054_v59  ;;  %v17059_v34 = vsub.f32 %v16949_v7, %v2351_v56  ;;  %v2354_v28 = vmul.f32 0.03125, %v2337_v36 }
 0x84e   : > { %v2334_v24 = vpop.xlane.xlu1 %2333 }
 0x84f   : > { %v2383_v3 = vmul.f32 %v17059_v34, %v17059_v34  ;;  %v17064_v10 = vsub.f32 %v16954_v60, %v2354_v28  ;;  %v2353_v62 = vmul.f32 0.03125, %v2334_v24  ;;  %2429 = vrot.lane.b32.xlu1 %v2384_v51, %s21342_s0 }
 0x851   : > { %v2386_v19 = vmul.f32 %v17064_v10, %v17064_v10  ;;  %v17070_v6 = vsub.f32 %v16959_v53, %v2353_v62  ;;  %2427 = vrot.lane.b32.xlu0 %v2383_v3, %s21342_s0 }
 0x853   : > { %v2385_v0 = vmul.f32 %v17070_v6, %v17070_v6  ;;  %2433 = vrot.lane.b32.xlu1 %v2386_v19, %s21342_s0 }
 0x855   : > { %2431 = vrot.lane.b32.xlu0 %v2385_v0, %s21342_s0 }
 0x881   : > { %v2406_v22 = vpop.permute.xlu0 %2405 }
 0x882   : > { %v2454_v29 = vsel %vm1331_vm0, %v2406_v22, 0.0 }
 0x883   : > { %2455 = vadd.xlane.f32.xlu1 %v2454_v29  ;;  %v2404_v14 = vpop.permute.xlu1 %2403 }
 0x884   : > { %v2451_v55 = vsel %vm1331_vm0, %v2404_v14, 0.0  ;;  %v12416_v14 = vld [vmem:[%s21307_s11 + $0x1] ss:$0 sm:$0xff] }
 0x885   : > { %2452 = vadd.xlane.f32.xlu0 %v2451_v55  ;;  %v12417_v55 = vld [vmem:[%s21307_s11 + $0x2] ss:$0 sm:$0xff] }
 0x88b   : > { %v2410_v43 = vpop.permute.xlu1 %2409 }
 0x88c   : > { %v2460_v32 = vsel %vm1331_vm0, %v2410_v43, 0.0  ;;  %v2614_v43 = vld [vmem:[%s21306_s10 + $0x38] sm:$0xff] }
 0x88d   : > { %2461 = vadd.xlane.f32.xlu0 %v2460_v32  ;;  %v2613_v32 = vld [vmem:[%s21306_s10 + $0x30] sm:$0xff]  ;;  %13870 = vmatprep.subr.mxu0 %v2614_v43 }
 0x88e   : > { %13871 = vmatpush3.msra.mxu0 %v2614_v43 }
 0x88f   : > { %v2412_v20 = vpop.permute.xlu0 %2411  ;;  %v2408_v42 = vpop.permute.xlu1 %2407  ;;  %13872 = vmatprep.subr.mxu0 %v2613_v32 }
 0x890   : > { %v2463_v44 = vsel %vm1331_vm0, %v2412_v20, 0.0  ;;  %v2457_v35 = vsel %vm1331_vm0, %v2408_v42, 0.0  ;;  %13873 = vmatpush3.msra.mxu0 %v2613_v32 }
 0x891   : > { %2464 = vadd.xlane.f32.xlu1 %v2463_v44  ;;  %2458 = vadd.xlane.f32.xlu0 %v2457_v35 }
 0x893   : > { %v2414_v57 = vpop.permute.xlu1 %2413 }
 0x894   : > { %v2466_v5 = vsel %vm1331_vm0, %v2414_v57, 0.0 }
 0x895   : > { %2467 = vadd.xlane.f32.xlu0 %v2466_v5 }
 0x8aa   : > { %v2418_v47 = vpop.permute.xlu1 %2417 }
 0x8ab   : > { %v2472_v40 = vsel %vm1331_vm0, %v2418_v47, 0.0 }
 0x8ac   : > { %v2416_v58 = vpop.permute.xlu0 %2415  ;;  %2473 = vadd.xlane.f32.xlu0 %v2472_v40 }
 0x8ad   : > { %v2469_v52 = vsel %vm1331_vm0, %v2416_v58, 0.0 }
 0x8ae   : > { %2470 = vadd.xlane.f32.xlu1 %v2469_v52 }
 0x8b2   : > { %v2422_v48 = vpop.permute.xlu1 %2421 }
 0x8b3   : > { %v2478_v2 = vsel %vm1331_vm0, %v2422_v48, 0.0 }
 0x8b4   : > { %v2420_v1 = vpop.permute.xlu0 %2419  ;;  %2479 = vadd.xlane.f32.xlu0 %v2478_v2 }
 0x8b5   : > { %v2475_v50 = vsel %vm1331_vm0, %v2420_v1, 0.0 }
 0x8b6   : > { %2476 = vadd.xlane.f32.xlu1 %v2475_v50 }
 0x8ba   : > { %v2426_v26 = vpop.permute.xlu1 %2425 }
 0x8bb   : > { %v2484_v56 = vsel %vm1331_vm0, %v2426_v26, 0.0 }
 0x8bc   : > { %v2424_v36 = vpop.permute.xlu0 %2423  ;;  %2485 = vadd.xlane.f32.xlu0 %v2484_v56 }
 0x8bd   : > { %v2481_v51 = vsel %vm1331_vm0, %v2424_v36, 0.0 }
 0x8be   : > { %2482 = vadd.xlane.f32.xlu1 %v2481_v51 }
 0x8c1   : > { %v2430_v28 = vpop.permute.xlu1 %2429 }
 0x8c2   : > { %v2490_v24 = vsel %vm1331_vm0, %v2430_v28, 0.0 }
 0x8c3   : > { %v2428_v3 = vpop.permute.xlu0 %2427  ;;  %2491 = vadd.xlane.f32.xlu0 %v2490_v24 }
 0x8c4   : > { %v2487_v62 = vsel %vm1331_vm0, %v2428_v3, 0.0 }
 0x8c5   : > { %2488 = vadd.xlane.f32.xlu1 %v2487_v62  ;;  %v2434_v19 = vpop.permute.xlu1 %2433 }
 0x8c6   : > { %v2496_v0 = vsel %vm1331_vm0, %v2434_v19, 0.0 }
 0x8c7   : > { %v2432_v22 = vpop.permute.xlu0 %2431  ;;  %2497 = vadd.xlane.f32.xlu0 %v2496_v0 }
 0x8c8   : > { %v2493_v29 = vsel %vm1331_vm0, %v2432_v22, 0.0 }
 0x8c9   : > { %2494 = vadd.xlane.f32.xlu1 %v2493_v29 }
 0x8da   : > { %2568 = vrot.lane.b32.xlu1 %v12416_v14, %s21342_s0 }
 0x8dd   : > { %2592 = vrot.lane.b32.xlu0 %v12417_v55, %s21342_s0 }
 0x90c   : > { %v2456_v35 = vpop.xlane.xlu1 %2455 }
 0x90d   : > { %v2500_v58 = vmul.f32 0.03125, %v2456_v35 }
 0x90e   : > { %v2453_v20 = vpop.xlane.xlu0 %2452 }
 0x90f   : > { %v2499_v5 = vmul.f32 0.03125, %v2453_v20  ;;  %v2516_v26 = vadd.f32 1e-05, %v2500_v58 }
 0x911   : > { %v2515_v2 = vadd.f32 1e-05, %v2499_v5  ;;  %v2611_v5 = vld [vmem:[%s21306_s10 + $0x20] sm:$0xff] }
 0x913   : > { %15601 = vrsqrt.f32 %v2515_v2 }
 0x916   : > { %v2462_v42 = vpop.xlane.xlu0 %2461 }
 0x917   : > { %v2502_v56 = vmul.f32 0.03125, %v2462_v42 }
 0x919   : > { %v2518_v3 = vadd.f32 1e-05, %v2502_v56 }
 0x91a   : > { %v2459_v44 = vpop.xlane.xlu0 %2458  ;;  %v2465_v57 = vpop.xlane.xlu1 %2464 }
 0x91b   : > { %v2501_v40 = vmul.f32 0.03125, %v2459_v44  ;;  %v2503_v52 = vmul.f32 0.03125, %v2465_v57  ;;  %v2612_v44 = vld [vmem:[%s21306_s10 + $0x28] sm:$0xff] }
 0x91c   : > { %13874 = vmatprep.subr.mxu0 %v2612_v44 }
 0x91d   : > { %v2517_v50 = vadd.f32 1e-05, %v2501_v40  ;;  %v2519_v36 = vadd.f32 1e-05, %v2503_v52  ;;  %13875 = vmatpush3.msra.mxu0 %v2612_v44 }
 0x91e   : > { %v2468_v47 = vpop.xlane.xlu0 %2467  ;;  %13876 = vmatprep.subr.mxu0 %v2611_v5 }
 0x91f   : > { %15603 = vrsqrt.f32 %v2517_v50  ;;  %v2504_v19 = vmul.f32 0.03125, %v2468_v47  ;;  %13877 = vmatpush3.msra.mxu0 %v2611_v5 }
 0x920   : > { %15605 = vrsqrt.f32 %v2516_v26  ;;  %v15602_v52 = vpop.eup %15601 }
 0x921   : > { %15607 = vrsqrt.f32 %v2519_v36  ;;  %v2520_v43 = vadd.f32 1e-05, %v2504_v19  ;;  %v2547_v19 = vmul.f32 %v15602_v52, %v16987_v33 }
 0x922   : > { %15609 = vrsqrt.f32 %v2518_v3 }
 0x92c   : > { %v15604_v2 = vpop.eup %15603 }
 0x92d   : > { %v15606_v56 = vpop.eup %15605 }
 0x935   : > { %v2474_v1 = vpop.xlane.xlu0 %2473 }
 0x936   : > { %v2506_v32 = vmul.f32 0.03125, %v2474_v1 }
 0x937   : > { %v2471_v48 = vpop.xlane.xlu1 %2470 }
 0x938   : > { %v2505_v51 = vmul.f32 0.03125, %v2471_v48  ;;  %v2522_v47 = vadd.f32 1e-05, %v2506_v32 }
 0x93a   : > { %v2521_v0 = vadd.f32 1e-05, %v2505_v51 }
 0x93c   : > { %15611 = vrsqrt.f32 %v2521_v0 }
 0x93d   : > { %v2480_v24 = vpop.xlane.xlu0 %2479 }
 0x93e   : > { %v2508_v35 = vmul.f32 0.03125, %v2480_v24 }
 0x93f   : > { %v2477_v28 = vpop.xlane.xlu1 %2476 }
 0x940   : > { %v2507_v62 = vmul.f32 0.03125, %v2477_v28  ;;  %v2524_v1 = vadd.f32 1e-05, %v2508_v35  ;;  %v15608_v28 = vpop.eup %15607 }
 0x941   : > { %v2551_v32 = vmul.f32 %v15608_v28, %v17002_v15 }
 0x942   : > { %v2523_v55 = vadd.f32 1e-05, %v2507_v62  ;;  %v2549_v62 = vmul.f32 %v15604_v2, %v16997_v11 }
 0x944   : > { %15613 = vrsqrt.f32 %v2523_v55 }
 0x945   : > { %v2486_v29 = vpop.xlane.xlu0 %2485  ;;  %15615 = vrsqrt.f32 %v2520_v43 }
 0x946   : > { %v2510_v40 = vmul.f32 0.03125, %v2486_v29  ;;  %v2548_v29 = vmul.f32 %v15606_v56, %v16982_v54 }
 0x947   : > { %v2483_v22 = vpop.xlane.xlu1 %2482 }
 0x948   : > { %v2509_v14 = vmul.f32 0.03125, %v2483_v22  ;;  %v2526_v36 = vadd.f32 1e-05, %v2510_v40 }
 0x94a   : > { %v2525_v42 = vadd.f32 1e-05, %v2509_v14  ;;  %v15610_v14 = vpop.eup %15609 }
 0x94b   : > { %v2550_v15 = vmul.f32 %v15610_v14, %v16994_v61 }
 0x94c   : > { %v2492_v20 = vpop.xlane.xlu0 %2491  ;;  %15617 = vrsqrt.f32 %v2525_v42 }
 0x94d   : > { %15619 = vrsqrt.f32 %v2522_v47  ;;  %v2512_v24 = vmul.f32 0.03125, %v2492_v20  ;;  %v15612_v20 = vpop.eup %15611 }
 0x94e   : > { %v2489_v57 = vpop.xlane.xlu1 %2488  ;;  %v2553_v5 = vmul.f32 %v15612_v20, %v17023_v8 }
 0x94f   : > { %v2511_v58 = vmul.f32 0.03125, %v2489_v57  ;;  %v2528_v42 = vadd.f32 1e-05, %v2512_v24 }
 0x950   : > { %v2498_v50 = vpop.xlane.xlu0 %2497 }
 0x951   : > { %v2527_v48 = vadd.f32 1e-05, %v2511_v58  ;;  %v2514_v11 = vmul.f32 0.03125, %v2498_v50  ;;  %v15614_v57 = vpop.eup %15613 }
 0x952   : > { %v2495_v26 = vpop.xlane.xlu1 %2494  ;;  %v15616_v47 = vpop.eup %15615  ;;  %v2555_v50 = vmul.f32 %v15614_v57, %v17035_v63 }
 0x953   : > { %v2513_v51 = vmul.f32 0.03125, %v2495_v26  ;;  %15621 = vrsqrt.f32 %v2527_v48  ;;  %v2530_v40 = vadd.f32 1e-05, %v2514_v11  ;;  %v2552_v61 = vmul.f32 %v15616_v47, %v17008_v41 }
 0x954   : > { %15623 = vrsqrt.f32 %v2524_v1  ;;  %v17117_v22 = vpop.permute.xlu0 %2592 }
 0x955   : > { %v2529_v3 = vadd.f32 1e-05, %v2513_v51  ;;  %15625 = vrsqrt.f32 %v2526_v36 }
 0x956   : > { %v17115_v0 = vpop.permute.xlu1 %2568 }
 0x957   : > { %v2573_v55 = vmul.f32 %v17115_v0, %v2549_v62  ;;  %v2571_v43 = vmul.f32 %v17115_v0, %v2547_v19  ;;  %15627 = vrsqrt.f32 %v2529_v3  ;;  %v2575_v35 = vmul.f32 %v17115_v0, %v2551_v32 }
 0x958   : > { %v2572_v54 = vmul.f32 %v17115_v0, %v2548_v29  ;;  %15629 = vrsqrt.f32 %v2528_v42  ;;  %v2577_v48 = vmul.f32 %v17115_v0, %v2553_v5  ;;  %v2574_v2 = vmul.f32 %v17115_v0, %v2550_v15 }
 0x959   : > { %v2597_v33 = vadd.f32 %v17117_v22, %v2573_v55  ;;  %v2595_v44 = vadd.f32 %v17117_v22, %v2571_v43  ;;  %v2599_v58 = vadd.f32 %v17117_v22, %v2575_v35  ;;  %v15618_v1 = vpop.eup %15617  ;;  %15631 = vrsqrt.f32 %v2530_v40 }
 0x95a   : > { %v2596_v52 = vadd.f32 %v17117_v22, %v2572_v54  ;;  %v15620_v8 = vpop.eup %15619  ;;  %v2579_v26 = vmul.f32 %v17115_v0, %v2555_v50  ;;  %v2601_v56 = vadd.f32 %v17117_v22, %v2577_v48  ;;  %v2598_v36 = vadd.f32 %v17117_v22, %v2574_v2 }
 0x95b   : > { %2640 = vrot.lane.b32.xlu0 %v2597_v33, %s21342_s0  ;;  %2636 = vrot.lane.b32.xlu1 %v2595_v44, %s21342_s0  ;;  %v2576_v51 = vmul.f32 %v17115_v0, %v2552_v61  ;;  %v2557_v28 = vmul.f32 %v15618_v1, %v17047_v9  ;;  %v2554_v41 = vmul.f32 %v15620_v8, %v17018_v45 }
 0x95c   : > { %v2603_v62 = vadd.f32 %v17117_v22, %v2579_v26 }
 0x95d   : > { %v2600_v29 = vadd.f32 %v17117_v22, %v2576_v51  ;;  %v2581_v14 = vmul.f32 %v17115_v0, %v2557_v28  ;;  %v2578_v55 = vmul.f32 %v17115_v0, %v2554_v41  ;;  %v3279_v41 = vld [vmem:[%s21306_s10 + $0x50] sm:$0xff] }
 0x95f   : > { %2644 = vrot.lane.b32.xlu0 %v2599_v58, %s21342_s0  ;;  %2638 = vrot.lane.b32.xlu1 %v2596_v52, %s21342_s0  ;;  %v2605_v42 = vadd.f32 %v17117_v22, %v2581_v14  ;;  %v2602_v11 = vadd.f32 %v17117_v22, %v2578_v55 }
 0x960   : > { %v15622_v24 = vpop.eup %15621 }
 0x961   : > { %v15624_v63 = vpop.eup %15623  ;;  %v2559_v9 = vmul.f32 %v15622_v24, %v17059_v34 }
 0x962   : > { %v15626_v3 = vpop.eup %15625  ;;  %v2556_v43 = vmul.f32 %v15624_v63, %v17030_v21  ;;  %v3280_v63 = vld [vmem:[%s21306_s10 + $0x58] sm:$0xff] }
 0x963   : > { %2648 = vrot.lane.b32.xlu0 %v2601_v56, %s21342_s0  ;;  %2642 = vrot.lane.b32.xlu1 %v2598_v36, %s21342_s0  ;;  %v2558_v32 = vmul.f32 %v15626_v3, %v17042_v46  ;;  %v2583_v33 = vmul.f32 %v17115_v0, %v2559_v9  ;;  %v3278_v3 = vld [vmem:[%s21306_s10 + $0x48] sm:$0xff] }
 0x964   : > { %v15628_v19 = vpop.eup %15627  ;;  %v2580_v45 = vmul.f32 %v17115_v0, %v2556_v43  ;;  %13902 = vmatprep.subr.mxu1 %v3280_v63 }
 0x965   : > { %v15630_v20 = vpop.eup %15629  ;;  %v2561_v44 = vmul.f32 %v15628_v19, %v17070_v6  ;;  %v2607_v35 = vadd.f32 %v17117_v22, %v2583_v33  ;;  %v2582_v54 = vmul.f32 %v17115_v0, %v2558_v32  ;;  %13903 = vmatpush3.msra.mxu1 %v3280_v63  ;;  %v17212_v19 = vld [vmem:[%s21307_s11 + $0x3] ss:$0 sm:$0xff] }
 0x966   : > { %v2604_v21 = vadd.f32 %v17117_v22, %v2580_v45  ;;  %v15632_v34 = vpop.eup %15631  ;;  %v2560_v57 = vmul.f32 %v15630_v20, %v17054_v59  ;;  %13904 = vmatprep.subr.mxu1 %v3279_v41 }
 0x967   : > { %2652 = vrot.lane.b32.xlu0 %v2603_v62, %s21342_s0  ;;  %2646 = vrot.lane.b32.xlu1 %v2600_v29, %s21342_s0  ;;  %v2585_v46 = vmul.f32 %v17115_v0, %v2561_v44  ;;  %v2606_v5 = vadd.f32 %v17117_v22, %v2582_v54  ;;  %v2562_v47 = vmul.f32 %v15632_v34, %v17064_v10  ;;  %v3277_v62 = vld [vmem:[%s21306_s10 + $0x40] sm:$0xff] }
 0x968   : > { %v2584_v15 = vmul.f32 %v17115_v0, %v2560_v57  ;;  %13905 = vmatpush3.msra.mxu1 %v3279_v41 }
 0x969   : > { %v2609_v6 = vadd.f32 %v17117_v22, %v2585_v46  ;;  %v2586_v59 = vmul.f32 %v17115_v0, %v2562_v47  ;;  %13906 = vmatprep.subr.mxu1 %v3278_v3 }
 0x96a   : > { %v2608_v40 = vadd.f32 %v17117_v22, %v2584_v15  ;;  %13907 = vmatpush3.msra.mxu1 %v3278_v3 }
 0x96b   : > { %2656 = vrot.lane.b32.xlu0 %v2605_v42, %s21342_s0  ;;  %2650 = vrot.lane.b32.xlu1 %v2602_v11, %s21342_s0  ;;  %v2610_v58 = vadd.f32 %v17117_v22, %v2586_v59 }
 0x96c   : > { %13908 = vmatprep.subr.mxu1 %v3277_v62 }
 0x96d   : > { %13909 = vmatpush3.msra.mxu1 %v3277_v62 }
 0x96f   : > { %2660 = vrot.lane.b32.xlu0 %v2607_v35, %s21342_s0  ;;  %2654 = vrot.lane.b32.xlu1 %v2604_v21, %s21342_s0 }
 0x973   : > { %2664 = vrot.lane.b32.xlu0 %v2609_v6, %s21342_s0  ;;  %2658 = vrot.lane.b32.xlu1 %v2606_v5, %s21342_s0 }
 0x977   : > { %2662 = vrot.lane.b32.xlu1 %v2608_v40, %s21342_s0 }
 0x97b   : > { %2666 = vrot.lane.b32.xlu1 %v2610_v58, %s21342_s0 }
 0x9cd   : > { %v2641_v52 = vpop.permute.xlu0 %2640  ;;  %v2637_v48 = vpop.permute.xlu1 %2636 }
 0x9ce   : > { %13878 = vmatprep.mubr.msk.f32.mxu0 %vm1331_vm0, %v2637_v48 }
 0x9d1   : > { %v2645_v2 = vpop.permute.xlu0 %2644  ;;  %v2639_v10 = vpop.permute.xlu1 %2638 }
 0x9d2   : > { %13879 = vmatmul.mubr.msk.f32.vlgmr.msra.gmra.mxu0 %vm1331_vm0, %v2639_v10 }
 0x9d3   : > { %13881 = vmatprep.mubr.msk.f32.mxu0 %vm1331_vm0, %v2641_v52 }
 0x9d5   : > { %v2649_v1 = vpop.permute.xlu0 %2648  ;;  %v2643_v50 = vpop.permute.xlu1 %2642 }
 0x9d6   : > { %13882 = vmatmul.mubr.msk.f32.gmra.mxu0 %vm1331_vm0, %v2643_v50 }
 0x9d7   : > { %13884 = vmatprep.mubr.msk.f32.mxu0 %vm1331_vm0, %v2645_v2 }
 0x9d9   : > { %v2653_v0 = vpop.permute.xlu0 %2652  ;;  %v2647_v22 = vpop.permute.xlu1 %2646 }
 0x9da   : > { %13885 = vmatmul.mubr.msk.f32.gmra.mxu0 %vm1331_vm0, %v2647_v22 }
 0x9db   : > { %13887 = vmatprep.mubr.msk.f32.mxu0 %vm1331_vm0, %v2649_v1 }
 0x9dd   : > { %v2651_v61 = vpop.permute.xlu1 %2650  ;;  %v2657_v8 = vpop.permute.xlu0 %2656 }
 0x9de   : > { %13888 = vmatmul.mubr.msk.f32.gmra.mxu0 %vm1331_vm0, %v2651_v61 }
 0x9df   : > { %13890 = vmatprep.mubr.msk.f32.mxu0 %vm1331_vm0, %v2653_v0 }
 0x9e1   : > { %v2655_v26 = vpop.permute.xlu1 %2654  ;;  %v2661_v56 = vpop.permute.xlu0 %2660 }
 0x9e2   : > { %13891 = vmatmul.mubr.msk.f32.gmra.mxu0 %vm1331_vm0, %v2655_v26 }
 0x9e3   : > { %13893 = vmatprep.mubr.msk.f32.mxu0 %vm1331_vm0, %v2657_v8 }
 0x9e5   : > { %v2659_v36 = vpop.permute.xlu1 %2658  ;;  %v2665_v28 = vpop.permute.xlu0 %2664 }
 0x9e6   : > { %13894 = vmatmul.mubr.msk.f32.gmra.mxu0 %vm1331_vm0, %v2659_v36  ;;  %v21333_v36 = vmov -1.0  }
 0x9e7   : > { %13896 = vmatprep.mubr.msk.f32.mxu0 %vm1331_vm0, %v2661_v56 }
 0x9e9   : > { %v2663_v51 = vpop.permute.xlu1 %2662 }
 0x9ea   : > { %13897 = vmatmul.mubr.msk.f32.gmra.mxu0 %vm1331_vm0, %v2663_v51 }
 0x9eb   : > { %13899 = vmatprep.mubr.msk.f32.mxu0 %vm1331_vm0, %v2665_v28 }
 0x9ed   : > { %v2667_v24 = vpop.permute.xlu1 %2666 }
 0x9ee   : > { %13900 = vmatmul.mubr.msk.f32.gmra.mxu0 %vm1331_vm0, %v2667_v24 }
 0xa92   : > { %v13880_v29 = vpop.f32.mrf.mxu0 }
 0xa93   : > { %v2772_v14 = vadd.f32 %v13880_v29, %v17212_v19 }
 0xa94   : > { %v2766_v55 = vpop.f32.mrf.mxu0 }
 0xa95   : > { %v2862_v9 = vmul.f32 0.70710677, %v2772_v14  ;;  %v2767_v43 = vadd.f32 %v17212_v19, %v2766_v55  ;;  %v17225_v61 = vmul.f32 0.5, %v2772_v14 }
 0xa96   : > { %v13883_v45 = vpop.f32.mrf.mxu0 }
 0xa97   : > { %v2910_v32 = vand.u32 2147483647, %v2862_v9  ;;  %v2861_v20 = vmul.f32 0.70710677, %v2767_v43  ;;  %v2782_v42 = vadd.f32 %v13883_v45, %v17212_v19  ;;  %vm2878_vm1 = vcmp.ge.f32.partialorder %v2862_v9, 0.0 }
 0xa98   : > { %v2776_v11 = vpop.f32.mrf.mxu0  ;;  %v17227_v8 = vmul.f32 0.5, %v2767_v43  ;;  %v17232_v51 = vsel %vm2878_vm1, 1.0, %v21333_v36 }
 0xa99   : > { %v2926_v33 = vmul.f32 0.3275911, %v2910_v32  ;;  %v2909_v44 = vand.u32 2147483647, %v2861_v20  ;;  %v2864_v21 = vmul.f32 0.70710677, %v2782_v42  ;;  %v2777_v34 = vadd.f32 %v17212_v19, %v2776_v11 }
 0xa9a   : > { %v13886_v35 = vpop.f32.mrf.mxu0  ;;  %v3134_v15 = vsub.f32 0.0, %v2910_v32  ;;  %vm2877_vm2 = vcmp.ge.f32.partialorder %v2861_v20, 0.0  ;;  %v17241_v29 = vmul.f32 0.5, %v2782_v42 }
 0xa9b   : > { %v2942_v46 = vadd.f32 1.0, %v2926_v33  ;;  %v2925_v54 = vmul.f32 0.3275911, %v2909_v44  ;;  %v2912_v57 = vand.u32 2147483647, %v2864_v21  ;;  %v3133_v58 = vsub.f32 0.0, %v2909_v44 }
 0xa9c   : > { %v2863_v6 = vmul.f32 0.70710677, %v2777_v34  ;;  %v2786_v5 = vpop.f32.mrf.mxu0  ;;  %v17219_v48 = vadd.f32 %v13886_v35, %v17212_v19  ;;  %v3150_v10 = vmul.f32 %v3134_v15, %v2910_v32  ;;  %v17239_v62 = vsel %vm2877_vm2, 1.0, %v21333_v36 }
 0xa9d   : > { %15633 = vrcp.f32 %v2942_v46  ;;  %v2941_v47 = vadd.f32 1.0, %v2925_v54  ;;  %v2928_v40 = vmul.f32 0.3275911, %v2912_v57  ;;  %v2787_v50 = vadd.f32 %v17212_v19, %v2786_v5 }
 0xa9e   : > { %v2911_v59 = vand.u32 2147483647, %v2863_v6  ;;  %v13889_v2 = vpop.f32.mrf.mxu0  ;;  %v3136_v0 = vsub.f32 0.0, %v2912_v57  ;;  %v17223_v22 = vmul.f32 0.70710677, %v17219_v48  ;;  %v3149_v28 = vmul.f32 %v3133_v58, %v2909_v44 }
 0xa9f   : > { %15635 = vrcp.f32 %v2941_v47  ;;  %v2944_v52 = vadd.f32 1.0, %v2928_v40  ;;  %v17229_v56 = vmul.f32 0.70710677, %v2787_v50  ;;  %v17236_v63 = vadd.f32 %v13889_v2, %v17212_v19 }
 0xaa0   : > { %v2927_v1 = vmul.f32 0.3275911, %v2911_v59  ;;  %v2914_v24 = vand.u32 2147483647, %v17223_v22  ;;  %v2796_v41 = vpop.f32.mrf.mxu0  ;;  %v3167_v3 = vmul.f32 1.442695, %v3150_v10  ;;  %v3152_v14 = vmul.f32 %v3136_v0, %v2912_v57 }
 0xaa1   : > { %15637 = vrcp.f32 %v2944_v52  ;;  %vm2880_vm3 = vcmp.ge.f32.partialorder %v2864_v21, 0.0  ;;  %v2913_v9 = vand.u32 2147483647, %v17229_v56  ;;  %v17244_v43 = vmul.f32 0.5, %v2777_v34 }
 0xaa2   : > { %v2943_v26 = vadd.f32 1.0, %v2927_v1  ;;  %v2930_v55 = vmul.f32 0.3275911, %v2914_v24  ;;  %v3135_v45 = vsub.f32 0.0, %v2911_v59  ;;  %v17247_v32 = vmul.f32 0.70710677, %v17236_v63 }
 0xaa3   : > { %v17250_v20 = vadd.f32 %v17212_v19, %v2796_v41  ;;  %v3165_v11 = vmul.f32 1.442695, %v3149_v28  ;;  %v17253_v33 = vsel %vm2880_vm3, 1.0, %v21333_v36  ;;  %v2929_v42 = vmul.f32 0.3275911, %v2913_v9 }
 0xaa4   : > { %15639 = vrcp.f32 %v2943_v26  ;;  %v2946_v44 = vadd.f32 1.0, %v2930_v55  ;;  %vm2879_vm4 = vcmp.ge.f32.partialorder %v2863_v6, 0.0  ;;  %v2916_v21 = vand.u32 2147483647, %v17247_v32  ;;  %v13892_v26 = vpop.f32.mrf.mxu0 }
 0xaa5   : > { %15641 = vpow2.f32 %v3167_v3  ;;  %v17257_v34 = vmul.f32 0.70710677, %v17250_v20  ;;  %v3171_v46 = vmul.f32 1.442695, %v3152_v14  ;;  %v3138_v54 = vsub.f32 0.0, %v2914_v24 }
 0xaa6   : > { %15643 = vrcp.f32 %v2946_v44  ;;  %v2945_v57 = vadd.f32 1.0, %v2929_v42  ;;  %v3151_v15 = vmul.f32 %v3135_v45, %v2911_v59  ;;  %v3137_v47 = vsub.f32 0.0, %v2913_v9 }
 0xaa7   : > { %v2932_v40 = vmul.f32 0.3275911, %v2916_v21  ;;  %15645 = vpow2.f32 %v3165_v11  ;;  %v17263_v58 = vsel %vm2879_vm4, 1.0, %v21333_v36  ;;  %v17265_v6 = vmul.f32 0.5, %v2787_v50 }
 0xaa8   : > { %v2915_v52 = vand.u32 2147483647, %v17257_v34  ;;  %15647 = vrcp.f32 %v2945_v57  ;;  %v3140_v0 = vsub.f32 0.0, %v2916_v21  ;;  %v3154_v59 = vmul.f32 %v3138_v54, %v2914_v24 }
 0xaa9   : > { %v2948_v1 = vadd.f32 1.0, %v2932_v40  ;;  %15649 = vpow2.f32 %v3171_v46  ;;  %v3169_v50 = vmul.f32 1.442695, %v3151_v15  ;;  %v3153_v55 = vmul.f32 %v3137_v47, %v2913_v9 }
 0xaaa   : > { %v17259_v35 = vpop.eup %15633  ;;  %v2931_v41 = vmul.f32 0.3275911, %v2915_v52  ;;  %v17276_v42 = vadd.f32 %v13892_v26, %v17212_v19  ;;  %vm2882_vm5 = vcmp.ge.f32.partialorder %v17223_v22, 0.0  ;;  %v3156_v46 = vmul.f32 %v3140_v0, %v2916_v21  ;;  %v2806_v0 = vpop.f32.mrf.mxu0 }
 0xaab   : > { %v2990_v5 = vmul.f32 1.0614054, %v17259_v35  ;;  %15651 = vrcp.f32 %v2948_v1  ;;  %v3139_v24 = vsub.f32 0.0, %v2915_v52  ;;  %v3175_v15 = vmul.f32 1.442695, %v3154_v59 }
 0xaac   : > { %v17268_v2 = vpop.eup %15635  ;;  %v2947_v44 = vadd.f32 1.0, %v2931_v41  ;;  %v17285_v1 = vmul.f32 0.70710677, %v17276_v42  ;;  %v17289_v21 = vsel %vm2882_vm5, 1.0, %v21333_v36  ;;  %v3179_v59 = vmul.f32 1.442695, %v3156_v46 }
 0xaad   : > { %v3006_v10 = vadd.f32 -1.4531521, %v2990_v5  ;;  %v2989_v28 = vmul.f32 1.0614054, %v17268_v2  ;;  %vm2881_vm6 = vcmp.ge.f32.partialorder %v17229_v56, 0.0  ;;  %vm2884_vm7 = vcmp.ge.f32.partialorder %v17247_v32, 0.0 }
 0xaae   : > { %v17271_v3 = vpop.eup %15637  ;;  %15653 = vrcp.f32 %v2947_v44  ;;  %vm2883_vm8 = vcmp.ge.f32.partialorder %v17257_v34, 0.0  ;;  %vm2886_vm9 = vcmp.ge.f32.partialorder %v17285_v1, 0.0  ;;  %vm15867_vm2 = vmmov 0  }
 0xaaf   : > { %v3022_v14 = vmul.f32 %v17259_v35, %v3006_v10  ;;  %v3005_v45 = vadd.f32 -1.4531521, %v2989_v28  ;;  %v2992_v11 = vmul.f32 1.0614054, %v17271_v3  ;;  %v3173_v10 = vmul.f32 1.442695, %v3153_v55 }
 0xab0   : > { %15655 = vpow2.f32 %v3169_v50  ;;  %v17293_v55 = vand.u32 2147483647, %v17285_v1  ;;  %vm6604_vm3 = vcmask 588800  }
 0xab1   : > { %v3038_v57 = vadd.f32 1.4214138, %v3022_v14  ;;  %v17279_v54 = vpop.eup %15639  ;;  %v3021_v5 = vmul.f32 %v17268_v2, %v3005_v45  ;;  %v3008_v40 = vadd.f32 -1.4531521, %v2992_v11  ;;  %v3155_v14 = vmul.f32 %v3139_v24, %v2915_v52 }
 0xab2   : > { %v2991_v47 = vmul.f32 1.0614054, %v17279_v54  ;;  %v15642_v45 = vpop.eup %15641  ;;  %15657 = vpow2.f32 %v3175_v15  ;;  %v2934_v15 = vmul.f32 0.3275911, %v17293_v55 }
 0xab3   : > { %v3054_v9 = vmul.f32 %v17259_v35, %v3038_v57  ;;  %v3037_v26 = vadd.f32 1.4214138, %v3021_v5  ;;  %v3024_v22 = vmul.f32 %v17271_v3, %v3008_v40  ;;  %v17295_v57 = vpop.eup %15643  ;;  %15659 = vpow2.f32 %v3173_v10 }
 0xab4   : > { %v3007_v41 = vadd.f32 -1.4531521, %v2991_v47  ;;  %v17300_v40 = vadd.f32 %v17212_v19, %v2806_v0  ;;  %v2994_v24 = vmul.f32 1.0614054, %v17295_v57  ;;  %15661 = vpow2.f32 %v3179_v59 }
 0xab5   : > { %v3070_v28 = vadd.f32 -0.28449672, %v3054_v9  ;;  %v3053_v11 = vmul.f32 %v17268_v2, %v3037_v26  ;;  %v3040_v44 = vadd.f32 1.4214138, %v3024_v22  ;;  %v15646_v9 = vpop.eup %15645  ;;  %v3177_v22 = vmul.f32 1.442695, %v3155_v14 }
 0xab6   : > { %v3023_v5 = vmul.f32 %v17279_v54, %v3007_v41  ;;  %v17305_v31 = vpop.eup %15647  ;;  %v3010_v41 = vadd.f32 -1.4531521, %v2994_v24  ;;  %v2950_v0 = vadd.f32 1.0, %v2934_v15  ;;  %v17312_v13 = vmul.f32 0.70710677, %v17300_v40 }
 0xab7   : > { %v3086_v50 = vmul.f32 %v17259_v35, %v3070_v28  ;;  %v3069_v46 = vadd.f32 -0.28449672, %v3053_v11  ;;  %v3056_v52 = vmul.f32 %v17271_v3, %v3040_v44  ;;  %v15650_v36 = vpop.eup %15649  ;;  %v2993_v25 = vmul.f32 1.0614054, %v17305_v31 }
 0xab8   : > { %v3039_v26 = vadd.f32 1.4214138, %v3023_v5  ;;  %v3026_v5 = vmul.f32 %v17295_v57, %v3010_v41  ;;  %15663 = vrcp.f32 %v2950_v0  ;;  %vm2885_vm10 = vcmp.ge.f32.partialorder %v17312_v13, 0.0 }
 0xab9   : > { %v3102_v47 = vadd.f32 0.2548296, %v3086_v50  ;;  %v3085_v28 = vmul.f32 %v17268_v2, %v3069_v46  ;;  %v3072_v10 = vadd.f32 -0.28449672, %v3056_v52  ;;  %v17314_v50 = vpop.eup %15651  ;;  %v3009_v24 = vadd.f32 -1.4531521, %v2993_v25 }
 0xaba   : > { %v3055_v44 = vmul.f32 %v17279_v54, %v3039_v26  ;;  %v3042_v26 = vadd.f32 1.4214138, %v3026_v5  ;;  %15665 = vpow2.f32 %v3177_v22 }
 0xabb   : > { %v3118_v11 = vmul.f32 %v17259_v35, %v3102_v47  ;;  %v3101_v59 = vadd.f32 0.2548296, %v3085_v28  ;;  %v3088_v14 = vmul.f32 %v17271_v3, %v3072_v10  ;;  %v2996_v35 = vmul.f32 1.0614054, %v17314_v50  ;;  %v17320_v30 = vpop.eup %15653 }
 0xabc   : > { %v3071_v52 = vadd.f32 -0.28449672, %v3055_v44  ;;  %v3025_v10 = vmul.f32 %v17305_v31, %v3009_v24  ;;  %v3058_v25 = vmul.f32 %v17295_v57, %v3042_v26  ;;  %v2995_v0 = vmul.f32 1.0614054, %v17320_v30 }
 0xabd   : > { %v3198_v46 = vmul.f32 %v15642_v45, %v3118_v11  ;;  %v3117_v15 = vmul.f32 %v17268_v2, %v3101_v59  ;;  %v3104_v47 = vadd.f32 0.2548296, %v3088_v14  ;;  %v3012_v23 = vadd.f32 -1.4531521, %v2996_v35  ;;  %v15656_v11 = vpop.eup %15655 }
 0xabe   : > { %v3087_v28 = vmul.f32 %v17279_v54, %v3071_v52  ;;  %v3041_v22 = vadd.f32 1.4214138, %v3025_v10  ;;  %v3011_v52 = vadd.f32 -1.4531521, %v2995_v0  ;;  %v17337_v10 = vand.u32 2147483647, %v17312_v13 }
 0xabf   : > { %v3214_v39 = vsub.f32 1.0, %v3198_v46  ;;  %v3197_v41 = vmul.f32 %v15646_v9, %v3117_v15  ;;  %v3120_v45 = vmul.f32 %v17271_v3, %v3104_v47  ;;  %v3028_v59 = vmul.f32 %v17314_v50, %v3012_v23  ;;  %v15658_v24 = vpop.eup %15657 }
 0xac0   : > { %v3103_v44 = vadd.f32 0.2548296, %v3087_v28  ;;  %v3074_v46 = vadd.f32 -0.28449672, %v3058_v25  ;;  %v3057_v3 = vmul.f32 %v17305_v31, %v3041_v22  ;;  %v15660_v47 = vpop.eup %15659  ;;  %v3027_v23 = vmul.f32 %v17320_v30, %v3011_v52 }
 0xac1   : > { %v3230_v2 = vmul.f32 %v3214_v39, %v17232_v51  ;;  %v3213_v14 = vsub.f32 1.0, %v3197_v41  ;;  %v3200_v5 = vmul.f32 %v15650_v36, %v3120_v45  ;;  %v3044_v15 = vadd.f32 1.4214138, %v3028_v59 }
 0xac2   : > { %v3119_v9 = vmul.f32 %v17279_v54, %v3103_v44  ;;  %v3090_v39 = vmul.f32 %v17295_v57, %v3074_v46  ;;  %v3073_v51 = vadd.f32 -0.28449672, %v3057_v3  ;;  %v15662_v54 = vpop.eup %15661  ;;  %v2933_v52 = vmul.f32 0.3275911, %v17337_v10 }
 0xac3   : > { %v3246_v35 = vadd.f32 1.0, %v3230_v2  ;;  %v3229_v26 = vmul.f32 %v3213_v14, %v17239_v62  ;;  %v3216_v4 = vsub.f32 1.0, %v3200_v5  ;;  %v3060_v28 = vmul.f32 %v17314_v50, %v3044_v15 }
 0xac4   : > { %v3199_v36 = vmul.f32 %v15656_v11, %v3119_v9  ;;  %v3106_v25 = vadd.f32 0.2548296, %v3090_v39  ;;  %v3043_v62 = vadd.f32 1.4214138, %v3027_v23  ;;  %v3089_v2 = vmul.f32 %v17305_v31, %v3073_v51  ;;  %v13895_v9 = vpop.f32.mrf.mxu0 }
 0xac5   : > { %v3245_v41 = vadd.f32 1.0, %v3229_v26  ;;  %v3232_v45 = vmul.f32 %v3216_v4, %v17253_v33  ;;  %v3076_v44 = vadd.f32 -0.28449672, %v3060_v28  ;;  %v3262_v11 = vmul.f32 %v3246_v35, %v17225_v61  ;;  %v17346_v5 = vpop.eup %15663 }
 0xac6   : > { %v3215_v0 = vsub.f32 1.0, %v3199_v36  ;;  %v3122_v59 = vmul.f32 %v17295_v57, %v3106_v25  ;;  %v3059_v14 = vmul.f32 %v17320_v30, %v3043_v62  ;;  %v3105_v33 = vadd.f32 0.2548296, %v3089_v2  ;;  %v2816_v25 = vpop.f32.mrf.mxu0 }
 0xac7   : > { %v3261_v22 = vmul.f32 %v3245_v41, %v17227_v8  ;;  %v3092_v46 = vmul.f32 %v17314_v50, %v3076_v44  ;;  %v3248_v3 = vadd.f32 1.0, %v3232_v45  ;;  %v2998_v61 = vmul.f32 1.0614054, %v17346_v5  ;;  %v15666_v8 = vpop.eup %15665 }
 0xac8   : > { %v3231_v4 = vmul.f32 %v3215_v0, %v17263_v58  ;;  %v3202_v15 = vmul.f32 %v15658_v24, %v3122_v59  ;;  %v3075_v26 = vadd.f32 -0.28449672, %v3059_v14  ;;  %v3121_v35 = vmul.f32 %v17305_v31, %v3105_v33 }
 0xac9   : > { %13910 = vmatprep.mubr.msk.f32.mxu1 %vm1331_vm0, %v3261_v22  ;;  %v3108_v39 = vadd.f32 0.2548296, %v3092_v46  ;;  %v2949_v23 = vadd.f32 1.0, %v2933_v52  ;;  %v3014_v51 = vadd.f32 -1.4531521, %v2998_v61  ;;  %v3142_v28 = vsub.f32 0.0, %v17293_v55 }
 0xaca   : > { %v3247_v57 = vadd.f32 1.0, %v3231_v4  ;;  %13911 = vmatmul.mubr.msk.f32.vlgmr.msra.gmra.mxu1 %vm1331_vm0, %v3262_v11  ;;  %v3218_v58 = vsub.f32 1.0, %v3202_v15  ;;  %v3091_v36 = vmul.f32 %v17320_v30, %v3075_v26  ;;  %v3201_v41 = vmul.f32 %v15660_v47, %v3121_v35  ;;  %v13898_v4 = vpop.f32.mrf.mxu0 }
 0xacb   : > { %v3124_v45 = vmul.f32 %v17314_v50, %v3108_v39  ;;  %15667 = vrcp.f32 %v2949_v23  ;;  %v3264_v62 = vmul.f32 %v3248_v3, %v17241_v29  ;;  %v3030_v2 = vmul.f32 %v17346_v5, %v3014_v51 }
 0xacc   : > { %v3263_v24 = vmul.f32 %v3247_v57, %v17244_v43  ;;  %v3234_v31 = vmul.f32 %v3218_v58, %v17289_v21  ;;  %v3107_v0 = vadd.f32 0.2548296, %v3091_v36  ;;  %v21376_v44 = vmov -1.0   ;;  %v2826_v23 = vpop.f32.mrf.mxu0 }
 0xacd   : > { %v2897_v11 = vsel %vm2881_vm6, 1.0, %v21376_v44  ;;  %v3217_v22 = vsub.f32 1.0, %v3201_v41  ;;  %v3204_v59 = vmul.f32 %v15662_v54, %v3124_v45  ;;  %v17366_v43 = vadd.f32 %v13895_v9, %v17212_v19 }
 0xace   : > { %13913 = vmatprep.mubr.msk.f32.mxu1 %vm1331_vm0, %v3263_v24  ;;  %v2900_v29 = vsel %vm2884_vm7, 1.0, %v21376_v44  ;;  %v3123_v21 = vmul.f32 %v17320_v30, %v3107_v0  ;;  %v3046_v50 = vadd.f32 1.4214138, %v3030_v2  ;;  %v3158_v47 = vmul.f32 %v3142_v28, %v17293_v55 }
 0xacf   : > { %13914 = vmatmul.mubr.msk.f32.gmra.mxu1 %vm1331_vm0, %v3264_v62  ;;  %v3233_v56 = vmul.f32 %v3217_v22, %v2897_v11  ;;  %v3220_v14 = vsub.f32 1.0, %v3204_v59  ;;  %v17377_v54 = vmul.f32 0.70710677, %v17366_v43  ;;  %v3250_v33 = vadd.f32 1.0, %v3234_v31 }
 0xad0   : > { %v3203_v46 = vmul.f32 %v15666_v8, %v3123_v21  ;;  %v3062_v32 = vmul.f32 %v17346_v5, %v3046_v50  ;;  %v17381_v52 = vadd.f32 %v17212_v19, %v2816_v25  ;;  %v3141_v55 = vsub.f32 0.0, %v17337_v10 }
 0xad1   : > { %v3249_v30 = vadd.f32 1.0, %v3233_v56  ;;  %v3236_v9 = vmul.f32 %v3220_v14, %v2900_v29  ;;  %v2920_v3 = vand.u32 2147483647, %v17377_v54  ;;  %v2850_v15 = vmul.f32 0.5, %v17219_v48  ;;  %v13901_v29 = vpop.f32.mrf.mxu0 }
 0xad2   : > { %v3219_v26 = vsub.f32 1.0, %v3203_v46  ;;  %v3183_v61 = vmul.f32 1.442695, %v3158_v47  ;;  %v2851_v35 = vmul.f32 0.5, %v17250_v20  ;;  %v2899_v8 = vsel %vm2883_vm8, 1.0, %v21376_v44 }
 0xad3   : > { %v3265_v57 = vmul.f32 %v3249_v30, %v17265_v6  ;;  %v2936_v39 = vmul.f32 0.3275911, %v2920_v3  ;;  %v3266_v58 = vmul.f32 %v3250_v33, %v2850_v15  ;;  %v3078_v51 = vadd.f32 -0.28449672, %v3062_v32  ;;  %v2836_v30 = vpop.f32.mrf.mxu0 }
 0xad4   : > { %v3235_v36 = vmul.f32 %v3219_v26, %v2899_v8  ;;  %v17392_v28 = vmul.f32 0.70710677, %v17381_v52  ;;  %v3252_v24 = vadd.f32 1.0, %v3236_v9  ;;  %v3157_v48 = vmul.f32 %v3141_v55, %v17337_v10 }
 0xad5   : > { %v2952_v41 = vadd.f32 1.0, %v2936_v39  ;;  %v17396_v6 = vadd.f32 %v13898_v4, %v17212_v19  ;;  %13916 = vmatprep.mubr.msk.f32.mxu1 %vm1331_vm0, %v3265_v57  ;;  %15669 = vpow2.f32 %v3183_v61  ;;  %v17401_v45 = vadd.f32 %v17212_v19, %v2826_v23 }
 0xad6   : > { %v3251_v20 = vadd.f32 1.0, %v3235_v36  ;;  %v2919_v34 = vand.u32 2147483647, %v17392_v28  ;;  %13917 = vmatmul.mubr.msk.f32.gmra.mxu1 %vm1331_vm0, %v3266_v58  ;;  %v2852_v25 = vmul.f32 0.5, %v17236_v63  ;;  %v3094_v31 = vmul.f32 %v17346_v5, %v3078_v51 }
 0xad7   : > { %15671 = vrcp.f32 %v2952_v41  ;;  %v3181_v22 = vmul.f32 1.442695, %v3157_v48  ;;  %v17407_v59 = vmul.f32 0.70710677, %v17396_v6  ;;  %v17410_v50 = vmul.f32 0.70710677, %v17401_v45 }
 0xad8   : > { %v15668_v62 = vpop.eup %15667  ;;  %v3267_v10 = vmul.f32 %v3251_v20, %v2851_v35  ;;  %v2935_v0 = vmul.f32 0.3275911, %v2919_v34  ;;  %v3268_v2 = vmul.f32 %v3252_v24, %v2852_v25  ;;  %v3110_v56 = vadd.f32 0.2548296, %v3094_v31 }
 0xad9   : > { %v2997_v11 = vmul.f32 1.0614054, %v15668_v62  ;;  %v2922_v47 = vand.u32 2147483647, %v17407_v59  ;;  %v3144_v14 = vsub.f32 0.0, %v2920_v3  ;;  %v17416_v4 = vadd.f32 %v13901_v29, %v17212_v19 }
 0xada   : > { %v2951_v21 = vadd.f32 1.0, %v2935_v0  ;;  %13919 = vmatprep.mubr.msk.f32.mxu1 %vm1331_vm0, %v3267_v10  ;;  %v2921_v32 = vand.u32 2147483647, %v17410_v50  ;;  %v3126_v15 = vmul.f32 %v17346_v5, %v3110_v56  ;;  %v17424_v8 = vadd.f32 %v17212_v19, %v2836_v30 }
 0xadb   : > { %v3013_v63 = vadd.f32 -1.4531521, %v2997_v11  ;;  %13920 = vmatmul.mubr.msk.f32.gmra.mxu1 %vm1331_vm0, %v3268_v2  ;;  %v2938_v46 = vmul.f32 0.3275911, %v2922_v47  ;;  %v3160_v26 = vmul.f32 %v3144_v14, %v2920_v3  ;;  %v17421_v57 = vmul.f32 0.70710677, %v17416_v4 }
 0xadc   : > { %15673 = vrcp.f32 %v2951_v21  ;;  %v2937_v61 = vmul.f32 0.3275911, %v2921_v32  ;;  %v3143_v39 = vsub.f32 0.0, %v2919_v34  ;;  %v17432_v48 = vmul.f32 0.70710677, %v17424_v8 }
 0xadd   : > { %v3029_v33 = vmul.f32 %v15668_v62, %v3013_v63  ;;  %15675 = vpow2.f32 %v3181_v22  ;;  %v2954_v55 = vadd.f32 1.0, %v2938_v46  ;;  %v17427_v51 = vand.u32 2147483647, %v17421_v57 }
 0xade   : > { %v2953_v23 = vadd.f32 1.0, %v2937_v61  ;;  %v3187_v3 = vmul.f32 1.442695, %v3160_v26  ;;  %v3146_v19 = vsub.f32 0.0, %v2922_v47  ;;  %v3159_v10 = vmul.f32 %v3143_v39, %v2919_v34 }
 0xadf   : > { %v3045_v9 = vadd.f32 1.4214138, %v3029_v33  ;;  %15677 = vrcp.f32 %v2954_v55  ;;  %v2940_v25 = vmul.f32 0.3275911, %v17427_v51  ;;  %v17437_v31 = vand.u32 2147483647, %v17432_v48 }
 0xae0   : > { %15679 = vrcp.f32 %v2953_v23  ;;  %v3162_v14 = vmul.f32 %v3146_v19, %v2922_v47  ;;  %v3185_v46 = vmul.f32 1.442695, %v3159_v10  ;;  %v3145_v30 = vsub.f32 0.0, %v2921_v32 }
 0xae1   : > { %v3061_v35 = vmul.f32 %v15668_v62, %v3045_v9  ;;  %v2956_v11 = vadd.f32 1.0, %v2940_v25  ;;  %15681 = vpow2.f32 %v3187_v3  ;;  %v2939_v29 = vmul.f32 0.3275911, %v17437_v31 }
 0xae2   : > { %v15670_v58 = vpop.eup %15669  ;;  %v2902_v55 = vsel %vm2886_vm9, 1.0, %v21376_v44  ;;  %v3191_v47 = vmul.f32 1.442695, %v3162_v14  ;;  %v2901_v23 = vsel %vm2885_vm10, 1.0, %v21376_v44  ;;  %v2853_v25 = vmul.f32 0.5, %v17300_v40 }
 0xae3   : > { %v3077_v36 = vadd.f32 -0.28449672, %v3061_v35  ;;  %v3206_v5 = vmul.f32 %v15670_v58, %v3126_v15  ;;  %15683 = vrcp.f32 %v2956_v11  ;;  %v2955_v9 = vadd.f32 1.0, %v2939_v29 }
 0xae4   : > { %v17429_v24 = vpop.eup %15671  ;;  %vm2888_vm11 = vcmp.ge.f32.partialorder %v17377_v54, 0.0  ;;  %vm2887_vm12 = vcmp.ge.f32.partialorder %v17392_v28, 0.0  ;;  %vm2890_vm13 = vcmp.ge.f32.partialorder %v17407_v59, 0.0  ;;  %vm2889_vm14 = vcmp.ge.f32.partialorder %v17410_v50, 0.0 }
 0xae5   : > { %v3093_v41 = vmul.f32 %v15668_v62, %v3077_v36  ;;  %v3000_v20 = vmul.f32 1.0614054, %v17429_v24  ;;  %v3222_v22 = vsub.f32 1.0, %v3206_v5  ;;  %15685 = vrcp.f32 %v2955_v9 }
 0xae6   : > { %15687 = vpow2.f32 %v3185_v46  ;;  %v3161_v36 = vmul.f32 %v3145_v30, %v2921_v32  ;;  %vm2892_vm15 = vcmp.ge.f32.partialorder %v17421_v57, 0.0  ;;  %vm2891_vm1 = vcmp.ge.f32.partialorder %v17432_v48, 0.0 }
 0xae7   : > { %v3109_v0 = vadd.f32 0.2548296, %v3093_v41  ;;  %v3016_v2 = vadd.f32 -1.4531521, %v3000_v20  ;;  %v3238_v26 = vmul.f32 %v3222_v22, %v2902_v55  ;;  %v3148_v41 = vsub.f32 0.0, %v17427_v51 }
 0xae8   : > { %v2854_v20 = vmul.f32 0.5, %v17276_v42  ;;  %15689 = vpow2.f32 %v3191_v47 }
 0xae9   : > { %v17441_v21 = vpop.eup %15673  ;;  %v3125_v63 = vmul.f32 %v15668_v62, %v3109_v0  ;;  %v3032_v56 = vmul.f32 %v17429_v24, %v3016_v2  ;;  %v3254_v19 = vadd.f32 1.0, %v3238_v26  ;;  %v3164_v40 = vmul.f32 %v3148_v41, %v17427_v51 }
 0xaea   : > { %v15676_v34 = vpop.eup %15675  ;;  %v2999_v33 = vmul.f32 1.0614054, %v17441_v21 }
 0xaeb   : > { %v3205_v1 = vmul.f32 %v15676_v34, %v3125_v63  ;;  %v3048_v15 = vadd.f32 1.4214138, %v3032_v56  ;;  %v3189_v63 = vmul.f32 1.442695, %v3161_v36  ;;  %v3147_v56 = vsub.f32 0.0, %v17437_v31 }
 0xaec   : > { %v3015_v61 = vadd.f32 -1.4531521, %v2999_v33  ;;  %v17448_v39 = vpop.eup %15677  ;;  %v3270_v33 = vmul.f32 %v3254_v19, %v2854_v20 }
 0xaed   : > { %v3221_v62 = vsub.f32 1.0, %v3205_v1  ;;  %v3064_v35 = vmul.f32 %v17429_v24, %v3048_v15  ;;  %v3002_v13 = vmul.f32 1.0614054, %v17448_v39  ;;  %v17456_v0 = vpop.eup %15679  ;;  %15691 = vpow2.f32 %v3189_v63 }
 0xaee   : > { %v3031_v58 = vmul.f32 %v17441_v21, %v3015_v61  ;;  %v3001_v29 = vmul.f32 1.0614054, %v17456_v0  ;;  %v15682_v9 = vpop.eup %15681 }
 0xaef   : > { %v3237_v5 = vmul.f32 %v3221_v62, %v2901_v23  ;;  %v3080_v3 = vadd.f32 -0.28449672, %v3064_v35  ;;  %v3018_v22 = vadd.f32 -1.4531521, %v3002_v13  ;;  %v3163_v62 = vmul.f32 %v3147_v56, %v17437_v31 }
 0xaf0   : > { %v3047_v10 = vadd.f32 1.4214138, %v3031_v58  ;;  %v3017_v30 = vadd.f32 -1.4531521, %v3001_v29  ;;  %v17466_v15 = vpop.eup %15683 }
 0xaf1   : > { %v3253_v2 = vadd.f32 1.0, %v3237_v5  ;;  %v3096_v11 = vmul.f32 %v17429_v24, %v3080_v3  ;;  %v3034_v34 = vmul.f32 %v17448_v39, %v3018_v22  ;;  %v3004_v47 = vmul.f32 1.0614054, %v17466_v15 }
 0xaf2   : > { %v3063_v32 = vmul.f32 %v17441_v21, %v3047_v10  ;;  %v3033_v61 = vmul.f32 %v17456_v0, %v3017_v30  ;;  %v17475_v36 = vpop.eup %15685  ;;  %v3193_v19 = vmul.f32 1.442695, %v3163_v62  ;;  %v2904_v10 = vsel %vm2888_vm11, 1.0, %v21376_v44 }
 0xaf3   : > { %v3269_v14 = vmul.f32 %v3253_v2, %v2853_v25  ;;  %v3112_v42 = vadd.f32 0.2548296, %v3096_v11  ;;  %v3050_v1 = vadd.f32 1.4214138, %v3034_v34  ;;  %v3020_v13 = vadd.f32 -1.4531521, %v3004_v47  ;;  %v15688_v25 = vpop.eup %15687 }
 0xaf4   : > { %v3079_v46 = vadd.f32 -0.28449672, %v3063_v32  ;;  %v3049_v58 = vadd.f32 1.4214138, %v3033_v61  ;;  %v3003_v20 = vmul.f32 1.0614054, %v17475_v36 }
 0xaf5   : > { %v3128_v55 = vmul.f32 %v17429_v24, %v3112_v42  ;;  %13922 = vmatprep.mubr.msk.f32.mxu1 %vm1331_vm0, %v3269_v14  ;;  %v3066_v35 = vmul.f32 %v17448_v39, %v3050_v1  ;;  %v3195_v24 = vmul.f32 1.442695, %v3164_v40  ;;  %v3036_v54 = vmul.f32 %v17466_v15, %v3020_v13  ;;  %v15690_v56 = vpop.eup %15689 }
 0xaf6   : > { %v3095_v26 = vmul.f32 %v17441_v21, %v3079_v46  ;;  %13923 = vmatmul.mubr.msk.f32.gmra.mxu1 %vm1331_vm0, %v3270_v33  ;;  %v3065_v31 = vmul.f32 %v17456_v0, %v3049_v58  ;;  %v3019_v32 = vadd.f32 -1.4531521, %v3003_v20  ;;  %v2903_v40 = vsel %vm2887_vm12, 1.0, %v21376_v44 }
 0xaf7   : > { %v3208_v51 = vmul.f32 %v15682_v9, %v3128_v55  ;;  %v3082_v3 = vadd.f32 -0.28449672, %v3066_v35  ;;  %15693 = vpow2.f32 %v3195_v24  ;;  %v3052_v63 = vadd.f32 1.4214138, %v3036_v54 }
 0xaf8   : > { %v3111_v23 = vadd.f32 0.2548296, %v3095_v26  ;;  %v3081_v22 = vadd.f32 -0.28449672, %v3065_v31  ;;  %v3035_v34 = vmul.f32 %v17475_v36, %v3019_v32  ;;  %15695 = vpow2.f32 %v3193_v19 }
 0xaf9   : > { %v3224_v5 = vsub.f32 1.0, %v3208_v51  ;;  %v3098_v2 = vmul.f32 %v17448_v39, %v3082_v3  ;;  %v3068_v46 = vmul.f32 %v17466_v15, %v3052_v63  ;;  %v2855_v61 = vmul.f32 0.5, %v17381_v52 }
 0xafa   : > { %v3127_v41 = vmul.f32 %v17441_v21, %v3111_v23  ;;  %v3097_v42 = vmul.f32 %v17456_v0, %v3081_v22  ;;  %v3051_v9 = vadd.f32 1.4214138, %v3035_v34  ;;  %v15692_v47 = vpop.eup %15691  ;;  %v2906_v24 = vsel %vm2890_vm13, 1.0, %v21376_v44 }
 0xafb   : > { %v3240_v29 = vmul.f32 %v3224_v5, %v2904_v10  ;;  %v3114_v21 = vadd.f32 0.2548296, %v3098_v2  ;;  %v3084_v26 = vadd.f32 -0.28449672, %v3068_v46  ;;  %v2857_v54 = vmul.f32 0.5, %v17401_v45 }
 0xafc   : > { %v3207_v11 = vmul.f32 %v15688_v25, %v3127_v41  ;;  %v3113_v30 = vadd.f32 0.2548296, %v3097_v42  ;;  %v3067_v35 = vmul.f32 %v17475_v36, %v3051_v9  ;;  %v2907_v45 = vsel %vm2891_vm1, 1.0, %v21376_v44 }
 0xafd   : > { %v3130_v33 = vmul.f32 %v17448_v39, %v3114_v21  ;;  %v3256_v55 = vadd.f32 1.0, %v3240_v29  ;;  %v2856_v39 = vmul.f32 0.5, %v17366_v43  ;;  %v3100_v59 = vmul.f32 %v17466_v15, %v3084_v26 }
 0xafe   : > { %v3223_v14 = vsub.f32 1.0, %v3207_v11  ;;  %v3129_v51 = vmul.f32 %v17456_v0, %v3113_v30  ;;  %v3083_v3 = vadd.f32 -0.28449672, %v3067_v35  ;;  %v2905_v43 = vsel %vm2889_vm14, 1.0, %v21376_v44 }
 0xaff   : > { %v3210_v1 = vmul.f32 %v15690_v56, %v3130_v33  ;;  %v3272_v13 = vmul.f32 %v3256_v55, %v2856_v39  ;;  %v3116_v41 = vadd.f32 0.2548296, %v3100_v59  ;;  %v2858_v29 = vmul.f32 0.5, %v17396_v6 }
 0xb00   : > { %v3239_v28 = vmul.f32 %v3223_v14, %v2903_v40  ;;  %v3209_v5 = vmul.f32 %v15692_v47, %v3129_v51  ;;  %v3099_v0 = vmul.f32 %v17475_v36, %v3083_v3  ;;  %v2859_v6 = vmul.f32 0.5, %v17424_v8 }
 0xb01   : > { %v3226_v23 = vsub.f32 1.0, %v3210_v1  ;;  %v3132_v20 = vmul.f32 %v17466_v15, %v3116_v41  ;;  %v2908_v15 = vsel %vm2892_vm15, 1.0, %v21376_v44  ;;  %v2860_v33 = vmul.f32 0.5, %v17416_v4 }
 0xb02   : > { %v3255_v62 = vadd.f32 1.0, %v3239_v28  ;;  %v3225_v31 = vsub.f32 1.0, %v3209_v5  ;;  %v3115_v10 = vadd.f32 0.2548296, %v3099_v0 }
 0xb03   : > { %v3242_v52 = vmul.f32 %v3226_v23, %v2906_v24  ;;  %v12435_v24 = vld [vmem:[%s21307_s11 + $0x4] ss:$0 sm:$0xff] }
 0xb04   : > { %v3271_v58 = vmul.f32 %v3255_v62, %v2855_v61  ;;  %v15694_v19 = vpop.eup %15693  ;;  %v3241_v25 = vmul.f32 %v3225_v31, %v2905_v43  ;;  %v3131_v22 = vmul.f32 %v17475_v36, %v3115_v10  ;;  %v15866_v10 = vmov 0.0  }
 0xb05   : > { %v3258_v50 = vadd.f32 1.0, %v3242_v52  ;;  %v3212_v2 = vmul.f32 %v15694_v19, %v3132_v20  ;;  %v15696_v32 = vpop.eup %15695  ;;  %13934 = vmatprep.subr.mxu0 %v15866_v10  ;;  %13993 = vmatprep.subr.mxu1 %v15866_v10 }
 0xb06   : > { %13925 = vmatprep.mubr.msk.f32.mxu1 %vm1331_vm0, %v3271_v58  ;;  %v3257_v11 = vadd.f32 1.0, %v3241_v25  ;;  %v3211_v56 = vmul.f32 %v15696_v32, %v3131_v22  ;;  %13966 = vmatprep.mubr.msk.f32.mxu0 %vm15867_vm2, %v15866_v10 }
 0xb07   : > { %13926 = vmatmul.mubr.msk.f32.gmra.mxu1 %vm1331_vm0, %v3272_v13  ;;  %v3228_v21 = vsub.f32 1.0, %v3212_v2  ;;  %v3274_v14 = vmul.f32 %v3258_v50, %v2858_v29 }
 0xb08   : > { %v3273_v63 = vmul.f32 %v3257_v11, %v2857_v54  ;;  %v3227_v34 = vsub.f32 1.0, %v3211_v56 }
 0xb09   : > { %v3244_v42 = vmul.f32 %v3228_v21, %v2908_v15 }
 0xb0a   : > { %13928 = vmatprep.mubr.msk.f32.mxu1 %vm1331_vm0, %v3273_v63  ;;  %v3243_v57 = vmul.f32 %v3227_v34, %v2907_v45 }
 0xb0b   : > { %13929 = vmatmul.mubr.msk.f32.gmra.mxu1 %vm1331_vm0, %v3274_v14  ;;  %v3260_v36 = vadd.f32 1.0, %v3244_v42 }
 0xb0c   : > { %v3259_v40 = vadd.f32 1.0, %v3243_v57 }
 0xb0d   : > { %v3276_v28 = vmul.f32 %v3260_v36, %v2860_v33 }
 0xb0e   : > { %v3275_v46 = vmul.f32 %v3259_v40, %v2859_v6 }
 0xb10   : > { %13931 = vmatprep.mubr.msk.f32.mxu1 %vm1331_vm0, %v3275_v46  ;;  %v21378_v46 = vld [vmem:[#allocation7_spill] sm:$0xff] }
 0xb11   : > { %13932 = vmatmul.mubr.msk.f32.gmra.mxu1 %vm1331_vm0, %v3276_v28 }
 0xb12   : > { %14025 = vmatprep.mubr.msk.f32.mxu1 %vm15867_vm2, %v15866_v10 }
 0xb8a   : > { %v13912_v48 = vpop.f32.mrf.mxu1 }
 0xb8b   : > { %v3406_v54 = vadd.f32 %v13912_v48, %v12435_v24  ;;  %v21379_v48 = vld [vmem:[#allocation3_spill] sm:$0xff] }
 0xb8c   : > { %v3400_v30 = vpop.f32.mrf.mxu1 }
 0xb8d   : > { %v3401_v11 = vadd.f32 %v12435_v24, %v3400_v30 }
 0xb8f   : > { %v13915_v9 = vpop.f32.mrf.mxu1 }
 0xb90   : > { %v3416_v50 = vadd.f32 %v13915_v9, %v12435_v24 }
 0xb91   : > { %v3410_v55 = vpop.f32.mrf.mxu1 }
 0xb92   : > { %v3411_v2 = vadd.f32 %v12435_v24, %v3410_v55  ;;  %v21380_v55 = vld [vmem:[#allocation6_spill] sm:$0xff] }
 0xb96   : > { %v13918_v1 = vpop.f32.mrf.mxu1 }
 0xb97   : > { %v3426_v19 = vadd.f32 %v13918_v1, %v12435_v24 }
 0xb98   : > { %v3420_v26 = vpop.f32.mrf.mxu1 }
 0xb99   : > { %v3421_v25 = vadd.f32 %v12435_v24, %v3420_v26 }
 0xb9b   : > { %v13921_v61 = vpop.f32.mrf.mxu1 }
 0xb9c   : > { %v3436_v43 = vadd.f32 %v13921_v61, %v12435_v24  ;;  %v21381_v61 = vld [vmem:[#allocation8_spill] sm:$0xff] }
 0xb9d   : > { %v3430_v62 = vpop.f32.mrf.mxu1 }
 0xb9e   : > { %v3431_v20 = vadd.f32 %v12435_v24, %v3430_v62 }
 0xbb6   : > { %v13924_v51 = vpop.f32.mrf.mxu1 }
 0xbb7   : > { %v3446_v31 = vadd.f32 %v13924_v51, %v12435_v24 }
 0xbb8   : > { %v3440_v35 = vpop.f32.mrf.mxu1 }
 0xbb9   : > { %v3441_v0 = vadd.f32 %v12435_v24, %v3440_v35 }
 0xbc7   : > { %v13927_v8 = vpop.f32.mrf.mxu1 }
 0xbc8   : > { %v3456_v52 = vadd.f32 %v13927_v8, %v12435_v24 }
 0xbc9   : > { %v3450_v47 = vpop.f32.mrf.mxu1 }
 0xbca   : > { %v3451_v41 = vadd.f32 %v12435_v24, %v3450_v47 }
 0xbcb   : > { %v13930_v39 = vpop.f32.mrf.mxu1 }
 0xbcc   : > { %v3466_v3 = vadd.f32 %v13930_v39, %v12435_v24 }
 0xbcd   : > { %v3460_v4 = vpop.f32.mrf.mxu1 }
 0xbce   : > { %v3461_v13 = vadd.f32 %v12435_v24, %v3460_v4 }
 0xbd1   : > { %v13933_v23 = vpop.f32.mrf.mxu1 }
 0xbd2   : > { %v3476_v59 = vadd.f32 %v13933_v23, %v12435_v24 }
 0xbd3   : > { %v3470_v58 = vpop.f32.mrf.mxu1 }
 0xbd4   : > { %v3471_v5 = vadd.f32 %v12435_v24, %v3470_v58  ;;  %3525 = vrot.lane.b32.xlu0 %v3476_v59, %s21342_s0 }
 0xbd6   : > { %3523 = vrot.lane.b32.xlu1 %v3471_v5, %s21342_s0 }
 0xbd8   : > { %3521 = vrot.lane.b32.xlu0 %v3466_v3, %s21342_s0 }
 0xbda   : > { %3519 = vrot.lane.b32.xlu1 %v3461_v13, %s21342_s0 }
 0xbdc   : > { %3517 = vrot.lane.b32.xlu0 %v3456_v52, %s21342_s0 }
 0xbde   : > { %3515 = vrot.lane.b32.xlu1 %v3451_v41, %s21342_s0 }
 0xbe0   : > { %3513 = vrot.lane.b32.xlu0 %v3446_v31, %s21342_s0  ;;  %v3559_v31 = vld [vmem:[%s21382_s27] sm:$0xff] }
 0xbe2   : > { %3511 = vrot.lane.b32.xlu1 %v3441_v0, %s21342_s0  ;;  %v12452_v0 = vld [vmem:[%s21382_s27 + $0x48] sm:$0xff] }
 0xbe4   : > { %3509 = vrot.lane.b32.xlu0 %v3436_v43, %s21342_s0 }
 0xbe6   : > { %3507 = vrot.lane.b32.xlu1 %v3431_v20, %s21342_s0  ;;  %v3878_v20 = vld [vmem:[%s21308_s12 + $0x38] sm:$0xff] }
 0xbe8   : > { %3505 = vrot.lane.b32.xlu0 %v3426_v19, %s21342_s0  ;;  %v3745_v19 = vld [vmem:[%s21308_s12 + $0x18] sm:$0xff] }
 0xbea   : > { %3503 = vrot.lane.b32.xlu1 %v3421_v25, %s21342_s0  ;;  %v3560_v25 = vld [vmem:[%s21382_s27 + $0x8] sm:$0xff] }
 0xbec   : > { %3501 = vrot.lane.b32.xlu0 %v3416_v50, %s21342_s0  ;;  %v12453_v50 = vld [vmem:[%s21382_s27 + $0x50] sm:$0xff] }
 0xbee   : > { %3499 = vrot.lane.b32.xlu1 %v3411_v2, %s21342_s0  ;;  %v3877_v2 = vld [vmem:[%s21308_s12 + $0x30] sm:$0xff] }
 0xbf0   : > { %3497 = vrot.lane.b32.xlu0 %v3406_v54, %s21342_s0  ;;  %v3744_v54 = vld [vmem:[%s21308_s12 + $0x10] sm:$0xff] }
 0xbf2   : > { %3495 = vrot.lane.b32.xlu1 %v3401_v11, %s21342_s0  ;;  %v3561_v11 = vld [vmem:[%s21382_s27 + $0x10] sm:$0xff] }
 0xc46   : > { %v3526_v22 = vpop.permute.xlu0 %3525 }
 0xc47   : > { %v3558_v32 = vadd.f32 %v3526_v22, %v16954_v60  ;;  %v12454_v22 = vld [vmem:[%s21382_s27 + $0x58] sm:$0xff] }
 0xc48   : > { %v3524_v29 = vpop.permute.xlu1 %3523 }
 0xc49   : > { %v3557_v21 = vadd.f32 %v3524_v29, %v16959_v53  ;;  %3614 = vrot.lane.b32.xlu0 %v3558_v32, %s21342_s0  ;;  %v3876_v32 = vld [vmem:[%s21308_s12 + $0x28] sm:$0xff] }
 0xc4a   : > { %v3522_v63 = vpop.permute.xlu0 %3521  ;;  %v3743_v29 = vld [vmem:[%s21308_s12 + $0x8] sm:$0xff] }
 0xc4b   : > { %v3556_v15 = vadd.f32 %v3522_v63, %v16946_v38  ;;  %3612 = vrot.lane.b32.xlu1 %v3557_v21, %s21342_s0  ;;  %v3562_v21 = vld [vmem:[%s21382_s27 + $0x18] sm:$0xff]  ;;  %v12455_v63 = vld [vmem:[%s21382_s27 + $0x60] sm:$0xff] }
 0xc4c   : > { %v3520_v56 = vpop.permute.xlu1 %3519 }
 0xc4d   : > { %v3555_v14 = vadd.f32 %v3520_v56, %v16949_v7  ;;  %3610 = vrot.lane.b32.xlu0 %v3556_v15, %s21342_s0  ;;  %v3875_v15 = vld [vmem:[%s21308_s12 + $0x20] sm:$0xff] }
 0xc4e   : > { %v3518_v42 = vpop.permute.xlu0 %3517  ;;  %v3563_v56 = vld [vmem:[%s21382_s27 + $0x20] sm:$0xff] }
 0xc4f   : > { %v3554_v34 = vadd.f32 %v3518_v42, %v16936_v37  ;;  %3608 = vrot.lane.b32.xlu1 %v3555_v14, %s21342_s0  ;;  %v12456_v14 = vld [vmem:[%s21382_s27 + $0x68] sm:$0xff] }
 0xc50   : > { %v3516_v60 = vpop.permute.xlu1 %3515  ;;  %v3564_v42 = vld [vmem:[%s21382_s27 + $0x28] sm:$0xff] }
 0xc51   : > { %v3553_v53 = vadd.f32 %v3516_v60, %v16939_v27  ;;  %3606 = vrot.lane.b32.xlu0 %v3554_v34, %s21342_s0  ;;  %v12457_v34 = vld [vmem:[%s21382_s27 + $0x70] sm:$0xff] }
 0xc52   : > { %v3514_v45 = vpop.permute.xlu0 %3513  ;;  %v3565_v60 = vld [vmem:[%s21382_s27 + $0x30] sm:$0xff] }
 0xc53   : > { %v3552_v38 = vadd.f32 %v3514_v45, %v16926_v49  ;;  %3604 = vrot.lane.b32.xlu1 %v3553_v53, %s21342_s0  ;;  %v12458_v53 = vld [vmem:[%s21382_s27 + $0x78] sm:$0xff] }
 0xc54   : > { %v3512_v57 = vpop.permute.xlu1 %3511  ;;  %v3566_v45 = vld [vmem:[%s21382_s27 + $0x38] sm:$0xff] }
 0xc55   : > { %v3551_v7 = vadd.f32 %v3512_v57, %v16929_v18  ;;  %3602 = vrot.lane.b32.xlu0 %v3552_v38, %s21342_s0  ;;  %v12459_v38 = vld [vmem:[%s21382_s27 + $0x80] sm:$0xff] }
 0xc56   : > { %v3510_v36 = vpop.permute.xlu0 %3509  ;;  %v3567_v57 = vld [vmem:[%s21382_s27 + $0x40] sm:$0xff] }
 0xc57   : > { %v3550_v37 = vadd.f32 %v3510_v36, %v16916_v12  ;;  %3600 = vrot.lane.b32.xlu1 %v3551_v7, %s21342_s0  ;;  %v21377_v12 = vld [vmem:[#allocation2_spill] sm:$0xff]  ;;  %v12460_v7 = vld [vmem:[%s21382_s27 + $0x88] sm:$0xff] }
 0xc58   : > { %v3508_v6 = vpop.permute.xlu1 %3507  ;;  %v3742_v36 = vld [vmem:[%s21308_s12] sm:$0xff] }
 0xc59   : > { %v3549_v27 = vadd.f32 %v3508_v6, %v16919_v16  ;;  %3598 = vrot.lane.b32.xlu0 %v3550_v37, %s21342_s0 }
 0xc5a   : > { %v3506_v40 = vpop.permute.xlu0 %3505 }
 0xc5b   : > { %v3548_v49 = vadd.f32 %v3506_v40, %v16906_v17  ;;  %3596 = vrot.lane.b32.xlu1 %v3549_v27, %s21342_s0 }
 0xc5c   : > { %v3504_v18 = vpop.permute.xlu1 %3503 }
 0xc5d   : > { %v3547_v33 = vadd.f32 %v3504_v18, %v21377_v12  ;;  %3594 = vrot.lane.b32.xlu0 %v3548_v49, %s21342_s0 }
 0xc5e   : > { %v3502_v16 = vpop.permute.xlu0 %3501 }
 0xc5f   : > { %v3546_v28 = vadd.f32 %v3502_v16, %v21378_v46  ;;  %3592 = vrot.lane.b32.xlu1 %v3547_v33, %s21342_s0 }
 0xc60   : > { %v3500_v17 = vpop.permute.xlu1 %3499 }
 0xc61   : > { %v3545_v30 = vadd.f32 %v3500_v17, %v21379_v48  ;;  %3590 = vrot.lane.b32.xlu0 %v3546_v28, %s21342_s0 }
 0xc62   : > { %v3498_v9 = vpop.permute.xlu0 %3497 }
 0xc63   : > { %v3544_v1 = vadd.f32 %v3498_v9, %v21380_v55  ;;  %3588 = vrot.lane.b32.xlu1 %v3545_v30, %s21342_s0 }
 0xc64   : > { %v3496_v26 = vpop.permute.xlu1 %3495 }
 0xc65   : > { %v3543_v62 = vadd.f32 %v3496_v26, %v21381_v61  ;;  %3586 = vrot.lane.b32.xlu0 %v3544_v1, %s21342_s0 }
 0xc67   : > { %3584 = vrot.lane.b32.xlu1 %v3543_v62, %s21342_s0 }
 0xcbb   : > { %v17572_v51 = vpop.permute.xlu0 %3614 }
 0xcbc   : > { %13935 = vmatpush3.msra.mxu0 %v17572_v51  ;;  %13994 = vmatpush3.msra.mxu1 %v17572_v51 }
 0xcbd   : > { %13936 = vmatprep.subr.mxu0 %v15866_v10  ;;  %13995 = vmatprep.subr.mxu1 %v15866_v10  ;;  %v17578_v35 = vpop.permute.xlu1 %3612 }
 0xcbe   : > { %13937 = vmatpush3.msra.mxu0 %v17578_v35  ;;  %13996 = vmatpush3.msra.mxu1 %v17578_v35 }
 0xcbf   : > { %v17582_v8 = vpop.permute.xlu0 %3610  ;;  %13938 = vmatprep.subr.mxu0 %v15866_v10  ;;  %13997 = vmatprep.subr.mxu1 %v15866_v10 }
 0xcc0   : > { %13939 = vmatpush3.msra.mxu0 %v17582_v8  ;;  %13998 = vmatpush3.msra.mxu1 %v17582_v8 }
 0xcc1   : > { %13940 = vmatprep.subr.mxu0 %v15866_v10  ;;  %13999 = vmatprep.subr.mxu1 %v15866_v10  ;;  %v17590_v47 = vpop.permute.xlu1 %3608 }
 0xcc2   : > { %13941 = vmatpush3.msra.mxu0 %v17590_v47  ;;  %14000 = vmatpush3.msra.mxu1 %v17590_v47 }
 0xcc3   : > { %v17594_v39 = vpop.permute.xlu0 %3606  ;;  %13942 = vmatprep.subr.mxu0 %v15866_v10  ;;  %14001 = vmatprep.subr.mxu1 %v15866_v10 }
 0xcc4   : > { %13943 = vmatpush3.msra.mxu0 %v17594_v39  ;;  %14002 = vmatpush3.msra.mxu1 %v17594_v39 }
 0xcc5   : > { %13944 = vmatprep.subr.mxu0 %v15866_v10  ;;  %14003 = vmatprep.subr.mxu1 %v15866_v10  ;;  %v17602_v4 = vpop.permute.xlu1 %3604 }
 0xcc6   : > { %13945 = vmatpush3.msra.mxu0 %v17602_v4  ;;  %14004 = vmatpush3.msra.mxu1 %v17602_v4 }
 0xcc7   : > { %v17606_v24 = vpop.permute.xlu0 %3602  ;;  %13946 = vmatprep.subr.mxu0 %v15866_v10  ;;  %14005 = vmatprep.subr.mxu1 %v15866_v10 }
 0xcc8   : > { %13947 = vmatpush3.msra.mxu0 %v17606_v24  ;;  %14006 = vmatpush3.msra.mxu1 %v17606_v24 }
 0xcc9   : > { %13948 = vmatprep.subr.mxu0 %v15866_v10  ;;  %14007 = vmatprep.subr.mxu1 %v15866_v10  ;;  %v17614_v23 = vpop.permute.xlu1 %3600 }
 0xcca   : > { %13949 = vmatpush3.msra.mxu0 %v17614_v23  ;;  %14008 = vmatpush3.msra.mxu1 %v17614_v23 }
 0xccb   : > { %v17618_v59 = vpop.permute.xlu0 %3598  ;;  %13950 = vmatprep.subr.mxu0 %v15866_v10  ;;  %14009 = vmatprep.subr.mxu1 %v15866_v10 }
 0xccc   : > { %13951 = vmatpush3.msra.mxu0 %v17618_v59  ;;  %14010 = vmatpush3.msra.mxu1 %v17618_v59 }
 0xccd   : > { %13952 = vmatprep.subr.mxu0 %v15866_v10  ;;  %14011 = vmatprep.subr.mxu1 %v15866_v10  ;;  %v17626_v58 = vpop.permute.xlu1 %3596 }
 0xcce   : > { %13953 = vmatpush3.msra.mxu0 %v17626_v58  ;;  %14012 = vmatpush3.msra.mxu1 %v17626_v58 }
 0xccf   : > { %v17630_v5 = vpop.permute.xlu0 %3594  ;;  %13954 = vmatprep.subr.mxu0 %v15866_v10  ;;  %14013 = vmatprep.subr.mxu1 %v15866_v10 }
 0xcd0   : > { %13955 = vmatpush3.msra.mxu0 %v17630_v5  ;;  %14014 = vmatpush3.msra.mxu1 %v17630_v5 }
 0xcd1   : > { %13956 = vmatprep.subr.mxu0 %v15866_v10  ;;  %14015 = vmatprep.subr.mxu1 %v15866_v10  ;;  %v17638_v3 = vpop.permute.xlu1 %3592 }
 0xcd2   : > { %13957 = vmatpush3.msra.mxu0 %v17638_v3  ;;  %14016 = vmatpush3.msra.mxu1 %v17638_v3 }
 0xcd3   : > { %v17642_v13 = vpop.permute.xlu0 %3590  ;;  %13958 = vmatprep.subr.mxu0 %v15866_v10  ;;  %14017 = vmatprep.subr.mxu1 %v15866_v10 }
 0xcd4   : > { %13959 = vmatpush3.msra.mxu0 %v17642_v13  ;;  %14018 = vmatpush3.msra.mxu1 %v17642_v13 }
 0xcd5   : > { %13960 = vmatprep.subr.mxu0 %v15866_v10  ;;  %14019 = vmatprep.subr.mxu1 %v15866_v10  ;;  %v17650_v52 = vpop.permute.xlu1 %3588 }
 0xcd6   : > { %13961 = vmatpush3.msra.mxu0 %v17650_v52  ;;  %14020 = vmatpush3.msra.mxu1 %v17650_v52 }
 0xcd7   : > { %v17654_v41 = vpop.permute.xlu0 %3586  ;;  %13962 = vmatprep.subr.mxu0 %v15866_v10  ;;  %14021 = vmatprep.subr.mxu1 %v15866_v10 }
 0xcd8   : > { %13963 = vmatpush3.msra.mxu0 %v17654_v41  ;;  %14022 = vmatpush3.msra.mxu1 %v17654_v41 }
 0xcd9   : > { %13964 = vmatprep.subr.mxu0 %v15866_v10  ;;  %14023 = vmatprep.subr.mxu1 %v15866_v10  ;;  %v17668_v43 = vpop.permute.xlu1 %3584 }
 0xcda   : > { %13965 = vmatpush3.msra.mxu0 %v17668_v43  ;;  %14024 = vmatpush3.msra.mxu1 %v17668_v43 }
 0xcdb   : > { %13967 = vmatmul.mubr.f32.vlgmr.msra.gmra.mxu0 %v3559_v31  ;;  %14026 = vmatmul.mubr.f32.vlgmr.msra.gmra.mxu1 %v12452_v0 }
 0xcdc   : > { %13969 = vmatprep.mubr.msk.f32.mxu0 %vm15867_vm2, %v15866_v10  ;;  %14028 = vmatprep.mubr.msk.f32.mxu1 %vm15867_vm2, %v15866_v10 }
 0xcdd   : > { %14052 = vmatprep.subr.mxu0 %v15866_v10  ;;  %14087 = vmatprep.subr.mxu1 %v15866_v10 }
 0xcde   : > { %14053 = vmatpush3.msra.mxu0 %v3878_v20  ;;  %14088 = vmatpush3.msra.mxu1 %v3745_v19 }
 0xcdf   : > { %13970 = vmatmul.mubr.f32.gmra.mxu0 %v3560_v25  ;;  %14029 = vmatmul.mubr.f32.gmra.mxu1 %v12453_v50 }
 0xce0   : > { %13972 = vmatprep.mubr.msk.f32.mxu0 %vm15867_vm2, %v15866_v10  ;;  %14031 = vmatprep.mubr.msk.f32.mxu1 %vm15867_vm2, %v15866_v10 }
 0xce1   : > { %14054 = vmatprep.subr.mxu0 %v15866_v10  ;;  %14089 = vmatprep.subr.mxu1 %v15866_v10 }
 0xce2   : > { %14055 = vmatpush3.msra.mxu0 %v3877_v2  ;;  %14090 = vmatpush3.msra.mxu1 %v3744_v54 }
 0xce3   : > { %13973 = vmatmul.mubr.f32.gmra.mxu0 %v3561_v11  ;;  %14032 = vmatmul.mubr.f32.gmra.mxu1 %v12454_v22 }
 0xce4   : > { %13975 = vmatprep.mubr.msk.f32.mxu0 %vm15867_vm2, %v15866_v10  ;;  %14034 = vmatprep.mubr.msk.f32.mxu1 %vm15867_vm2, %v15866_v10 }
 0xce5   : > { %14056 = vmatprep.subr.mxu0 %v15866_v10  ;;  %14091 = vmatprep.subr.mxu1 %v15866_v10 }
 0xce6   : > { %14057 = vmatpush3.msra.mxu0 %v3876_v32  ;;  %14092 = vmatpush3.msra.mxu1 %v3743_v29 }
 0xce7   : > { %13976 = vmatmul.mubr.f32.gmra.mxu0 %v3562_v21  ;;  %14035 = vmatmul.mubr.f32.gmra.mxu1 %v12455_v63 }
 0xce8   : > { %13978 = vmatprep.mubr.msk.f32.mxu0 %vm15867_vm2, %v15866_v10  ;;  %14037 = vmatprep.mubr.msk.f32.mxu1 %vm15867_vm2, %v15866_v10 }
 0xce9   : > { %14058 = vmatprep.subr.mxu0 %v15866_v10  ;;  %14093 = vmatprep.subr.mxu1 %v15866_v10 }
 0xcea   : > { %14059 = vmatpush3.msra.mxu0 %v3875_v15  ;;  %14094 = vmatpush3.msra.mxu1 %v3742_v36 }
 0xceb   : > { %13979 = vmatmul.mubr.f32.gmra.mxu0 %v3563_v56  ;;  %14038 = vmatmul.mubr.f32.gmra.mxu1 %v12456_v14 }
 0xcec   : > { %13981 = vmatprep.mubr.msk.f32.mxu0 %vm15867_vm2, %v15866_v10  ;;  %14040 = vmatprep.mubr.msk.f32.mxu1 %vm15867_vm2, %v15866_v10 }
 0xced   : > { %14122 = vmatprep.subr.mxu0 %v15866_v10  ;;  %14181 = vmatprep.subr.mxu1 %v15866_v10 }
 0xcef   : > { %13982 = vmatmul.mubr.f32.gmra.mxu0 %v3564_v42  ;;  %14041 = vmatmul.mubr.f32.gmra.mxu1 %v12457_v34 }
 0xcf0   : > { %13984 = vmatprep.mubr.msk.f32.mxu0 %vm15867_vm2, %v15866_v10  ;;  %14043 = vmatprep.mubr.msk.f32.mxu1 %vm15867_vm2, %v15866_v10 }
 0xcf3   : > { %13985 = vmatmul.mubr.f32.gmra.mxu0 %v3565_v60  ;;  %14044 = vmatmul.mubr.f32.gmra.mxu1 %v12458_v53 }
 0xcf4   : > { %13987 = vmatprep.mubr.msk.f32.mxu0 %vm15867_vm2, %v15866_v10  ;;  %14046 = vmatprep.mubr.msk.f32.mxu1 %vm15867_vm2, %v15866_v10 }
 0xcf7   : > { %13988 = vmatmul.mubr.f32.gmra.mxu0 %v3566_v45  ;;  %14047 = vmatmul.mubr.f32.gmra.mxu1 %v12459_v38 }
 0xcf8   : > { %13990 = vmatprep.mubr.msk.f32.mxu0 %vm15867_vm2, %v15866_v10  ;;  %14049 = vmatprep.mubr.msk.f32.mxu1 %vm15867_vm2, %v15866_v10 }
 0xcfb   : > { %13991 = vmatmul.mubr.f32.gmra.mxu0 %v3567_v57  ;;  %14050 = vmatmul.mubr.f32.gmra.mxu1 %v12460_v7 }
 0xcfc   : > { %14060 = vmatprep.mubr.msk.f32.mxu0 %vm15867_vm2, %v15866_v10  ;;  %14095 = vmatprep.mubr.msk.f32.mxu1 %vm15867_vm2, %v15866_v10 }
 0xd9b   : > { %v3698_v37 = vpop.f32.mrf.mxu0  ;;  %v3831_v6 = vpop.f32.mrf.mxu1 }
 0xd9c   : > { %v3746_v27 = vmul.f32 %v3698_v37, %v3698_v37  ;;  %v17790_v40 = vadd.f32 %v3831_v6, %v3698_v37  ;;  %v4162_v49 = vmul.f32 %v3831_v6, %v3831_v6  ;;  %14061 = vmatmul.mubr.msk.f32.vlgmr.msra.gmra.mxu0 %vm1331_vm0, %v3831_v6  ;;  %14096 = vmatmul.mubr.msk.f32.vlgmr.msra.gmra.mxu1 %vm1331_vm0, %v3698_v37 }
 0xd9d   : > { %14123 = vmatpush3.msra.mxu0 %v17572_v51  ;;  %v13968_v18 = vpop.f32.mrf.mxu0  ;;  %v14027_v12 = vpop.f32.mrf.mxu1  ;;  %14063 = vmatprep.mubr.msk.f32.mxu0 %vm15867_vm2, %v15866_v10 }
 0xd9e   : > { %v17797_v33 = vadd.f32 %v4162_v49, %v3746_v27  ;;  %14124 = vmatprep.subr.mxu0 %v15866_v10  ;;  %14098 = vmatprep.mubr.msk.f32.mxu1 %vm15867_vm2, %v15866_v10 }
 0xd9f   : > { %14125 = vmatpush3.msra.mxu0 %v17578_v35  ;;  %v3703_v16 = vpop.f32.mrf.mxu0  ;;  %v3836_v46 = vpop.f32.mrf.mxu1 }
 0xda0   : > { %v3747_v28 = vmul.f32 %v3703_v16, %v3703_v16  ;;  %v17803_v17 = vadd.f32 %v3836_v46, %v3703_v16  ;;  %v4163_v48 = vmul.f32 %v3836_v46, %v3836_v46  ;;  %14126 = vmatprep.subr.mxu0 %v15866_v10  ;;  %14064 = vmatmul.mubr.msk.f32.gmra.mxu0 %vm1331_vm0, %v3836_v46 }
 0xda1   : > { %14099 = vmatmul.mubr.msk.f32.gmra.mxu1 %vm1331_vm0, %v3703_v16  ;;  %14127 = vmatpush3.msra.mxu0 %v17582_v8  ;;  %v13971_v30 = vpop.f32.mrf.mxu0  ;;  %v14030_v9 = vpop.f32.mrf.mxu1 }
 0xda2   : > { %v17809_v55 = vadd.f32 %v4163_v48, %v3747_v28  ;;  %14128 = vmatprep.subr.mxu0 %v15866_v10  ;;  %14066 = vmatprep.mubr.msk.f32.mxu0 %vm15867_vm2, %v15866_v10 }
 0xda3   : > { %14129 = vmatpush3.msra.mxu0 %v17590_v47  ;;  %v3708_v1 = vpop.f32.mrf.mxu0  ;;  %v3841_v26 = vpop.f32.mrf.mxu1  ;;  %14101 = vmatprep.mubr.msk.f32.mxu1 %vm15867_vm2, %v15866_v10 }
 0xda4   : > { %v3748_v61 = vmul.f32 %v3708_v1, %v3708_v1  ;;  %v17817_v62 = vadd.f32 %v3841_v26, %v3708_v1  ;;  %v4164_v31 = vmul.f32 %v3841_v26, %v3841_v26  ;;  %14130 = vmatprep.subr.mxu0 %v15866_v10  ;;  %14067 = vmatmul.mubr.msk.f32.gmra.mxu0 %vm1331_vm0, %v3841_v26 }
 0xda5   : > { %14102 = vmatmul.mubr.msk.f32.gmra.mxu1 %vm1331_vm0, %v3708_v1  ;;  %14131 = vmatpush3.msra.mxu0 %v17594_v39  ;;  %v13974_v0 = vpop.f32.mrf.mxu0  ;;  %v14033_v20 = vpop.f32.mrf.mxu1 }
 0xda6   : > { %v17823_v19 = vadd.f32 %v4164_v31, %v3748_v61  ;;  %14132 = vmatprep.subr.mxu0 %v15866_v10  ;;  %14069 = vmatprep.mubr.msk.f32.mxu0 %vm15867_vm2, %v15866_v10 }
 0xda7   : > { %14133 = vmatpush3.msra.mxu0 %v17602_v4  ;;  %v3713_v25 = vpop.f32.mrf.mxu0  ;;  %v3846_v50 = vpop.f32.mrf.mxu1  ;;  %14104 = vmatprep.mubr.msk.f32.mxu1 %vm15867_vm2, %v15866_v10 }
 0xda8   : > { %v3749_v2 = vmul.f32 %v3713_v25, %v3713_v25  ;;  %v17831_v54 = vadd.f32 %v3846_v50, %v3713_v25  ;;  %v4165_v11 = vmul.f32 %v3846_v50, %v3846_v50  ;;  %14134 = vmatprep.subr.mxu0 %v15866_v10  ;;  %14070 = vmatmul.mubr.msk.f32.gmra.mxu0 %vm1331_vm0, %v3846_v50 }
 0xda9   : > { %14105 = vmatmul.mubr.msk.f32.gmra.mxu1 %vm1331_vm0, %v3713_v25  ;;  %14135 = vmatpush3.msra.mxu0 %v17606_v24  ;;  %v13977_v22 = vpop.f32.mrf.mxu0  ;;  %v14036_v32 = vpop.f32.mrf.mxu1 }
 0xdaa   : > { %v17837_v29 = vadd.f32 %v4165_v11, %v3749_v2  ;;  %14136 = vmatprep.subr.mxu0 %v15866_v10  ;;  %14072 = vmatprep.mubr.msk.f32.mxu0 %vm15867_vm2, %v15866_v10 }
 0xdab   : > { %14137 = vmatpush3.msra.mxu0 %v17614_v23  ;;  %v3718_v21 = vpop.f32.mrf.mxu0  ;;  %v3851_v63 = vpop.f32.mrf.mxu1  ;;  %14107 = vmatprep.mubr.msk.f32.mxu1 %vm15867_vm2, %v15866_v10 }
 0xdac   : > { %v3750_v15 = vmul.f32 %v3718_v21, %v3718_v21  ;;  %v17845_v56 = vadd.f32 %v3851_v63, %v3718_v21  ;;  %v4166_v14 = vmul.f32 %v3851_v63, %v3851_v63  ;;  %14138 = vmatprep.subr.mxu0 %v15866_v10  ;;  %14073 = vmatmul.mubr.msk.f32.gmra.mxu0 %vm1331_vm0, %v3851_v63 }
 0xdad   : > { %14108 = vmatmul.mubr.msk.f32.gmra.mxu1 %vm1331_vm0, %v3718_v21  ;;  %14139 = vmatpush3.msra.mxu0 %v17618_v59  ;;  %v13980_v42 = vpop.f32.mrf.mxu0  ;;  %v14039_v34 = vpop.f32.mrf.mxu1  ;;  %v12479_v21 = vld [vmem:[%s21382_s27 + $0x90] sm:$0xff] }
 0xdae   : > { %v17851_v60 = vadd.f32 %v4166_v14, %v3750_v15  ;;  %14140 = vmatprep.subr.mxu0 %v15866_v10  ;;  %14075 = vmatprep.mubr.msk.f32.mxu0 %vm15867_vm2, %v15866_v10  ;;  %v12480_v14 = vld [vmem:[%s21382_s27 + $0x98] sm:$0xff]  ;;  %v12481_v42 = vld [vmem:[%s21382_s27 + $0xa0] sm:$0xff]  ;;  %v12482_v34 = vld [vmem:[%s21382_s27 + $0xa8] sm:$0xff] }
 0xdaf   : > { %14141 = vmatpush3.msra.mxu0 %v17626_v58  ;;  %v3723_v53 = vpop.f32.mrf.mxu0  ;;  %v3856_v45 = vpop.f32.mrf.mxu1  ;;  %14110 = vmatprep.mubr.msk.f32.mxu1 %vm15867_vm2, %v15866_v10 }
 0xdb0   : > { %v3751_v38 = vmul.f32 %v3723_v53, %v3723_v53  ;;  %v17859_v57 = vadd.f32 %v3856_v45, %v3723_v53  ;;  %v4167_v7 = vmul.f32 %v3856_v45, %v3856_v45  ;;  %14142 = vmatprep.subr.mxu0 %v15866_v10  ;;  %14076 = vmatmul.mubr.msk.f32.gmra.mxu0 %vm1331_vm0, %v3856_v45  ;;  %v12484_v45 = vld [vmem:[%s21382_s27 + $0xb8] sm:$0xff] }
 0xdb1   : > { %14111 = vmatmul.mubr.msk.f32.gmra.mxu1 %vm1331_vm0, %v3723_v53  ;;  %14143 = vmatpush3.msra.mxu0 %v17630_v5  ;;  %v13983_v36 = vpop.f32.mrf.mxu0  ;;  %v14042_v37 = vpop.f32.mrf.mxu1  ;;  %v12483_v53 = vld [vmem:[%s21382_s27 + $0xb0] sm:$0xff] }
 0xdb2   : > { %v17865_v6 = vadd.f32 %v4167_v7, %v3751_v38  ;;  %14144 = vmatprep.subr.mxu0 %v15866_v10  ;;  %14078 = vmatprep.mubr.msk.f32.mxu0 %vm15867_vm2, %v15866_v10  ;;  %v12485_v38 = vld [vmem:[%s21382_s27 + $0xc0] sm:$0xff]  ;;  %v12486_v7 = vld [vmem:[%s21382_s27 + $0xc8] sm:$0xff]  ;;  %v12487_v36 = vld [vmem:[%s21382_s27 + $0xd0] sm:$0xff] }
 0xdb3   : > { %14145 = vmatpush3.msra.mxu0 %v17638_v3  ;;  %v3728_v27 = vpop.f32.mrf.mxu0  ;;  %v3861_v49 = vpop.f32.mrf.mxu1  ;;  %14113 = vmatprep.mubr.msk.f32.mxu1 %vm15867_vm2, %v15866_v10  ;;  %v12497_v37 = vld [vmem:[%s21382_s27 + $0xd8] sm:$0xff] }
 0xdb4   : > { %v3752_v18 = vmul.f32 %v3728_v27, %v3728_v27  ;;  %v17873_v12 = vadd.f32 %v3861_v49, %v3728_v27  ;;  %v4168_v16 = vmul.f32 %v3861_v49, %v3861_v49  ;;  %14146 = vmatprep.subr.mxu0 %v15866_v10  ;;  %14079 = vmatmul.mubr.msk.f32.gmra.mxu0 %vm1331_vm0, %v3861_v49  ;;  %v12499_v49 = vld [vmem:[%s21382_s27 + $0xe8] sm:$0xff] }
 0xdb5   : > { %14114 = vmatmul.mubr.msk.f32.gmra.mxu1 %vm1331_vm0, %v3728_v27  ;;  %14147 = vmatpush3.msra.mxu0 %v17642_v13  ;;  %v13986_v46 = vpop.f32.mrf.mxu0  ;;  %v14045_v28 = vpop.f32.mrf.mxu1  ;;  %v12498_v27 = vld [vmem:[%s21382_s27 + $0xe0] sm:$0xff] }
 0xdb6   : > { %v17879_v48 = vadd.f32 %v4168_v16, %v3752_v18  ;;  %14148 = vmatprep.subr.mxu0 %v15866_v10  ;;  %14081 = vmatprep.mubr.msk.f32.mxu0 %vm15867_vm2, %v15866_v10  ;;  %v12500_v18 = vld [vmem:[%s21382_s27 + $0xf0] sm:$0xff]  ;;  %v4303_v16 = vld [vmem:[%s21308_s12 + $0x58] sm:$0xff]  ;;  %v12502_v28 = vld [vmem:[%s21382_s27 + $0x100] sm:$0xff] }
 0xdb7   : > { %14149 = vmatpush3.msra.mxu0 %v17650_v52  ;;  %v3733_v30 = vpop.f32.mrf.mxu0  ;;  %v3866_v9 = vpop.f32.mrf.mxu1  ;;  %14116 = vmatprep.mubr.msk.f32.mxu1 %vm15867_vm2, %v15866_v10  ;;  %v12501_v46 = vld [vmem:[%s21382_s27 + $0xf8] sm:$0xff] }
 0xdb8   : > { %v3753_v1 = vmul.f32 %v3733_v30, %v3733_v30  ;;  %v17887_v26 = vadd.f32 %v3866_v9, %v3733_v30  ;;  %v4169_v61 = vmul.f32 %v3866_v9, %v3866_v9  ;;  %14150 = vmatprep.subr.mxu0 %v15866_v10  ;;  %14082 = vmatmul.mubr.msk.f32.gmra.mxu0 %vm1331_vm0, %v3866_v9  ;;  %v4302_v9 = vld [vmem:[%s21308_s12 + $0x50] sm:$0xff] }
 0xdb9   : > { %14117 = vmatmul.mubr.msk.f32.gmra.mxu1 %vm1331_vm0, %v3733_v30  ;;  %14151 = vmatpush3.msra.mxu0 %v17654_v41  ;;  %v13989_v31 = vpop.f32.mrf.mxu0  ;;  %v14048_v0 = vpop.f32.mrf.mxu1  ;;  %v12503_v30 = vld [vmem:[%s21382_s27 + $0x108] sm:$0xff] }
 0xdba   : > { %v17893_v20 = vadd.f32 %v4169_v61, %v3753_v1  ;;  %14152 = vmatprep.subr.mxu0 %v15866_v10  ;;  %14084 = vmatprep.mubr.msk.f32.mxu0 %vm15867_vm2, %v15866_v10  ;;  %v12504_v1 = vld [vmem:[%s21382_s27 + $0x110] sm:$0xff]  ;;  %v4301_v61 = vld [vmem:[%s21308_s12 + $0x48] sm:$0xff]  ;;  %v4300_v31 = vld [vmem:[%s21308_s12 + $0x40] sm:$0xff] }
 0xdbb   : > { %14153 = vmatpush3.msra.mxu0 %v17668_v43  ;;  %v3738_v25 = vpop.f32.mrf.mxu0  ;;  %v3871_v50 = vpop.f32.mrf.mxu1  ;;  %14119 = vmatprep.mubr.msk.f32.mxu1 %vm15867_vm2, %v15866_v10  ;;  %v12505_v0 = vld [vmem:[%s21382_s27 + $0x118] sm:$0xff] }
 0xdbc   : > { %v3754_v2 = vmul.f32 %v3738_v25, %v3738_v25  ;;  %v17901_v11 = vadd.f32 %v3871_v50, %v3738_v25  ;;  %v4170_v22 = vmul.f32 %v3871_v50, %v3871_v50  ;;  %14085 = vmatmul.mubr.msk.f32.gmra.mxu0 %vm1331_vm0, %v3871_v50  ;;  %14216 = vmatprep.subr.mxu0 %v15866_v10  ;;  %v12516_v50 = vld [vmem:[%s21382_s27 + $0x128] sm:$0xff] }
 0xdbd   : > { %14120 = vmatmul.mubr.msk.f32.gmra.mxu1 %vm1331_vm0, %v3738_v25  ;;  %v14051_v32 = vpop.f32.mrf.mxu1  ;;  %14154 = vmatprep.mubr.msk.f32.mxu0 %vm15867_vm2, %v15866_v10  ;;  %v13992_v63 = vpop.f32.mrf.mxu0  ;;  %v12515_v25 = vld [vmem:[%s21382_s27 + $0x120] sm:$0xff] }
 0xdbe   : > { %v17911_v15 = vadd.f32 %v4170_v22, %v3754_v2  ;;  %14189 = vmatprep.mubr.msk.f32.mxu1 %vm15867_vm2, %v15866_v10  ;;  %14182 = vmatpush3.msra.mxu1 %v4303_v16  ;;  %v12517_v2 = vld [vmem:[%s21382_s27 + $0x130] sm:$0xff]  ;;  %v12518_v22 = vld [vmem:[%s21382_s27 + $0x138] sm:$0xff]  ;;  %v12519_v32 = vld [vmem:[%s21382_s27 + $0x140] sm:$0xff] }
 0xdbf   : > { %14183 = vmatprep.subr.mxu1 %v15866_v10  ;;  %v12521_v63 = vld [vmem:[%s21382_s27 + $0x150] sm:$0xff]  ;;  %v12552_v16 = vld [vmem:[%s21382_s27 + $0x1b8] sm:$0xff] }
 0xdc0   : > { %14155 = vmatmul.mubr.f32.vlgmr.msra.gmra.mxu0 %v12479_v21  ;;  %14184 = vmatpush3.msra.mxu1 %v4302_v9  ;;  %v12520_v21 = vld [vmem:[%s21382_s27 + $0x148] sm:$0xff] }
 0xdc1   : > { %14217 = vmatpush3.msra.mxu0 %v17572_v51  ;;  %14157 = vmatprep.mubr.msk.f32.mxu0 %vm15867_vm2, %v15866_v10 }
 0xdc2   : > { %14218 = vmatprep.subr.mxu0 %v15866_v10  ;;  %14185 = vmatprep.subr.mxu1 %v15866_v10 }
 0xdc3   : > { %14219 = vmatpush3.msra.mxu0 %v17578_v35  ;;  %14186 = vmatpush3.msra.mxu1 %v4301_v61  ;;  %v12555_v61 = vld [vmem:[%s21382_s27 + $0x1d0] sm:$0xff] }
 0xdc4   : > { %14220 = vmatprep.subr.mxu0 %v15866_v10  ;;  %14158 = vmatmul.mubr.f32.gmra.mxu0 %v12480_v14  ;;  %v12522_v14 = vld [vmem:[%s21382_s27 + $0x158] sm:$0xff] }
 0xdc5   : > { %14221 = vmatpush3.msra.mxu0 %v17582_v8  ;;  %14160 = vmatprep.mubr.msk.f32.mxu0 %vm15867_vm2, %v15866_v10 }
 0xdc6   : > { %14222 = vmatprep.subr.mxu0 %v15866_v10  ;;  %14187 = vmatprep.subr.mxu1 %v15866_v10 }
 0xdc7   : > { %14223 = vmatpush3.msra.mxu0 %v17590_v47  ;;  %14188 = vmatpush3.msra.mxu1 %v4300_v31 }
 0xdc8   : > { %14224 = vmatprep.subr.mxu0 %v15866_v10  ;;  %14161 = vmatmul.mubr.f32.gmra.mxu0 %v12481_v42  ;;  %v12523_v42 = vld [vmem:[%s21382_s27 + $0x160] sm:$0xff] }
 0xdc9   : > { %14225 = vmatpush3.msra.mxu0 %v17594_v39  ;;  %14163 = vmatprep.mubr.msk.f32.mxu0 %vm15867_vm2, %v15866_v10 }
 0xdca   : > { %14226 = vmatprep.subr.mxu0 %v15866_v10  ;;  %14275 = vmatprep.subr.mxu1 %v15866_v10 }
 0xdcb   : > { %14227 = vmatpush3.msra.mxu0 %v17602_v4 }
 0xdcc   : > { %14228 = vmatprep.subr.mxu0 %v15866_v10  ;;  %14164 = vmatmul.mubr.f32.gmra.mxu0 %v12482_v34  ;;  %v12533_v34 = vld [vmem:[%s21382_s27 + $0x168] sm:$0xff] }
 0xdcd   : > { %14229 = vmatpush3.msra.mxu0 %v17606_v24  ;;  %14166 = vmatprep.mubr.msk.f32.mxu0 %vm15867_vm2, %v15866_v10 }
 0xdce   : > { %14230 = vmatprep.subr.mxu0 %v15866_v10 }
 0xdcf   : > { %14231 = vmatpush3.msra.mxu0 %v17614_v23 }
 0xdd0   : > { %14232 = vmatprep.subr.mxu0 %v15866_v10  ;;  %14167 = vmatmul.mubr.f32.gmra.mxu0 %v12483_v53  ;;  %v12534_v53 = vld [vmem:[%s21382_s27 + $0x170] sm:$0xff] }
 0xdd1   : > { %14233 = vmatpush3.msra.mxu0 %v17618_v59  ;;  %14169 = vmatprep.mubr.msk.f32.mxu0 %vm15867_vm2, %v15866_v10 }
 0xdd2   : > { %14234 = vmatprep.subr.mxu0 %v15866_v10 }
 0xdd3   : > { %14235 = vmatpush3.msra.mxu0 %v17626_v58 }
 0xdd4   : > { %14236 = vmatprep.subr.mxu0 %v15866_v10  ;;  %14170 = vmatmul.mubr.f32.gmra.mxu0 %v12484_v45  ;;  %v12535_v45 = vld [vmem:[%s21382_s27 + $0x178] sm:$0xff] }
 0xdd5   : > { %14237 = vmatpush3.msra.mxu0 %v17630_v5  ;;  %14172 = vmatprep.mubr.msk.f32.mxu0 %vm15867_vm2, %v15866_v10 }
 0xdd6   : > { %14238 = vmatprep.subr.mxu0 %v15866_v10 }
 0xdd7   : > { %14239 = vmatpush3.msra.mxu0 %v17638_v3 }
 0xdd8   : > { %14240 = vmatprep.subr.mxu0 %v15866_v10  ;;  %14173 = vmatmul.mubr.f32.gmra.mxu0 %v12485_v38  ;;  %v12536_v38 = vld [vmem:[%s21382_s27 + $0x180] sm:$0xff] }
 0xdd9   : > { %14241 = vmatpush3.msra.mxu0 %v17642_v13  ;;  %14175 = vmatprep.mubr.msk.f32.mxu0 %vm15867_vm2, %v15866_v10 }
 0xdda   : > { %14242 = vmatprep.subr.mxu0 %v15866_v10 }
 0xddb   : > { %14243 = vmatpush3.msra.mxu0 %v17650_v52 }
 0xddc   : > { %14244 = vmatprep.subr.mxu0 %v15866_v10  ;;  %14176 = vmatmul.mubr.f32.gmra.mxu0 %v12486_v7  ;;  %v12537_v7 = vld [vmem:[%s21382_s27 + $0x188] sm:$0xff] }
 0xddd   : > { %14245 = vmatpush3.msra.mxu0 %v17654_v41  ;;  %14178 = vmatprep.mubr.msk.f32.mxu0 %vm15867_vm2, %v15866_v10 }
 0xdde   : > { %14246 = vmatprep.subr.mxu0 %v15866_v10 }
 0xddf   : > { %14247 = vmatpush3.msra.mxu0 %v17668_v43 }
 0xde0   : > { %14179 = vmatmul.mubr.f32.gmra.mxu0 %v12487_v36  ;;  %14310 = vmatprep.subr.mxu0 %v15866_v10  ;;  %v12538_v36 = vld [vmem:[%s21382_s27 + $0x190] sm:$0xff] }
 0xde1   : > { %14248 = vmatprep.mubr.msk.f32.mxu0 %vm15867_vm2, %v15866_v10 }
 0xde4   : > { %14249 = vmatmul.mubr.f32.vlgmr.msra.gmra.mxu0 %v12497_v37  ;;  %v12539_v37 = vld [vmem:[%s21382_s27 + $0x198] sm:$0xff] }
 0xde5   : > { %14311 = vmatpush3.msra.mxu0 %v17572_v51  ;;  %14251 = vmatprep.mubr.msk.f32.mxu0 %vm15867_vm2, %v15866_v10 }
 0xde6   : > { %14312 = vmatprep.subr.mxu0 %v15866_v10 }
 0xde7   : > { %14313 = vmatpush3.msra.mxu0 %v17578_v35 }
 0xde8   : > { %14314 = vmatprep.subr.mxu0 %v15866_v10  ;;  %14252 = vmatmul.mubr.f32.gmra.mxu0 %v12498_v27  ;;  %v12540_v27 = vld [vmem:[%s21382_s27 + $0x1a0] sm:$0xff] }
 0xde9   : > { %14315 = vmatpush3.msra.mxu0 %v17582_v8  ;;  %14254 = vmatprep.mubr.msk.f32.mxu0 %vm15867_vm2, %v15866_v10 }
 0xdea   : > { %14316 = vmatprep.subr.mxu0 %v15866_v10 }
 0xdeb   : > { %14317 = vmatpush3.msra.mxu0 %v17590_v47 }
 0xdec   : > { %14318 = vmatprep.subr.mxu0 %v15866_v10  ;;  %14255 = vmatmul.mubr.f32.gmra.mxu0 %v12499_v49  ;;  %v12541_v49 = vld [vmem:[%s21382_s27 + $0x1a8] sm:$0xff] }
 0xded   : > { %14319 = vmatpush3.msra.mxu0 %v17594_v39  ;;  %14257 = vmatprep.mubr.msk.f32.mxu0 %vm15867_vm2, %v15866_v10 }
 0xdee   : > { %14320 = vmatprep.subr.mxu0 %v15866_v10 }
 0xdef   : > { %14321 = vmatpush3.msra.mxu0 %v17602_v4 }
 0xdf0   : > { %14322 = vmatprep.subr.mxu0 %v15866_v10  ;;  %14258 = vmatmul.mubr.f32.gmra.mxu0 %v12500_v18  ;;  %v12551_v18 = vld [vmem:[%s21382_s27 + $0x1b0] sm:$0xff] }
 0xdf1   : > { %14323 = vmatpush3.msra.mxu0 %v17606_v24  ;;  %14260 = vmatprep.mubr.msk.f32.mxu0 %vm15867_vm2, %v15866_v10 }
 0xdf2   : > { %14324 = vmatprep.subr.mxu0 %v15866_v10 }
 0xdf3   : > { %14325 = vmatpush3.msra.mxu0 %v17614_v23 }
 0xdf4   : > { %14326 = vmatprep.subr.mxu0 %v15866_v10  ;;  %14261 = vmatmul.mubr.f32.gmra.mxu0 %v12501_v46  ;;  %v12553_v46 = vld [vmem:[%s21382_s27 + $0x1c0] sm:$0xff] }
 0xdf5   : > { %14327 = vmatpush3.msra.mxu0 %v17618_v59  ;;  %14263 = vmatprep.mubr.msk.f32.mxu0 %vm15867_vm2, %v15866_v10 }
 0xdf6   : > { %14328 = vmatprep.subr.mxu0 %v15866_v10 }
 0xdf7   : > { %14329 = vmatpush3.msra.mxu0 %v17626_v58 }
 0xdf8   : > { %14330 = vmatprep.subr.mxu0 %v15866_v10  ;;  %14264 = vmatmul.mubr.f32.gmra.mxu0 %v12502_v28  ;;  %v12554_v28 = vld [vmem:[%s21382_s27 + $0x1c8] sm:$0xff] }
 0xdf9   : > { %14331 = vmatpush3.msra.mxu0 %v17630_v5  ;;  %14266 = vmatprep.mubr.msk.f32.mxu0 %vm15867_vm2, %v15866_v10 }
 0xdfa   : > { %14332 = vmatprep.subr.mxu0 %v15866_v10 }
 0xdfb   : > { %14333 = vmatpush3.msra.mxu0 %v17638_v3 }
 0xdfc   : > { %14334 = vmatprep.subr.mxu0 %v15866_v10  ;;  %14267 = vmatmul.mubr.f32.gmra.mxu0 %v12503_v30 }
 0xdfd   : > { %14335 = vmatpush3.msra.mxu0 %v17642_v13  ;;  %14269 = vmatprep.mubr.msk.f32.mxu0 %vm15867_vm2, %v15866_v10 }
 0xdfe   : > { %14336 = vmatprep.subr.mxu0 %v15866_v10 }
 0xdff   : > { %14337 = vmatpush3.msra.mxu0 %v17650_v52 }
 0xe00   : > { %14338 = vmatprep.subr.mxu0 %v15866_v10  ;;  %14270 = vmatmul.mubr.f32.gmra.mxu0 %v12504_v1 }
 0xe01   : > { %14339 = vmatpush3.msra.mxu0 %v17654_v41  ;;  %14272 = vmatprep.mubr.msk.f32.mxu0 %vm15867_vm2, %v15866_v10 }
 0xe02   : > { %14340 = vmatprep.subr.mxu0 %v15866_v10 }
 0xe03   : > { %14341 = vmatpush3.msra.mxu0 %v17668_v43 }
 0xe04   : > { %14273 = vmatmul.mubr.f32.gmra.mxu0 %v12505_v0  ;;  %14404 = vmatprep.subr.mxu0 %v15866_v10 }
 0xe05   : > { %14342 = vmatprep.mubr.msk.f32.mxu0 %vm15867_vm2, %v15866_v10 }
 0xe08   : > { %14343 = vmatmul.mubr.f32.vlgmr.msra.gmra.mxu0 %v12515_v25 }
 0xe09   : > { %14405 = vmatpush3.msra.mxu0 %v17572_v51  ;;  %14345 = vmatprep.mubr.msk.f32.mxu0 %vm15867_vm2, %v15866_v10 }
 0xe0a   : > { %14406 = vmatprep.subr.mxu0 %v15866_v10 }
 0xe0b   : > { %14407 = vmatpush3.msra.mxu0 %v17578_v35 }
 0xe0c   : > { %14408 = vmatprep.subr.mxu0 %v15866_v10  ;;  %14346 = vmatmul.mubr.f32.gmra.mxu0 %v12516_v50 }
 0xe0d   : > { %14409 = vmatpush3.msra.mxu0 %v17582_v8  ;;  %14348 = vmatprep.mubr.msk.f32.mxu0 %vm15867_vm2, %v15866_v10 }
 0xe0e   : > { %14410 = vmatprep.subr.mxu0 %v15866_v10 }
 0xe0f   : > { %14411 = vmatpush3.msra.mxu0 %v17590_v47 }
 0xe10   : > { %14412 = vmatprep.subr.mxu0 %v15866_v10  ;;  %14349 = vmatmul.mubr.f32.gmra.mxu0 %v12517_v2  ;;  %v12556_v2 = vld [vmem:[%s21382_s27 + $0x1d8] sm:$0xff] }
 0xe11   : > { %14413 = vmatpush3.msra.mxu0 %v17594_v39  ;;  %14351 = vmatprep.mubr.msk.f32.mxu0 %vm15867_vm2, %v15866_v10 }
 0xe12   : > { %14414 = vmatprep.subr.mxu0 %v15866_v10 }
 0xe13   : > { %14415 = vmatpush3.msra.mxu0 %v17602_v4 }
 0xe14   : > { %14416 = vmatprep.subr.mxu0 %v15866_v10  ;;  %14352 = vmatmul.mubr.f32.gmra.mxu0 %v12518_v22 }
 0xe15   : > { %14417 = vmatpush3.msra.mxu0 %v17606_v24  ;;  %14354 = vmatprep.mubr.msk.f32.mxu0 %vm15867_vm2, %v15866_v10 }
 0xe16   : > { %14418 = vmatprep.subr.mxu0 %v15866_v10 }
 0xe17   : > { %14419 = vmatpush3.msra.mxu0 %v17614_v23 }
 0xe18   : > { %14420 = vmatprep.subr.mxu0 %v15866_v10  ;;  %14355 = vmatmul.mubr.f32.gmra.mxu0 %v12519_v32 }
 0xe19   : > { %14421 = vmatpush3.msra.mxu0 %v17618_v59  ;;  %14357 = vmatprep.mubr.msk.f32.mxu0 %vm15867_vm2, %v15866_v10 }
 0xe1a   : > { %14422 = vmatprep.subr.mxu0 %v15866_v10 }
 0xe1b   : > { %14423 = vmatpush3.msra.mxu0 %v17626_v58 }
 0xe1c   : > { %14424 = vmatprep.subr.mxu0 %v15866_v10  ;;  %14358 = vmatmul.mubr.f32.gmra.mxu0 %v12520_v21 }
 0xe1d   : > { %14425 = vmatpush3.msra.mxu0 %v17630_v5  ;;  %14360 = vmatprep.mubr.msk.f32.mxu0 %vm15867_vm2, %v15866_v10 }
 0xe1e   : > { %14426 = vmatprep.subr.mxu0 %v15866_v10 }
 0xe1f   : > { %14427 = vmatpush3.msra.mxu0 %v17638_v3 }
 0xe20   : > { %14428 = vmatprep.subr.mxu0 %v15866_v10  ;;  %14361 = vmatmul.mubr.f32.gmra.mxu0 %v12521_v63 }
 0xe21   : > { %14429 = vmatpush3.msra.mxu0 %v17642_v13  ;;  %14363 = vmatprep.mubr.msk.f32.mxu0 %vm15867_vm2, %v15866_v10 }
 0xe22   : > { %14430 = vmatprep.subr.mxu0 %v15866_v10 }
 0xe23   : > { %14431 = vmatpush3.msra.mxu0 %v17650_v52 }
 0xe24   : > { %14432 = vmatprep.subr.mxu0 %v15866_v10  ;;  %14364 = vmatmul.mubr.f32.gmra.mxu0 %v12522_v14 }
 0xe25   : > { %14433 = vmatpush3.msra.mxu0 %v17654_v41  ;;  %14366 = vmatprep.mubr.msk.f32.mxu0 %vm15867_vm2, %v15866_v10 }
 0xe26   : > { %14434 = vmatprep.subr.mxu0 %v15866_v10 }
 0xe27   : > { %14435 = vmatpush3.msra.mxu0 %v17668_v43 }
 0xe28   : > { %14367 = vmatmul.mubr.f32.gmra.mxu0 %v12523_v42  ;;  %14498 = vmatprep.subr.mxu0 %v15866_v10  ;;  %v12557_v42 = vld [vmem:[%s21382_s27 + $0x1e0] sm:$0xff] }
 0xe29   : > { %14436 = vmatprep.mubr.msk.f32.mxu0 %vm15867_vm2, %v15866_v10 }
 0xe2c   : > { %14437 = vmatmul.mubr.f32.vlgmr.msra.gmra.mxu0 %v12533_v34 }
 0xe2d   : > { %14499 = vmatpush3.msra.mxu0 %v17572_v51  ;;  %14439 = vmatprep.mubr.msk.f32.mxu0 %vm15867_vm2, %v15866_v10 }
 0xe2e   : > { %14500 = vmatprep.subr.mxu0 %v15866_v10 }
 0xe2f   : > { %14501 = vmatpush3.msra.mxu0 %v17578_v35 }
 0xe30   : > { %14502 = vmatprep.subr.mxu0 %v15866_v10  ;;  %14440 = vmatmul.mubr.f32.gmra.mxu0 %v12534_v53 }
 0xe31   : > { %14503 = vmatpush3.msra.mxu0 %v17582_v8  ;;  %14442 = vmatprep.mubr.msk.f32.mxu0 %vm15867_vm2, %v15866_v10 }
 0xe32   : > { %14504 = vmatprep.subr.mxu0 %v15866_v10 }
 0xe33   : > { %14505 = vmatpush3.msra.mxu0 %v17590_v47 }
 0xe34   : > { %14506 = vmatprep.subr.mxu0 %v15866_v10  ;;  %14443 = vmatmul.mubr.f32.gmra.mxu0 %v12535_v45 }
 0xe35   : > { %14507 = vmatpush3.msra.mxu0 %v17594_v39  ;;  %14445 = vmatprep.mubr.msk.f32.mxu0 %vm15867_vm2, %v15866_v10 }
 0xe36   : > { %14508 = vmatprep.subr.mxu0 %v15866_v10 }
 0xe37   : > { %14509 = vmatpush3.msra.mxu0 %v17602_v4 }
 0xe38   : > { %14510 = vmatprep.subr.mxu0 %v15866_v10  ;;  %14446 = vmatmul.mubr.f32.gmra.mxu0 %v12536_v38 }
 0xe39   : > { %14511 = vmatpush3.msra.mxu0 %v17606_v24  ;;  %14448 = vmatprep.mubr.msk.f32.mxu0 %vm15867_vm2, %v15866_v10 }
 0xe3a   : > { %14512 = vmatprep.subr.mxu0 %v15866_v10 }
 0xe3b   : > { %14513 = vmatpush3.msra.mxu0 %v17614_v23 }
 0xe3c   : > { %14514 = vmatprep.subr.mxu0 %v15866_v10  ;;  %14449 = vmatmul.mubr.f32.gmra.mxu0 %v12537_v7 }
 0xe3d   : > { %14515 = vmatpush3.msra.mxu0 %v17618_v59  ;;  %14451 = vmatprep.mubr.msk.f32.mxu0 %vm15867_vm2, %v15866_v10 }
 0xe3e   : > { %14516 = vmatprep.subr.mxu0 %v15866_v10 }
 0xe3f   : > { %14517 = vmatpush3.msra.mxu0 %v17626_v58 }
 0xe40   : > { %14518 = vmatprep.subr.mxu0 %v15866_v10  ;;  %14452 = vmatmul.mubr.f32.gmra.mxu0 %v12538_v36  ;;  %v12558_v36 = vld [vmem:[%s21382_s27 + $0x1e8] sm:$0xff] }
 0xe41   : > { %14519 = vmatpush3.msra.mxu0 %v17630_v5  ;;  %14454 = vmatprep.mubr.msk.f32.mxu0 %vm15867_vm2, %v15866_v10 }
 0xe42   : > { %14520 = vmatprep.subr.mxu0 %v15866_v10 }
 0xe43   : > { %14521 = vmatpush3.msra.mxu0 %v17638_v3 }
 0xe44   : > { %14522 = vmatprep.subr.mxu0 %v15866_v10  ;;  %14455 = vmatmul.mubr.f32.gmra.mxu0 %v12539_v37 }
 0xe45   : > { %14523 = vmatpush3.msra.mxu0 %v17642_v13  ;;  %14457 = vmatprep.mubr.msk.f32.mxu0 %vm15867_vm2, %v15866_v10 }
 0xe46   : > { %14524 = vmatprep.subr.mxu0 %v15866_v10 }
 0xe47   : > { %14525 = vmatpush3.msra.mxu0 %v17650_v52 }
 0xe48   : > { %14526 = vmatprep.subr.mxu0 %v15866_v10  ;;  %14458 = vmatmul.mubr.f32.gmra.mxu0 %v12540_v27 }
 0xe49   : > { %14527 = vmatpush3.msra.mxu0 %v17654_v41  ;;  %14460 = vmatprep.mubr.msk.f32.mxu0 %vm15867_vm2, %v15866_v10 }
 0xe4a   : > { %14528 = vmatprep.subr.mxu0 %v15866_v10 }
 0xe4b   : > { %14529 = vmatpush3.msra.mxu0 %v17668_v43 }
 0xe4c   : > { %14461 = vmatmul.mubr.f32.gmra.mxu0 %v12541_v49  ;;  %14592 = vmatprep.subr.mxu0 %v15866_v10 }
 0xe4d   : > { %14530 = vmatprep.mubr.msk.f32.mxu0 %vm15867_vm2, %v15866_v10 }
 0xe50   : > { %14531 = vmatmul.mubr.f32.vlgmr.msra.gmra.mxu0 %v12551_v18 }
 0xe51   : > { %14593 = vmatpush3.msra.mxu0 %v17572_v51  ;;  %14533 = vmatprep.mubr.msk.f32.mxu0 %vm15867_vm2, %v15866_v10 }
 0xe52   : > { %14594 = vmatprep.subr.mxu0 %v15866_v10 }
 0xe53   : > { %14595 = vmatpush3.msra.mxu0 %v17578_v35 }
 0xe54   : > { %14596 = vmatprep.subr.mxu0 %v15866_v10  ;;  %14534 = vmatmul.mubr.f32.gmra.mxu0 %v12552_v16 }
 0xe55   : > { %14597 = vmatpush3.msra.mxu0 %v17582_v8  ;;  %14536 = vmatprep.mubr.msk.f32.mxu0 %vm15867_vm2, %v15866_v10 }
 0xe56   : > { %14598 = vmatprep.subr.mxu0 %v15866_v10 }
 0xe57   : > { %14599 = vmatpush3.msra.mxu0 %v17590_v47 }
 0xe58   : > { %14600 = vmatprep.subr.mxu0 %v15866_v10  ;;  %14537 = vmatmul.mubr.f32.gmra.mxu0 %v12553_v46  ;;  %v12559_v46 = vld [vmem:[%s21382_s27 + $0x1f0] sm:$0xff] }
 0xe59   : > { %14601 = vmatpush3.msra.mxu0 %v17594_v39  ;;  %14539 = vmatprep.mubr.msk.f32.mxu0 %vm15867_vm2, %v15866_v10 }
 0xe5a   : > { %14602 = vmatprep.subr.mxu0 %v15866_v10 }
 0xe5b   : > { %14603 = vmatpush3.msra.mxu0 %v17602_v4 }
 0xe5c   : > { %14604 = vmatprep.subr.mxu0 %v15866_v10  ;;  %v3972_v30 = vpop.f32.mrf.mxu0  ;;  %v4109_v9 = vpop.f32.mrf.mxu1  ;;  %14540 = vmatmul.mubr.f32.gmra.mxu0 %v12554_v28 }
 0xe5d   : > { %v18266_v1 = vadd.f32 %v4109_v9, %v3972_v30  ;;  %14605 = vmatpush3.msra.mxu0 %v17606_v24  ;;  %14542 = vmatprep.mubr.msk.f32.mxu0 %vm15867_vm2, %v15866_v10 }
 0xe5e   : > { %14606 = vmatprep.subr.mxu0 %v15866_v10  ;;  %v14062_v31 = vpop.f32.mrf.mxu0  ;;  %v14097_v0 = vpop.f32.mrf.mxu1 }
 0xe5f   : > { %14607 = vmatpush3.msra.mxu0 %v17614_v23  ;;  %v12569_v0 = vld [vmem:[%s21382_s27 + $0x1f8] sm:$0xff] }
 0xe60   : > { %14608 = vmatprep.subr.mxu0 %v15866_v10  ;;  %v3977_v25 = vpop.f32.mrf.mxu0  ;;  %14543 = vmatmul.mubr.f32.gmra.mxu0 %v12555_v61 }
 0xe61   : > { %v4114_v50 = vpop.f32.mrf.mxu1  ;;  %14609 = vmatpush3.msra.mxu0 %v17618_v59  ;;  %14545 = vmatprep.mubr.msk.f32.mxu0 %vm15867_vm2, %v15866_v10 }
 0xe62   : > { %v18283_v22 = vadd.f32 %v4114_v50, %v3977_v25  ;;  %14610 = vmatprep.subr.mxu0 %v15866_v10  ;;  %v14065_v32 = vpop.f32.mrf.mxu0 }
 0xe63   : > { %v14100_v21 = vpop.f32.mrf.mxu1  ;;  %14611 = vmatpush3.msra.mxu0 %v17626_v58 }
 0xe64   : > { %14612 = vmatprep.subr.mxu0 %v15866_v10  ;;  %v3982_v63 = vpop.f32.mrf.mxu0  ;;  %14546 = vmatmul.mubr.f32.gmra.mxu0 %v12556_v2 }
 0xe65   : > { %v4119_v14 = vpop.f32.mrf.mxu1  ;;  %14613 = vmatpush3.msra.mxu0 %v17630_v5  ;;  %14548 = vmatprep.mubr.msk.f32.mxu0 %vm15867_vm2, %v15866_v10 }
 0xe66   : > { %v18294_v34 = vadd.f32 %v4119_v14, %v3982_v63  ;;  %14614 = vmatprep.subr.mxu0 %v15866_v10  ;;  %v14068_v53 = vpop.f32.mrf.mxu0  ;;  %v12570_v63 = vld [vmem:[%s21382_s27 + $0x200] sm:$0xff] }
 0xe67   : > { %v14103_v45 = vpop.f32.mrf.mxu1  ;;  %14615 = vmatpush3.msra.mxu0 %v17638_v3 }
 0xe68   : > { %14616 = vmatprep.subr.mxu0 %v15866_v10  ;;  %v3987_v38 = vpop.f32.mrf.mxu0  ;;  %14549 = vmatmul.mubr.f32.gmra.mxu0 %v12557_v42 }
 0xe69   : > { %v4124_v7 = vpop.f32.mrf.mxu1  ;;  %14617 = vmatpush3.msra.mxu0 %v17642_v13  ;;  %14551 = vmatprep.mubr.msk.f32.mxu0 %vm15867_vm2, %v15866_v10 }
 0xe6a   : > { %v18305_v37 = vadd.f32 %v4124_v7, %v3987_v38  ;;  %14618 = vmatprep.subr.mxu0 %v15866_v10  ;;  %v14071_v27 = vpop.f32.mrf.mxu0  ;;  %v12571_v38 = vld [vmem:[%s21382_s27 + $0x208] sm:$0xff] }
 0xe6b   : > { %v14106_v49 = vpop.f32.mrf.mxu1  ;;  %14619 = vmatpush3.msra.mxu0 %v17650_v52 }
 0xe6c   : > { %14620 = vmatprep.subr.mxu0 %v15866_v10  ;;  %v3992_v18 = vpop.f32.mrf.mxu0  ;;  %14552 = vmatmul.mubr.f32.gmra.mxu0 %v12558_v36  ;;  %v12572_v49 = vld [vmem:[%s21382_s27 + $0x210] sm:$0xff] }
 0xe6d   : > { %v4129_v16 = vpop.f32.mrf.mxu1  ;;  %14621 = vmatpush3.msra.mxu0 %v17654_v41  ;;  %14554 = vmatprep.mubr.msk.f32.mxu0 %vm15867_vm2, %v15866_v10 }
 0xe6e   : > { %v18316_v28 = vadd.f32 %v4129_v16, %v3992_v18  ;;  %14622 = vmatprep.subr.mxu0 %v15866_v10  ;;  %v14074_v30 = vpop.f32.mrf.mxu0 }
 0xe6f   : > { %v14109_v9 = vpop.f32.mrf.mxu1  ;;  %14623 = vmatpush3.msra.mxu0 %v17668_v43 }
 0xe70   : > { %v3997_v61 = vpop.f32.mrf.mxu0  ;;  %14555 = vmatmul.mubr.f32.gmra.mxu0 %v12559_v46  ;;  %14686 = vmatprep.subr.mxu0 %v15866_v10  ;;  %v12573_v9 = vld [vmem:[%s21382_s27 + $0x218] sm:$0xff] }
 0xe71   : > { %v4134_v31 = vpop.f32.mrf.mxu1  ;;  %14624 = vmatprep.mubr.msk.f32.mxu0 %vm15867_vm2, %v15866_v10 }
 0xe72   : > { %v18326_v25 = vadd.f32 %v4134_v31, %v3997_v61  ;;  %v14077_v50 = vpop.f32.mrf.mxu0 }
 0xe73   : > { %v14112_v2 = vpop.f32.mrf.mxu1 }
 0xe74   : > { %v4002_v32 = vpop.f32.mrf.mxu0  ;;  %14625 = vmatmul.mubr.f32.vlgmr.msra.gmra.mxu0 %v12569_v0 }
 0xe75   : > { %v4139_v21 = vpop.f32.mrf.mxu1  ;;  %14687 = vmatpush3.msra.mxu0 %v17572_v51  ;;  %14627 = vmatprep.mubr.msk.f32.mxu0 %vm15867_vm2, %v15866_v10 }
 0xe76   : > { %v18334_v14 = vadd.f32 %v4139_v21, %v4002_v32  ;;  %14688 = vmatprep.subr.mxu0 %v15866_v10  ;;  %v14080_v42 = vpop.f32.mrf.mxu0 }
 0xe77   : > { %v14115_v53 = vpop.f32.mrf.mxu1  ;;  %14689 = vmatpush3.msra.mxu0 %v17578_v35 }
 0xe78   : > { %14690 = vmatprep.subr.mxu0 %v15866_v10  ;;  %v4007_v45 = vpop.f32.mrf.mxu0  ;;  %14628 = vmatmul.mubr.f32.gmra.mxu0 %v12570_v63 }
 0xe79   : > { %v4144_v51 = vpop.f32.mrf.mxu1  ;;  %14691 = vmatpush3.msra.mxu0 %v17582_v8  ;;  %14630 = vmatprep.mubr.msk.f32.mxu0 %vm15867_vm2, %v15866_v10 }
 0xe7a   : > { %v18345_v7 = vadd.f32 %v4144_v51, %v4007_v45  ;;  %14692 = vmatprep.subr.mxu0 %v15866_v10  ;;  %v14083_v36 = vpop.f32.mrf.mxu0 }
 0xe7b   : > { %v14118_v35 = vpop.f32.mrf.mxu1  ;;  %14693 = vmatpush3.msra.mxu0 %v17590_v47 }
 0xe7c   : > { %14694 = vmatprep.subr.mxu0 %v15866_v10  ;;  %v4012_v27 = vpop.f32.mrf.mxu0  ;;  %14631 = vmatmul.mubr.f32.gmra.mxu0 %v12571_v38 }
 0xe7d   : > { %v4149_v8 = vpop.f32.mrf.mxu1  ;;  %14695 = vmatpush3.msra.mxu0 %v17594_v39  ;;  %14633 = vmatprep.mubr.msk.f32.mxu0 %vm15867_vm2, %v15866_v10 }
 0xe7e   : > { %v18356_v18 = vadd.f32 %v4149_v8, %v4012_v27  ;;  %14696 = vmatprep.subr.mxu0 %v15866_v10  ;;  %v14086_v16 = vpop.f32.mrf.mxu0  ;;  %v4597_v8 = vld [vmem:[%s21308_s12 + $0x60] sm:$0xff] }
 0xe7f   : > { %14697 = vmatpush3.msra.mxu0 %v17602_v4  ;;  %v14121_v47 = vpop.f32.mrf.mxu1 }
 0xe80   : > { %14698 = vmatprep.subr.mxu0 %v15866_v10  ;;  %v4256_v46 = vpop.f32.mrf.mxu0  ;;  %14634 = vmatmul.mubr.f32.gmra.mxu0 %v12572_v49 }
 0xe81   : > { %v18362_v39 = vadd.f32 %v4256_v46, %v17790_v40  ;;  %v4459_v30 = vmul.f32 %v4256_v46, %v4256_v46  ;;  %14699 = vmatpush3.msra.mxu0 %v17606_v24  ;;  %14190 = vmatmul.mubr.msk.f32.vlgmr.msra.gmra.mxu1 %vm1331_vm0, %v4256_v46 }
 0xe82   : > { %14700 = vmatprep.subr.mxu0 %v15866_v10  ;;  %v14156_v4 = vpop.f32.mrf.mxu0  ;;  %14636 = vmatprep.mubr.msk.f32.mxu0 %vm15867_vm2, %v15866_v10 }
 0xe83   : > { %v18373_v61 = vadd.f32 %v4459_v30, %v17797_v33  ;;  %14701 = vmatpush3.msra.mxu0 %v17614_v23  ;;  %14192 = vmatprep.mubr.msk.f32.mxu1 %vm15867_vm2, %v15866_v10  ;;  %v12574_v33 = vld [vmem:[%s21382_s27 + $0x220] sm:$0xff]  ;;  %v12589_v30 = vld [vmem:[%s21382_s27 + $0x250] sm:$0xff] }
 0xe84   : > { %14702 = vmatprep.subr.mxu0 %v15866_v10  ;;  %v4261_v24 = vpop.f32.mrf.mxu0  ;;  %14637 = vmatmul.mubr.f32.gmra.mxu0 %v12573_v9 }
 0xe85   : > { %v18380_v40 = vadd.f32 %v4261_v24, %v17803_v17  ;;  %v4460_v31 = vmul.f32 %v4261_v24, %v4261_v24  ;;  %14703 = vmatpush3.msra.mxu0 %v17618_v59  ;;  %14193 = vmatmul.mubr.msk.f32.gmra.mxu1 %vm1331_vm0, %v4261_v24 }
 0xe86   : > { %14704 = vmatprep.subr.mxu0 %v15866_v10  ;;  %v14159_v23 = vpop.f32.mrf.mxu0  ;;  %14639 = vmatprep.mubr.msk.f32.mxu0 %vm15867_vm2, %v15866_v10 }
 0xe87   : > { %v18391_v0 = vadd.f32 %v4460_v31, %v17809_v55  ;;  %14705 = vmatpush3.msra.mxu0 %v17626_v58  ;;  %14195 = vmatprep.mubr.msk.f32.mxu1 %vm15867_vm2, %v15866_v10  ;;  %v12575_v55 = vld [vmem:[%s21382_s27 + $0x228] sm:$0xff]  ;;  %v12590_v31 = vld [vmem:[%s21382_s27 + $0x258] sm:$0xff] }
 0xe88   : > { %14706 = vmatprep.subr.mxu0 %v15866_v10  ;;  %v4266_v59 = vpop.f32.mrf.mxu0  ;;  %14640 = vmatmul.mubr.f32.gmra.mxu0 %v12574_v33 }
 0xe89   : > { %v18398_v17 = vadd.f32 %v4266_v59, %v17817_v62  ;;  %v4461_v50 = vmul.f32 %v4266_v59, %v4266_v59  ;;  %14707 = vmatpush3.msra.mxu0 %v17630_v5  ;;  %14196 = vmatmul.mubr.msk.f32.gmra.mxu1 %vm1331_vm0, %v4266_v59 }
 0xe8a   : > { %14708 = vmatprep.subr.mxu0 %v15866_v10  ;;  %v14162_v58 = vpop.f32.mrf.mxu0  ;;  %14642 = vmatprep.mubr.msk.f32.mxu0 %vm15867_vm2, %v15866_v10 }
 0xe8b   : > { %v18409_v2 = vadd.f32 %v4461_v50, %v17823_v19  ;;  %14709 = vmatpush3.msra.mxu0 %v17638_v3  ;;  %14198 = vmatprep.mubr.msk.f32.mxu1 %vm15867_vm2, %v15866_v10  ;;  %v12576_v19 = vld [vmem:[%s21382_s27 + $0x230] sm:$0xff] }
 0xe8c   : > { %14710 = vmatprep.subr.mxu0 %v15866_v10  ;;  %v4271_v5 = vpop.f32.mrf.mxu0  ;;  %14643 = vmatmul.mubr.f32.gmra.mxu0 %v12575_v55  ;;  %v4896_v55 = vld [vmem:[%s21308_s12 + $0x90] sm:$0xff] }
 0xe8d   : > { %v18416_v62 = vadd.f32 %v4271_v5, %v17831_v54  ;;  %v4462_v32 = vmul.f32 %v4271_v5, %v4271_v5  ;;  %14711 = vmatpush3.msra.mxu0 %v17642_v13  ;;  %14199 = vmatmul.mubr.msk.f32.gmra.mxu1 %vm1331_vm0, %v4271_v5  ;;  %v4600_v13 = vld [vmem:[%s21308_s12 + $0x78] sm:$0xff] }
 0xe8e   : > { %14712 = vmatprep.subr.mxu0 %v15866_v10  ;;  %v14165_v3 = vpop.f32.mrf.mxu0  ;;  %14645 = vmatprep.mubr.msk.f32.mxu0 %vm15867_vm2, %v15866_v10 }
 0xe8f   : > { %v18427_v21 = vadd.f32 %v4462_v32, %v17837_v29  ;;  %14713 = vmatpush3.msra.mxu0 %v17650_v52  ;;  %14201 = vmatprep.mubr.msk.f32.mxu1 %vm15867_vm2, %v15866_v10  ;;  %v12577_v52 = vld [vmem:[%s21382_s27 + $0x238] sm:$0xff]  ;;  %v4895_v32 = vld [vmem:[%s21308_s12 + $0x88] sm:$0xff] }
 0xe90   : > { %14714 = vmatprep.subr.mxu0 %v15866_v10  ;;  %v4276_v54 = vpop.f32.mrf.mxu0  ;;  %14646 = vmatmul.mubr.f32.gmra.mxu0 %v12576_v19 }
 0xe91   : > { %v18437_v63 = vadd.f32 %v4276_v54, %v17845_v56  ;;  %v4463_v42 = vmul.f32 %v4276_v54, %v4276_v54  ;;  %14715 = vmatpush3.msra.mxu0 %v17654_v41  ;;  %14202 = vmatmul.mubr.msk.f32.gmra.mxu1 %vm1331_vm0, %v4276_v54  ;;  %v4599_v41 = vld [vmem:[%s21308_s12 + $0x70] sm:$0xff] }
 0xe92   : > { %14716 = vmatprep.subr.mxu0 %v15866_v10  ;;  %v14168_v29 = vpop.f32.mrf.mxu0  ;;  %14276 = vmatpush3.msra.mxu1 %v4600_v13 }
 0xe93   : > { %v18446_v53 = vadd.f32 %v4463_v42, %v17851_v60  ;;  %14717 = vmatpush3.msra.mxu0 %v17668_v43  ;;  %14648 = vmatprep.mubr.msk.f32.mxu0 %vm15867_vm2, %v15866_v10  ;;  %v12587_v43 = vld [vmem:[%s21382_s27 + $0x240] sm:$0xff] }
 0xe94   : > { %v4281_v56 = vpop.f32.mrf.mxu0  ;;  %14204 = vmatprep.mubr.msk.f32.mxu1 %vm15867_vm2, %v15866_v10  ;;  %14649 = vmatmul.mubr.f32.gmra.mxu0 %v12577_v52 }
 0xe95   : > { %v18457_v45 = vadd.f32 %v4281_v56, %v17859_v57  ;;  %v4464_v51 = vmul.f32 %v4281_v56, %v4281_v56  ;;  %14205 = vmatmul.mubr.msk.f32.gmra.mxu1 %vm1331_vm0, %v4281_v56  ;;  %14718 = vmatprep.mubr.msk.f32.mxu0 %vm15867_vm2, %v15866_v10  ;;  %v4598_v57 = vld [vmem:[%s21308_s12 + $0x68] sm:$0xff] }
 0xe96   : > { %v14171_v60 = vpop.f32.mrf.mxu0  ;;  %14207 = vmatprep.mubr.msk.f32.mxu1 %vm15867_vm2, %v15866_v10  ;;  %14277 = vmatprep.subr.mxu1 %v15866_v10 }
 0xe97   : > { %v18469_v38 = vadd.f32 %v4464_v51, %v17865_v6  ;;  %14278 = vmatpush3.msra.mxu1 %v4599_v41  ;;  %14780 = vmatprep.subr.mxu0 %v15866_v10  ;;  %v12588_v6 = vld [vmem:[%s21382_s27 + $0x248] sm:$0xff]  ;;  %v12594_v60 = vld [vmem:[%s21382_s27 + $0x278] sm:$0xff] }
 0xe98   : > { %v4286_v36 = vpop.f32.mrf.mxu0  ;;  %14719 = vmatmul.mubr.f32.vlgmr.msra.gmra.mxu0 %v12587_v43  ;;  %14279 = vmatprep.subr.mxu1 %v15866_v10 }
 0xe99   : > { %v18477_v35 = vadd.f32 %v4286_v36, %v17873_v12  ;;  %v4465_v27 = vmul.f32 %v4286_v36, %v4286_v36  ;;  %14208 = vmatmul.mubr.msk.f32.gmra.mxu1 %vm1331_vm0, %v4286_v36  ;;  %14721 = vmatprep.mubr.msk.f32.mxu0 %vm15867_vm2, %v15866_v10 }
 0xe9a   : > { %v14174_v49 = vpop.f32.mrf.mxu0  ;;  %14210 = vmatprep.mubr.msk.f32.mxu1 %vm15867_vm2, %v15866_v10  ;;  %14280 = vmatpush3.msra.mxu1 %v4598_v57 }
 0xe9b   : > { %v18491_v12 = vadd.f32 %v4465_v27, %v17879_v48  ;;  %14281 = vmatprep.subr.mxu1 %v15866_v10 }
 0xe9c   : > { %v4291_v16 = vpop.f32.mrf.mxu0  ;;  %14722 = vmatmul.mubr.f32.gmra.mxu0 %v12588_v6  ;;  %14282 = vmatpush3.msra.mxu1 %v4597_v8  ;;  %v12595_v6 = vld [vmem:[%s21382_s27 + $0x280] sm:$0xff] }
 0xe9d   : > { %v18495_v47 = vadd.f32 %v4291_v16, %v17887_v26  ;;  %v4466_v46 = vmul.f32 %v4291_v16, %v4291_v16  ;;  %14211 = vmatmul.mubr.msk.f32.gmra.mxu1 %vm1331_vm0, %v4291_v16  ;;  %14724 = vmatprep.mubr.msk.f32.mxu0 %vm15867_vm2, %v15866_v10 }
 0xe9e   : > { %v14177_v48 = vpop.f32.mrf.mxu0  ;;  %14213 = vmatprep.mubr.msk.f32.mxu1 %vm15867_vm2, %v15866_v10  ;;  %14369 = vmatprep.subr.mxu1 %v15866_v10 }
 0xe9f   : > { %v18507_v9 = vadd.f32 %v4466_v46, %v17893_v20 }
 0xea0   : > { %v4296_v26 = vpop.f32.mrf.mxu0  ;;  %14725 = vmatmul.mubr.f32.gmra.mxu0 %v12589_v30 }
 0xea1   : > { %v18510_v4 = vadd.f32 %v4296_v26, %v17901_v11  ;;  %v4467_v24 = vmul.f32 %v4296_v26, %v4296_v26  ;;  %14214 = vmatmul.mubr.msk.f32.gmra.mxu1 %vm1331_vm0, %v4296_v26  ;;  %14727 = vmatprep.mubr.msk.f32.mxu0 %vm15867_vm2, %v15866_v10  ;;  %v4897_v11 = vld [vmem:[%s21308_s12 + $0x98] sm:$0xff] }
 0xea2   : > { %v14180_v33 = vpop.f32.mrf.mxu0  ;;  %14283 = vmatprep.mubr.msk.f32.mxu1 %vm15867_vm2, %v15866_v10 }
 0xea3   : > { %v18521_v20 = vadd.f32 %v4467_v24, %v17911_v15  ;;  %v12591_v15 = vld [vmem:[%s21382_s27 + $0x260] sm:$0xff] }
 0xea4   : > { %v4553_v23 = vpop.f32.mrf.mxu0  ;;  %14728 = vmatmul.mubr.f32.gmra.mxu0 %v12590_v31 }
 0xea5   : > { %v18527_v59 = vadd.f32 %v4553_v23, %v18362_v39  ;;  %v4756_v50 = vmul.f32 %v4553_v23, %v4553_v23  ;;  %14284 = vmatmul.mubr.msk.f32.vlgmr.msra.gmra.mxu1 %vm1331_vm0, %v4553_v23  ;;  %14730 = vmatprep.mubr.msk.f32.mxu0 %vm15867_vm2, %v15866_v10 }
 0xea6   : > { %v14250_v58 = vpop.f32.mrf.mxu0  ;;  %14286 = vmatprep.mubr.msk.f32.mxu1 %vm15867_vm2, %v15866_v10  ;;  %14370 = vmatpush3.msra.mxu1 %v4897_v11 }
 0xea7   : > { %v18541_v39 = vadd.f32 %v4756_v50, %v18373_v61  ;;  %14371 = vmatprep.subr.mxu1 %v15866_v10  ;;  %v12592_v61 = vld [vmem:[%s21382_s27 + $0x268] sm:$0xff] }
 0xea8   : > { %v4558_v5 = vpop.f32.mrf.mxu0  ;;  %14731 = vmatmul.mubr.f32.gmra.mxu0 %v12591_v15  ;;  %14372 = vmatpush3.msra.mxu1 %v4896_v55  ;;  %v5194_v55 = vld [vmem:[%s21308_s12 + $0xb8] sm:$0xff] }
 0xea9   : > { %v18548_v19 = vadd.f32 %v4558_v5, %v18380_v40  ;;  %v4757_v3 = vmul.f32 %v4558_v5, %v4558_v5  ;;  %14287 = vmatmul.mubr.msk.f32.gmra.mxu1 %vm1331_vm0, %v4558_v5  ;;  %14733 = vmatprep.mubr.msk.f32.mxu0 %vm15867_vm2, %v15866_v10  ;;  %v4894_v40 = vld [vmem:[%s21308_s12 + $0x80] sm:$0xff]  ;;  %v5193_v5 = vld [vmem:[%s21308_s12 + $0xb0] sm:$0xff] }
 0xeaa   : > { %v14253_v13 = vpop.f32.mrf.mxu0  ;;  %14289 = vmatprep.mubr.msk.f32.mxu1 %vm15867_vm2, %v15866_v10  ;;  %14373 = vmatprep.subr.mxu1 %v15866_v10 }
 0xeab   : > { %v18560_v54 = vadd.f32 %v4757_v3, %v18391_v0  ;;  %14374 = vmatpush3.msra.mxu1 %v4895_v32  ;;  %v12593_v0 = vld [vmem:[%s21382_s27 + $0x270] sm:$0xff] }
 0xeac   : > { %v4563_v42 = vpop.f32.mrf.mxu0  ;;  %14734 = vmatmul.mubr.f32.gmra.mxu0 %v12592_v61  ;;  %14375 = vmatprep.subr.mxu1 %v15866_v10 }
 0xead   : > { %v18567_v52 = vadd.f32 %v4563_v42, %v18398_v17  ;;  %v4758_v29 = vmul.f32 %v4563_v42, %v4563_v42  ;;  %14290 = vmatmul.mubr.msk.f32.gmra.mxu1 %vm1331_vm0, %v4563_v42  ;;  %14736 = vmatprep.mubr.msk.f32.mxu0 %vm15867_vm2, %v15866_v10 }
 0xeae   : > { %v14256_v56 = vpop.f32.mrf.mxu0  ;;  %14292 = vmatprep.mubr.msk.f32.mxu1 %vm15867_vm2, %v15866_v10  ;;  %14376 = vmatpush3.msra.mxu1 %v4894_v40 }
 0xeaf   : > { %v18578_v41 = vadd.f32 %v4758_v29, %v18409_v2  ;;  %14463 = vmatprep.subr.mxu1 %v15866_v10 }
 0xeb0   : > { %v4568_v17 = vpop.f32.mrf.mxu0  ;;  %14737 = vmatmul.mubr.f32.gmra.mxu0 %v12593_v0 }
 0xeb1   : > { %v18582_v51 = vadd.f32 %v4568_v17, %v18416_v62  ;;  %v4759_v43 = vmul.f32 %v4568_v17, %v4568_v17  ;;  %14293 = vmatmul.mubr.msk.f32.gmra.mxu1 %vm1331_vm0, %v4568_v17  ;;  %14739 = vmatprep.mubr.msk.f32.mxu0 %vm15867_vm2, %v15866_v10 }
 0xeb2   : > { %v14259_v57 = vpop.f32.mrf.mxu0  ;;  %14295 = vmatprep.mubr.msk.f32.mxu1 %vm15867_vm2, %v15866_v10 }
 0xeb3   : > { %v18593_v2 = vadd.f32 %v4759_v43, %v18427_v21 }
 0xeb4   : > { %v4573_v36 = vpop.f32.mrf.mxu0  ;;  %14740 = vmatmul.mubr.f32.gmra.mxu0 %v12594_v60 }
 0xeb5   : > { %v18596_v62 = vadd.f32 %v4573_v36, %v18437_v63  ;;  %v4760_v27 = vmul.f32 %v4573_v36, %v4573_v36  ;;  %14296 = vmatmul.mubr.msk.f32.gmra.mxu1 %vm1331_vm0, %v4573_v36  ;;  %14742 = vmatprep.mubr.msk.f32.mxu0 %vm15867_vm2, %v15866_v10 }
 0xeb6   : > { %v14262_v8 = vpop.f32.mrf.mxu0  ;;  %14298 = vmatprep.mubr.msk.f32.mxu1 %vm15867_vm2, %v15866_v10 }
 0xeb7   : > { %v18607_v21 = vadd.f32 %v4760_v27, %v18446_v53 }
 0xeb8   : > { %v4578_v49 = vpop.f32.mrf.mxu0  ;;  %14743 = vmatmul.mubr.f32.gmra.mxu0 %v12595_v6 }
 0xeb9   : > { %v18610_v63 = vadd.f32 %v4578_v49, %v18457_v45  ;;  %v4761_v16 = vmul.f32 %v4578_v49, %v4578_v49  ;;  %14299 = vmatmul.mubr.msk.f32.gmra.mxu1 %vm1331_vm0, %v4578_v49  ;;  %14798 = vmatprep.mubr.msk.f32.mxu0 %vm15867_vm2, %v15866_v10 }
 0xeba   : > { %v14265_v46 = vpop.f32.mrf.mxu0  ;;  %14301 = vmatprep.mubr.msk.f32.mxu1 %vm15867_vm2, %v15866_v10 }
 0xebb   : > { %v18618_v30 = vadd.f32 %v4761_v16, %v18469_v38 }
 0xebc   : > { %v4583_v53 = vpop.f32.mrf.mxu0 }
 0xebd   : > { %v18621_v48 = vadd.f32 %v4583_v53, %v18477_v35  ;;  %v4762_v26 = vmul.f32 %v4583_v53, %v4583_v53  ;;  %14302 = vmatmul.mubr.msk.f32.gmra.mxu1 %vm1331_vm0, %v4583_v53 }
 0xebe   : > { %v14268_v45 = vpop.f32.mrf.mxu0  ;;  %14304 = vmatprep.mubr.msk.f32.mxu1 %vm15867_vm2, %v15866_v10 }
 0xebf   : > { %v18627_v24 = vadd.f32 %v4762_v26, %v18491_v12 }
 0xec0   : > { %v4588_v31 = vpop.f32.mrf.mxu0 }
 0xec1   : > { %v18630_v33 = vadd.f32 %v4588_v31, %v18495_v47  ;;  %v4763_v38 = vmul.f32 %v4588_v31, %v4588_v31  ;;  %14305 = vmatmul.mubr.msk.f32.gmra.mxu1 %vm1331_vm0, %v4588_v31 }
 0xec2   : > { %v14271_v11 = vpop.f32.mrf.mxu0  ;;  %14307 = vmatprep.mubr.msk.f32.mxu1 %vm15867_vm2, %v15866_v10 }
 0xec3   : > { %v18636_v35 = vadd.f32 %v4763_v38, %v18507_v9 }
 0xec4   : > { %v4593_v23 = vpop.f32.mrf.mxu0 }
 0xec5   : > { %v18639_v50 = vadd.f32 %v4593_v23, %v18510_v4  ;;  %v4764_v12 = vmul.f32 %v4593_v23, %v4593_v23  ;;  %14308 = vmatmul.mubr.msk.f32.gmra.mxu1 %vm1331_vm0, %v4593_v23 }
 0xec6   : > { %v14274_v15 = vpop.f32.mrf.mxu0  ;;  %14377 = vmatprep.mubr.msk.f32.mxu1 %vm15867_vm2, %v15866_v10 }
 0xec7   : > { %v18645_v47 = vadd.f32 %v4764_v12, %v18521_v20  ;;  %v5491_v15 = vld [vmem:[%s21308_s12 + $0xd8] sm:$0xff] }
 0xec8   : > { %v4850_v9 = vpop.f32.mrf.mxu0 }
 0xec9   : > { %v18651_v58 = vadd.f32 %v4850_v9, %v18527_v59  ;;  %v5053_v4 = vmul.f32 %v4850_v9, %v4850_v9  ;;  %14378 = vmatmul.mubr.msk.f32.vlgmr.msra.gmra.mxu1 %vm1331_vm0, %v4850_v9  ;;  %v5192_v59 = vld [vmem:[%s21308_s12 + $0xa8] sm:$0xff]  ;;  %v5490_v9 = vld [vmem:[%s21308_s12 + $0xd0] sm:$0xff] }
 0xeca   : > { %v14344_v32 = vpop.f32.mrf.mxu0  ;;  %14380 = vmatprep.mubr.msk.f32.mxu1 %vm15867_vm2, %v15866_v10  ;;  %14464 = vmatpush3.msra.mxu1 %v5194_v55 }
 0xecb   : > { %v18660_v20 = vadd.f32 %v5053_v4, %v18541_v39  ;;  %14465 = vmatprep.subr.mxu1 %v15866_v10  ;;  %v5191_v39 = vld [vmem:[%s21308_s12 + $0xa0] sm:$0xff] }
 0xecc   : > { %v4855_v3 = vpop.f32.mrf.mxu0  ;;  %14466 = vmatpush3.msra.mxu1 %v5193_v5 }
 0xecd   : > { %v18667_v61 = vadd.f32 %v4855_v3, %v18548_v19  ;;  %v5054_v13 = vmul.f32 %v4855_v3, %v4855_v3  ;;  %14381 = vmatmul.mubr.msk.f32.gmra.mxu1 %vm1331_vm0, %v4855_v3  ;;  %14467 = vmatprep.subr.mxu1 %v15866_v10 }
 0xece   : > { %v14347_v40 = vpop.f32.mrf.mxu0  ;;  %14383 = vmatprep.mubr.msk.f32.mxu1 %vm15867_vm2, %v15866_v10  ;;  %14468 = vmatpush3.msra.mxu1 %v5192_v59 }
 0xecf   : > { %v18677_v42 = vadd.f32 %v5054_v13, %v18560_v54  ;;  %14469 = vmatprep.subr.mxu1 %v15866_v10 }
 0xed0   : > { %v4860_v19 = vpop.f32.mrf.mxu0  ;;  %14470 = vmatpush3.msra.mxu1 %v5191_v39 }
 0xed1   : > { %v18681_v29 = vadd.f32 %v4860_v19, %v18567_v52  ;;  %v5055_v0 = vmul.f32 %v4860_v19, %v4860_v19  ;;  %14384 = vmatmul.mubr.msk.f32.gmra.mxu1 %vm1331_vm0, %v4860_v19  ;;  %14557 = vmatprep.subr.mxu1 %v15866_v10 }
 0xed2   : > { %v14350_v56 = vpop.f32.mrf.mxu0  ;;  %14386 = vmatprep.mubr.msk.f32.mxu1 %vm15867_vm2, %v15866_v10 }
 0xed3   : > { %v18688_v17 = vadd.f32 %v5055_v0, %v18578_v41 }
 0xed4   : > { %v4865_v54 = vpop.f32.mrf.mxu0 }
 0xed5   : > { %v18691_v43 = vadd.f32 %v4865_v54, %v18582_v51  ;;  %v5056_v60 = vmul.f32 %v4865_v54, %v4865_v54  ;;  %14387 = vmatmul.mubr.msk.f32.gmra.mxu1 %vm1331_vm0, %v4865_v54 }
 0xed6   : > { %v14353_v52 = vpop.f32.mrf.mxu0  ;;  %14389 = vmatprep.mubr.msk.f32.mxu1 %vm15867_vm2, %v15866_v10 }
 0xed7   : > { %v18697_v57 = vadd.f32 %v5056_v60, %v18593_v2 }
 0xed8   : > { %v4870_v36 = vpop.f32.mrf.mxu0 }
 0xed9   : > { %v18700_v27 = vadd.f32 %v4870_v36, %v18596_v62  ;;  %v5057_v41 = vmul.f32 %v4870_v36, %v4870_v36  ;;  %14390 = vmatmul.mubr.msk.f32.gmra.mxu1 %vm1331_vm0, %v4870_v36 }
 0xeda   : > { %v14356_v6 = vpop.f32.mrf.mxu0  ;;  %14392 = vmatprep.mubr.msk.f32.mxu1 %vm15867_vm2, %v15866_v10 }
 0xedb   : > { %v18706_v51 = vadd.f32 %v5057_v41, %v18607_v21 }
 0xedc   : > { %v4875_v8 = vpop.f32.mrf.mxu0 }
 0xedd   : > { %v18709_v49 = vadd.f32 %v4875_v8, %v18610_v63  ;;  %v5058_v2 = vmul.f32 %v4875_v8, %v4875_v8  ;;  %14393 = vmatmul.mubr.msk.f32.gmra.mxu1 %vm1331_vm0, %v4875_v8 }
 0xede   : > { %v14359_v16 = vpop.f32.mrf.mxu0  ;;  %14395 = vmatprep.mubr.msk.f32.mxu1 %vm15867_vm2, %v15866_v10 }
 0xedf   : > { %v18715_v62 = vadd.f32 %v5058_v2, %v18618_v30 }
 0xee0   : > { %v4880_v46 = vpop.f32.mrf.mxu0 }
 0xee1   : > { %v18718_v53 = vadd.f32 %v4880_v46, %v18621_v48  ;;  %v5059_v21 = vmul.f32 %v4880_v46, %v4880_v46  ;;  %14396 = vmatmul.mubr.msk.f32.gmra.mxu1 %vm1331_vm0, %v4880_v46 }
 0xee2   : > { %v14362_v26 = vpop.f32.mrf.mxu0  ;;  %14398 = vmatprep.mubr.msk.f32.mxu1 %vm15867_vm2, %v15866_v10 }
 0xee3   : > { %v18724_v63 = vadd.f32 %v5059_v21, %v18627_v24 }
 0xee4   : > { %v4885_v45 = vpop.f32.mrf.mxu0 }
 0xee5   : > { %v18727_v31 = vadd.f32 %v4885_v45, %v18630_v33  ;;  %v5060_v30 = vmul.f32 %v4885_v45, %v4885_v45  ;;  %14399 = vmatmul.mubr.msk.f32.gmra.mxu1 %vm1331_vm0, %v4885_v45 }
 0xee6   : > { %v14365_v38 = vpop.f32.mrf.mxu0  ;;  %14401 = vmatprep.mubr.msk.f32.mxu1 %vm15867_vm2, %v15866_v10 }
 0xee7   : > { %v18733_v48 = vadd.f32 %v5060_v30, %v18636_v35 }
 0xee8   : > { %v4890_v11 = vpop.f32.mrf.mxu0 }
 0xee9   : > { %v18736_v23 = vadd.f32 %v4890_v11, %v18639_v50  ;;  %v5061_v24 = vmul.f32 %v4890_v11, %v4890_v11  ;;  %14402 = vmatmul.mubr.msk.f32.gmra.mxu1 %vm1331_vm0, %v4890_v11 }
 0xeea   : > { %v14368_v12 = vpop.f32.mrf.mxu0  ;;  %14471 = vmatprep.mubr.msk.f32.mxu1 %vm15867_vm2, %v15866_v10 }
 0xeeb   : > { %v18742_v33 = vadd.f32 %v5061_v24, %v18645_v47  ;;  %v5788_v12 = vld [vmem:[%s21308_s12 + $0xf8] sm:$0xff] }
 0xeec   : > { %v5147_v35 = vpop.f32.mrf.mxu0 }
 0xeed   : > { %v18748_v55 = vadd.f32 %v5147_v35, %v18651_v58  ;;  %v5350_v50 = vmul.f32 %v5147_v35, %v5147_v35  ;;  %14472 = vmatmul.mubr.msk.f32.vlgmr.msra.gmra.mxu1 %vm1331_vm0, %v5147_v35  ;;  %v5489_v58 = vld [vmem:[%s21308_s12 + $0xc8] sm:$0xff]  ;;  %v5787_v35 = vld [vmem:[%s21308_s12 + $0xf0] sm:$0xff] }
 0xeee   : > { %v14438_v4 = vpop.f32.mrf.mxu0  ;;  %14474 = vmatprep.mubr.msk.f32.mxu1 %vm15867_vm2, %v15866_v10  ;;  %14558 = vmatpush3.msra.mxu1 %v5491_v15 }
 0xeef   : > { %v18757_v47 = vadd.f32 %v5350_v50, %v18660_v20  ;;  %14559 = vmatprep.subr.mxu1 %v15866_v10  ;;  %v5488_v20 = vld [vmem:[%s21308_s12 + $0xc0] sm:$0xff] }
 0xef0   : > { %v5152_v5 = vpop.f32.mrf.mxu0  ;;  %14560 = vmatpush3.msra.mxu1 %v5490_v9 }
 0xef1   : > { %v18764_v32 = vadd.f32 %v5152_v5, %v18667_v61  ;;  %v5351_v59 = vmul.f32 %v5152_v5, %v5152_v5  ;;  %14475 = vmatmul.mubr.msk.f32.gmra.mxu1 %vm1331_vm0, %v5152_v5  ;;  %14561 = vmatprep.subr.mxu1 %v15866_v10 }
 0xef2   : > { %v14441_v3 = vpop.f32.mrf.mxu0  ;;  %14477 = vmatprep.mubr.msk.f32.mxu1 %vm15867_vm2, %v15866_v10  ;;  %14562 = vmatpush3.msra.mxu1 %v5489_v58 }
 0xef3   : > { %v18774_v13 = vadd.f32 %v5351_v59, %v18677_v42  ;;  %14563 = vmatprep.subr.mxu1 %v15866_v10 }
 0xef4   : > { %v5157_v61 = vpop.f32.mrf.mxu0  ;;  %14564 = vmatpush3.msra.mxu1 %v5488_v20 }
 0xef5   : > { %v18778_v39 = vadd.f32 %v5157_v61, %v18681_v29  ;;  %v5352_v40 = vmul.f32 %v5157_v61, %v5157_v61  ;;  %14478 = vmatmul.mubr.msk.f32.gmra.mxu1 %vm1331_vm0, %v5157_v61  ;;  %14651 = vmatprep.subr.mxu1 %v15866_v10 }
 0xef6   : > { %v14444_v19 = vpop.f32.mrf.mxu0  ;;  %14480 = vmatprep.mubr.msk.f32.mxu1 %vm15867_vm2, %v15866_v10 }
 0xef7   : > { %v18785_v0 = vadd.f32 %v5352_v40, %v18688_v17 }
 0xef8   : > { %v5162_v42 = vpop.f32.mrf.mxu0 }
 0xef9   : > { %v18788_v56 = vadd.f32 %v5162_v42, %v18691_v43  ;;  %v5353_v54 = vmul.f32 %v5162_v42, %v5162_v42  ;;  %14481 = vmatmul.mubr.msk.f32.gmra.mxu1 %vm1331_vm0, %v5162_v42 }
 0xefa   : > { %v14447_v29 = vpop.f32.mrf.mxu0  ;;  %14483 = vmatprep.mubr.msk.f32.mxu1 %vm15867_vm2, %v15866_v10 }
 0xefb   : > { %v18794_v60 = vadd.f32 %v5353_v54, %v18697_v57 }
 0xefc   : > { %v5167_v52 = vpop.f32.mrf.mxu0 }
 0xefd   : > { %v18797_v36 = vadd.f32 %v5167_v52, %v18700_v27  ;;  %v5354_v17 = vmul.f32 %v5167_v52, %v5167_v52  ;;  %14484 = vmatmul.mubr.msk.f32.gmra.mxu1 %vm1331_vm0, %v5167_v52 }
 0xefe   : > { %v14450_v41 = vpop.f32.mrf.mxu0  ;;  %14486 = vmatprep.mubr.msk.f32.mxu1 %vm15867_vm2, %v15866_v10 }
 0xeff   : > { %v18803_v43 = vadd.f32 %v5354_v17, %v18706_v51 }
 0xf00   : > { %v5172_v6 = vpop.f32.mrf.mxu0 }
 0xf01   : > { %v18806_v8 = vadd.f32 %v5172_v6, %v18709_v49  ;;  %v5355_v57 = vmul.f32 %v5172_v6, %v5172_v6  ;;  %14487 = vmatmul.mubr.msk.f32.gmra.mxu1 %vm1331_vm0, %v5172_v6 }
 0xf02   : > { %v14453_v2 = vpop.f32.mrf.mxu0  ;;  %14489 = vmatprep.mubr.msk.f32.mxu1 %vm15867_vm2, %v15866_v10 }
 0xf03   : > { %v18812_v27 = vadd.f32 %v5355_v57, %v18715_v62 }
 0xf04   : > { %v5177_v16 = vpop.f32.mrf.mxu0 }
 0xf05   : > { %v18815_v46 = vadd.f32 %v5177_v16, %v18718_v53  ;;  %v5356_v51 = vmul.f32 %v5177_v16, %v5177_v16  ;;  %14490 = vmatmul.mubr.msk.f32.gmra.mxu1 %vm1331_vm0, %v5177_v16 }
 0xf06   : > { %v14456_v21 = vpop.f32.mrf.mxu0  ;;  %14492 = vmatprep.mubr.msk.f32.mxu1 %vm15867_vm2, %v15866_v10 }
 0xf07   : > { %v18821_v49 = vadd.f32 %v5356_v51, %v18724_v63 }
 0xf08   : > { %v5182_v26 = vpop.f32.mrf.mxu0 }
 0xf09   : > { %v18824_v45 = vadd.f32 %v5182_v26, %v18727_v31  ;;  %v5357_v62 = vmul.f32 %v5182_v26, %v5182_v26  ;;  %14493 = vmatmul.mubr.msk.f32.gmra.mxu1 %vm1331_vm0, %v5182_v26 }
 0xf0a   : > { %v14459_v30 = vpop.f32.mrf.mxu0  ;;  %14495 = vmatprep.mubr.msk.f32.mxu1 %vm15867_vm2, %v15866_v10 }
 0xf0b   : > { %v18830_v53 = vadd.f32 %v5357_v62, %v18733_v48 }
 0xf0c   : > { %v5187_v38 = vpop.f32.mrf.mxu0 }
 0xf0d   : > { %v18833_v11 = vadd.f32 %v5187_v38, %v18736_v23  ;;  %v5358_v63 = vmul.f32 %v5187_v38, %v5187_v38  ;;  %14496 = vmatmul.mubr.msk.f32.gmra.mxu1 %vm1331_vm0, %v5187_v38 }
 0xf0e   : > { %v14462_v24 = vpop.f32.mrf.mxu0  ;;  %14565 = vmatprep.mubr.msk.f32.mxu1 %vm15867_vm2, %v15866_v10 }
 0xf0f   : > { %v18839_v31 = vadd.f32 %v5358_v63, %v18742_v33  ;;  %v6085_v24 = vld [vmem:[%s21308_s12 + $0x118] sm:$0xff] }
 0xf10   : > { %v5444_v48 = vpop.f32.mrf.mxu0 }
 0xf11   : > { %v18845_v15 = vadd.f32 %v5444_v48, %v18748_v55  ;;  %v5647_v23 = vmul.f32 %v5444_v48, %v5444_v48  ;;  %14566 = vmatmul.mubr.msk.f32.vlgmr.msra.gmra.mxu1 %vm1331_vm0, %v5444_v48  ;;  %v5786_v55 = vld [vmem:[%s21308_s12 + $0xe8] sm:$0xff]  ;;  %v6084_v48 = vld [vmem:[%s21308_s12 + $0x110] sm:$0xff] }
 0xf12   : > { %v14532_v50 = vpop.f32.mrf.mxu0  ;;  %14568 = vmatprep.mubr.msk.f32.mxu1 %vm15867_vm2, %v15866_v10  ;;  %14652 = vmatpush3.msra.mxu1 %v5788_v12 }
 0xf13   : > { %v18854_v33 = vadd.f32 %v5647_v23, %v18757_v47  ;;  %14653 = vmatprep.subr.mxu1 %v15866_v10  ;;  %v5785_v47 = vld [vmem:[%s21308_s12 + $0xe0] sm:$0xff] }
 0xf14   : > { %v5449_v9 = vpop.f32.mrf.mxu0  ;;  %14654 = vmatpush3.msra.mxu1 %v5787_v35 }
 0xf15   : > { %v18861_v4 = vadd.f32 %v5449_v9, %v18764_v32  ;;  %v5648_v58 = vmul.f32 %v5449_v9, %v5449_v9  ;;  %14569 = vmatmul.mubr.msk.f32.gmra.mxu1 %vm1331_vm0, %v5449_v9  ;;  %14655 = vmatprep.subr.mxu1 %v15866_v10 }
 0xf16   : > { %v14535_v5 = vpop.f32.mrf.mxu0  ;;  %14571 = vmatprep.mubr.msk.f32.mxu1 %vm15867_vm2, %v15866_v10  ;;  %14656 = vmatpush3.msra.mxu1 %v5786_v55 }
 0xf17   : > { %v18871_v59 = vadd.f32 %v5648_v58, %v18774_v13  ;;  %14657 = vmatprep.subr.mxu1 %v15866_v10 }
 0xf18   : > { %v5454_v32 = vpop.f32.mrf.mxu0  ;;  %14658 = vmatpush3.msra.mxu1 %v5785_v47 }
 0xf19   : > { %v18875_v20 = vadd.f32 %v5454_v32, %v18778_v39  ;;  %v5649_v3 = vmul.f32 %v5454_v32, %v5454_v32  ;;  %14572 = vmatmul.mubr.msk.f32.gmra.mxu1 %vm1331_vm0, %v5454_v32  ;;  %14745 = vmatprep.subr.mxu1 %v15866_v10 }
 0xf1a   : > { %v14538_v61 = vpop.f32.mrf.mxu0  ;;  %14574 = vmatprep.mubr.msk.f32.mxu1 %vm15867_vm2, %v15866_v10 }
 0xf1b   : > { %v18882_v40 = vadd.f32 %v5649_v3, %v18785_v0 }
 0xf1c   : > { %v5459_v13 = vpop.f32.mrf.mxu0 }
 0xf1d   : > { %v18885_v19 = vadd.f32 %v5459_v13, %v18788_v56  ;;  %v5650_v42 = vmul.f32 %v5459_v13, %v5459_v13  ;;  %14575 = vmatmul.mubr.msk.f32.gmra.mxu1 %vm1331_vm0, %v5459_v13 }
 0xf1e   : > { %v14541_v39 = vpop.f32.mrf.mxu0  ;;  %14577 = vmatprep.mubr.msk.f32.mxu1 %vm15867_vm2, %v15866_v10 }
 0xf1f   : > { %v18891_v54 = vadd.f32 %v5650_v42, %v18794_v60 }
 0xf20   : > { %v5464_v29 = vpop.f32.mrf.mxu0 }
 0xf21   : > { %v18894_v52 = vadd.f32 %v5464_v29, %v18797_v36  ;;  %v5651_v0 = vmul.f32 %v5464_v29, %v5464_v29  ;;  %14578 = vmatmul.mubr.msk.f32.gmra.mxu1 %vm1331_vm0, %v5464_v29 }
 0xf22   : > { %v14544_v17 = vpop.f32.mrf.mxu0  ;;  %14580 = vmatprep.mubr.msk.f32.mxu1 %vm15867_vm2, %v15866_v10 }
 0xf23   : > { %v18900_v56 = vadd.f32 %v5651_v0, %v18803_v43 }
 0xf24   : > { %v5469_v41 = vpop.f32.mrf.mxu0 }
 0xf25   : > { %v18903_v6 = vadd.f32 %v5469_v41, %v18806_v8  ;;  %v5652_v60 = vmul.f32 %v5469_v41, %v5469_v41  ;;  %14581 = vmatmul.mubr.msk.f32.gmra.mxu1 %vm1331_vm0, %v5469_v41 }
 0xf26   : > { %v14547_v57 = vpop.f32.mrf.mxu0  ;;  %14583 = vmatprep.mubr.msk.f32.mxu1 %vm15867_vm2, %v15866_v10 }
 0xf27   : > { %v18909_v36 = vadd.f32 %v5652_v60, %v18812_v27 }
 0xf28   : > { %v5474_v2 = vpop.f32.mrf.mxu0 }
 0xf29   : > { %v18912_v16 = vadd.f32 %v5474_v2, %v18815_v46  ;;  %v5653_v43 = vmul.f32 %v5474_v2, %v5474_v2  ;;  %14584 = vmatmul.mubr.msk.f32.gmra.mxu1 %vm1331_vm0, %v5474_v2 }
 0xf2a   : > { %v14550_v51 = vpop.f32.mrf.mxu0  ;;  %14586 = vmatprep.mubr.msk.f32.mxu1 %vm15867_vm2, %v15866_v10 }
 0xf2b   : > { %v18918_v8 = vadd.f32 %v5653_v43, %v18821_v49 }
 0xf2c   : > { %v5479_v21 = vpop.f32.mrf.mxu0 }
 0xf2d   : > { %v18921_v26 = vadd.f32 %v5479_v21, %v18824_v45  ;;  %v5654_v27 = vmul.f32 %v5479_v21, %v5479_v21  ;;  %14587 = vmatmul.mubr.msk.f32.gmra.mxu1 %vm1331_vm0, %v5479_v21 }
 0xf2e   : > { %v14553_v62 = vpop.f32.mrf.mxu0  ;;  %14589 = vmatprep.mubr.msk.f32.mxu1 %vm15867_vm2, %v15866_v10 }
 0xf2f   : > { %v18927_v46 = vadd.f32 %v5654_v27, %v18830_v53 }
 0xf30   : > { %v5484_v30 = vpop.f32.mrf.mxu0 }
 0xf31   : > { %v18930_v38 = vadd.f32 %v5484_v30, %v18833_v11  ;;  %v5655_v49 = vmul.f32 %v5484_v30, %v5484_v30  ;;  %14590 = vmatmul.mubr.msk.f32.gmra.mxu1 %vm1331_vm0, %v5484_v30 }
 0xf32   : > { %v14556_v63 = vpop.f32.mrf.mxu0  ;;  %14659 = vmatprep.mubr.msk.f32.mxu1 %vm15867_vm2, %v15866_v10 }
 0xf33   : > { %v18936_v45 = vadd.f32 %v5655_v49, %v18839_v31 }
 0xf34   : > { %v5741_v53 = vpop.f32.mrf.mxu0 }
 0xf35   : > { %v18942_v12 = vadd.f32 %v5741_v53, %v18845_v15  ;;  %v5944_v11 = vmul.f32 %v5741_v53, %v5741_v53  ;;  %14660 = vmatmul.mubr.msk.f32.vlgmr.msra.gmra.mxu1 %vm1331_vm0, %v5741_v53  ;;  %v6083_v15 = vld [vmem:[%s21308_s12 + $0x108] sm:$0xff] }
 0xf36   : > { %v14626_v23 = vpop.f32.mrf.mxu0  ;;  %14662 = vmatprep.mubr.msk.f32.mxu1 %vm15867_vm2, %v15866_v10  ;;  %14746 = vmatpush3.msra.mxu1 %v6085_v24 }
 0xf37   : > { %v18951_v31 = vadd.f32 %v5944_v11, %v18854_v33  ;;  %14747 = vmatprep.subr.mxu1 %v15866_v10  ;;  %v6082_v33 = vld [vmem:[%s21308_s12 + $0x100] sm:$0xff] }
 0xf38   : > { %v5746_v35 = vpop.f32.mrf.mxu0  ;;  %14748 = vmatpush3.msra.mxu1 %v6084_v48 }
 0xf39   : > { %v18958_v50 = vadd.f32 %v5746_v35, %v18861_v4  ;;  %v5945_v55 = vmul.f32 %v5746_v35, %v5746_v35  ;;  %14663 = vmatmul.mubr.msk.f32.gmra.mxu1 %vm1331_vm0, %v5746_v35  ;;  %14749 = vmatprep.subr.mxu1 %v15866_v10 }
 0xf3a   : > { %v14629_v9 = vpop.f32.mrf.mxu0  ;;  %14665 = vmatprep.mubr.msk.f32.mxu1 %vm15867_vm2, %v15866_v10  ;;  %14750 = vmatpush3.msra.mxu1 %v6083_v15 }
 0xf3b   : > { %v18968_v58 = vadd.f32 %v5945_v55, %v18871_v59  ;;  %14751 = vmatprep.subr.mxu1 %v15866_v10 }
 0xf3c   : > { %v5751_v4 = vpop.f32.mrf.mxu0  ;;  %14752 = vmatpush3.msra.mxu1 %v6082_v33 }
 0xf3d   : > { %v18972_v47 = vadd.f32 %v5751_v4, %v18875_v20  ;;  %v5946_v5 = vmul.f32 %v5751_v4, %v5751_v4  ;;  %14666 = vmatmul.mubr.msk.f32.gmra.mxu1 %vm1331_vm0, %v5751_v4  ;;  %14825 = vmatprep.subr.mxu1 %v15866_v10 }
 0xf3e   : > { %v14632_v32 = vpop.f32.mrf.mxu0  ;;  %14668 = vmatprep.mubr.msk.f32.mxu1 %vm15867_vm2, %v15866_v10 }
 0xf3f   : > { %v18979_v3 = vadd.f32 %v5946_v5, %v18882_v40 }
 0xf40   : > { %v5756_v59 = vpop.f32.mrf.mxu0 }
 0xf41   : > { %v18982_v61 = vadd.f32 %v5756_v59, %v18885_v19  ;;  %v5947_v13 = vmul.f32 %v5756_v59, %v5756_v59  ;;  %v4397_v42 = vpop.f32.mrf.mxu1  ;;  %14669 = vmatmul.mubr.msk.f32.gmra.mxu1 %vm1331_vm0, %v5756_v59 }
 0xf42   : > { %v18986_v20 = vadd.f32 %v4397_v42, %v18266_v1  ;;  %v14635_v39 = vpop.f32.mrf.mxu0  ;;  %14671 = vmatprep.mubr.msk.f32.mxu1 %vm15867_vm2, %v15866_v10 }
 0xf43   : > { %v18991_v29 = vadd.f32 %v5947_v13, %v18891_v54  ;;  %v14191_v40 = vpop.f32.mrf.mxu1 }
 0xf44   : > { %v5761_v0 = vpop.f32.mrf.mxu0 }
 0xf45   : > { %v18994_v17 = vadd.f32 %v5761_v0, %v18894_v52  ;;  %v5948_v19 = vmul.f32 %v5761_v0, %v5761_v0  ;;  %v4402_v41 = vpop.f32.mrf.mxu1  ;;  %14672 = vmatmul.mubr.msk.f32.gmra.mxu1 %vm1331_vm0, %v5761_v0 }
 0xf46   : > { %v18998_v60 = vadd.f32 %v4402_v41, %v18283_v22  ;;  %v14638_v1 = vpop.f32.mrf.mxu0  ;;  %14674 = vmatprep.mubr.msk.f32.mxu1 %vm15867_vm2, %v15866_v10 }
 0xf47   : > { %v19003_v57 = vadd.f32 %v5948_v19, %v18900_v56  ;;  %v14194_v54 = vpop.f32.mrf.mxu1 }
 0xf48   : > { %v19005_v2 = vpop.f32.mrf.mxu0 }
 0xf49   : > { %v4407_v43 = vpop.f32.mrf.mxu1  ;;  %14675 = vmatmul.mubr.msk.f32.gmra.mxu1 %vm1331_vm0, %v19005_v2 }
 0xf4a   : > { %v19010_v52 = vadd.f32 %v4407_v43, %v18294_v34  ;;  %v14641_v51 = vpop.f32.mrf.mxu0  ;;  %14677 = vmatprep.mubr.msk.f32.mxu1 %vm15867_vm2, %v15866_v10 }
 0xf4b   : > { %v14197_v22 = vpop.f32.mrf.mxu1 }
 0xf4c   : > { %v19014_v21 = vpop.f32.mrf.mxu0 }
 0xf4d   : > { %v4412_v27 = vpop.f32.mrf.mxu1  ;;  %14678 = vmatmul.mubr.msk.f32.gmra.mxu1 %vm1331_vm0, %v19014_v21 }
 0xf4e   : > { %v19019_v56 = vadd.f32 %v4412_v27, %v18305_v37  ;;  %v14644_v62 = vpop.f32.mrf.mxu0  ;;  %14680 = vmatprep.mubr.msk.f32.mxu1 %vm15867_vm2, %v15866_v10 }
 0xf4f   : > { %v14200_v34 = vpop.f32.mrf.mxu1 }
 0xf50   : > { %v19023_v30 = vpop.f32.mrf.mxu0 }
 0xf51   : > { %v4417_v49 = vpop.f32.mrf.mxu1  ;;  %14681 = vmatmul.mubr.msk.f32.gmra.mxu1 %vm1331_vm0, %v19023_v30 }
 0xf52   : > { %v19028_v63 = vadd.f32 %v4417_v49, %v18316_v28  ;;  %v14647_v24 = vpop.f32.mrf.mxu0  ;;  %14683 = vmatprep.mubr.msk.f32.mxu1 %vm15867_vm2, %v15866_v10 }
 0xf53   : > { %v14203_v37 = vpop.f32.mrf.mxu1 }
 0xf54   : > { %v19032_v53 = vpop.f32.mrf.mxu0 }
 0xf55   : > { %v4422_v11 = vpop.f32.mrf.mxu1  ;;  %14684 = vmatmul.mubr.msk.f32.gmra.mxu1 %vm1331_vm0, %v19032_v53 }
 0xf56   : > { %v19037_v48 = vadd.f32 %v4422_v11, %v18326_v25  ;;  %v14650_v23 = vpop.f32.mrf.mxu0  ;;  %14753 = vmatprep.mubr.msk.f32.mxu1 %vm15867_vm2, %v15866_v10 }
 0xf57   : > { %v14206_v28 = vpop.f32.mrf.mxu1 }
 0xf58   : > { %v19041_v15 = vpop.f32.mrf.mxu0 }
 0xf59   : > { %v6241_v35 = vmul.f32 %v19041_v15, %v19041_v15  ;;  %v4427_v55 = vpop.f32.mrf.mxu1  ;;  %14754 = vmatmul.mubr.msk.f32.vlgmr.msra.gmra.mxu1 %vm1331_vm0, %v19041_v15 }
 0xf5a   : > { %v19048_v33 = vadd.f32 %v4427_v55, %v18334_v14  ;;  %v14720_v9 = vpop.f32.mrf.mxu0  ;;  %14756 = vmatprep.mubr.msk.f32.mxu1 %vm15867_vm2, %v15866_v10 }
 0xf5b   : > { %v14209_v25 = vpop.f32.mrf.mxu1  ;;  %v19053_v4 = vadd.f32 %v6241_v35, %v18951_v31 }
 0xf5c   : > { %v19055_v5 = vpop.f32.mrf.mxu0 }
 0xf5d   : > { %v4432_v32 = vpop.f32.mrf.mxu1  ;;  %14757 = vmatmul.mubr.msk.f32.gmra.mxu1 %vm1331_vm0, %v19055_v5 }
 0xf5e   : > { %v19060_v59 = vadd.f32 %v4432_v32, %v18345_v7  ;;  %v14723_v13 = vpop.f32.mrf.mxu0  ;;  %14759 = vmatprep.mubr.msk.f32.mxu1 %vm15867_vm2, %v15866_v10 }
 0xf5f   : > { %v14212_v14 = vpop.f32.mrf.mxu1  ;;  %v5942_v13 = vadd.f32 %v19023_v30, %v18921_v26 }
 0xf60   : > { %v19064_v42 = vpop.f32.mrf.mxu0 }
 0xf61   : > { %v4437_v39 = vpop.f32.mrf.mxu1  ;;  %14760 = vmatmul.mubr.msk.f32.gmra.mxu1 %vm1331_vm0, %v19064_v42 }
 0xf62   : > { %v19069_v31 = vadd.f32 %v4437_v39, %v18356_v18  ;;  %v14726_v40 = vpop.f32.mrf.mxu0  ;;  %14762 = vmatprep.mubr.msk.f32.mxu1 %vm15867_vm2, %v15866_v10  ;;  %v5951_v39 = vmul.f32 %v19023_v30, %v19023_v30 }
 0xf63   : > { %v14215_v7 = vpop.f32.mrf.mxu1 }
 0xf64   : > { %v19073_v0 = vpop.f32.mrf.mxu0 }
 0xf65   : > { %v4694_v19 = vpop.f32.mrf.mxu1  ;;  %14763 = vmatmul.mubr.msk.f32.gmra.mxu1 %vm1331_vm0, %v19073_v0 }
 0xf66   : > { %v19078_v41 = vadd.f32 %v4694_v19, %v18986_v20  ;;  %v14729_v1 = vpop.f32.mrf.mxu0  ;;  %14765 = vmatprep.mubr.msk.f32.mxu1 %vm15867_vm2, %v15866_v10 }
 0xf67   : > { %v14285_v18 = vpop.f32.mrf.mxu1  ;;  %v5941_v1 = vadd.f32 %v19014_v21, %v18912_v16 }
 0xf68   : > { %v19082_v54 = vpop.f32.mrf.mxu0 }
 0xf69   : > { %v4699_v43 = vpop.f32.mrf.mxu1  ;;  %14766 = vmatmul.mubr.msk.f32.gmra.mxu1 %vm1331_vm0, %v19082_v54 }
 0xf6a   : > { %v19087_v51 = vadd.f32 %v4699_v43, %v18998_v60  ;;  %v14732_v22 = vpop.f32.mrf.mxu0  ;;  %14768 = vmatprep.mubr.msk.f32.mxu1 %vm15867_vm2, %v15866_v10 }
 0xf6b   : > { %v14288_v20 = vpop.f32.mrf.mxu1  ;;  %v5950_v22 = vmul.f32 %v19014_v21, %v19014_v21 }
 0xf6c   : > { %v6063_v27 = vpop.f32.mrf.mxu0  ;;  %v5960_v20 = vadd.f32 %v5951_v39, %v18927_v46  ;;  %v5949_v46 = vmul.f32 %v19005_v2, %v19005_v2 }
 0xf6d   : > { %v4704_v62 = vpop.f32.mrf.mxu1  ;;  %14769 = vmatmul.mubr.msk.f32.gmra.mxu1 %vm1331_vm0, %v6063_v27  ;;  %v5959_v21 = vadd.f32 %v5950_v22, %v18918_v8 }
 0xf6e   : > { %v19093_v34 = vadd.f32 %v4704_v62, %v19010_v52  ;;  %v14735_v49 = vpop.f32.mrf.mxu0  ;;  %14771 = vmatprep.mubr.msk.f32.mxu1 %vm15867_vm2, %v15866_v10  ;;  %v5952_v52 = vmul.f32 %v19032_v53, %v19032_v53 }
 0xf6f   : > { %v14291_v24 = vpop.f32.mrf.mxu1 }
 0xf70   : > { %v6068_v37 = vpop.f32.mrf.mxu0  ;;  %v5961_v40 = vadd.f32 %v5952_v52, %v18936_v45  ;;  %v5940_v24 = vadd.f32 %v19005_v2, %v18903_v6  ;;  %v6246_v6 = vmul.f32 %v6063_v27, %v6063_v27  ;;  %v6236_v2 = vadd.f32 %v19082_v54, %v18994_v17 }
 0xf71   : > { %v4709_v60 = vpop.f32.mrf.mxu1  ;;  %14772 = vmatmul.mubr.msk.f32.gmra.mxu1 %vm1331_vm0, %v6068_v37  ;;  %v6238_v16 = vadd.f32 %v6068_v37, %v5941_v1 }
 0xf72   : > { %v19099_v11 = vadd.f32 %v4709_v60, %v19019_v56  ;;  %v14738_v23 = vpop.f32.mrf.mxu0  ;;  %14774 = vmatprep.mubr.msk.f32.mxu1 %vm15867_vm2, %v15866_v10  ;;  %v5943_v56 = vadd.f32 %v19032_v53, %v18930_v38  ;;  %v6247_v60 = vmul.f32 %v6068_v37, %v6068_v37  ;;  %v6237_v52 = vadd.f32 %v6063_v27, %v5940_v24 }
 0xf73   : > { %v14294_v28 = vpop.f32.mrf.mxu1  ;;  %v6271_v17 = vsel %vm1331_vm0, %v6236_v2, 0.0 }
 0xf74   : > { %v6073_v35 = vpop.f32.mrf.mxu0 }
 0xf75   : > { %v4714_v55 = vpop.f32.mrf.mxu1  ;;  %14775 = vmatmul.mubr.msk.f32.gmra.mxu1 %vm1331_vm0, %v6073_v35  ;;  %v6239_v26 = vadd.f32 %v6073_v35, %v5942_v13  ;;  %v6248_v18 = vmul.f32 %v6073_v35, %v6073_v35  ;;  %v5958_v13 = vadd.f32 %v5949_v46, %v18909_v36  ;;  %v6235_v36 = vadd.f32 %v19073_v0, %v18982_v61 }
 0xf76   : > { %v19107_v9 = vadd.f32 %v4714_v55, %v19028_v63  ;;  %v14741_v25 = vpop.f32.mrf.mxu0  ;;  %14777 = vmatprep.mubr.msk.f32.mxu1 %vm15867_vm2, %v15866_v10 }
 0xf77   : > { %v14297_v32 = vpop.f32.mrf.mxu1  ;;  %v6280_v28 = vsel %vm1331_vm0, %v6239_v26, 0.0  ;;  %v6257_v35 = vadd.f32 %v6248_v18, %v5960_v20  ;;  %v6234_v26 = vadd.f32 %v19064_v42, %v18972_v47  ;;  %v6268_v61 = vsel %vm1331_vm0, %v6235_v36, 0.0 }
 0xf78   : > { %v6078_v14 = vpop.f32.mrf.mxu0  ;;  %v6256_v32 = vadd.f32 %v6247_v60, %v5959_v21  ;;  %v6295_v21 = vsel %vm1331_vm0, %v19053_v4, 0.0 }
 0xf79   : > { %v6240_v7 = vadd.f32 %v6078_v14, %v5943_v56  ;;  %v6249_v63 = vmul.f32 %v6078_v14, %v6078_v14  ;;  %v4719_v19 = vpop.f32.mrf.mxu1  ;;  %14778 = vmatmul.mubr.msk.f32.gmra.mxu1 %vm1331_vm0, %v6078_v14  ;;  %v6316_v56 = vsel %vm1331_vm0, %v6257_v35, 0.0  ;;  %v6274_v14 = vsel %vm1331_vm0, %v6237_v52, 0.0 }
 0xf7a   : > { %v19122_v38 = vadd.f32 %v4719_v19, %v19037_v48  ;;  %v14744_v53 = vpop.f32.mrf.mxu0  ;;  %14843 = vmatprep.mubr.msk.f32.mxu1 %vm15867_vm2, %v15866_v10  ;;  %v6265_v47 = vsel %vm1331_vm0, %v6234_v26, 0.0 }
 0xf7b   : > { %v14300_v30 = vpop.f32.mrf.mxu1  ;;  %v6283_v45 = vsel %vm1331_vm0, %v6240_v7, 0.0  ;;  %v6258_v43 = vadd.f32 %v6249_v63, %v5961_v40  ;;  %v6313_v40 = vsel %vm1331_vm0, %v6256_v32, 0.0  ;;  %v6255_v7 = vadd.f32 %v6246_v6, %v5958_v13 }
 0xf7c   : > { %6284 = vadd.xlane.f32.xlu0 %v6283_v45 }
 0xf7d   : > { %v4724_v62 = vpop.f32.mrf.mxu1  ;;  %v6319_v48 = vsel %vm1331_vm0, %v6258_v43, 0.0 }
 0xf7e   : > { %v19132_v49 = vadd.f32 %v4724_v62, %v19048_v33  ;;  %6320 = vadd.xlane.f32.xlu1 %v6319_v48  ;;  %v6277_v33 = vsel %vm1331_vm0, %v6238_v16, 0.0 }
 0xf7f   : > { %v14303_v23 = vpop.f32.mrf.mxu1 }
 0xf80   : > { %6281 = vadd.xlane.f32.xlu0 %v6280_v28 }
 0xf81   : > { %v4729_v55 = vpop.f32.mrf.mxu1 }
 0xf82   : > { %v19142_v25 = vadd.f32 %v4729_v55, %v19060_v59  ;;  %6278 = vadd.xlane.f32.xlu1 %v6277_v33  ;;  %v6245_v59 = vmul.f32 %v19082_v54, %v19082_v54  ;;  %v6310_v54 = vsel %vm1331_vm0, %v6255_v7, 0.0 }
 0xf83   : > { %v14306_v37 = vpop.f32.mrf.mxu1 }
 0xf84   : > { %6317 = vadd.xlane.f32.xlu0 %v6316_v56  ;;  %v6254_v53 = vadd.f32 %v6245_v59, %v19003_v57  ;;  %v6233_v57 = vadd.f32 %v19055_v5, %v18958_v50 }
 0xf85   : > { %v4734_v8 = vpop.f32.mrf.mxu1 }
 0xf86   : > { %v19150_v39 = vadd.f32 %v4734_v8, %v19069_v31  ;;  %6275 = vadd.xlane.f32.xlu1 %v6274_v14  ;;  %v6244_v31 = vmul.f32 %v19073_v0, %v19073_v0  ;;  %v6307_v0 = vsel %vm1331_vm0, %v6254_v53, 0.0  ;;  %v6262_v50 = vsel %vm1331_vm0, %v6233_v57, 0.0 }
 0xf87   : > { %v14309_v27 = vpop.f32.mrf.mxu1 }
 0xf88   : > { %6314 = vadd.xlane.f32.xlu0 %v6313_v40  ;;  %v6253_v43 = vadd.f32 %v6244_v31, %v18991_v29  ;;  %v6232_v29 = vadd.f32 %v19041_v15, %v18942_v12 }
 0xf89   : > { %v4991_v63 = vpop.f32.mrf.mxu1 }
 0xf8a   : > { %v5035_v19 = vadd.f32 %v4991_v63, %v19078_v41  ;;  %6272 = vadd.xlane.f32.xlu1 %v6271_v17  ;;  %v6243_v41 = vmul.f32 %v19064_v42, %v19064_v42  ;;  %v6304_v42 = vsel %vm1331_vm0, %v6253_v43, 0.0  ;;  %v6259_v28 = vsel %vm1331_vm0, %v6232_v29, 0.0 }
 0xf8b   : > { %v14379_v1 = vpop.f32.mrf.mxu1 }
 0xf8c   : > { %6311 = vadd.xlane.f32.xlu0 %v6310_v54  ;;  %v6252_v62 = vadd.f32 %v6243_v41, %v18979_v3 }
 0xf8d   : > { %v4996_v18 = vpop.f32.mrf.mxu1 }
 0xf8e   : > { %v5036_v30 = vadd.f32 %v4996_v18, %v19087_v51  ;;  %6269 = vadd.xlane.f32.xlu1 %v6268_v61  ;;  %v6242_v51 = vmul.f32 %v19055_v5, %v19055_v5  ;;  %v6301_v60 = vsel %vm1331_vm0, %v6252_v62, 0.0 }
 0xf8f   : > { %v14382_v45 = vpop.f32.mrf.mxu1 }
 0xf90   : > { %6308 = vadd.xlane.f32.xlu0 %v6307_v0  ;;  %v6251_v5 = vadd.f32 %v6242_v51, %v18968_v58 }
 0xf91   : > { %v5001_v22 = vpop.f32.mrf.mxu1 }
 0xf92   : > { %v5037_v20 = vadd.f32 %v5001_v22, %v19093_v34  ;;  %6266 = vadd.xlane.f32.xlu1 %v6265_v47  ;;  %v6298_v12 = vsel %vm1331_vm0, %v6251_v5, 0.0 }
 0xf93   : > { %v14385_v16 = vpop.f32.mrf.mxu1 }
 0xf94   : > { %6305 = vadd.xlane.f32.xlu0 %v6304_v42 }
 0xf95   : > { %v5006_v48 = vpop.f32.mrf.mxu1 }
 0xf96   : > { %v5038_v24 = vadd.f32 %v5006_v48, %v19099_v11  ;;  %6263 = vadd.xlane.f32.xlu1 %v6262_v50 }
 0xf97   : > { %v14388_v34 = vpop.f32.mrf.mxu1 }
 0xf98   : > { %6302 = vadd.xlane.f32.xlu0 %v6301_v60 }
 0xf99   : > { %v5011_v23 = vpop.f32.mrf.mxu1 }
 0xf9a   : > { %v5039_v3 = vadd.f32 %v5011_v23, %v19107_v9  ;;  %6260 = vadd.xlane.f32.xlu1 %v6259_v28 }
 0xf9b   : > { %v14391_v35 = vpop.f32.mrf.mxu1 }
 0xf9c   : > { %6299 = vadd.xlane.f32.xlu0 %v6298_v12 }
 0xf9d   : > { %v5016_v15 = vpop.f32.mrf.mxu1 }
 0xf9e   : > { %v5040_v11 = vadd.f32 %v5016_v15, %v19122_v38 }
 0xf9f   : > { %v14394_v46 = vpop.f32.mrf.mxu1 }
 0xfa0   : > { %6296 = vadd.xlane.f32.xlu0 %v6295_v21 }
 0xfa1   : > { %v5021_v58 = vpop.f32.mrf.mxu1 }
 0xfa2   : > { %v5041_v52 = vadd.f32 %v5021_v58, %v19132_v49 }
 0xfa3   : > { %v14397_v55 = vpop.f32.mrf.mxu1 }
 0xfa5   : > { %v5026_v33 = vpop.f32.mrf.mxu1 }
 0xfa6   : > { %v5042_v9 = vadd.f32 %v5026_v33, %v19142_v25 }
 0xfa7   : > { %v14400_v6 = vpop.f32.mrf.mxu1 }
 0xfa9   : > { %v5031_v37 = vpop.f32.mrf.mxu1 }
 0xfaa   : > { %v5043_v56 = vadd.f32 %v5031_v37, %v19150_v39 }
 0xfab   : > { %v14403_v32 = vpop.f32.mrf.mxu1 }
 0xfad   : > { %v5288_v13 = vpop.f32.mrf.mxu1 }
 0xfae   : > { %v5332_v2 = vadd.f32 %v5288_v13, %v5035_v19 }
 0xfaf   : > { %v14473_v38 = vpop.f32.mrf.mxu1 }
 0xfb1   : > { %v5293_v8 = vpop.f32.mrf.mxu1 }
 0xfb2   : > { %v5333_v14 = vadd.f32 %v5293_v8, %v5036_v30 }
 0xfb3   : > { %v14476_v59 = vpop.f32.mrf.mxu1 }
 0xfb5   : > { %v5298_v4 = vpop.f32.mrf.mxu1 }
 0xfb6   : > { %v5334_v27 = vadd.f32 %v5298_v4, %v5037_v20 }
 0xfb7   : > { %v14479_v40 = vpop.f32.mrf.mxu1 }
 0xfb9   : > { %v5303_v7 = vpop.f32.mrf.mxu1 }
 0xfba   : > { %v5335_v49 = vadd.f32 %v5303_v7, %v5038_v24 }
 0xfbb   : > { %v14482_v36 = vpop.f32.mrf.mxu1 }
 0xfbd   : > { %v5308_v63 = vpop.f32.mrf.mxu1 }
 0xfbe   : > { %v5336_v17 = vadd.f32 %v5308_v63, %v5039_v3 }
 0xfbf   : > { %v14485_v25 = vpop.f32.mrf.mxu1 }
 0xfc1   : > { %v5313_v31 = vpop.f32.mrf.mxu1 }
 0xfc2   : > { %v5337_v1 = vadd.f32 %v5313_v31, %v5040_v11 }
 0xfc3   : > { %v14488_v54 = vpop.f32.mrf.mxu1 }
 0xfc5   : > { %v5318_v39 = vpop.f32.mrf.mxu1 }
 0xfc6   : > { %v5338_v53 = vadd.f32 %v5318_v39, %v5041_v52 }
 0xfc7   : > { %v14491_v26 = vpop.f32.mrf.mxu1 }
 0xfc9   : > { %v5323_v19 = vpop.f32.mrf.mxu1 }
 0xfca   : > { %v5339_v18 = vadd.f32 %v5323_v19, %v5042_v9 }
 0xfcb   : > { %v14494_v61 = vpop.f32.mrf.mxu1 }
 0xfcd   : > { %v5328_v30 = vpop.f32.mrf.mxu1 }
 0xfce   : > { %v5340_v41 = vadd.f32 %v5328_v30, %v5043_v56 }
 0xfcf   : > { %v14497_v45 = vpop.f32.mrf.mxu1 }
 0xfd1   : > { %v5585_v0 = vpop.f32.mrf.mxu1 }
 0xfd2   : > { %v5629_v43 = vadd.f32 %v5585_v0, %v5332_v2 }
 0xfd3   : > { %v14567_v57 = vpop.f32.mrf.mxu1 }
 0xfd5   : > { %v5590_v22 = vpop.f32.mrf.mxu1 }
 0xfd6   : > { %v5630_v47 = vadd.f32 %v5590_v22, %v5333_v14 }
 0xfd7   : > { %v14570_v20 = vpop.f32.mrf.mxu1 }
 0xfd9   : > { %v5595_v51 = vpop.f32.mrf.mxu1 }
 0xfda   : > { %v19194_v16 = vadd.f32 %v5595_v51, %v5334_v27 }
 0xfdb   : > { %v14573_v42 = vpop.f32.mrf.mxu1 }
 0xfdd   : > { %v5600_v62 = vpop.f32.mrf.mxu1 }
 0xfde   : > { %v5632_v29 = vadd.f32 %v5600_v62, %v5335_v49 }
 0xfdf   : > { %v14576_v48 = vpop.f32.mrf.mxu1 }
 0xfe1   : > { %v5605_v50 = vpop.f32.mrf.mxu1 }
 0xfe2   : > { %v19196_v24 = vadd.f32 %v5605_v50, %v5336_v17 }
 0xfe3   : > { %v14579_v34 = vpop.f32.mrf.mxu1 }
 0xfe5   : > { %v5610_v60 = vpop.f32.mrf.mxu1 }
 0xfe6   : > { %v19198_v5 = vadd.f32 %v5610_v60, %v5337_v1 }
 0xfe7   : > { %v14582_v23 = vpop.f32.mrf.mxu1 }
 0xfe9   : > { %v5615_v28 = vpop.f32.mrf.mxu1 }
 0xfea   : > { %v19200_v3 = vadd.f32 %v5615_v28, %v5338_v53 }
 0xfeb   : > { %v14585_v35 = vpop.f32.mrf.mxu1 }
 0xfed   : > { %v5620_v12 = vpop.f32.mrf.mxu1 }
 0xfee   : > { %v19202_v15 = vadd.f32 %v5620_v12, %v5339_v18 }
 0xfef   : > { %v14588_v11 = vpop.f32.mrf.mxu1 }
 0xff1   : > { %v5625_v46 = vpop.f32.mrf.mxu1 }
 0xff2   : > { %v19204_v21 = vadd.f32 %v5625_v46, %v5340_v41 }
 0xff3   : > { %v14591_v58 = vpop.f32.mrf.mxu1 }
 0xff5   : > { %v5882_v52 = vpop.f32.mrf.mxu1 }
 0xff6   : > { %v19206_v55 = vadd.f32 %v5882_v52, %v5629_v43 }
 0xff7   : > { %v14661_v33 = vpop.f32.mrf.mxu1 }
 0xff9   : > { %v5887_v9 = vpop.f32.mrf.mxu1 }
 0xffa   : > { %v19208_v6 = vadd.f32 %v5887_v9, %v5630_v47 }
 0xffb   : > { %v14664_v37 = vpop.f32.mrf.mxu1 }
 0xffd   : > { %v19210_v56 = vpop.f32.mrf.mxu1 }
 0xfff   : > { %v14667_v32 = vpop.f32.mrf.mxu1 }
0x1001   : > { %v5897_v13 = vpop.f32.mrf.mxu1 }
0x1002   : > { %v19212_v2 = vadd.f32 %v5897_v13, %v5632_v29 }
0x1003   : > { %v14670_v38 = vpop.f32.mrf.mxu1 }
0x1005   : > { %v19214_v8 = vpop.f32.mrf.mxu1  ;;  %v6285_v14 = vpop.xlane.xlu0 %6284 }
0x1006   : > { %v19228_v45 = vmul.f32 0.0034722222, %v6285_v14 }
0x1007   : > { %v14673_v59 = vpop.f32.mrf.mxu1  ;;  %v6321_v4 = vpop.xlane.xlu1 %6320 }
0x1008   : > { %v6339_v62 = vmul.f32 %v19228_v45, %v19228_v45  ;;  %v6330_v29 = vmul.f32 0.0034722222, %v6321_v4 }
0x1009   : > { %v19216_v27 = vpop.f32.mrf.mxu1  ;;  %v6282_v40 = vpop.xlane.xlu0 %6281 }
0x100a   : > { %v19224_v61 = vmul.f32 0.0034722222, %v6282_v40  ;;  %v6348_v58 = vsub.f32 %v6330_v29, %v6339_v62 }
0x100b   : > { %v14676_v7 = vpop.f32.mrf.mxu1  ;;  %v6279_v49 = vpop.xlane.xlu1 %6278 }
0x100c   : > { %v6338_v20 = vmul.f32 %v19224_v61, %v19224_v61  ;;  %v19240_v50 = vmul.f32 0.0034722222, %v6279_v49 }
0x100d   : > { %v19218_v36 = vpop.f32.mrf.mxu1  ;;  %v6318_v63 = vpop.xlane.xlu0 %6317 }
0x100e   : > { %v6329_v43 = vmul.f32 0.0034722222, %v6318_v63  ;;  %v6337_v52 = vmul.f32 %v19240_v50, %v19240_v50 }
0x100f   : > { %v14679_v17 = vpop.f32.mrf.mxu1  ;;  %v6276_v25 = vpop.xlane.xlu1 %6275 }
0x1010   : > { %v6347_v34 = vsub.f32 %v6329_v43, %v6338_v20  ;;  %v19250_v38 = vmul.f32 0.0034722222, %v6276_v25 }
0x1011   : > { %v19220_v31 = vpop.f32.mrf.mxu1  ;;  %v6315_v1 = vpop.xlane.xlu0 %6314 }
0x1012   : > { %v6328_v12 = vmul.f32 0.0034722222, %v6315_v1  ;;  %v6356_v33 = vmax.f32 %v6347_v34, 0.0  ;;  %v6357_v1 = vmax.f32 %v6348_v58, 0.0 }
0x1013   : > { %v14682_v54 = vpop.f32.mrf.mxu1  ;;  %v6273_v39 = vpop.xlane.xlu1 %6272 }
0x1014   : > { %v19230_v0 = vmul.f32 0.0034722222, %v6273_v39  ;;  %v6346_v59 = vsub.f32 %v6328_v12, %v6337_v52  ;;  %v6365_v54 = vadd.f32 1e-05, %v6356_v33 }
0x1015   : > { %v19222_v53 = vpop.f32.mrf.mxu1  ;;  %v6312_v26 = vpop.xlane.xlu0 %6311 }
0x1016   : > { %v6335_v48 = vmul.f32 %v19230_v0, %v19230_v0  ;;  %v6327_v49 = vmul.f32 0.0034722222, %v6312_v26  ;;  %15697 = vrsqrt.f32 %v6365_v54  ;;  %v5933_v54 = vadd.f32 %v19220_v31, %v19202_v15 }
0x1017   : > { %v14685_v19 = vpop.f32.mrf.mxu1  ;;  %v6270_v18 = vpop.xlane.xlu1 %6269 }
0x1018   : > { %v19254_v63 = vmul.f32 0.0034722222, %v6270_v18  ;;  %v6336_v19 = vmul.f32 %v19250_v38, %v19250_v38 }
0x1019   : > { %v19226_v30 = vpop.f32.mrf.mxu1  ;;  %v6309_v41 = vpop.xlane.xlu0 %6308 }
0x101a   : > { %v6326_v47 = vmul.f32 0.0034722222, %v6309_v41  ;;  %v6345_v62 = vsub.f32 %v6327_v49, %v6336_v19  ;;  %v6334_v26 = vmul.f32 %v19254_v63, %v19254_v63  ;;  %v5930_v49 = vadd.f32 %v19214_v8, %v19196_v24 }
0x101b   : > { %v14755_v57 = vpop.f32.mrf.mxu1  ;;  %v6267_v22 = vpop.xlane.xlu1 %6266  ;;  %v5928_v8 = vadd.f32 %v19210_v56, %v19194_v16 }
0x101c   : > { %v19242_v60 = vmul.f32 0.0034722222, %v6267_v22  ;;  %v6344_v35 = vsub.f32 %v6326_v47, %v6335_v48  ;;  %v6355_v57 = vmax.f32 %v6346_v59, 0.0  ;;  %v6366_v48 = vadd.f32 1e-05, %v6357_v1 }
0x101d   : > { %v19234_v51 = vpop.f32.mrf.mxu1  ;;  %v6306_v42 = vpop.xlane.xlu0 %6305  ;;  %v6354_v52 = vmax.f32 %v6345_v62, 0.0  ;;  %v19273_v1 = vld [vmem:[%s21309_s13] ss:$0 sm:$0xff]  ;;  %v5934_v62 = vadd.f32 %v19222_v53, %v19204_v21  ;;  %v12606_v53 = vld [vmem:[%s21309_s13 + $0x1] ss:$0 sm:$0xff] }
0x101e   : > { %v6333_v9 = vmul.f32 %v19242_v60, %v19242_v60  ;;  %v6353_v14 = vmax.f32 %v6344_v35, 0.0  ;;  %v6325_v25 = vmul.f32 0.0034722222, %v6306_v42  ;;  %v6364_v58 = vadd.f32 1e-05, %v6355_v57 }
0x101f   : > { %v14758_v23 = vpop.f32.mrf.mxu1  ;;  %v6264_v28 = vpop.xlane.xlu1 %6263  ;;  %v6363_v59 = vadd.f32 1e-05, %v6354_v52  ;;  %v6388_v19 = vmul.f32 %v19273_v1, %v19224_v61  ;;  %v6385_v57 = vmul.f32 %v19273_v1, %v19230_v0  ;;  %v6387_v16 = vmul.f32 %v19273_v1, %v19240_v50 }
0x1020   : > { %v6362_v41 = vadd.f32 1e-05, %v6353_v14  ;;  %v19260_v22 = vmul.f32 0.0034722222, %v6264_v28  ;;  %v6343_v42 = vsub.f32 %v6325_v25, %v6334_v26  ;;  %v5932_v25 = vadd.f32 %v19218_v36, %v19200_v3 }
0x1021   : > { %v19244_v11 = vpop.f32.mrf.mxu1  ;;  %v6303_v46 = vpop.xlane.xlu0 %6302  ;;  %v6389_v3 = vmul.f32 %v19273_v1, %v19228_v45  ;;  %v5931_v36 = vadd.f32 %v19216_v27, %v19198_v5  ;;  %v6383_v21 = vmul.f32 %v19273_v1, %v19242_v60 }
0x1022   : > { %v6324_v37 = vmul.f32 0.0034722222, %v6303_v46  ;;  %15699 = vrsqrt.f32 %v6362_v41  ;;  %v6332_v28 = vmul.f32 %v19260_v22, %v19260_v22  ;;  %v6225_v0 = vadd.f32 %v19244_v11, %v5928_v8 }
0x1023   : > { %v14761_v32 = vpop.f32.mrf.mxu1  ;;  %v6261_v13 = vpop.xlane.xlu1 %6260  ;;  %15701 = vrsqrt.f32 %v6366_v48 }
0x1024   : > { %v6342_v4 = vsub.f32 %v6324_v37, %v6333_v9  ;;  %v19256_v17 = vmul.f32 0.0034722222, %v6261_v13  ;;  %v6352_v32 = vmax.f32 %v6343_v42, 0.0  ;;  %v15698_v31 = vpop.eup %15697 }
0x1025   : > { %v19252_v40 = vpop.f32.mrf.mxu1  ;;  %v6300_v7 = vpop.xlane.xlu0 %6299 }
0x1026   : > { %v6351_v43 = vmax.f32 %v6342_v4, 0.0  ;;  %v6331_v18 = vmul.f32 %v19256_v17, %v19256_v17  ;;  %v6323_v34 = vmul.f32 0.0034722222, %v6300_v7  ;;  %v6381_v60 = vmul.f32 %v19273_v1, %v19256_v17 }
0x1027   : > { %v14764_v39 = vpop.f32.mrf.mxu1  ;;  %v6226_v17 = vadd.f32 %v19252_v40, %v19212_v2  ;;  %v6382_v2 = vmul.f32 %v19273_v1, %v19260_v22 }
0x1028   : > { %v6360_v35 = vadd.f32 1e-05, %v6351_v43  ;;  %v6341_v9 = vsub.f32 %v6323_v34, %v6332_v28  ;;  %v6361_v39 = vadd.f32 1e-05, %v6352_v32 }
0x1029   : > { %v6199_v47 = vpop.f32.mrf.mxu1  ;;  %v6297_v20 = vpop.xlane.xlu0 %6296 }
0x102a   : > { %v6322_v29 = vmul.f32 0.0034722222, %v6297_v20  ;;  %15703 = vrsqrt.f32 %v6360_v35  ;;  %v6350_v4 = vmax.f32 %v6341_v9, 0.0  ;;  %v6227_v43 = vadd.f32 %v6199_v47, %v5930_v49 }
0x102b   : > { %v14767_v23 = vpop.f32.mrf.mxu1  ;;  %15705 = vrsqrt.f32 %v6364_v58  ;;  %v6386_v35 = vmul.f32 %v19273_v1, %v19250_v38  ;;  %v6223_v58 = vadd.f32 %v19226_v30, %v19206_v55  ;;  %v6384_v55 = vmul.f32 %v19273_v1, %v19254_v63 }
0x102c   : > { %v6340_v12 = vsub.f32 %v6322_v29, %v6331_v18  ;;  %v6359_v20 = vadd.f32 1e-05, %v6350_v4  ;;  %v6394_v47 = vsub.f32 %v6227_v43, %v6385_v57  ;;  %v6224_v63 = vadd.f32 %v19234_v51, %v19208_v6 }
0x102d   : > { %v6204_v46 = vpop.f32.mrf.mxu1  ;;  %v6393_v40 = vsub.f32 %v6226_v17, %v6384_v55  ;;  %v6426_v55 = vld [vmem:[%s21383_s2 + $0x20] sm:$0xff] }
0x102e   : > { %v6349_v33 = vmax.f32 %v6340_v12, 0.0  ;;  %v6228_v45 = vadd.f32 %v6204_v46, %v5931_v36  ;;  %v6392_v12 = vsub.f32 %v6225_v0, %v6383_v21 }
0x102f   : > { %v14770_v37 = vpop.f32.mrf.mxu1  ;;  %v15700_v18 = vpop.eup %15699 }
0x1030   : > { %v6358_v13 = vadd.f32 1e-05, %v6349_v33  ;;  %v15702_v5 = vpop.eup %15701  ;;  %v6403_v27 = vmul.f32 %v15700_v18, %v6394_v47  ;;  %v6395_v52 = vsub.f32 %v6228_v45, %v6386_v35 }
0x1031   : > { %v6209_v14 = vpop.f32.mrf.mxu1 }
0x1032   : > { %15707 = vrsqrt.f32 %v6358_v13  ;;  %v6229_v61 = vadd.f32 %v6209_v14, %v5932_v25  ;;  %v19309_v33 = vadd.f32 %v12606_v53, %v6403_v27  ;;  %v6390_v13 = vsub.f32 %v6223_v58, %v6381_v60 }
0x1033   : > { %v14773_v7 = vpop.f32.mrf.mxu1  ;;  %15709 = vrsqrt.f32 %v6363_v59  ;;  %v6391_v25 = vsub.f32 %v6224_v63, %v6382_v2 }
0x1034   : > { %15711 = vrsqrt.f32 %v6361_v39  ;;  %v6396_v23 = vsub.f32 %v6229_v61, %v6387_v16 }
0x1035   : > { %v6214_v41 = vpop.f32.mrf.mxu1  ;;  %15713 = vrsqrt.f32 %v6359_v20 }
0x1036   : > { %v6230_v24 = vadd.f32 %v6214_v41, %v5933_v54 }
0x1037   : > { %v14776_v15 = vpop.f32.mrf.mxu1  ;;  %v15704_v11 = vpop.eup %15703 }
0x1038   : > { %v6397_v26 = vsub.f32 %v6230_v24, %v6388_v19  ;;  %v15706_v46 = vpop.eup %15705  ;;  %v6401_v32 = vmul.f32 %v15704_v11, %v6392_v12 }
0x1039   : > { %v6219_v56 = vpop.f32.mrf.mxu1  ;;  %v6405_v9 = vmul.f32 %v15706_v46, %v6396_v23 }
0x103a   : > { %v6406_v29 = vmul.f32 %v15698_v31, %v6397_v26  ;;  %v6231_v48 = vadd.f32 %v6219_v56, %v5934_v62  ;;  %v19323_v4 = vadd.f32 %v12606_v53, %v6401_v32  ;;  %v6425_v32 = vld [vmem:[%s21383_s2 + $0x18] sm:$0xff] }
0x103b   : > { %v14779_v34 = vpop.f32.mrf.mxu1  ;;  %v19321_v59 = vadd.f32 %v12606_v53, %v6405_v9 }
0x103c   : > { %v19299_v50 = vadd.f32 %v12606_v53, %v6406_v29  ;;  %v6398_v42 = vsub.f32 %v6231_v48, %v6389_v3  ;;  %v6422_v34 = vld [vmem:[%s21383_s2] sm:$0xff] }
0x103e   : > { %v6407_v28 = vmul.f32 %v15702_v5, %v6398_v42  ;;  %6454 = vrot.lane.b32.xlu0 %v19299_v50, %s15862_s4  ;;  %v6423_v42 = vld [vmem:[%s21383_s2 + $0x8] sm:$0xff] }
0x103f   : > { %v15708_v38 = vpop.eup %15707 }
0x1040   : > { %v19311_v37 = vadd.f32 %v12606_v53, %v6407_v28  ;;  %v15710_v14 = vpop.eup %15709  ;;  %v6399_v7 = vmul.f32 %v15708_v38, %v6390_v13  ;;  %v6424_v28 = vld [vmem:[%s21383_s2 + $0x10] sm:$0xff] }
0x1041   : > { %v6404_v30 = vmul.f32 %v15710_v14, %v6395_v52  ;;  %v15712_v49 = vpop.eup %15711 }
0x1042   : > { %6448 = vrot.lane.b32.xlu0 %v19309_v33, %s15862_s4  ;;  %6456 = vrot.lane.b32.xlu1 %v19311_v37, %s15862_s4  ;;  %v15714_v54 = vpop.eup %15713  ;;  %v6402_v39 = vmul.f32 %v15712_v49, %v6393_v40  ;;  %v19335_v41 = vadd.f32 %v12606_v53, %v6399_v7  ;;  %v6427_v40 = vld [vmem:[%s21383_s2 + $0x28] sm:$0xff] }
0x1043   : > { %v19333_v19 = vadd.f32 %v12606_v53, %v6404_v30  ;;  %v6400_v1 = vmul.f32 %v15714_v54, %v6391_v25 }
0x1044   : > { %v19341_v22 = vadd.f32 %v12606_v53, %v6402_v39 }
0x1045   : > { %v19347_v6 = vadd.f32 %v12606_v53, %v6400_v1  ;;  %v6428_v1 = vld [vmem:[%s21383_s2 + $0x30] sm:$0xff] }
0x1046   : > { %6444 = vrot.lane.b32.xlu0 %v19323_v4, %s15862_s4  ;;  %6452 = vrot.lane.b32.xlu1 %v19321_v59, %s15862_s4 }
0x104a   : > { %6440 = vrot.lane.b32.xlu0 %v19335_v41, %s15862_s4  ;;  %6450 = vrot.lane.b32.xlu1 %v19333_v19, %s15862_s4 }
0x104e   : > { %6671 = vrot.lane.b32.xlu0 %v19321_v59, %s21342_s0  ;;  %6446 = vrot.lane.b32.xlu1 %v19341_v22, %s15862_s4 }
0x1052   : > { %6669 = vrot.lane.b32.xlu0 %v19333_v19, %s21342_s0  ;;  %6442 = vrot.lane.b32.xlu1 %v19347_v6, %s15862_s4 }
0x1056   : > { %6665 = vrot.lane.b32.xlu0 %v19341_v22, %s21342_s0  ;;  %6673 = vrot.lane.b32.xlu1 %v19299_v50, %s21342_s0 }
0x105a   : > { %6663 = vrot.lane.b32.xlu0 %v19323_v4, %s21342_s0  ;;  %6667 = vrot.lane.b32.xlu1 %v19309_v33, %s21342_s0 }
0x105e   : > { %6675 = vrot.lane.b32.xlu0 %v19311_v37, %s21342_s0 }
0x10b0   : > { %v6455_v51 = vpop.permute.xlu0 %6454 }
0x10b4   : > { %v6449_v43 = vpop.permute.xlu0 %6448  ;;  %v6457_v24 = vpop.permute.xlu1 %6456 }
0x10b5   : > { %14781 = vmatpush3.xpose.msk.msra.mxu0 %vm1331_vm0, %v6457_v24 }
0x10b6   : > { %14782 = vmatprep.subr.mxu0 %v15866_v10 }
0x10b8   : > { %v6445_v8 = vpop.permute.xlu0 %6444  ;;  %v6453_v57 = vpop.permute.xlu1 %6452 }
0x10b9   : > { %14783 = vmatpush3.xpose.msk.msra.mxu0 %vm1331_vm0, %v6455_v51 }
0x10ba   : > { %14784 = vmatprep.subr.mxu0 %v15866_v10 }
0x10bc   : > { %v6441_v20 = vpop.permute.xlu0 %6440  ;;  %v6451_v15 = vpop.permute.xlu1 %6450 }
0x10bd   : > { %14785 = vmatpush3.xpose.msk.msra.mxu0 %vm1331_vm0, %v6453_v57 }
0x10be   : > { %14786 = vmatprep.subr.mxu0 %v15866_v10 }
0x10c0   : > { %v6672_v31 = vpop.permute.xlu0 %6671  ;;  %v6447_v62 = vpop.permute.xlu1 %6446 }
0x10c1   : > { %14787 = vmatpush3.xpose.msk.msra.mxu0 %vm1331_vm0, %v6451_v15  ;;  %v6692_v47 = vsel %vm1331_vm0, %v6672_v31, 1.0 }
0x10c2   : > { %14788 = vmatprep.subr.mxu0 %v15866_v10 }
0x10c4   : > { %v6670_v61 = vpop.permute.xlu0 %6669  ;;  %v6443_v18 = vpop.permute.xlu1 %6442 }
0x10c5   : > { %14789 = vmatpush3.xpose.msk.msra.mxu0 %vm1331_vm0, %v6449_v43  ;;  %v6691_v48 = vsel %vm1331_vm0, %v6670_v61, 1.0  ;;  %v6429_v61 = vld [vmem:[%s21383_s2 + $0x38] sm:$0xff] }
0x10c6   : > { %14790 = vmatprep.subr.mxu0 %v15866_v10 }
0x10c8   : > { %v6666_v26 = vpop.permute.xlu0 %6665  ;;  %v6674_v36 = vpop.permute.xlu1 %6673 }
0x10c9   : > { %14791 = vmatpush3.xpose.msk.msra.mxu0 %vm1331_vm0, %v6447_v62  ;;  %v6693_v0 = vsel %vm1331_vm0, %v6674_v36, 1.0  ;;  %v6689_v53 = vsel %vm1331_vm0, %v6666_v26, 1.0 }
0x10ca   : > { %14792 = vmatprep.subr.mxu0 %v15866_v10 }
0x10cc   : > { %v6664_v3 = vpop.permute.xlu0 %6663  ;;  %v6668_v29 = vpop.permute.xlu1 %6667 }
0x10cd   : > { %14793 = vmatpush3.xpose.msk.msra.mxu0 %vm1331_vm0, %v6445_v8  ;;  %v6690_v21 = vsel %vm1331_vm0, %v6668_v29, 1.0  ;;  %v6688_v45 = vsel %vm1331_vm0, %v6664_v3, 1.0 }
0x10ce   : > { %14794 = vmatprep.subr.mxu0 %v15866_v10 }
0x10d0   : > { %v6676_v16 = vpop.permute.xlu0 %6675 }
0x10d1   : > { %v6694_v56 = vsel %vm1331_vm0, %v6676_v16, 1.0  ;;  %14795 = vmatpush3.xpose.msk.msra.mxu0 %vm1331_vm0, %v6443_v18  ;;  %v6430_v18 = vld [vmem:[%s21383_s2 + $0x40] sm:$0xff] }
0x10d2   : > { %14826 = vmatpush3.msra.mxu1 %v6694_v56  ;;  %14796 = vmatprep.subr.mxu0 %v15866_v10 }
0x10d3   : > { %14827 = vmatprep.subr.mxu1 %v15866_v10 }
0x10d4   : > { %14828 = vmatpush3.msra.mxu1 %v6693_v0 }
0x10d5   : > { %14797 = vmatpush3.xpose.msk.msra.mxu0 %vm1331_vm0, %v6441_v20  ;;  %14829 = vmatprep.subr.mxu1 %v15866_v10 }
0x10d6   : > { %14830 = vmatpush3.msra.mxu1 %v6692_v47  ;;  %14870 = vmatprep.subr.mxu0 %v15866_v10 }
0x10d7   : > { %14831 = vmatprep.subr.mxu1 %v15866_v10 }
0x10d8   : > { %14799 = vmatmul.mubr.msk.f32.vlgmr.msra.gmra.mxu0 %vm1331_vm0, %v19335_v41  ;;  %14832 = vmatpush3.msra.mxu1 %v6691_v48 }
0x10d9   : > { %14833 = vmatprep.subr.mxu1 %v15866_v10  ;;  %14801 = vmatprep.mubr.msk.f32.mxu0 %vm15867_vm2, %v15866_v10 }
0x10da   : > { %14834 = vmatpush3.msra.mxu1 %v6690_v21 }
0x10db   : > { %14835 = vmatprep.subr.mxu1 %v15866_v10 }
0x10dc   : > { %14802 = vmatmul.mubr.msk.f32.gmra.mxu0 %vm1331_vm0, %v19347_v6  ;;  %14836 = vmatpush3.msra.mxu1 %v6689_v53 }
0x10dd   : > { %14837 = vmatprep.subr.mxu1 %v15866_v10  ;;  %14804 = vmatprep.mubr.msk.f32.mxu0 %vm15867_vm2, %v15866_v10 }
0x10de   : > { %14838 = vmatpush3.msra.mxu1 %v6688_v45 }
0x10df   : > { %14839 = vmatprep.subr.mxu1 %v15866_v10 }
0x10e0   : > { %14805 = vmatmul.mubr.msk.f32.gmra.mxu0 %vm1331_vm0, %v19323_v4 }
0x10e1   : > { %14807 = vmatprep.mubr.msk.f32.mxu0 %vm15867_vm2, %v15866_v10 }
0x10e4   : > { %14808 = vmatmul.mubr.msk.f32.gmra.mxu0 %vm1331_vm0, %v19341_v22 }
0x10e5   : > { %14810 = vmatprep.mubr.msk.f32.mxu0 %vm15867_vm2, %v15866_v10 }
0x10e8   : > { %14811 = vmatmul.mubr.msk.f32.gmra.mxu0 %vm1331_vm0, %v19309_v33 }
0x10e9   : > { %14813 = vmatprep.mubr.msk.f32.mxu0 %vm15867_vm2, %v15866_v10 }
0x10ec   : > { %14814 = vmatmul.mubr.msk.f32.gmra.mxu0 %vm1331_vm0, %v19333_v19 }
0x10ed   : > { %14816 = vmatprep.mubr.msk.f32.mxu0 %vm15867_vm2, %v15866_v10 }
0x10f0   : > { %14817 = vmatmul.mubr.msk.f32.gmra.mxu0 %vm1331_vm0, %v19321_v59 }
0x10f1   : > { %14819 = vmatprep.mubr.msk.f32.mxu0 %vm15867_vm2, %v15866_v10 }
0x10f4   : > { %14820 = vmatmul.mubr.msk.f32.gmra.mxu0 %vm1331_vm0, %v19299_v50 }
0x10f5   : > { %14822 = vmatprep.mubr.msk.f32.mxu0 %vm15867_vm2, %v15866_v10 }
0x10f8   : > { %14823 = vmatmul.mubr.msk.f32.gmra.mxu0 %vm1331_vm0, %v19311_v37 }
0x10f9   : > { %14878 = vmatprep.mubr.msk.f32.mxu0 %vm15867_vm2, %v15866_v10 }
0x1198   : > { %v6560_v5 = vpop.f32.mrf.mxu0 }
0x1199   : > { %v6561_v27 = vadd.f32 %v6560_v5, %v6422_v34 }
0x119a   : > { %v14800_v23 = vpop.f32.mrf.mxu0 }
0x119b   : > { %v6605_v11 = vsel %vm6604_vm3, %v6561_v27, -inf }
0x119c   : > { %6606 = vmax.xlane.f32.xlu1 %v6605_v11  ;;  %v6565_v35 = vpop.f32.mrf.mxu0 }
0x119d   : > { %v6566_v12 = vadd.f32 %v6565_v35, %v6423_v42 }
0x119e   : > { %v14803_v60 = vpop.f32.mrf.mxu0 }
0x119f   : > { %v6608_v46 = vsel %vm6604_vm3, %v6566_v12, -inf }
0x11a0   : > { %6609 = vmax.xlane.f32.xlu0 %v6608_v46  ;;  %v6570_v58 = vpop.f32.mrf.mxu0 }
0x11a1   : > { %v6571_v52 = vadd.f32 %v6570_v58, %v6424_v28 }
0x11a2   : > { %v14806_v9 = vpop.f32.mrf.mxu0 }
0x11a3   : > { %v6611_v38 = vsel %vm6604_vm3, %v6571_v52, -inf }
0x11a4   : > { %6612 = vmax.xlane.f32.xlu0 %v6611_v38  ;;  %v6575_v13 = vpop.f32.mrf.mxu0 }
0x11a5   : > { %v6576_v17 = vadd.f32 %v6575_v13, %v6425_v32 }
0x11a6   : > { %v14809_v14 = vpop.f32.mrf.mxu0 }
0x11a7   : > { %v6614_v30 = vsel %vm6604_vm3, %v6576_v17, -inf }
0x11a8   : > { %6615 = vmax.xlane.f32.xlu1 %v6614_v30  ;;  %v6580_v7 = vpop.f32.mrf.mxu0 }
0x11a9   : > { %v6581_v49 = vadd.f32 %v6580_v7, %v6426_v55 }
0x11aa   : > { %v14812_v2 = vpop.f32.mrf.mxu0 }
0x11ab   : > { %v6617_v54 = vsel %vm6604_vm3, %v6581_v49, -inf }
0x11ac   : > { %6618 = vmax.xlane.f32.xlu1 %v6617_v54  ;;  %v6585_v63 = vpop.f32.mrf.mxu0 }
0x11ad   : > { %v6586_v39 = vadd.f32 %v6585_v63, %v6427_v40 }
0x11ae   : > { %v14815_v25 = vpop.f32.mrf.mxu0 }
0x11af   : > { %v6620_v51 = vsel %vm6604_vm3, %v6586_v39, -inf }
0x11b0   : > { %6621 = vmax.xlane.f32.xlu0 %v6620_v51  ;;  %v6590_v43 = vpop.f32.mrf.mxu0 }
0x11b1   : > { %v6591_v24 = vadd.f32 %v6590_v43, %v6428_v1 }
0x11b2   : > { %v14818_v8 = vpop.f32.mrf.mxu0 }
0x11b3   : > { %v6623_v57 = vsel %vm6604_vm3, %v6591_v24, -inf  ;;  %v6897_v8 = vld [vmem:[%s21310_s14 + $0x10] sm:$0xff] }
0x11b4   : > { %6624 = vmax.xlane.f32.xlu1 %v6623_v57  ;;  %v6595_v20 = vpop.f32.mrf.mxu0  ;;  %v6896_v57 = vld [vmem:[%s21310_s14 + $0x8] sm:$0xff] }
0x11b5   : > { %v19466_v26 = vadd.f32 %v6595_v20, %v6429_v61 }
0x11b6   : > { %v14821_v15 = vpop.f32.mrf.mxu0 }
0x11b7   : > { %v6626_v36 = vsel %vm6604_vm3, %v19466_v26, -inf }
0x11b8   : > { %v6600_v31 = vpop.f32.mrf.mxu0 }
0x11b9   : > { %v19471_v3 = vadd.f32 %v6600_v31, %v6430_v18  ;;  %v6895_v18 = vld [vmem:[%s21310_s14] sm:$0xff] }
0x11ba   : > { %v14824_v62 = vpop.f32.mrf.mxu0 }
0x11bb   : > { %v6629_v16 = vsel %vm6604_vm3, %v19471_v3, -inf }
0x11c5   : > { %6659 = vrot.lane.b32.xlu1 %v19335_v41, %s21342_s0 }
0x11c6   : > { %6661 = vrot.lane.b32.xlu0 %v19347_v6, %s21342_s0 }
0x11e5   : > { %6627 = vmax.xlane.f32.xlu0 %v6626_v36 }
0x11e9   : > { %6630 = vmax.xlane.f32.xlu0 %v6629_v16 }
0x1225   : > { %v6607_v56 = vpop.xlane.xlu1 %6606 }
0x1226   : > { %v6632_v47 = vsub.f32 %v6561_v27, %v6607_v56 }
0x1228   : > { %v6641_v29 = vmul.f32 1.442695, %v6632_v47 }
0x1229   : > { %v6610_v0 = vpop.xlane.xlu0 %6609 }
0x122a   : > { %v6633_v48 = vsub.f32 %v6566_v12, %v6610_v0  ;;  %15715 = vpow2.f32 %v6641_v29 }
0x122c   : > { %v6643_v45 = vmul.f32 1.442695, %v6633_v48 }
0x122d   : > { %v6613_v21 = vpop.xlane.xlu0 %6612 }
0x122e   : > { %v6634_v34 = vsub.f32 %v6571_v52, %v6613_v21  ;;  %15717 = vpow2.f32 %v6643_v45 }
0x1230   : > { %v6645_v42 = vmul.f32 1.442695, %v6634_v34 }
0x1231   : > { %v6616_v53 = vpop.xlane.xlu1 %6615 }
0x1232   : > { %v6635_v11 = vsub.f32 %v6576_v17, %v6616_v53  ;;  %15719 = vpow2.f32 %v6645_v42 }
0x1234   : > { %v6647_v28 = vmul.f32 1.442695, %v6635_v11 }
0x1235   : > { %v6619_v5 = vpop.xlane.xlu1 %6618 }
0x1236   : > { %v6636_v46 = vsub.f32 %v6581_v49, %v6619_v5  ;;  %15721 = vpow2.f32 %v6647_v28 }
0x1237   : > { %v15716_v32 = vpop.eup %15715 }
0x1238   : > { %v6649_v12 = vmul.f32 1.442695, %v6636_v46 }
0x1239   : > { %v6622_v23 = vpop.xlane.xlu0 %6621 }
0x123a   : > { %v6637_v9 = vsub.f32 %v6586_v39, %v6622_v23  ;;  %15723 = vpow2.f32 %v6649_v12 }
0x123b   : > { %v15718_v17 = vpop.eup %15717 }
0x123c   : > { %v6651_v38 = vmul.f32 1.442695, %v6637_v9 }
0x123d   : > { %v6662_v35 = vpop.permute.xlu0 %6661  ;;  %v6625_v60 = vpop.xlane.xlu1 %6624 }
0x123e   : > { %v6687_v58 = vsel %vm1331_vm0, %v6662_v35, 1.0  ;;  %v6638_v13 = vsub.f32 %v6591_v24, %v6625_v60  ;;  %15725 = vpow2.f32 %v6651_v38  ;;  %v6898_v24 = vld [vmem:[%s21310_s14 + $0x18] sm:$0xff] }
0x123f   : > { %14840 = vmatpush3.msra.mxu1 %v6687_v58  ;;  %v15720_v55 = vpop.eup %15719  ;;  %14871 = vmatpush3.msra.mxu0 %v6898_v24 }
0x1240   : > { %14841 = vmatprep.subr.mxu1 %v15866_v10  ;;  %v6653_v14 = vmul.f32 1.442695, %v6638_v13  ;;  %14872 = vmatprep.subr.mxu0 %v15866_v10 }
0x1241   : > { %v6660_v27 = vpop.permute.xlu1 %6659  ;;  %14873 = vmatpush3.msra.mxu0 %v6897_v8 }
0x1242   : > { %v6686_v52 = vsel %vm1331_vm0, %v6660_v27, 1.0  ;;  %15727 = vpow2.f32 %v6653_v14  ;;  %14874 = vmatprep.subr.mxu0 %v15866_v10 }
0x1243   : > { %14842 = vmatpush3.msra.mxu1 %v6686_v52  ;;  %v15722_v30 = vpop.eup %15721  ;;  %14875 = vmatpush3.msra.mxu0 %v6896_v57 }
0x1244   : > { %14844 = vmatmul.mubr.msk.f32.vlgmr.msra.gmra.mxu1 %vm6604_vm3, %v15716_v32  ;;  %14905 = vmatprep.subr.mxu1 %v15866_v10 }
0x1245   : > { %14846 = vmatprep.mubr.msk.f32.mxu1 %vm15867_vm2, %v15866_v10  ;;  %14876 = vmatprep.subr.mxu0 %v15866_v10 }
0x1246   : > { %14877 = vmatpush3.msra.mxu0 %v6895_v18 }
0x1247   : > { %v15724_v7 = vpop.eup %15723  ;;  %14940 = vmatprep.subr.mxu0 %v15866_v10 }
0x1248   : > { %14847 = vmatmul.mubr.msk.f32.gmra.mxu1 %vm6604_vm3, %v15718_v17 }
0x1249   : > { %14849 = vmatprep.mubr.msk.f32.mxu1 %vm15867_vm2, %v15866_v10 }
0x124b   : > { %v15726_v49 = vpop.eup %15725 }
0x124c   : > { %14850 = vmatmul.mubr.msk.f32.gmra.mxu1 %vm6604_vm3, %v15720_v55 }
0x124d   : > { %14852 = vmatprep.mubr.msk.f32.mxu1 %vm15867_vm2, %v15866_v10 }
0x124f   : > { %v15728_v2 = vpop.eup %15727 }
0x1250   : > { %14853 = vmatmul.mubr.msk.f32.gmra.mxu1 %vm6604_vm3, %v15722_v30 }
0x1251   : > { %14855 = vmatprep.mubr.msk.f32.mxu1 %vm15867_vm2, %v15866_v10 }
0x1254   : > { %14856 = vmatmul.mubr.msk.f32.gmra.mxu1 %vm6604_vm3, %v15724_v7 }
0x1255   : > { %14858 = vmatprep.mubr.msk.f32.mxu1 %vm15867_vm2, %v15866_v10 }
0x1258   : > { %14859 = vmatmul.mubr.msk.f32.gmra.mxu1 %vm6604_vm3, %v15726_v49 }
0x1259   : > { %14861 = vmatprep.mubr.msk.f32.mxu1 %vm15867_vm2, %v15866_v10 }
0x125c   : > { %14862 = vmatmul.mubr.msk.f32.gmra.mxu1 %vm6604_vm3, %v15728_v2 }
0x125d   : > { %14864 = vmatprep.mubr.msk.f32.mxu1 %vm15867_vm2, %v15866_v10 }
0x126e   : > { %v6628_v40 = vpop.xlane.xlu0 %6627 }
0x126f   : > { %v6639_v54 = vsub.f32 %v19466_v26, %v6628_v40 }
0x1271   : > { %v6655_v63 = vmul.f32 1.442695, %v6639_v54 }
0x1272   : > { %v6631_v39 = vpop.xlane.xlu0 %6630 }
0x1273   : > { %15729 = vpow2.f32 %v6655_v63  ;;  %v6640_v25 = vsub.f32 %v19471_v3, %v6631_v39 }
0x1275   : > { %v6657_v1 = vmul.f32 1.442695, %v6640_v25  ;;  %v12634_v25 = vld [vmem:[%s21311_s15] ss:$0 sm:$0xff] }
0x1277   : > { %15731 = vpow2.f32 %v6657_v1 }
0x1280   : > { %v15730_v51 = vpop.eup %15729 }
0x1281   : > { %14865 = vmatmul.mubr.msk.f32.gmra.mxu1 %vm6604_vm3, %v15730_v51 }
0x1282   : > { %14867 = vmatprep.mubr.msk.f32.mxu1 %vm15867_vm2, %v15866_v10 }
0x1284   : > { %v15732_v43 = vpop.eup %15731 }
0x1285   : > { %14868 = vmatmul.mubr.msk.f32.gmra.mxu1 %vm6604_vm3, %v15732_v43 }
0x1286   : > { %14913 = vmatprep.mubr.msk.f32.mxu1 %vm15867_vm2, %v15866_v10 }
0x1304   : > { %v6788_v20 = vpop.f32.mrf.mxu1 }
0x1305   : > { %15733 = vrcp.f32 %v6788_v20 }
0x1306   : > { %v14845_v15 = vpop.f32.mrf.mxu1 }
0x1308   : > { %v6793_v31 = vpop.f32.mrf.mxu1 }
0x1309   : > { %15735 = vrcp.f32 %v6793_v31 }
0x130a   : > { %v14848_v62 = vpop.f32.mrf.mxu1 }
0x130c   : > { %v6798_v61 = vpop.f32.mrf.mxu1 }
0x130d   : > { %15737 = vrcp.f32 %v6798_v61 }
0x130e   : > { %v14851_v26 = vpop.f32.mrf.mxu1 }
0x1310   : > { %v6803_v3 = vpop.f32.mrf.mxu1 }
0x1311   : > { %15739 = vrcp.f32 %v6803_v3 }
0x1312   : > { %v15734_v36 = vpop.eup %15733  ;;  %v14854_v16 = vpop.f32.mrf.mxu1 }
0x1313   : > { %6843 = vperm.xlu0 %15504, %v15734_v36  }
0x1314   : > { %v6808_v56 = vpop.f32.mrf.mxu1 }
0x1315   : > { %15741 = vrcp.f32 %v6808_v56 }
0x1316   : > { %v15736_v0 = vpop.eup %15735  ;;  %v14857_v47 = vpop.f32.mrf.mxu1 }
0x1317   : > { %6848 = vperm.xlu1 %15503, %v15736_v0  }
0x1318   : > { %v6813_v29 = vpop.f32.mrf.mxu1 }
0x1319   : > { %15743 = vrcp.f32 %v6813_v29 }
0x131a   : > { %v15738_v48 = vpop.eup %15737  ;;  %v14860_v21 = vpop.f32.mrf.mxu1 }
0x131b   : > { %6853 = vperm.xlu1 %15503, %v15738_v48  }
0x131c   : > { %v6818_v53 = vpop.f32.mrf.mxu1 }
0x131d   : > { %15745 = vrcp.f32 %v6818_v53 }
0x131e   : > { %v15740_v45 = vpop.eup %15739  ;;  %v14863_v34 = vpop.f32.mrf.mxu1 }
0x131f   : > { %6858 = vperm.xlu1 %15503, %v15740_v45  }
0x1322   : > { %v15742_v5 = vpop.eup %15741 }
0x1323   : > { %6863 = vperm.xlu1 %15503, %v15742_v5  }
0x1326   : > { %v15744_v23 = vpop.eup %15743 }
0x1327   : > { %6868 = vperm.xlu1 %15503, %v15744_v23  }
0x132a   : > { %v15746_v42 = vpop.eup %15745 }
0x132b   : > { %6873 = vperm.xlu1 %15503, %v15746_v42  }
0x1341   : > { %v6823_v11 = vpop.f32.mrf.mxu1 }
0x1342   : > { %15747 = vrcp.f32 %v6823_v11 }
0x1343   : > { %v14866_v35 = vpop.f32.mrf.mxu1 }
0x1345   : > { %v6828_v60 = vpop.f32.mrf.mxu1 }
0x1346   : > { %15749 = vrcp.f32 %v6828_v60 }
0x1347   : > { %v14869_v28 = vpop.f32.mrf.mxu1 }
0x134f   : > { %v15748_v46 = vpop.eup %15747 }
0x1350   : > { %6878 = vperm.xlu0 %15504, %v15748_v46  }
0x1353   : > { %v15750_v58 = vpop.eup %15749 }
0x1354   : > { %6883 = vperm.xlu1 %15503, %v15750_v58  }
0x138e   : > { %v6844_v27 = vpop.permute.xlu0 %6843 }
0x138f   : > { %v6886_v12 = vmul.f32 %v6844_v27, %v6788_v20 }
0x1391   : > { %14879 = vmatmul.mubr.msk.f32.vlgmr.msra.gmra.mxu0 %vm1331_vm0, %v6886_v12 }
0x1392   : > { %v6849_v9 = vpop.permute.xlu1 %6848  ;;  %14881 = vmatprep.mubr.msk.f32.mxu0 %vm15867_vm2, %v15866_v10 }
0x1393   : > { %v6887_v52 = vmul.f32 %v6849_v9, %v6793_v31 }
0x1395   : > { %14882 = vmatmul.mubr.msk.f32.gmra.mxu0 %vm1331_vm0, %v6887_v52 }
0x1396   : > { %v6854_v32 = vpop.permute.xlu1 %6853  ;;  %14884 = vmatprep.mubr.msk.f32.mxu0 %vm15867_vm2, %v15866_v10 }
0x1397   : > { %v6888_v38 = vmul.f32 %v6854_v32, %v6798_v61 }
0x1399   : > { %14885 = vmatmul.mubr.msk.f32.gmra.mxu0 %vm1331_vm0, %v6888_v38 }
0x139a   : > { %v6859_v13 = vpop.permute.xlu1 %6858  ;;  %14887 = vmatprep.mubr.msk.f32.mxu0 %vm15867_vm2, %v15866_v10 }
0x139b   : > { %v6889_v17 = vmul.f32 %v6859_v13, %v6803_v3 }
0x139d   : > { %14888 = vmatmul.mubr.msk.f32.gmra.mxu0 %vm1331_vm0, %v6889_v17 }
0x139e   : > { %v6864_v14 = vpop.permute.xlu1 %6863  ;;  %14890 = vmatprep.mubr.msk.f32.mxu0 %vm15867_vm2, %v15866_v10 }
0x139f   : > { %v6890_v55 = vmul.f32 %v6864_v14, %v6808_v56 }
0x13a1   : > { %14891 = vmatmul.mubr.msk.f32.gmra.mxu0 %vm1331_vm0, %v6890_v55 }
0x13a2   : > { %v6869_v30 = vpop.permute.xlu1 %6868  ;;  %14893 = vmatprep.mubr.msk.f32.mxu0 %vm15867_vm2, %v15866_v10 }
0x13a3   : > { %v6891_v7 = vmul.f32 %v6869_v30, %v6813_v29 }
0x13a5   : > { %14894 = vmatmul.mubr.msk.f32.gmra.mxu0 %vm1331_vm0, %v6891_v7 }
0x13a6   : > { %v6874_v49 = vpop.permute.xlu1 %6873  ;;  %14896 = vmatprep.mubr.msk.f32.mxu0 %vm15867_vm2, %v15866_v10 }
0x13a7   : > { %v6892_v2 = vmul.f32 %v6874_v49, %v6818_v53 }
0x13a9   : > { %14897 = vmatmul.mubr.msk.f32.gmra.mxu0 %vm1331_vm0, %v6892_v2 }
0x13aa   : > { %14899 = vmatprep.mubr.msk.f32.mxu0 %vm15867_vm2, %v15866_v10 }
0x13cb   : > { %v6879_v40 = vpop.permute.xlu0 %6878 }
0x13cc   : > { %v6893_v54 = vmul.f32 %v6879_v40, %v6823_v11 }
0x13ce   : > { %14900 = vmatmul.mubr.msk.f32.gmra.mxu0 %vm1331_vm0, %v6893_v54 }
0x13cf   : > { %v6884_v63 = vpop.permute.xlu1 %6883  ;;  %14902 = vmatprep.mubr.msk.f32.mxu0 %vm15867_vm2, %v15866_v10 }
0x13d0   : > { %v6894_v39 = vmul.f32 %v6884_v63, %v6828_v60 }
0x13d2   : > { %14903 = vmatmul.mubr.msk.f32.gmra.mxu0 %vm1331_vm0, %v6894_v39 }
0x13d3   : > { %14948 = vmatprep.mubr.msk.f32.mxu0 %vm15867_vm2, %v15866_v10 }
0x1451   : > { %v6997_v1 = vpop.f32.mrf.mxu0 }
0x1452   : > { %v6998_v51 = vadd.f32 %v12634_v25, %v6997_v1 }
0x1453   : > { %v14880_v43 = vpop.f32.mrf.mxu0 }
0x1454   : > { %7050 = vrot.lane.b32.xlu0 %v6998_v51, %s21342_s0 }
0x1455   : > { %v7002_v24 = vpop.f32.mrf.mxu0 }
0x1456   : > { %v7003_v8 = vadd.f32 %v12634_v25, %v7002_v24 }
0x1457   : > { %v14883_v57 = vpop.f32.mrf.mxu0 }
0x1458   : > { %7052 = vrot.lane.b32.xlu1 %v7003_v8, %s21342_s0 }
0x1459   : > { %v7007_v20 = vpop.f32.mrf.mxu0 }
0x145a   : > { %v7008_v15 = vadd.f32 %v12634_v25, %v7007_v20 }
0x145b   : > { %v14886_v31 = vpop.f32.mrf.mxu0 }
0x145c   : > { %7054 = vrot.lane.b32.xlu0 %v7008_v15, %s21342_s0 }
0x145d   : > { %v7012_v62 = vpop.f32.mrf.mxu0 }
0x145e   : > { %v7013_v61 = vadd.f32 %v12634_v25, %v7012_v62 }
0x145f   : > { %v14889_v26 = vpop.f32.mrf.mxu0 }
0x1460   : > { %7056 = vrot.lane.b32.xlu1 %v7013_v61, %s21342_s0 }
0x1461   : > { %v7017_v18 = vpop.f32.mrf.mxu0 }
0x1462   : > { %v7018_v3 = vadd.f32 %v12634_v25, %v7017_v18 }
0x1463   : > { %v14892_v36 = vpop.f32.mrf.mxu0 }
0x1464   : > { %7058 = vrot.lane.b32.xlu0 %v7018_v3, %s21342_s0 }
0x1465   : > { %v7022_v16 = vpop.f32.mrf.mxu0 }
0x1466   : > { %v7023_v56 = vadd.f32 %v12634_v25, %v7022_v16 }
0x1467   : > { %v14895_v0 = vpop.f32.mrf.mxu0 }
0x1468   : > { %7060 = vrot.lane.b32.xlu1 %v7023_v56, %s21342_s0 }
0x1469   : > { %v7027_v47 = vpop.f32.mrf.mxu0 }
0x146a   : > { %v7028_v29 = vadd.f32 %v12634_v25, %v7027_v47 }
0x146b   : > { %v14898_v48 = vpop.f32.mrf.mxu0 }
0x146c   : > { %7062 = vrot.lane.b32.xlu0 %v7028_v29, %s21342_s0 }
0x148e   : > { %v7032_v21 = vpop.f32.mrf.mxu0 }
0x148f   : > { %v7033_v53 = vadd.f32 %v12634_v25, %v7032_v21 }
0x1490   : > { %v14901_v45 = vpop.f32.mrf.mxu0 }
0x1491   : > { %7064 = vrot.lane.b32.xlu1 %v7033_v53, %s21342_s0 }
0x1492   : > { %v7037_v34 = vpop.f32.mrf.mxu0 }
0x1493   : > { %v7038_v5 = vadd.f32 %v12634_v25, %v7037_v34 }
0x1494   : > { %v14904_v23 = vpop.f32.mrf.mxu0 }
0x1495   : > { %7066 = vrot.lane.b32.xlu0 %v7038_v5, %s21342_s0 }
0x14c6   : > { %v7051_v42 = vpop.permute.xlu0 %7050 }
0x14c7   : > { %v19566_v11 = vadd.f32 %v7051_v42, %v19335_v41 }
0x14c9   : > { %7097 = vrot.lane.b32.xlu1 %v19566_v11, %s21342_s0 }
0x14ca   : > { %v7053_v35 = vpop.permute.xlu1 %7052 }
0x14cb   : > { %v19571_v60 = vadd.f32 %v7053_v35, %v19347_v6 }
0x14cd   : > { %7099 = vrot.lane.b32.xlu0 %v19571_v60, %s21342_s0 }
0x14ce   : > { %v7055_v28 = vpop.permute.xlu0 %7054 }
0x14cf   : > { %v19576_v46 = vadd.f32 %v7055_v28, %v19323_v4 }
0x14d1   : > { %7101 = vrot.lane.b32.xlu1 %v19576_v46, %s21342_s0 }
0x14d2   : > { %v7057_v58 = vpop.permute.xlu1 %7056 }
0x14d3   : > { %v19581_v41 = vadd.f32 %v7057_v58, %v19341_v22 }
0x14d5   : > { %7103 = vrot.lane.b32.xlu0 %v19581_v41, %s21342_s0 }
0x14d6   : > { %v7059_v27 = vpop.permute.xlu0 %7058 }
0x14d7   : > { %v19586_v6 = vadd.f32 %v7059_v27, %v19309_v33 }
0x14d9   : > { %7105 = vrot.lane.b32.xlu1 %v19586_v6, %s21342_s0 }
0x14da   : > { %v7061_v12 = vpop.permute.xlu1 %7060 }
0x14db   : > { %v19591_v4 = vadd.f32 %v7061_v12, %v19333_v19 }
0x14dd   : > { %7107 = vrot.lane.b32.xlu0 %v19591_v4, %s21342_s0 }
0x14de   : > { %v7063_v9 = vpop.permute.xlu0 %7062 }
0x14df   : > { %v19596_v22 = vadd.f32 %v7063_v9, %v19321_v59 }
0x14e1   : > { %7109 = vrot.lane.b32.xlu1 %v19596_v22, %s21342_s0 }
0x1503   : > { %v7065_v52 = vpop.permute.xlu1 %7064 }
0x1504   : > { %v19601_v33 = vadd.f32 %v7065_v52, %v19299_v50 }
0x1506   : > { %7111 = vrot.lane.b32.xlu0 %v19601_v33, %s21342_s0 }
0x1507   : > { %v7067_v32 = vpop.permute.xlu0 %7066 }
0x1508   : > { %v19606_v19 = vadd.f32 %v7067_v32, %v19311_v37 }
0x150a   : > { %7113 = vrot.lane.b32.xlu1 %v19606_v19, %s21342_s0 }
0x153b   : > { %v7098_v38 = vpop.permute.xlu1 %7097 }
0x153c   : > { %v7124_v59 = vsel %vm1331_vm0, %v7098_v38, 0.0 }
0x153d   : > { %7125 = vadd.xlane.f32.xlu0 %v7124_v59 }
0x153f   : > { %v7100_v13 = vpop.permute.xlu0 %7099 }
0x1540   : > { %v7127_v17 = vsel %vm1331_vm0, %v7100_v13, 0.0 }
0x1541   : > { %7128 = vadd.xlane.f32.xlu1 %v7127_v17 }
0x1543   : > { %v7102_v50 = vpop.permute.xlu1 %7101 }
0x1544   : > { %v7130_v14 = vsel %vm1331_vm0, %v7102_v50, 0.0 }
0x1545   : > { %7131 = vadd.xlane.f32.xlu0 %v7130_v14 }
0x1547   : > { %v7104_v55 = vpop.permute.xlu0 %7103 }
0x1548   : > { %v7133_v30 = vsel %vm1331_vm0, %v7104_v55, 0.0 }
0x1549   : > { %7134 = vadd.xlane.f32.xlu0 %v7133_v30 }
0x154b   : > { %v7106_v37 = vpop.permute.xlu1 %7105 }
0x154c   : > { %v7136_v7 = vsel %vm1331_vm0, %v7106_v37, 0.0 }
0x154d   : > { %7137 = vadd.xlane.f32.xlu1 %v7136_v7 }
0x154f   : > { %v7108_v49 = vpop.permute.xlu0 %7107 }
0x1550   : > { %v7139_v2 = vsel %vm1331_vm0, %v7108_v49, 0.0 }
0x1551   : > { %7140 = vadd.xlane.f32.xlu0 %v7139_v2 }
0x1553   : > { %v7110_v40 = vpop.permute.xlu1 %7109 }
0x1554   : > { %v7142_v54 = vsel %vm1331_vm0, %v7110_v40, 0.0 }
0x1555   : > { %7143 = vadd.xlane.f32.xlu1 %v7142_v54 }
0x1578   : > { %v7112_v63 = vpop.permute.xlu0 %7111 }
0x1579   : > { %v7145_v39 = vsel %vm1331_vm0, %v7112_v63, 0.0 }
0x157a   : > { %7146 = vadd.xlane.f32.xlu0 %v7145_v39 }
0x157c   : > { %v7114_v25 = vpop.permute.xlu1 %7113 }
0x157d   : > { %v7148_v1 = vsel %vm1331_vm0, %v7114_v25, 0.0 }
0x157e   : > { %7149 = vadd.xlane.f32.xlu1 %v7148_v1 }
0x15c6   : > { %v7126_v51 = vpop.xlane.xlu0 %7125 }
0x15c7   : > { %v7151_v43 = vmul.f32 0.03125, %v7126_v51 }
0x15c9   : > { %v19620_v24 = vsub.f32 %v19566_v11, %v7151_v43  ;;  %v12645_v43 = vld [vmem:[%s21311_s15 + $0x2] ss:$0 sm:$0xff] }
0x15ca   : > { %v7129_v8 = vpop.xlane.xlu1 %7128 }
0x15cb   : > { %v7169_v57 = vmul.f32 %v19620_v24, %v19620_v24  ;;  %v7152_v20 = vmul.f32 0.03125, %v7129_v8  ;;  %v12644_v8 = vld [vmem:[%s21311_s15 + $0x1] ss:$0 sm:$0xff] }
0x15cd   : > { %v19625_v15 = vsub.f32 %v19571_v60, %v7152_v20  ;;  %7187 = vrot.lane.b32.xlu0 %v7169_v57, %s21342_s0  ;;  %v7314_v57 = vld [vmem:[%s21310_s14 + $0x38] sm:$0xff]  ;;  %v7313_v20 = vld [vmem:[%s21310_s14 + $0x30] sm:$0xff] }
0x15ce   : > { %v7132_v31 = vpop.xlane.xlu0 %7131  ;;  %14906 = vmatpush3.msra.mxu1 %v7314_v57 }
0x15cf   : > { %v7170_v62 = vmul.f32 %v19625_v15, %v19625_v15  ;;  %v7153_v61 = vmul.f32 0.03125, %v7132_v31  ;;  %14907 = vmatprep.subr.mxu1 %v15866_v10  ;;  %v7312_v31 = vld [vmem:[%s21310_s14 + $0x28] sm:$0xff] }
0x15d0   : > { %14908 = vmatpush3.msra.mxu1 %v7313_v20 }
0x15d1   : > { %v19631_v26 = vsub.f32 %v19576_v46, %v7153_v61  ;;  %7189 = vrot.lane.b32.xlu1 %v7170_v62, %s21342_s0  ;;  %14909 = vmatprep.subr.mxu1 %v15866_v10  ;;  %v7311_v62 = vld [vmem:[%s21310_s14 + $0x20] sm:$0xff] }
0x15d2   : > { %v7135_v18 = vpop.xlane.xlu0 %7134  ;;  %14910 = vmatpush3.msra.mxu1 %v7312_v31 }
0x15d3   : > { %v7171_v3 = vmul.f32 %v19631_v26, %v19631_v26  ;;  %v7154_v36 = vmul.f32 0.03125, %v7135_v18  ;;  %14911 = vmatprep.subr.mxu1 %v15866_v10 }
0x15d4   : > { %14912 = vmatpush3.msra.mxu1 %v7311_v62 }
0x15d5   : > { %v19637_v16 = vsub.f32 %v19581_v41, %v7154_v36  ;;  %7191 = vrot.lane.b32.xlu1 %v7171_v3, %s21342_s0 }
0x15d6   : > { %v7138_v56 = vpop.xlane.xlu1 %7137 }
0x15d7   : > { %v7172_v0 = vmul.f32 %v19637_v16, %v19637_v16  ;;  %v7155_v47 = vmul.f32 0.03125, %v7138_v56 }
0x15d9   : > { %v19643_v29 = vsub.f32 %v19586_v6, %v7155_v47  ;;  %7193 = vrot.lane.b32.xlu0 %v7172_v0, %s21342_s0 }
0x15da   : > { %v7141_v48 = vpop.xlane.xlu0 %7140 }
0x15db   : > { %v7173_v21 = vmul.f32 %v19643_v29, %v19643_v29  ;;  %v7156_v53 = vmul.f32 0.03125, %v7141_v48 }
0x15dd   : > { %v19649_v45 = vsub.f32 %v19591_v4, %v7156_v53  ;;  %7195 = vrot.lane.b32.xlu1 %v7173_v21, %s21342_s0 }
0x15de   : > { %v7144_v34 = vpop.xlane.xlu1 %7143 }
0x15df   : > { %v7174_v5 = vmul.f32 %v19649_v45, %v19649_v45  ;;  %v7157_v23 = vmul.f32 0.03125, %v7144_v34 }
0x15e1   : > { %v19655_v42 = vsub.f32 %v19596_v22, %v7157_v23  ;;  %7197 = vrot.lane.b32.xlu0 %v7174_v5, %s21342_s0 }
0x15e3   : > { %v7175_v35 = vmul.f32 %v19655_v42, %v19655_v42 }
0x15e5   : > { %7199 = vrot.lane.b32.xlu1 %v7175_v35, %s21342_s0 }
0x1603   : > { %v7147_v28 = vpop.xlane.xlu0 %7146 }
0x1604   : > { %v7158_v58 = vmul.f32 0.03125, %v7147_v28 }
0x1606   : > { %v19662_v27 = vsub.f32 %v19601_v33, %v7158_v58 }
0x1607   : > { %v7150_v12 = vpop.xlane.xlu1 %7149 }
0x1608   : > { %v7176_v9 = vmul.f32 %v19662_v27, %v19662_v27  ;;  %v7159_v52 = vmul.f32 0.03125, %v7150_v12 }
0x160a   : > { %v19667_v32 = vsub.f32 %v19606_v19, %v7159_v52  ;;  %7201 = vrot.lane.b32.xlu0 %v7176_v9, %s21342_s0 }
0x160c   : > { %v7177_v38 = vmul.f32 %v19667_v32, %v19667_v32 }
0x160e   : > { %7203 = vrot.lane.b32.xlu1 %v7177_v38, %s21342_s0 }
0x163f   : > { %v7188_v59 = vpop.permute.xlu0 %7187 }
0x1640   : > { %v7214_v13 = vsel %vm1331_vm0, %v7188_v59, 0.0 }
0x1641   : > { %7215 = vadd.xlane.f32.xlu0 %v7214_v13 }
0x1643   : > { %v7190_v17 = vpop.permute.xlu1 %7189 }
0x1644   : > { %v7217_v50 = vsel %vm1331_vm0, %v7190_v17, 0.0 }
0x1645   : > { %7218 = vadd.xlane.f32.xlu1 %v7217_v50 }
0x1647   : > { %v7192_v14 = vpop.permute.xlu1 %7191 }
0x1648   : > { %v7220_v55 = vsel %vm1331_vm0, %v7192_v14, 0.0 }
0x1649   : > { %7221 = vadd.xlane.f32.xlu0 %v7220_v55 }
0x164b   : > { %v7194_v30 = vpop.permute.xlu0 %7193 }
0x164c   : > { %v7223_v37 = vsel %vm1331_vm0, %v7194_v30, 0.0 }
0x164d   : > { %7224 = vadd.xlane.f32.xlu0 %v7223_v37 }
0x164f   : > { %v7196_v7 = vpop.permute.xlu1 %7195 }
0x1650   : > { %v7226_v49 = vsel %vm1331_vm0, %v7196_v7, 0.0 }
0x1651   : > { %7227 = vadd.xlane.f32.xlu1 %v7226_v49 }
0x1653   : > { %v7198_v2 = vpop.permute.xlu0 %7197 }
0x1654   : > { %v7229_v40 = vsel %vm1331_vm0, %v7198_v2, 0.0 }
0x1655   : > { %7230 = vadd.xlane.f32.xlu0 %v7229_v40 }
0x1657   : > { %v7200_v54 = vpop.permute.xlu1 %7199 }
0x1658   : > { %v7232_v63 = vsel %vm1331_vm0, %v7200_v54, 0.0 }
0x1659   : > { %7233 = vadd.xlane.f32.xlu1 %v7232_v63 }
0x167c   : > { %v7202_v39 = vpop.permute.xlu0 %7201 }
0x167d   : > { %v7235_v25 = vsel %vm1331_vm0, %v7202_v39, 0.0 }
0x167e   : > { %7236 = vadd.xlane.f32.xlu0 %v7235_v25 }
0x1680   : > { %v7204_v1 = vpop.permute.xlu1 %7203 }
0x1681   : > { %v7238_v51 = vsel %vm1331_vm0, %v7204_v1, 0.0 }
0x1682   : > { %7239 = vadd.xlane.f32.xlu1 %v7238_v51 }
0x1693   : > { %7299 = vrot.lane.b32.xlu1 %v12645_v43, %s21342_s0 }
0x1694   : > { %7282 = vrot.lane.b32.xlu0 %v12644_v8, %s21342_s0 }
0x16ca   : > { %v7216_v61 = vpop.xlane.xlu0 %7215 }
0x16cb   : > { %v7241_v36 = vmul.f32 0.03125, %v7216_v61 }
0x16cd   : > { %v7250_v47 = vadd.f32 1e-05, %v7241_v36 }
0x16ce   : > { %v7219_v3 = vpop.xlane.xlu1 %7218 }
0x16cf   : > { %v7242_v56 = vmul.f32 0.03125, %v7219_v3  ;;  %15751 = vrsqrt.f32 %v7250_v47 }
0x16d1   : > { %v7251_v21 = vadd.f32 1e-05, %v7242_v56 }
0x16d2   : > { %v7222_v18 = vpop.xlane.xlu0 %7221 }
0x16d3   : > { %v7243_v48 = vmul.f32 0.03125, %v7222_v18  ;;  %15753 = vrsqrt.f32 %v7251_v21 }
0x16d5   : > { %v7252_v23 = vadd.f32 1e-05, %v7243_v48 }
0x16d6   : > { %v7225_v0 = vpop.xlane.xlu0 %7224 }
0x16d7   : > { %v7244_v53 = vmul.f32 0.03125, %v7225_v0  ;;  %15755 = vrsqrt.f32 %v7252_v23 }
0x16d9   : > { %v7253_v28 = vadd.f32 1e-05, %v7244_v53 }
0x16da   : > { %v7228_v34 = vpop.xlane.xlu1 %7227 }
0x16db   : > { %v7245_v35 = vmul.f32 0.03125, %v7228_v34  ;;  %15757 = vrsqrt.f32 %v7253_v28 }
0x16dc   : > { %v15752_v17 = vpop.eup %15751 }
0x16dd   : > { %v7254_v9 = vadd.f32 1e-05, %v7245_v35  ;;  %v7268_v40 = vmul.f32 %v15752_v17, %v19620_v24  ;;  %v7720_v17 = vld [vmem:[%s21310_s14 + $0x50] sm:$0xff] }
0x16de   : > { %v7231_v5 = vpop.xlane.xlu0 %7230 }
0x16df   : > { %v7246_v58 = vmul.f32 0.03125, %v7231_v5  ;;  %15759 = vrsqrt.f32 %v7254_v9 }
0x16e0   : > { %v15754_v14 = vpop.eup %15753 }
0x16e1   : > { %v7255_v52 = vadd.f32 1e-05, %v7246_v58  ;;  %v7269_v2 = vmul.f32 %v15754_v14, %v19625_v15  ;;  %v7718_v14 = vld [vmem:[%s21310_s14 + $0x40] sm:$0xff] }
0x16e2   : > { %v7234_v12 = vpop.xlane.xlu1 %7233 }
0x16e3   : > { %v7247_v38 = vmul.f32 0.03125, %v7234_v12  ;;  %15761 = vrsqrt.f32 %v7255_v52 }
0x16e4   : > { %v15756_v7 = vpop.eup %15755 }
0x16e5   : > { %v7256_v59 = vadd.f32 1e-05, %v7247_v38  ;;  %v7270_v51 = vmul.f32 %v15756_v7, %v19631_v26 }
0x16e7   : > { %15763 = vrsqrt.f32 %v7256_v59 }
0x16e8   : > { %v15758_v54 = vpop.eup %15757 }
0x16e9   : > { %v7271_v20 = vmul.f32 %v15758_v54, %v19637_v16 }
0x16ec   : > { %v15760_v43 = vpop.eup %15759 }
0x16ed   : > { %v7272_v3 = vmul.f32 %v15760_v43, %v19643_v29 }
0x16f0   : > { %v15762_v31 = vpop.eup %15761 }
0x16f1   : > { %v7273_v18 = vmul.f32 %v15762_v31, %v19649_v45 }
0x16f4   : > { %v15764_v26 = vpop.eup %15763 }
0x16f5   : > { %v7274_v47 = vmul.f32 %v15764_v26, %v19655_v42 }
0x1707   : > { %v7237_v13 = vpop.xlane.xlu0 %7236 }
0x1708   : > { %v7248_v50 = vmul.f32 0.03125, %v7237_v13  ;;  %v7721_v13 = vld [vmem:[%s21310_s14 + $0x58] sm:$0xff] }
0x1709   : > { %14941 = vmatpush3.msra.mxu0 %v7721_v13 }
0x170a   : > { %v7257_v55 = vadd.f32 1e-05, %v7248_v50  ;;  %14942 = vmatprep.subr.mxu0 %v15866_v10  ;;  %v7719_v50 = vld [vmem:[%s21310_s14 + $0x48] sm:$0xff] }
0x170b   : > { %v7240_v30 = vpop.xlane.xlu1 %7239  ;;  %v7283_v37 = vpop.permute.xlu0 %7282  ;;  %14943 = vmatpush3.msra.mxu0 %v7720_v17 }
0x170c   : > { %15765 = vrsqrt.f32 %v7257_v55  ;;  %v7249_v49 = vmul.f32 0.03125, %v7240_v30  ;;  %v7286_v39 = vmul.f32 %v7283_v37, %v7269_v2  ;;  %v7285_v25 = vmul.f32 %v7283_v37, %v7268_v40  ;;  %14944 = vmatprep.subr.mxu0 %v15866_v10  ;;  %v19766_v55 = vld [vmem:[%s21311_s15 + $0x3] ss:$0 sm:$0xff] }
0x170d   : > { %v7288_v15 = vmul.f32 %v7283_v37, %v7271_v20  ;;  %v7287_v24 = vmul.f32 %v7283_v37, %v7270_v51  ;;  %v7290_v36 = vmul.f32 %v7283_v37, %v7273_v18  ;;  %v7289_v16 = vmul.f32 %v7283_v37, %v7272_v3  ;;  %14945 = vmatpush3.msra.mxu0 %v7719_v50 }
0x170e   : > { %v7258_v63 = vadd.f32 1e-05, %v7249_v49  ;;  %v7291_v21 = vmul.f32 %v7283_v37, %v7274_v47  ;;  %14946 = vmatprep.subr.mxu0 %v15866_v10 }
0x170f   : > { %v7300_v1 = vpop.permute.xlu1 %7299  ;;  %14947 = vmatpush3.msra.mxu0 %v7718_v14 }
0x1710   : > { %15767 = vrsqrt.f32 %v7258_v63  ;;  %v7303_v8 = vadd.f32 %v7300_v1, %v7286_v39  ;;  %v7302_v57 = vadd.f32 %v7300_v1, %v7285_v25  ;;  %v7305_v62 = vadd.f32 %v7300_v1, %v7288_v15 }
0x1711   : > { %v7304_v61 = vadd.f32 %v7300_v1, %v7287_v24  ;;  %v7307_v56 = vadd.f32 %v7300_v1, %v7290_v36  ;;  %v7306_v0 = vadd.f32 %v7300_v1, %v7289_v16  ;;  %v7308_v29 = vadd.f32 %v7300_v1, %v7291_v21 }
0x1712   : > { %7331 = vrot.lane.b32.xlu0 %v7303_v8, %s21342_s0  ;;  %7329 = vrot.lane.b32.xlu1 %v7302_v57, %s21342_s0 }
0x1716   : > { %7335 = vrot.lane.b32.xlu0 %v7305_v62, %s21342_s0  ;;  %7333 = vrot.lane.b32.xlu1 %v7304_v61, %s21342_s0 }
0x1719   : > { %v15766_v48 = vpop.eup %15765 }
0x171a   : > { %7339 = vrot.lane.b32.xlu0 %v7307_v56, %s21342_s0  ;;  %7337 = vrot.lane.b32.xlu1 %v7306_v0, %s21342_s0  ;;  %v7275_v45 = vmul.f32 %v15766_v48, %v19662_v27 }
0x171c   : > { %v7292_v53 = vmul.f32 %v7283_v37, %v7275_v45 }
0x171d   : > { %v15768_v34 = vpop.eup %15767 }
0x171e   : > { %7341 = vrot.lane.b32.xlu1 %v7308_v29, %s21342_s0  ;;  %v7309_v5 = vadd.f32 %v7300_v1, %v7292_v53  ;;  %v7276_v23 = vmul.f32 %v15768_v34, %v19667_v32 }
0x1720   : > { %7343 = vrot.lane.b32.xlu0 %v7309_v5, %s21342_s0  ;;  %v7293_v35 = vmul.f32 %v7283_v37, %v7276_v23 }
0x1722   : > { %v7310_v42 = vadd.f32 %v7300_v1, %v7293_v35 }
0x1724   : > { %7345 = vrot.lane.b32.xlu1 %v7310_v42, %s21342_s0 }
0x1784   : > { %v7330_v28 = vpop.permute.xlu1 %7329  ;;  %v7332_v27 = vpop.permute.xlu0 %7331 }
0x1785   : > { %14914 = vmatmul.mubr.msk.f32.vlgmr.msra.gmra.mxu1 %vm1331_vm0, %v7330_v28 }
0x1786   : > { %14916 = vmatprep.mubr.msk.f32.mxu1 %vm15867_vm2, %v15866_v10 }
0x1788   : > { %v7334_v58 = vpop.permute.xlu1 %7333  ;;  %v7336_v32 = vpop.permute.xlu0 %7335 }
0x1789   : > { %14917 = vmatmul.mubr.msk.f32.gmra.mxu1 %vm1331_vm0, %v7332_v27 }
0x178a   : > { %14919 = vmatprep.mubr.msk.f32.mxu1 %vm15867_vm2, %v15866_v10 }
0x178c   : > { %v7338_v12 = vpop.permute.xlu1 %7337  ;;  %v7340_v9 = vpop.permute.xlu0 %7339 }
0x178d   : > { %14920 = vmatmul.mubr.msk.f32.gmra.mxu1 %vm1331_vm0, %v7334_v58 }
0x178e   : > { %14922 = vmatprep.mubr.msk.f32.mxu1 %vm15867_vm2, %v15866_v10 }
0x1790   : > { %v7342_v52 = vpop.permute.xlu1 %7341 }
0x1791   : > { %14923 = vmatmul.mubr.msk.f32.gmra.mxu1 %vm1331_vm0, %v7336_v32 }
0x1792   : > { %14925 = vmatprep.mubr.msk.f32.mxu1 %vm15867_vm2, %v15866_v10  ;;  %v7344_v38 = vpop.permute.xlu0 %7343 }
0x1795   : > { %14926 = vmatmul.mubr.msk.f32.gmra.mxu1 %vm1331_vm0, %v7338_v12 }
0x1796   : > { %14928 = vmatprep.mubr.msk.f32.mxu1 %vm15867_vm2, %v15866_v10  ;;  %v7346_v59 = vpop.permute.xlu1 %7345 }
0x1799   : > { %14929 = vmatmul.mubr.msk.f32.gmra.mxu1 %vm1331_vm0, %v7340_v9 }
0x179a   : > { %14931 = vmatprep.mubr.msk.f32.mxu1 %vm15867_vm2, %v15866_v10 }
0x179d   : > { %14932 = vmatmul.mubr.msk.f32.gmra.mxu1 %vm1331_vm0, %v7342_v52 }
0x179e   : > { %14934 = vmatprep.mubr.msk.f32.mxu1 %vm15867_vm2, %v15866_v10 }
0x17a1   : > { %14935 = vmatmul.mubr.msk.f32.gmra.mxu1 %vm1331_vm0, %v7344_v38 }
0x17a2   : > { %14937 = vmatprep.mubr.msk.f32.mxu1 %vm15867_vm2, %v15866_v10 }
0x17a5   : > { %14938 = vmatmul.mubr.msk.f32.gmra.mxu1 %vm1331_vm0, %v7346_v59 }
0x1845   : > { %v7431_v30 = vpop.f32.mrf.mxu1 }
0x1846   : > { %v7432_v37 = vadd.f32 %v19766_v55, %v7431_v30 }
0x1847   : > { %v14915_v7 = vpop.f32.mrf.mxu1 }
0x1848   : > { %v7484_v49 = vmul.f32 0.70710677, %v7432_v37  ;;  %v19802_v38 = vmul.f32 0.5, %v7432_v37 }
0x1849   : > { %v7436_v2 = vpop.f32.mrf.mxu1 }
0x184a   : > { %v7511_v40 = vand.u32 2147483647, %v7484_v49  ;;  %v7437_v54 = vadd.f32 %v19766_v55, %v7436_v2  ;;  %vm7493_vm4 = vcmp.ge.f32.partialorder %v7484_v49, 0.0 }
0x184b   : > { %v14918_v63 = vpop.f32.mrf.mxu1  ;;  %v19806_v17 = vsel %vm7493_vm4, 1.0, %v21376_v44 }
0x184c   : > { %v7520_v39 = vmul.f32 0.3275911, %v7511_v40  ;;  %v19770_v25 = vmul.f32 0.70710677, %v7437_v54  ;;  %v7637_v3 = vsub.f32 0.0, %v7511_v40 }
0x184d   : > { %v7441_v1 = vpop.f32.mrf.mxu1 }
0x184e   : > { %v7529_v51 = vadd.f32 1.0, %v7520_v39  ;;  %v7512_v43 = vand.u32 2147483647, %v19770_v25  ;;  %v19774_v8 = vadd.f32 %v19766_v55, %v7441_v1  ;;  %v7646_v29 = vmul.f32 %v7637_v3, %v7511_v40 }
0x184f   : > { %v14921_v57 = vpop.f32.mrf.mxu1  ;;  %vm7494_vm5 = vcmp.ge.f32.partialorder %v19770_v25, 0.0  ;;  %v19815_v40 = vmul.f32 0.5, %v7437_v54 }
0x1850   : > { %15769 = vrcp.f32 %v7529_v51  ;;  %v7521_v20 = vmul.f32 0.3275911, %v7512_v43  ;;  %v19777_v31 = vmul.f32 0.70710677, %v19774_v8  ;;  %v7638_v21 = vsub.f32 0.0, %v7512_v43 }
0x1851   : > { %v7446_v15 = vpop.f32.mrf.mxu1  ;;  %v7655_v9 = vmul.f32 1.442695, %v7646_v29 }
0x1852   : > { %v7530_v24 = vadd.f32 1.0, %v7521_v20  ;;  %v19780_v62 = vadd.f32 %v19766_v55, %v7446_v15  ;;  %v7513_v61 = vand.u32 2147483647, %v19777_v31  ;;  %v7647_v28 = vmul.f32 %v7638_v21, %v7512_v43 }
0x1853   : > { %v14924_v18 = vpop.f32.mrf.mxu1  ;;  %v19828_v15 = vsel %vm7494_vm5, 1.0, %v21376_v44  ;;  %vm7495_vm6 = vcmp.ge.f32.partialorder %v19777_v31, 0.0 }
0x1854   : > { %15771 = vrcp.f32 %v7530_v24  ;;  %v7522_v26 = vmul.f32 0.3275911, %v7513_v61  ;;  %v19784_v36 = vmul.f32 0.70710677, %v19780_v62  ;;  %v7639_v27 = vsub.f32 0.0, %v7513_v61 }
0x1855   : > { %v7451_v16 = vpop.f32.mrf.mxu1  ;;  %v7657_v49 = vmul.f32 1.442695, %v7647_v28 }
0x1856   : > { %v19787_v56 = vadd.f32 %v19766_v55, %v7451_v16  ;;  %v7531_v0 = vadd.f32 1.0, %v7522_v26  ;;  %v7514_v47 = vand.u32 2147483647, %v19784_v36  ;;  %v7648_v2 = vmul.f32 %v7639_v27, %v7513_v61 }
0x1857   : > { %v14927_v48 = vpop.f32.mrf.mxu1  ;;  %vm7496_vm7 = vcmp.ge.f32.partialorder %v19784_v36, 0.0 }
0x1858   : > { %v19791_v45 = vmul.f32 0.70710677, %v19787_v56  ;;  %15773 = vrcp.f32 %v7531_v0  ;;  %v7523_v53 = vmul.f32 0.3275911, %v7514_v47  ;;  %v7640_v57 = vsub.f32 0.0, %v7514_v47 }
0x1859   : > { %v7456_v34 = vpop.f32.mrf.mxu1  ;;  %v7659_v16 = vmul.f32 1.442695, %v7648_v2  ;;  %v19832_v0 = vmul.f32 0.5, %v19774_v8 }
0x185a   : > { %v7515_v5 = vand.u32 2147483647, %v19791_v45  ;;  %v19795_v23 = vadd.f32 %v19766_v55, %v7456_v34  ;;  %v7532_v35 = vadd.f32 1.0, %v7523_v53  ;;  %v7649_v34 = vmul.f32 %v7640_v57, %v7514_v47 }
0x185b   : > { %v14930_v42 = vpop.f32.mrf.mxu1  ;;  %vm7497_vm8 = vcmp.ge.f32.partialorder %v19791_v45, 0.0 }
0x185c   : > { %v7524_v58 = vmul.f32 0.3275911, %v7515_v5  ;;  %v19798_v32 = vmul.f32 0.70710677, %v19795_v23  ;;  %15775 = vrcp.f32 %v7532_v35  ;;  %v7641_v54 = vsub.f32 0.0, %v7515_v5 }
0x185d   : > { %v19800_v12 = vpop.eup %15769  ;;  %v7461_v52 = vpop.f32.mrf.mxu1  ;;  %v7661_v2 = vmul.f32 1.442695, %v7649_v34  ;;  %v7506_v36 = vsel %vm7497_vm8, 1.0, %v21376_v44 }
0x185e   : > { %v7556_v59 = vmul.f32 1.0614054, %v19800_v12  ;;  %v7533_v13 = vadd.f32 1.0, %v7524_v58  ;;  %v7516_v50 = vand.u32 2147483647, %v19798_v32  ;;  %v19811_v14 = vadd.f32 %v19766_v55, %v7461_v52 }
0x185f   : > { %v14933_v30 = vpop.f32.mrf.mxu1  ;;  %v7650_v28 = vmul.f32 %v7641_v54, %v7515_v5  ;;  %vm7498_vm9 = vcmp.ge.f32.partialorder %v19798_v32, 0.0 }
0x1860   : > { %v7565_v7 = vadd.f32 -1.4531521, %v7556_v59  ;;  %15777 = vrcp.f32 %v7533_v13  ;;  %v7525_v63 = vmul.f32 0.3275911, %v7516_v50  ;;  %v19818_v39 = vmul.f32 0.70710677, %v19811_v14 }
0x1861   : > { %v19813_v37 = vpop.eup %15771  ;;  %15779 = vpow2.f32 %v7655_v9  ;;  %v7466_v1 = vpop.f32.mrf.mxu1  ;;  %v7642_v8 = vsub.f32 0.0, %v7516_v50  ;;  %v19846_v59 = vsel %vm7495_vm6, 1.0, %v21376_v44 }
0x1862   : > { %v7574_v51 = vmul.f32 %v19800_v12, %v7565_v7  ;;  %v7557_v43 = vmul.f32 1.0614054, %v19813_v37  ;;  %v19823_v20 = vadd.f32 %v19766_v55, %v7466_v1  ;;  %v7534_v24 = vadd.f32 1.0, %v7525_v63 }
0x1863   : > { %v7517_v61 = vand.u32 2147483647, %v19818_v39  ;;  %v14936_v18 = vpop.f32.mrf.mxu1  ;;  %15781 = vpow2.f32 %v7657_v49  ;;  %vm7499_vm10 = vcmp.ge.f32.partialorder %v19818_v39, 0.0 }
0x1864   : > { %v7583_v3 = vadd.f32 1.4214138, %v7574_v51  ;;  %v7566_v26 = vadd.f32 -1.4531521, %v7557_v43  ;;  %15783 = vrcp.f32 %v7534_v24  ;;  %v19840_v35 = vmul.f32 0.70710677, %v19823_v20 }
0x1865   : > { %v7526_v48 = vmul.f32 0.3275911, %v7517_v61  ;;  %v7471_v21 = vpop.f32.mrf.mxu1  ;;  %v19835_v25 = vpop.eup %15773  ;;  %15785 = vpow2.f32 %v7659_v16  ;;  %v7643_v47 = vsub.f32 0.0, %v7517_v61  ;;  %v7663_v51 = vmul.f32 1.442695, %v7650_v28 }
0x1866   : > { %v7592_v29 = vmul.f32 %v19800_v12, %v7583_v3  ;;  %v7575_v53 = vmul.f32 %v19813_v37, %v7566_v26  ;;  %v7558_v42 = vmul.f32 1.0614054, %v19835_v25  ;;  %v19849_v30 = vadd.f32 %v19766_v55, %v7471_v21 }
0x1867   : > { %v7535_v27 = vadd.f32 1.0, %v7526_v48  ;;  %v14939_v58 = vpop.f32.mrf.mxu1  ;;  %v19856_v63 = vand.u32 2147483647, %v19840_v35  ;;  %v7651_v43 = vmul.f32 %v7642_v8, %v7516_v50  ;;  %v7652_v26 = vmul.f32 %v7643_v47, %v7517_v61 }
0x1868   : > { %v7601_v9 = vadd.f32 -0.28449672, %v7592_v29  ;;  %v7584_v52 = vadd.f32 1.4214138, %v7575_v53  ;;  %v7567_v13 = vadd.f32 -1.4531521, %v7558_v42 }
0x1869   : > { %15787 = vrcp.f32 %v7535_v27  ;;  %v19851_v7 = vpop.eup %15775  ;;  %v7527_v55 = vmul.f32 0.3275911, %v19856_v63  ;;  %v19864_v16 = vmul.f32 0.70710677, %v19849_v30  ;;  %v7665_v28 = vmul.f32 1.442695, %v7651_v43 }
0x186a   : > { %v7610_v5 = vmul.f32 %v19800_v12, %v7601_v9  ;;  %v7593_v49 = vmul.f32 %v19813_v37, %v7584_v52  ;;  %v7576_v31 = vmul.f32 %v19835_v25, %v7567_v13  ;;  %v7559_v1 = vmul.f32 1.0614054, %v19851_v7 }
0x186b   : > { %v7536_v50 = vadd.f32 1.0, %v7527_v55  ;;  %15789 = vpow2.f32 %v7661_v2  ;;  %vm7500_vm11 = vcmp.ge.f32.partialorder %v19840_v35, 0.0  ;;  %vm7501_vm12 = vcmp.ge.f32.partialorder %v19864_v16, 0.0 }
0x186c   : > { %v7619_v57 = vadd.f32 0.2548296, %v7610_v5  ;;  %v7602_v54 = vadd.f32 -0.28449672, %v7593_v49  ;;  %v7585_v18 = vadd.f32 1.4214138, %v7576_v31 }
0x186d   : > { %v19861_v24 = vpop.eup %15777  ;;  %v7568_v3 = vadd.f32 -1.4531521, %v7559_v1  ;;  %15791 = vrcp.f32 %v7536_v50  ;;  %v19876_v31 = vand.u32 2147483647, %v19864_v16 }
0x186e   : > { %v15780_v48 = vpop.eup %15779  ;;  %v7628_v21 = vmul.f32 %v19800_v12, %v7619_v57  ;;  %v7611_v29 = vmul.f32 %v19813_v37, %v7602_v54  ;;  %v7560_v53 = vmul.f32 1.0614054, %v19861_v24  ;;  %v7594_v34 = vmul.f32 %v19835_v25, %v7585_v18 }
0x186f   : > { %v7577_v42 = vmul.f32 %v19851_v7, %v7568_v3  ;;  %15793 = vpow2.f32 %v7663_v51  ;;  %v7667_v12 = vmul.f32 1.442695, %v7652_v26  ;;  %v7644_v57 = vsub.f32 0.0, %v19856_v63 }
0x1870   : > { %v7673_v8 = vmul.f32 %v15780_v48, %v7628_v21  ;;  %v7620_v27 = vadd.f32 0.2548296, %v7611_v29  ;;  %v7569_v61 = vadd.f32 -1.4531521, %v7560_v53  ;;  %v15782_v58 = vpop.eup %15781  ;;  %v7603_v9 = vadd.f32 -0.28449672, %v7594_v34 }
0x1871   : > { %v7586_v52 = vadd.f32 1.4214138, %v7577_v42  ;;  %v19871_v13 = vpop.eup %15783  ;;  %v7528_v18 = vmul.f32 0.3275911, %v19876_v31  ;;  %15795 = vpow2.f32 %v7665_v28 }
0x1872   : > { %v7682_v47 = vsub.f32 1.0, %v7673_v8  ;;  %v7629_v5 = vmul.f32 %v19813_v37, %v7620_v27  ;;  %v7578_v49 = vmul.f32 %v19861_v24, %v7569_v61  ;;  %v7612_v2 = vmul.f32 %v19835_v25, %v7603_v9  ;;  %v15786_v37 = vpop.eup %15785 }
0x1873   : > { %v7595_v1 = vmul.f32 %v19851_v7, %v7586_v52  ;;  %v7561_v43 = vmul.f32 1.0614054, %v19871_v13  ;;  %v7537_v34 = vadd.f32 1.0, %v7528_v18 }
0x1874   : > { %v7691_v51 = vmul.f32 %v7682_v47, %v19806_v17  ;;  %v7674_v54 = vmul.f32 %v15782_v58, %v7629_v5  ;;  %v7587_v55 = vadd.f32 1.4214138, %v7578_v49  ;;  %v7621_v3 = vadd.f32 0.2548296, %v7612_v2 }
0x1875   : > { %v7604_v26 = vadd.f32 -0.28449672, %v7595_v1  ;;  %v7570_v48 = vadd.f32 -1.4531521, %v7561_v43  ;;  %15797 = vrcp.f32 %v7537_v34 }
0x1876   : > { %v19884_v21 = vpop.eup %15787  ;;  %v7700_v29 = vadd.f32 1.0, %v7691_v51  ;;  %v7683_v53 = vsub.f32 1.0, %v7674_v54  ;;  %v7596_v50 = vmul.f32 %v19861_v24, %v7587_v55  ;;  %v7630_v42 = vmul.f32 %v19835_v25, %v7621_v3 }
0x1877   : > { %v7613_v17 = vmul.f32 %v19851_v7, %v7604_v26  ;;  %v7579_v8 = vmul.f32 %v19871_v13, %v7570_v48  ;;  %v7562_v27 = vmul.f32 1.0614054, %v19884_v21  ;;  %15799 = vpow2.f32 %v7667_v12 }
0x1878   : > { %v7709_v61 = vmul.f32 %v7700_v29, %v19802_v38  ;;  %v7692_v58 = vmul.f32 %v7683_v53, %v19828_v15  ;;  %v7605_v28 = vadd.f32 -0.28449672, %v7596_v50  ;;  %v7675_v9 = vmul.f32 %v15786_v37, %v7630_v42  ;;  %v15790_v51 = vpop.eup %15789 }
0x1879   : > { %v7622_v52 = vadd.f32 0.2548296, %v7613_v17  ;;  %v7588_v47 = vadd.f32 1.4214138, %v7579_v8  ;;  %v7571_v5 = vadd.f32 -1.4531521, %v7562_v27  ;;  %v7653_v25 = vmul.f32 %v7644_v57, %v19856_v63 }
0x187a   : > { %v7701_v49 = vadd.f32 1.0, %v7692_v58  ;;  %v7614_v2 = vmul.f32 %v19861_v24, %v7605_v28  ;;  %14949 = vmatmul.mubr.msk.f32.vlgmr.msra.gmra.mxu0 %vm1331_vm0, %v7709_v61  ;;  %v7684_v1 = vsub.f32 1.0, %v7675_v9  ;;  %v7478_v55 = vmul.f32 0.5, %v19780_v62  ;;  %v19904_v12 = vpop.eup %15791 }
0x187b   : > { %v7631_v43 = vmul.f32 %v19851_v7, %v7622_v52  ;;  %v7597_v38 = vmul.f32 %v19871_v13, %v7588_v47  ;;  %v7580_v15 = vmul.f32 %v19884_v21, %v7571_v5  ;;  %14951 = vmatprep.mubr.msk.f32.mxu0 %vm15867_vm2, %v15866_v10  ;;  %v7563_v48 = vmul.f32 1.0614054, %v19904_v12 }
0x187c   : > { %v7710_v54 = vmul.f32 %v7701_v49, %v19815_v40  ;;  %v7623_v63 = vadd.f32 0.2548296, %v7614_v2  ;;  %v7693_v57 = vmul.f32 %v7684_v1, %v19846_v59  ;;  %v15794_v3 = vpop.eup %15793  ;;  %v7669_v29 = vmul.f32 1.442695, %v7653_v25 }
0x187d   : > { %v7676_v7 = vmul.f32 %v15790_v51, %v7631_v43  ;;  %v7606_v18 = vadd.f32 -0.28449672, %v7597_v38  ;;  %v7589_v37 = vadd.f32 1.4214138, %v7580_v15  ;;  %v7645_v40 = vsub.f32 0.0, %v19876_v31 }
0x187e   : > { %v7632_v26 = vmul.f32 %v19861_v24, %v7623_v63  ;;  %14952 = vmatmul.mubr.msk.f32.gmra.mxu0 %vm1331_vm0, %v7710_v54  ;;  %v7702_v62 = vadd.f32 1.0, %v7693_v57  ;;  %v7505_v59 = vsel %vm7496_vm7, 1.0, %v21376_v44  ;;  %v7572_v42 = vadd.f32 -1.4531521, %v7563_v48  ;;  %v15796_v58 = vpop.eup %15795 }
0x187f   : > { %v7685_v53 = vsub.f32 1.0, %v7676_v7  ;;  %v7615_v50 = vmul.f32 %v19871_v13, %v7606_v18  ;;  %v7598_v34 = vmul.f32 %v19884_v21, %v7589_v37  ;;  %14954 = vmatprep.mubr.msk.f32.mxu0 %vm15867_vm2, %v15866_v10  ;;  %15801 = vpow2.f32 %v7669_v29 }
0x1880   : > { %v7677_v24 = vmul.f32 %v15794_v3, %v7632_v26  ;;  %v7711_v17 = vmul.f32 %v7702_v62, %v19832_v0  ;;  %v7581_v9 = vmul.f32 %v19904_v12, %v7572_v42  ;;  %v7654_v52 = vmul.f32 %v7645_v40, %v19876_v31 }
0x1881   : > { %v7694_v8 = vmul.f32 %v7685_v53, %v7505_v59  ;;  %v7624_v27 = vadd.f32 0.2548296, %v7615_v50  ;;  %v7607_v61 = vadd.f32 -0.28449672, %v7598_v34  ;;  %v7479_v0 = vmul.f32 0.5, %v19787_v56 }
0x1882   : > { %v7686_v28 = vsub.f32 1.0, %v7677_v24  ;;  %14955 = vmatmul.mubr.msk.f32.gmra.mxu0 %vm1331_vm0, %v7711_v17  ;;  %v7590_v2 = vadd.f32 1.4214138, %v7581_v9  ;;  %v15798_v25 = vpop.eup %15797  ;;  %v7671_v51 = vmul.f32 1.442695, %v7654_v52  ;;  %v7507_v7 = vsel %vm7498_vm9, 1.0, %v21376_v44 }
0x1883   : > { %v7703_v47 = vadd.f32 1.0, %v7694_v8  ;;  %v7633_v5 = vmul.f32 %v19871_v13, %v7624_v27  ;;  %v7616_v45 = vmul.f32 %v19884_v21, %v7607_v61  ;;  %14957 = vmatprep.mubr.msk.f32.mxu0 %vm15867_vm2, %v15866_v10  ;;  %v7564_v15 = vmul.f32 1.0614054, %v15798_v25 }
0x1884   : > { %v7695_v49 = vmul.f32 %v7686_v28, %v7506_v36  ;;  %v7599_v13 = vmul.f32 %v19904_v12, %v7590_v2  ;;  %v15800_v54 = vpop.eup %15799  ;;  %15803 = vpow2.f32 %v7671_v51  ;;  %v7508_v40 = vsel %vm7499_vm10, 1.0, %v21376_v44 }
0x1885   : > { %v7712_v1 = vmul.f32 %v7703_v47, %v7478_v55  ;;  %v7678_v31 = vmul.f32 %v15796_v58, %v7633_v5  ;;  %v7625_v43 = vadd.f32 0.2548296, %v7616_v45  ;;  %v7573_v55 = vadd.f32 -1.4531521, %v7564_v15 }
0x1886   : > { %v7704_v38 = vadd.f32 1.0, %v7695_v49  ;;  %v7608_v18 = vadd.f32 -0.28449672, %v7599_v13  ;;  %v7481_v42 = vmul.f32 0.5, %v19811_v14  ;;  %v7509_v28 = vsel %vm7500_vm11, 1.0, %v21376_v44 }
0x1887   : > { %v7687_v63 = vsub.f32 1.0, %v7678_v31  ;;  %v7634_v56 = vmul.f32 %v19884_v21, %v7625_v43  ;;  %14958 = vmatmul.mubr.msk.f32.gmra.mxu0 %vm1331_vm0, %v7712_v1  ;;  %v7582_v26 = vmul.f32 %v15798_v25, %v7573_v55  ;;  %v7480_v21 = vmul.f32 0.5, %v19795_v23 }
0x1888   : > { %v7713_v57 = vmul.f32 %v7704_v38, %v7479_v0  ;;  %14960 = vmatprep.mubr.msk.f32.mxu0 %vm15867_vm2, %v15866_v10  ;;  %v7617_v3 = vmul.f32 %v19904_v12, %v7608_v18  ;;  %v7482_v14 = vmul.f32 0.5, %v19823_v20  ;;  %v7510_v0 = vsel %vm7501_vm12, 1.0, %v21376_v44 }
0x1889   : > { %v7696_v32 = vmul.f32 %v7687_v63, %v7507_v7  ;;  %v7679_v37 = vmul.f32 %v15800_v54, %v7634_v56  ;;  %v7591_v53 = vadd.f32 1.4214138, %v7582_v26  ;;  %v7483_v2 = vmul.f32 0.5, %v19849_v30  ;;  %v12656_v30 = vld [vmem:[%s21311_s15 + $0x4] ss:$0 sm:$0xff] }
0x188a   : > { %v7626_v62 = vadd.f32 0.2548296, %v7617_v3 }
0x188b   : > { %v7705_v48 = vadd.f32 1.0, %v7696_v32  ;;  %v7688_v29 = vsub.f32 1.0, %v7679_v37  ;;  %14961 = vmatmul.mubr.msk.f32.gmra.mxu0 %vm1331_vm0, %v7713_v57  ;;  %v7600_v59 = vmul.f32 %v15798_v25, %v7591_v53 }
0x188c   : > { %14963 = vmatprep.mubr.msk.f32.mxu0 %vm15867_vm2, %v15866_v10  ;;  %v7635_v34 = vmul.f32 %v19904_v12, %v7626_v62  ;;  %v15802_v24 = vpop.eup %15801 }
0x188d   : > { %v7714_v50 = vmul.f32 %v7705_v48, %v7480_v21  ;;  %v7697_v39 = vmul.f32 %v7688_v29, %v7508_v40  ;;  %v7609_v8 = vadd.f32 -0.28449672, %v7600_v59 }
0x188e   : > { %v7680_v17 = vmul.f32 %v15802_v24, %v7635_v34 }
0x188f   : > { %v7706_v23 = vadd.f32 1.0, %v7697_v39  ;;  %14964 = vmatmul.mubr.msk.f32.gmra.mxu0 %vm1331_vm0, %v7714_v50  ;;  %v7618_v58 = vmul.f32 %v15798_v25, %v7609_v8 }
0x1890   : > { %14966 = vmatprep.mubr.msk.f32.mxu0 %vm15867_vm2, %v15866_v10  ;;  %v7689_v61 = vsub.f32 1.0, %v7680_v17 }
0x1891   : > { %v7715_v27 = vmul.f32 %v7706_v23, %v7481_v42  ;;  %v7627_v9 = vadd.f32 0.2548296, %v7618_v58  ;;  %v15804_v47 = vpop.eup %15803 }
0x1892   : > { %v7698_v12 = vmul.f32 %v7689_v61, %v7509_v28 }
0x1893   : > { %14967 = vmatmul.mubr.msk.f32.gmra.mxu0 %vm1331_vm0, %v7715_v27  ;;  %v7636_v52 = vmul.f32 %v15798_v25, %v7627_v9 }
0x1894   : > { %14969 = vmatprep.mubr.msk.f32.mxu0 %vm15867_vm2, %v15866_v10  ;;  %v7707_v35 = vadd.f32 1.0, %v7698_v12 }
0x1895   : > { %v7681_v5 = vmul.f32 %v15804_v47, %v7636_v52 }
0x1896   : > { %v7716_v36 = vmul.f32 %v7707_v35, %v7482_v14 }
0x1897   : > { %v7690_v45 = vsub.f32 1.0, %v7681_v5 }
0x1898   : > { %14970 = vmatmul.mubr.msk.f32.gmra.mxu0 %vm1331_vm0, %v7716_v36 }
0x1899   : > { %14972 = vmatprep.mubr.msk.f32.mxu0 %vm15867_vm2, %v15866_v10  ;;  %v7699_v49 = vmul.f32 %v7690_v45, %v7510_v0  ;;  %v7910_v0 = vld [vmem:[%s21384_s29 + $0x8] sm:$0xff] }
0x189b   : > { %v7708_v1 = vadd.f32 1.0, %v7699_v49  ;;  %v12687_v49 = vld [vmem:[%s21384_s29 + $0x48] sm:$0xff] }
0x189d   : > { %v7717_v20 = vmul.f32 %v7708_v1, %v7483_v2  ;;  %v7911_v2 = vld [vmem:[%s21384_s29 + $0x10] sm:$0xff]  ;;  %v7912_v1 = vld [vmem:[%s21384_s29 + $0x18] sm:$0xff] }
0x189f   : > { %14973 = vmatmul.mubr.msk.f32.gmra.mxu0 %vm1331_vm0, %v7717_v20  ;;  %v12688_v20 = vld [vmem:[%s21384_s29 + $0x50] sm:$0xff] }
0x193a   : > { %v7820_v25 = vpop.f32.mrf.mxu0 }
0x193b   : > { %v7821_v39 = vadd.f32 %v12656_v30, %v7820_v25  ;;  %v12689_v25 = vld [vmem:[%s21384_s29 + $0x58] sm:$0xff] }
0x193c   : > { %v14950_v31 = vpop.f32.mrf.mxu0 }
0x193d   : > { %v12670_v31 = vld [vmem:[%s21384_s29 + $0x20] sm:$0xff] }
0x193e   : > { %v7825_v43 = vpop.f32.mrf.mxu0 }
0x193f   : > { %v7826_v40 = vadd.f32 %v12656_v30, %v7825_v43  ;;  %v12671_v43 = vld [vmem:[%s21384_s29 + $0x28] sm:$0xff] }
0x1940   : > { %v14953_v16 = vpop.f32.mrf.mxu0 }
0x1941   : > { %v12698_v16 = vld [vmem:[%s21384_s29 + $0x60] sm:$0xff] }
0x1942   : > { %v7830_v38 = vpop.f32.mrf.mxu0 }
0x1943   : > { %v7831_v50 = vadd.f32 %v12656_v30, %v7830_v38  ;;  %v8909_v38 = vld [vmem:[%s21312_s16 + $0x98] sm:$0xff] }
0x1944   : > { %v14956_v13 = vpop.f32.mrf.mxu0 }
0x1945   : > { %v12699_v13 = vld [vmem:[%s21384_s29 + $0x68] sm:$0xff] }
0x1947   : > { %v7835_v15 = vpop.f32.mrf.mxu0 }
0x1948   : > { %v7836_v21 = vadd.f32 %v12656_v30, %v7835_v15  ;;  %v12672_v15 = vld [vmem:[%s21384_s29 + $0x30] sm:$0xff] }
0x1949   : > { %v14959_v51 = vpop.f32.mrf.mxu0 }
0x194a   : > { %v12700_v51 = vld [vmem:[%s21384_s29 + $0x70] sm:$0xff] }
0x194b   : > { %v7840_v54 = vpop.f32.mrf.mxu0 }
0x194c   : > { %v7841_v53 = vadd.f32 %v12656_v30, %v7840_v54  ;;  %v8908_v54 = vld [vmem:[%s21312_s16 + $0x90] sm:$0xff] }
0x194d   : > { %v14962_v63 = vpop.f32.mrf.mxu0 }
0x194e   : > { %v12673_v63 = vld [vmem:[%s21384_s29 + $0x38] sm:$0xff] }
0x194f   : > { %v7845_v56 = vpop.f32.mrf.mxu0 }
0x1950   : > { %v7846_v3 = vadd.f32 %v12656_v30, %v7845_v56  ;;  %v8907_v56 = vld [vmem:[%s21312_s16 + $0x88] sm:$0xff] }
0x1951   : > { %v14965_v57 = vpop.f32.mrf.mxu0 }
0x1952   : > { %v12701_v57 = vld [vmem:[%s21384_s29 + $0x78] sm:$0xff] }
0x1953   : > { %v7850_v7 = vpop.f32.mrf.mxu0 }
0x1954   : > { %v7851_v62 = vadd.f32 %v12656_v30, %v7850_v7  ;;  %v8906_v7 = vld [vmem:[%s21312_s16 + $0x80] sm:$0xff] }
0x1955   : > { %v14968_v18 = vpop.f32.mrf.mxu0 }
0x1956   : > { %v8159_v18 = vld [vmem:[%s21312_s16 + $0x38] sm:$0xff] }
0x1958   : > { %v7855_v55 = vpop.f32.mrf.mxu0 }
0x1959   : > { %v7856_v32 = vadd.f32 %v12656_v30, %v7855_v55  ;;  %v8157_v55 = vld [vmem:[%s21312_s16 + $0x28] sm:$0xff] }
0x195a   : > { %v14971_v37 = vpop.f32.mrf.mxu0 }
0x195b   : > { %7887 = vrot.lane.b32.xlu1 %v7856_v32, %s21342_s0  ;;  %v8156_v32 = vld [vmem:[%s21312_s16 + $0x20] sm:$0xff]  ;;  %v8049_v37 = vld [vmem:[%s21312_s16 + $0x18] sm:$0xff] }
0x195f   : > { %7883 = vrot.lane.b32.xlu1 %v7846_v3, %s21342_s0  ;;  %v7860_v26 = vpop.f32.mrf.mxu0 }
0x1960   : > { %v7861_v48 = vadd.f32 %v12656_v30, %v7860_v26  ;;  %v8158_v30 = vld [vmem:[%s21312_s16 + $0x30] sm:$0xff] }
0x1961   : > { %v14974_v29 = vpop.f32.mrf.mxu0 }
0x1962   : > { %7889 = vrot.lane.b32.xlu0 %v7861_v48, %s21342_s0 }
0x1963   : > { %7879 = vrot.lane.b32.xlu1 %v7836_v21, %s21342_s0 }
0x1966   : > { %7885 = vrot.lane.b32.xlu0 %v7851_v62, %s21342_s0 }
0x1967   : > { %7875 = vrot.lane.b32.xlu1 %v7826_v40, %s21342_s0 }
0x196a   : > { %7881 = vrot.lane.b32.xlu0 %v7841_v53, %s21342_s0 }
0x196e   : > { %7877 = vrot.lane.b32.xlu0 %v7831_v50, %s21342_s0 }
0x1972   : > { %7873 = vrot.lane.b32.xlu0 %v7821_v39, %s21342_s0 }
0x19cd   : > { %v7888_v34 = vpop.permute.xlu1 %7887 }
0x19ce   : > { %v7907_v59 = vadd.f32 %v7888_v34, %v19601_v33 }
0x19d0   : > { %7936 = vrot.lane.b32.xlu0 %v7907_v59, %s21342_s0 }
0x19d1   : > { %v7884_v24 = vpop.permute.xlu1 %7883 }
0x19d2   : > { %v7905_v42 = vadd.f32 %v7884_v24, %v19591_v4  ;;  %v7909_v4 = vld [vmem:[%s21384_s29] sm:$0xff] }
0x19d3   : > { %14993 = vmatprep.mubr.msk.f32.mxu1 %vm6604_vm3, %v7909_v4 }
0x19d4   : > { %7932 = vrot.lane.b32.xlu0 %v7905_v42, %s21342_s0  ;;  %v7890_v23 = vpop.permute.xlu0 %7889 }
0x19d5   : > { %v7880_v17 = vpop.permute.xlu1 %7879  ;;  %v7908_v8 = vadd.f32 %v7890_v23, %v19606_v19 }
0x19d6   : > { %v7903_v27 = vadd.f32 %v7880_v17, %v19581_v41  ;;  %v12686_v41 = vld [vmem:[%s21384_s29 + $0x40] sm:$0xff] }
0x19d7   : > { %7938 = vrot.lane.b32.xlu1 %v7908_v8, %s21342_s0  ;;  %15069 = vmatprep.mubr.msk.f32.mxu0 %vm6604_vm3, %v12686_v41 }
0x19d8   : > { %7928 = vrot.lane.b32.xlu0 %v7903_v27, %s21342_s0  ;;  %v7886_v61 = vpop.permute.xlu0 %7885 }
0x19d9   : > { %v7876_v58 = vpop.permute.xlu1 %7875  ;;  %v7906_v33 = vadd.f32 %v7886_v61, %v19596_v22 }
0x19da   : > { %v7901_v28 = vadd.f32 %v7876_v58, %v19571_v60 }
0x19db   : > { %7934 = vrot.lane.b32.xlu1 %v7906_v33, %s21342_s0 }
0x19dc   : > { %7924 = vrot.lane.b32.xlu0 %v7901_v28, %s21342_s0  ;;  %v7882_v19 = vpop.permute.xlu0 %7881  ;;  %v8048_v28 = vld [vmem:[%s21312_s16 + $0x10] sm:$0xff] }
0x19dd   : > { %v7904_v12 = vadd.f32 %v7882_v19, %v19586_v6 }
0x19df   : > { %7930 = vrot.lane.b32.xlu1 %v7904_v12, %s21342_s0 }
0x19e0   : > { %v7878_v60 = vpop.permute.xlu0 %7877 }
0x19e1   : > { %v7902_v22 = vadd.f32 %v7878_v60, %v19576_v46 }
0x19e3   : > { %7926 = vrot.lane.b32.xlu1 %v7902_v22, %s21342_s0 }
0x19e4   : > { %v7874_v9 = vpop.permute.xlu0 %7873 }
0x19e5   : > { %v7900_v14 = vadd.f32 %v7874_v9, %v19566_v11 }
0x19e7   : > { %7922 = vrot.lane.b32.xlu1 %v7900_v14, %s21342_s0 }
0x1a42   : > { %v19999_v35 = vpop.permute.xlu0 %7936 }
0x1a46   : > { %v20005_v6 = vpop.permute.xlu0 %7932 }
0x1a49   : > { %v20001_v52 = vpop.permute.xlu1 %7938 }
0x1a4a   : > { %14975 = vmatprep.subr.mxu1 %v20001_v52  ;;  %15051 = vmatprep.subr.mxu0 %v20001_v52  ;;  %v20021_v46 = vpop.permute.xlu0 %7928 }
0x1a4b   : > { %14976 = vmatpush3.msra.mxu1 %v20001_v52  ;;  %15052 = vmatpush3.msra.mxu0 %v20001_v52 }
0x1a4c   : > { %14977 = vmatprep.subr.mxu1 %v19999_v35  ;;  %15053 = vmatprep.subr.mxu0 %v19999_v35 }
0x1a4d   : > { %v20011_v11 = vpop.permute.xlu1 %7934  ;;  %14978 = vmatpush3.msra.mxu1 %v19999_v35  ;;  %15054 = vmatpush3.msra.mxu0 %v19999_v35 }
0x1a4e   : > { %14979 = vmatprep.subr.mxu1 %v20011_v11  ;;  %15055 = vmatprep.subr.mxu0 %v20011_v11  ;;  %v20039_v5 = vpop.permute.xlu0 %7924 }
0x1a4f   : > { %14980 = vmatpush3.msra.mxu1 %v20011_v11  ;;  %15056 = vmatpush3.msra.mxu0 %v20011_v11 }
0x1a50   : > { %14981 = vmatprep.subr.mxu1 %v20005_v6  ;;  %15057 = vmatprep.subr.mxu0 %v20005_v6 }
0x1a51   : > { %v20023_v47 = vpop.permute.xlu1 %7930  ;;  %14982 = vmatpush3.msra.mxu1 %v20005_v6  ;;  %15058 = vmatpush3.msra.mxu0 %v20005_v6 }
0x1a52   : > { %14983 = vmatprep.subr.mxu1 %v20023_v47  ;;  %15059 = vmatprep.subr.mxu0 %v20023_v47 }
0x1a53   : > { %14984 = vmatpush3.msra.mxu1 %v20023_v47  ;;  %15060 = vmatpush3.msra.mxu0 %v20023_v47 }
0x1a54   : > { %14985 = vmatprep.subr.mxu1 %v20021_v46  ;;  %15061 = vmatprep.subr.mxu0 %v20021_v46 }
0x1a55   : > { %v20033_v36 = vpop.permute.xlu1 %7926  ;;  %14986 = vmatpush3.msra.mxu1 %v20021_v46  ;;  %15062 = vmatpush3.msra.mxu0 %v20021_v46 }
0x1a56   : > { %14987 = vmatprep.subr.mxu1 %v20033_v36  ;;  %15063 = vmatprep.subr.mxu0 %v20033_v36 }
0x1a57   : > { %14988 = vmatpush3.msra.mxu1 %v20033_v36  ;;  %15064 = vmatpush3.msra.mxu0 %v20033_v36 }
0x1a58   : > { %14989 = vmatprep.subr.mxu1 %v20039_v5  ;;  %15065 = vmatprep.subr.mxu0 %v20039_v5 }
0x1a59   : > { %v20045_v45 = vpop.permute.xlu1 %7922  ;;  %14990 = vmatpush3.msra.mxu1 %v20039_v5  ;;  %15066 = vmatpush3.msra.mxu0 %v20039_v5 }
0x1a5a   : > { %14991 = vmatprep.subr.mxu1 %v20045_v45  ;;  %15067 = vmatprep.subr.mxu0 %v20045_v45 }
0x1a5b   : > { %14992 = vmatpush3.msra.mxu1 %v20045_v45  ;;  %15068 = vmatpush3.msra.mxu0 %v20045_v45 }
0x1a5c   : > { %14999 = vmatprep.subr.mxu1 %v20001_v52  ;;  %15089 = vmatprep.subr.mxu0 %v20001_v52 }
0x1a5d   : > { %14994 = vmatmul.mubr.msk.f32.vlgmr.msra.gmra.mxu1 %vm6604_vm3, %v7910_v0  ;;  %15070 = vmatmul.mubr.msk.f32.vlgmr.msra.gmra.mxu0 %vm6604_vm3, %v12687_v49 }
0x1a5e   : > { %15000 = vmatpush3.msra.mxu1 %v20001_v52  ;;  %15090 = vmatpush3.msra.mxu0 %v20001_v52 }
0x1a5f   : > { %15001 = vmatprep.subr.mxu1 %v19999_v35  ;;  %15091 = vmatprep.subr.mxu0 %v19999_v35 }
0x1a60   : > { %15002 = vmatpush3.msra.mxu1 %v19999_v35  ;;  %15092 = vmatpush3.msra.mxu0 %v19999_v35 }
0x1a61   : > { %15003 = vmatprep.subr.mxu1 %v20011_v11  ;;  %15093 = vmatprep.subr.mxu0 %v20011_v11 }
0x1a62   : > { %15004 = vmatpush3.msra.mxu1 %v20011_v11  ;;  %15094 = vmatpush3.msra.mxu0 %v20011_v11 }
0x1a63   : > { %15005 = vmatprep.subr.mxu1 %v20005_v6  ;;  %15095 = vmatprep.subr.mxu0 %v20005_v6 }
0x1a64   : > { %15006 = vmatpush3.msra.mxu1 %v20005_v6  ;;  %15096 = vmatpush3.msra.mxu0 %v20005_v6 }
0x1a65   : > { %15007 = vmatprep.subr.mxu1 %v20023_v47  ;;  %15097 = vmatprep.subr.mxu0 %v20023_v47 }
0x1a66   : > { %15008 = vmatpush3.msra.mxu1 %v20023_v47  ;;  %15098 = vmatpush3.msra.mxu0 %v20023_v47 }
0x1a67   : > { %15009 = vmatprep.subr.mxu1 %v20021_v46  ;;  %15099 = vmatprep.subr.mxu0 %v20021_v46 }
0x1a68   : > { %15010 = vmatpush3.msra.mxu1 %v20021_v46  ;;  %15100 = vmatpush3.msra.mxu0 %v20021_v46 }
0x1a69   : > { %15011 = vmatprep.subr.mxu1 %v20033_v36  ;;  %15101 = vmatprep.subr.mxu0 %v20033_v36 }
0x1a6a   : > { %14996 = vmatprep.mubr.msk.f32.mxu1 %vm6604_vm3, %v7911_v2  ;;  %15012 = vmatpush3.msra.mxu1 %v20033_v36  ;;  %v8047_v2 = vld [vmem:[%s21312_s16 + $0x8] sm:$0xff] }
0x1a6b   : > { %15102 = vmatpush3.msra.mxu0 %v20033_v36  ;;  %14997 = vmatmul.mubr.msk.f32.gmra.mxu1 %vm6604_vm3, %v7912_v1 }
0x1a6c   : > { %15013 = vmatprep.subr.mxu1 %v20039_v5  ;;  %15072 = vmatprep.mubr.msk.f32.mxu0 %vm6604_vm3, %v12688_v20 }
0x1a6d   : > { %15103 = vmatprep.subr.mxu0 %v20039_v5  ;;  %15014 = vmatpush3.msra.mxu1 %v20039_v5 }
0x1a6e   : > { %15073 = vmatmul.mubr.msk.f32.gmra.mxu0 %vm6604_vm3, %v12689_v25  ;;  %15015 = vmatprep.subr.mxu1 %v20045_v45 }
0x1a6f   : > { %15104 = vmatpush3.msra.mxu0 %v20039_v5  ;;  %15016 = vmatpush3.msra.mxu1 %v20045_v45 }
0x1a70   : > { %15105 = vmatprep.subr.mxu0 %v20045_v45  ;;  %15017 = vmatprep.mubr.msk.f32.mxu1 %vm6604_vm3, %v12670_v31 }
0x1a71   : > { %15106 = vmatpush3.msra.mxu0 %v20045_v45  ;;  %15018 = vmatmul.mubr.msk.f32.vlgmr.msra.gmra.mxu1 %vm6604_vm3, %v12671_v43 }
0x1a72   : > { %15107 = vmatprep.mubr.msk.f32.mxu0 %vm6604_vm3, %v12698_v16  ;;  %15151 = vmatprep.subr.mxu0 %v8909_v38 }
0x1a73   : > { %15108 = vmatmul.mubr.msk.f32.vlgmr.msra.gmra.mxu0 %vm6604_vm3, %v12699_v13  ;;  %15020 = vmatprep.mubr.msk.f32.mxu1 %vm6604_vm3, %v12672_v15 }
0x1a74   : > { %15152 = vmatpush3.msra.mxu0 %v8909_v38  ;;  %15110 = vmatprep.mubr.msk.f32.mxu0 %vm6604_vm3, %v12700_v51 }
0x1a75   : > { %15153 = vmatprep.subr.mxu0 %v8908_v54  ;;  %15021 = vmatmul.mubr.msk.f32.gmra.mxu1 %vm6604_vm3, %v12673_v63 }
0x1a76   : > { %15154 = vmatpush3.msra.mxu0 %v8908_v54  ;;  %15023 = vmatprep.subr.mxu1 %v8159_v18 }
0x1a77   : > { %15155 = vmatprep.subr.mxu0 %v8907_v56  ;;  %15111 = vmatmul.mubr.msk.f32.gmra.mxu0 %vm6604_vm3, %v12701_v57 }
0x1a78   : > { %15156 = vmatpush3.msra.mxu0 %v8907_v56  ;;  %15024 = vmatpush3.msra.mxu1 %v8159_v18  ;;  %v8046_v56 = vld [vmem:[%s21312_s16] sm:$0xff] }
0x1a79   : > { %15157 = vmatprep.subr.mxu0 %v8906_v7  ;;  %15025 = vmatprep.subr.mxu1 %v8158_v30 }
0x1a7a   : > { %15158 = vmatpush3.msra.mxu0 %v8906_v7  ;;  %15026 = vmatpush3.msra.mxu1 %v8158_v30 }
0x1a7b   : > { %15165 = vmatprep.subr.mxu0 %v20001_v52  ;;  %15027 = vmatprep.subr.mxu1 %v8157_v55 }
0x1a7c   : > { %15028 = vmatpush3.msra.mxu1 %v8157_v55 }
0x1a7d   : > { %15029 = vmatprep.subr.mxu1 %v8156_v32 }
0x1a7e   : > { %15030 = vmatpush3.msra.mxu1 %v8156_v32 }
0x1a7f   : > { %15037 = vmatprep.subr.mxu1 %v8049_v37 }
0x1b1d   : > { %v20173_v3 = vpop.f32.mrf.mxu1  ;;  %v20175_v26 = vpop.f32.mrf.mxu0 }
0x1b1e   : > { %v8051_v39 = vmul.f32 %v20173_v3, %v20173_v3  ;;  %v8578_v34 = vmul.f32 %v20175_v26, %v20175_v26 }
0x1b1f   : > { %v8027_v21 = vpop.f32.mrf.mxu1  ;;  %v20177_v48 = vpop.f32.mrf.mxu0 }
0x1b20   : > { %v8050_v42 = vmul.f32 %v8027_v21, %v8027_v21  ;;  %v8577_v23 = vmul.f32 %v20177_v48, %v20177_v48 }
0x1b2b   : > { %v20179_v29 = vpop.f32.mrf.mxu1 }
0x1b2c   : > { %v8053_v4 = vmul.f32 %v20179_v29, %v20179_v29 }
0x1b2d   : > { %v20183_v62 = vpop.f32.mrf.mxu1 }
0x1b2e   : > { %v20181_v40 = vpop.f32.mrf.mxu0  ;;  %v8052_v19 = vmul.f32 %v20183_v62, %v20183_v62 }
0x1b2f   : > { %v8580_v41 = vmul.f32 %v20181_v40, %v20181_v40 }
0x1b30   : > { %v20185_v53 = vpop.f32.mrf.mxu0 }
0x1b31   : > { %v15019_v50 = vpop.f32.mrf.mxu1  ;;  %v8579_v1 = vmul.f32 %v20185_v53, %v20185_v53 }
0x1b32   : > { %v8355_v59 = vadd.f32 %v15019_v50, %v20173_v3  ;;  %v8359_v24 = vmul.f32 %v15019_v50, %v15019_v50 }
0x1b33   : > { %v8137_v17 = vpop.f32.mrf.mxu1  ;;  %v20194_v8 = vpop.f32.mrf.mxu0 }
0x1b34   : > { %v8363_v27 = vadd.f32 %v8359_v24, %v8051_v39  ;;  %v8354_v61 = vadd.f32 %v8137_v17, %v8027_v21  ;;  %v8358_v58 = vmul.f32 %v8137_v17, %v8137_v17  ;;  %15031 = vmatprep.mubr.msk.f32.mxu1 %vm1331_vm0, %v8137_v17  ;;  %v8574_v33 = vadd.f32 %v20175_v26, %v8355_v59  ;;  %v8470_v59 = vld [vmem:[%s21312_s16 + $0x50] sm:$0xff]  ;;  %v8468_v24 = vld [vmem:[%s21312_s16 + $0x40] sm:$0xff] }
0x1b35   : > { %v15022_v12 = vpop.f32.mrf.mxu1  ;;  %15032 = vmatmul.mubr.msk.f32.vlgmr.msra.gmra.mxu1 %vm1331_vm0, %v15019_v50  ;;  %v8797_v60 = vmul.f32 %v20194_v8, %v20194_v8  ;;  %v20210_v22 = vpop.f32.mrf.mxu0  ;;  %v9127_v17 = vld [vmem:[%s21312_s16 + $0xb0] sm:$0xff] }
0x1b36   : > { %v8362_v9 = vadd.f32 %v8358_v58, %v8050_v42  ;;  %v8357_v14 = vadd.f32 %v15022_v12, %v20179_v29  ;;  %v8361_v0 = vmul.f32 %v15022_v12, %v15022_v12  ;;  %15038 = vmatpush3.msra.mxu1 %v8049_v37  ;;  %v8582_v49 = vadd.f32 %v8578_v34, %v8363_v27  ;;  %v8471_v37 = vld [vmem:[%s21312_s16 + $0x58] sm:$0xff]  ;;  %v9126_v27 = vld [vmem:[%s21312_s16 + $0xa8] sm:$0xff] }
0x1b37   : > { %v20219_v20 = vadd.f32 %v20194_v8, %v8574_v33  ;;  %15039 = vmatprep.subr.mxu1 %v8048_v28  ;;  %v8147_v25 = vpop.f32.mrf.mxu1  ;;  %v8573_v31 = vadd.f32 %v20177_v48, %v8354_v61  ;;  %v8796_v43 = vmul.f32 %v20210_v22, %v20210_v22  ;;  %v20224_v16 = vpop.f32.mrf.mxu0  ;;  %v9128_v42 = vld [vmem:[%s21312_s16 + $0xb8] sm:$0xff]  ;;  %v9125_v61 = vld [vmem:[%s21312_s16 + $0xa0] sm:$0xff] }
0x1b38   : > { %v8365_v38 = vadd.f32 %v8361_v0, %v8053_v4  ;;  %v20226_v13 = vadd.f32 %v8797_v60, %v8582_v49  ;;  %v8356_v15 = vadd.f32 %v8147_v25, %v20183_v62  ;;  %v8360_v51 = vmul.f32 %v8147_v25, %v8147_v25  ;;  %15040 = vmatpush3.msra.mxu1 %v8048_v28 }
0x1b39   : > { %v8581_v54 = vadd.f32 %v8577_v23, %v8362_v9  ;;  %v20230_v63 = vadd.f32 %v20210_v22, %v8573_v31  ;;  %15034 = vmatprep.mubr.msk.f32.mxu1 %vm1331_vm0, %v8147_v25  ;;  %15041 = vmatprep.subr.mxu1 %v8047_v2  ;;  %v8576_v57 = vadd.f32 %v20181_v40, %v8357_v14  ;;  %v12712_v23 = vld [vmem:[%s21384_s29 + $0x90] sm:$0xff] }
0x1b3a   : > { %v8364_v7 = vadd.f32 %v8360_v51, %v8052_v19  ;;  %15035 = vmatmul.mubr.msk.f32.gmra.mxu1 %vm1331_vm0, %v15022_v12  ;;  %v8584_v18 = vadd.f32 %v8580_v41, %v8365_v38  ;;  %v8799_v30 = vmul.f32 %v20224_v16, %v20224_v16  ;;  %v20241_v55 = vadd.f32 %v20185_v53, %v8356_v15 }
0x1b3b   : > { %v20243_v32 = vadd.f32 %v8796_v43, %v8581_v54  ;;  %15042 = vmatpush3.msra.mxu1 %v8047_v2  ;;  %15045 = vmatprep.mubr.msk.f32.mxu1 %vm1331_vm0, %v8027_v21  ;;  %v20250_v50 = vadd.f32 %v20224_v16, %v8576_v57  ;;  %v8469_v21 = vld [vmem:[%s21312_s16 + $0x48] sm:$0xff] }
0x1b3c   : > { %15043 = vmatprep.subr.mxu1 %v8046_v56  ;;  %v20252_v39 = vadd.f32 %v8799_v30, %v8584_v18  ;;  %v20254_v34 = vadd.f32 %v8579_v1, %v8364_v7 }
0x1b3d   : > { %15044 = vmatpush3.msra.mxu1 %v8046_v56 }
0x1b3e   : > { %15075 = vmatprep.subr.mxu1 %v8471_v37  ;;  %15046 = vmatmul.mubr.msk.f32.vlgmr.msra.gmra.mxu1 %vm1331_vm0, %v20173_v3  ;;  %v8690_v3 = vld [vmem:[%s21312_s16 + $0x78] sm:$0xff] }
0x1b3f   : > { %15076 = vmatpush3.msra.mxu1 %v8471_v37  ;;  %15048 = vmatprep.mubr.msk.f32.mxu1 %vm1331_vm0, %v20183_v62  ;;  %v8689_v62 = vld [vmem:[%s21312_s16 + $0x70] sm:$0xff] }
0x1b40   : > { %15077 = vmatprep.subr.mxu1 %v8470_v59 }
0x1b41   : > { %15078 = vmatpush3.msra.mxu1 %v8470_v59 }
0x1b42   : > { %15079 = vmatprep.subr.mxu1 %v8469_v21  ;;  %15049 = vmatmul.mubr.msk.f32.gmra.mxu1 %vm1331_vm0, %v20179_v29  ;;  %v8687_v29 = vld [vmem:[%s21312_s16 + $0x60] sm:$0xff] }
0x1b43   : > { %15080 = vmatpush3.msra.mxu1 %v8469_v21  ;;  %15083 = vmatprep.mubr.msk.f32.mxu1 %vm1331_vm0, %v20177_v48  ;;  %v8688_v48 = vld [vmem:[%s21312_s16 + $0x68] sm:$0xff] }
0x1b44   : > { %15081 = vmatprep.subr.mxu1 %v8468_v24 }
0x1b45   : > { %15082 = vmatpush3.msra.mxu1 %v8468_v24 }
0x1b46   : > { %15113 = vmatprep.subr.mxu1 %v8690_v3  ;;  %15084 = vmatmul.mubr.msk.f32.vlgmr.msra.gmra.mxu1 %vm1331_vm0, %v20175_v26  ;;  %v20293_v26 = vpop.f32.mrf.mxu0 }
0x1b47   : > { %15114 = vmatpush3.msra.mxu1 %v8690_v3  ;;  %15086 = vmatprep.mubr.msk.f32.mxu1 %vm1331_vm0, %v20185_v53  ;;  %v12711_v53 = vld [vmem:[%s21384_s29 + $0x88] sm:$0xff] }
0x1b48   : > { %15115 = vmatprep.subr.mxu1 %v8689_v62 }
0x1b49   : > { %15116 = vmatpush3.msra.mxu1 %v8689_v62 }
0x1b4a   : > { %15117 = vmatprep.subr.mxu1 %v8688_v48  ;;  %15087 = vmatmul.mubr.msk.f32.gmra.mxu1 %vm1331_vm0, %v20181_v40  ;;  %v12710_v40 = vld [vmem:[%s21384_s29 + $0x80] sm:$0xff] }
0x1b4b   : > { %15118 = vmatpush3.msra.mxu1 %v8688_v48  ;;  %15121 = vmatprep.mubr.msk.f32.mxu1 %vm1331_vm0, %v20210_v22 }
0x1b4c   : > { %15119 = vmatprep.subr.mxu1 %v8687_v29 }
0x1b4d   : > { %15120 = vmatpush3.msra.mxu1 %v8687_v29 }
0x1b4e   : > { %15127 = vmatprep.subr.mxu1 %v20001_v52  ;;  %15122 = vmatmul.mubr.msk.f32.vlgmr.msra.gmra.mxu1 %vm1331_vm0, %v20194_v8  ;;  %v12713_v8 = vld [vmem:[%s21384_s29 + $0x98] sm:$0xff] }
0x1b4f   : > { %15128 = vmatpush3.msra.mxu1 %v20001_v52  ;;  %15124 = vmatprep.mubr.msk.f32.mxu1 %vm1331_vm0, %v20293_v26 }
0x1b50   : > { %15129 = vmatprep.subr.mxu1 %v19999_v35 }
0x1b51   : > { %15130 = vmatpush3.msra.mxu1 %v19999_v35 }
0x1b52   : > { %15131 = vmatprep.subr.mxu1 %v20011_v11  ;;  %15125 = vmatmul.mubr.msk.f32.gmra.mxu1 %vm1331_vm0, %v20224_v16 }
0x1b53   : > { %15132 = vmatpush3.msra.mxu1 %v20011_v11  ;;  %15145 = vmatprep.mubr.msk.f32.mxu1 %vm6604_vm3, %v12710_v40 }
0x1b54   : > { %15133 = vmatprep.subr.mxu1 %v20005_v6 }
0x1b55   : > { %15134 = vmatpush3.msra.mxu1 %v20005_v6 }
0x1b56   : > { %15135 = vmatprep.subr.mxu1 %v20023_v47 }
0x1b57   : > { %15136 = vmatpush3.msra.mxu1 %v20023_v47 }
0x1b58   : > { %15137 = vmatprep.subr.mxu1 %v20021_v46 }
0x1b59   : > { %15138 = vmatpush3.msra.mxu1 %v20021_v46 }
0x1b5a   : > { %15139 = vmatprep.subr.mxu1 %v20033_v36 }
0x1b5b   : > { %15140 = vmatpush3.msra.mxu1 %v20033_v36 }
0x1b5c   : > { %15141 = vmatprep.subr.mxu1 %v20039_v5 }
0x1b5d   : > { %15142 = vmatpush3.msra.mxu1 %v20039_v5 }
0x1b5e   : > { %15143 = vmatprep.subr.mxu1 %v20045_v45 }
0x1b5f   : > { %15144 = vmatpush3.msra.mxu1 %v20045_v45 }
0x1b60   : > { %15146 = vmatmul.mubr.msk.f32.vlgmr.msra.gmra.mxu1 %vm6604_vm3, %v12711_v53  ;;  %15189 = vmatprep.subr.mxu1 %v9128_v42 }
0x1b61   : > { %15190 = vmatpush3.msra.mxu1 %v9128_v42  ;;  %15148 = vmatprep.mubr.msk.f32.mxu1 %vm6604_vm3, %v12712_v23  ;;  %v9346_v23 = vld [vmem:[%s21312_s16 + $0xd0] sm:$0xff] }
0x1b62   : > { %15191 = vmatprep.subr.mxu1 %v9127_v17 }
0x1b63   : > { %15192 = vmatpush3.msra.mxu1 %v9127_v17  ;;  %v12725_v17 = vld [vmem:[%s21384_s29 + $0xb8] sm:$0xff] }
0x1b64   : > { %15149 = vmatmul.mubr.msk.f32.gmra.mxu1 %vm6604_vm3, %v12713_v8  ;;  %15193 = vmatprep.subr.mxu1 %v9126_v27  ;;  %v9345_v8 = vld [vmem:[%s21312_s16 + $0xc8] sm:$0xff] }
0x1b65   : > { %15194 = vmatpush3.msra.mxu1 %v9126_v27  ;;  %v9344_v27 = vld [vmem:[%s21312_s16 + $0xc0] sm:$0xff] }
0x1b66   : > { %15195 = vmatprep.subr.mxu1 %v9125_v61 }
0x1b67   : > { %15196 = vmatpush3.msra.mxu1 %v9125_v61 }
0x1b68   : > { %15203 = vmatprep.subr.mxu1 %v20001_v52 }
0x1bf5   : > { %v15033_v58 = vpop.f32.mrf.mxu1 }
0x1bf7   : > { %v8238_v33 = vpop.f32.mrf.mxu1 }
0x1bfa   : > { %v15036_v28 = vpop.f32.mrf.mxu1 }
0x1bfc   : > { %v8248_v4 = vpop.f32.mrf.mxu1 }
0x1bfe   : > { %v15047_v19 = vpop.f32.mrf.mxu1 }
0x1bff   : > { %v8341_v41 = vadd.f32 %v15047_v19, %v15033_v58 }
0x1c00   : > { %v8335_v12 = vpop.f32.mrf.mxu1 }
0x1c01   : > { %v8336_v60 = vadd.f32 %v8335_v12, %v8238_v33 }
0x1c02   : > { %v15050_v22 = vpop.f32.mrf.mxu1 }
0x1c03   : > { %v8351_v9 = vadd.f32 %v15050_v22, %v15036_v28 }
0x1c04   : > { %v8345_v14 = vpop.f32.mrf.mxu1 }
0x1c05   : > { %v8346_v0 = vadd.f32 %v8345_v14, %v8248_v4 }
0x1c06   : > { %v15085_v49 = vpop.f32.mrf.mxu1 }
0x1c07   : > { %v8570_v2 = vadd.f32 %v15085_v49, %v8341_v41 }
0x1c08   : > { %v8550_v1 = vpop.f32.mrf.mxu1 }
0x1c09   : > { %v8569_v25 = vadd.f32 %v8550_v1, %v8336_v60 }
0x1c0a   : > { %v15088_v31 = vpop.f32.mrf.mxu1 }
0x1c0b   : > { %v8572_v43 = vadd.f32 %v15088_v31, %v8351_v9 }
0x1c0c   : > { %v8560_v16 = vpop.f32.mrf.mxu1 }
0x1c0d   : > { %v8571_v38 = vadd.f32 %v8560_v16, %v8346_v0 }
0x1c0e   : > { %v15123_v15 = vpop.f32.mrf.mxu1 }
0x1c0f   : > { %v20348_v51 = vadd.f32 %v15123_v15, %v8570_v2 }
0x1c10   : > { %v8769_v54 = vpop.f32.mrf.mxu1 }
0x1c11   : > { %v20350_v56 = vadd.f32 %v8769_v54, %v8569_v25  ;;  %v9566_v54 = vld [vmem:[%s21312_s16 + $0xf8] sm:$0xff] }
0x1c12   : > { %v15126_v57 = vpop.f32.mrf.mxu1 }
0x1c13   : > { %v20352_v7 = vadd.f32 %v15126_v57, %v8572_v43  ;;  %v9565_v57 = vld [vmem:[%s21312_s16 + $0xf0] sm:$0xff] }
0x1c14   : > { %v8779_v18 = vpop.f32.mrf.mxu1 }
0x1c15   : > { %v20354_v30 = vadd.f32 %v8779_v18, %v8571_v38  ;;  %v12734_v38 = vld [vmem:[%s21384_s29 + $0xc0] sm:$0xff]  ;;  %v9564_v18 = vld [vmem:[%s21312_s16 + $0xe8] sm:$0xff] }
0x1c20   : > { %v15147_v37 = vpop.f32.mrf.mxu1 }
0x1c21   : > { %v20357_v59 = vadd.f32 %v15147_v37, %v20219_v20  ;;  %v9016_v21 = vmul.f32 %v15147_v37, %v15147_v37 }
0x1c22   : > { %v8887_v24 = vpop.f32.mrf.mxu1 }
0x1c23   : > { %v20360_v3 = vadd.f32 %v9016_v21, %v20226_v13  ;;  %v20363_v62 = vadd.f32 %v8887_v24, %v20230_v63  ;;  %v9015_v48 = vmul.f32 %v8887_v24, %v8887_v24  ;;  %15159 = vmatprep.mubr.msk.f32.mxu0 %vm1331_vm0, %v8887_v24  ;;  %v12722_v63 = vld [vmem:[%s21384_s29 + $0xa0] sm:$0xff] }
0x1c24   : > { %v15150_v29 = vpop.f32.mrf.mxu1  ;;  %15160 = vmatmul.mubr.msk.f32.vlgmr.msra.gmra.mxu0 %vm1331_vm0, %v15147_v37 }
0x1c25   : > { %v20368_v40 = vadd.f32 %v9015_v48, %v20243_v32  ;;  %v20371_v20 = vadd.f32 %v15150_v29, %v20250_v50  ;;  %v9018_v53 = vmul.f32 %v15150_v29, %v15150_v29  ;;  %15166 = vmatpush3.msra.mxu0 %v20001_v52  ;;  %v12723_v32 = vld [vmem:[%s21384_s29 + $0xa8] sm:$0xff]  ;;  %v9347_v50 = vld [vmem:[%s21312_s16 + $0xd8] sm:$0xff] }
0x1c26   : > { %15167 = vmatprep.subr.mxu0 %v19999_v35  ;;  %v20375_v13 = vpop.f32.mrf.mxu1 }
0x1c27   : > { %v20381_v42 = vadd.f32 %v9018_v53, %v20252_v39  ;;  %15168 = vmatpush3.msra.mxu0 %v19999_v35  ;;  %15162 = vmatprep.mubr.msk.f32.mxu0 %vm1331_vm0, %v20375_v13  ;;  %v12724_v39 = vld [vmem:[%s21384_s29 + $0xb0] sm:$0xff] }
0x1c28   : > { %15169 = vmatprep.subr.mxu0 %v20011_v11  ;;  %15163 = vmatmul.mubr.msk.f32.gmra.mxu0 %vm1331_vm0, %v15150_v29 }
0x1c29   : > { %15170 = vmatpush3.msra.mxu0 %v20011_v11  ;;  %15183 = vmatprep.mubr.msk.f32.mxu0 %vm6604_vm3, %v12722_v63 }
0x1c2a   : > { %15171 = vmatprep.subr.mxu0 %v20005_v6 }
0x1c2b   : > { %15172 = vmatpush3.msra.mxu0 %v20005_v6 }
0x1c2c   : > { %15173 = vmatprep.subr.mxu0 %v20023_v47 }
0x1c2d   : > { %15174 = vmatpush3.msra.mxu0 %v20023_v47 }
0x1c2e   : > { %15175 = vmatprep.subr.mxu0 %v20021_v46 }
0x1c2f   : > { %15176 = vmatpush3.msra.mxu0 %v20021_v46 }
0x1c30   : > { %15177 = vmatprep.subr.mxu0 %v20033_v36 }
0x1c31   : > { %15178 = vmatpush3.msra.mxu0 %v20033_v36 }
0x1c32   : > { %15179 = vmatprep.subr.mxu0 %v20039_v5 }
0x1c33   : > { %15180 = vmatpush3.msra.mxu0 %v20039_v5 }
0x1c34   : > { %15181 = vmatprep.subr.mxu0 %v20045_v45 }
0x1c35   : > { %15182 = vmatpush3.msra.mxu0 %v20045_v45 }
0x1c36   : > { %15184 = vmatmul.mubr.msk.f32.vlgmr.msra.gmra.mxu0 %vm6604_vm3, %v12723_v32  ;;  %15227 = vmatprep.subr.mxu0 %v9347_v50 }
0x1c37   : > { %15228 = vmatpush3.msra.mxu0 %v9347_v50  ;;  %15186 = vmatprep.mubr.msk.f32.mxu0 %vm6604_vm3, %v12724_v39 }
0x1c38   : > { %15229 = vmatprep.subr.mxu0 %v9346_v23 }
0x1c39   : > { %15230 = vmatpush3.msra.mxu0 %v9346_v23 }
0x1c3a   : > { %15187 = vmatmul.mubr.msk.f32.gmra.mxu0 %vm6604_vm3, %v12725_v17  ;;  %15231 = vmatprep.subr.mxu0 %v9345_v8 }
0x1c3b   : > { %15232 = vmatpush3.msra.mxu0 %v9345_v8 }
0x1c3c   : > { %15233 = vmatprep.subr.mxu0 %v9344_v27 }
0x1c3d   : > { %15234 = vmatpush3.msra.mxu0 %v9344_v27 }
0x1c3e   : > { %15241 = vmatprep.subr.mxu0 %v20001_v52 }
0x1ce4   : > { %v15161_v61 = vpop.f32.mrf.mxu0 }
0x1ce5   : > { %v20428_v58 = vadd.f32 %v15161_v61, %v20348_v51  ;;  %v12735_v51 = vld [vmem:[%s21384_s29 + $0xc8] sm:$0xff]  ;;  %v12746_v61 = vld [vmem:[%s21384_s29 + $0xe0] sm:$0xff] }
0x1ce6   : > { %v8988_v33 = vpop.f32.mrf.mxu0 }
0x1ce7   : > { %v20431_v28 = vadd.f32 %v8988_v33, %v20350_v56  ;;  %v12736_v56 = vld [vmem:[%s21384_s29 + $0xd0] sm:$0xff]  ;;  %v12747_v33 = vld [vmem:[%s21384_s29 + $0xe8] sm:$0xff] }
0x1ce8   : > { %v15164_v4 = vpop.f32.mrf.mxu0 }
0x1ce9   : > { %v20434_v19 = vadd.f32 %v15164_v4, %v20352_v7  ;;  %v12737_v7 = vld [vmem:[%s21384_s29 + $0xd8] sm:$0xff] }
0x1cea   : > { %v8998_v41 = vpop.f32.mrf.mxu0  ;;  %v12749_v4 = vld [vmem:[%s21384_s29 + $0xf8] sm:$0xff] }
0x1ceb   : > { %v20437_v12 = vadd.f32 %v8998_v41, %v20354_v30  ;;  %v9563_v30 = vld [vmem:[%s21312_s16 + $0xe0] sm:$0xff] }
0x1cf6   : > { %v15185_v60 = vpop.f32.mrf.mxu0 }
0x1cf7   : > { %v20440_v22 = vadd.f32 %v15185_v60, %v20357_v59  ;;  %v9235_v9 = vmul.f32 %v15185_v60, %v15185_v60 }
0x1cf8   : > { %v9106_v14 = vpop.f32.mrf.mxu0 }
0x1cf9   : > { %v20443_v0 = vadd.f32 %v9235_v9, %v20360_v3  ;;  %v20446_v49 = vadd.f32 %v9106_v14, %v20363_v62  ;;  %v9234_v2 = vmul.f32 %v9106_v14, %v9106_v14  ;;  %15197 = vmatprep.mubr.msk.f32.mxu1 %vm1331_vm0, %v9106_v14 }
0x1cfa   : > { %v15188_v1 = vpop.f32.mrf.mxu0  ;;  %15198 = vmatmul.mubr.msk.f32.vlgmr.msra.gmra.mxu1 %vm1331_vm0, %v15185_v60 }
0x1cfb   : > { %v20451_v25 = vadd.f32 %v9234_v2, %v20368_v40  ;;  %v20454_v31 = vadd.f32 %v15188_v1, %v20371_v20  ;;  %v9237_v43 = vmul.f32 %v15188_v1, %v15188_v1  ;;  %15204 = vmatpush3.msra.mxu1 %v20001_v52 }
0x1cfc   : > { %15205 = vmatprep.subr.mxu1 %v19999_v35  ;;  %v20458_v16 = vpop.f32.mrf.mxu0 }
0x1cfd   : > { %v20464_v15 = vadd.f32 %v9237_v43, %v20381_v42  ;;  %15206 = vmatpush3.msra.mxu1 %v19999_v35  ;;  %15200 = vmatprep.mubr.msk.f32.mxu1 %vm1331_vm0, %v20458_v16 }
0x1cfe   : > { %15207 = vmatprep.subr.mxu1 %v20011_v11  ;;  %15201 = vmatmul.mubr.msk.f32.gmra.mxu1 %vm1331_vm0, %v15188_v1 }
0x1cff   : > { %15208 = vmatpush3.msra.mxu1 %v20011_v11  ;;  %15221 = vmatprep.mubr.msk.f32.mxu1 %vm6604_vm3, %v12734_v38 }
0x1d00   : > { %15209 = vmatprep.subr.mxu1 %v20005_v6 }
0x1d01   : > { %15210 = vmatpush3.msra.mxu1 %v20005_v6 }
0x1d02   : > { %15211 = vmatprep.subr.mxu1 %v20023_v47 }
0x1d03   : > { %15212 = vmatpush3.msra.mxu1 %v20023_v47 }
0x1d04   : > { %15213 = vmatprep.subr.mxu1 %v20021_v46 }
0x1d05   : > { %15214 = vmatpush3.msra.mxu1 %v20021_v46 }
0x1d06   : > { %15215 = vmatprep.subr.mxu1 %v20033_v36 }
0x1d07   : > { %15216 = vmatpush3.msra.mxu1 %v20033_v36 }
0x1d08   : > { %15217 = vmatprep.subr.mxu1 %v20039_v5 }
0x1d09   : > { %15218 = vmatpush3.msra.mxu1 %v20039_v5 }
0x1d0a   : > { %15219 = vmatprep.subr.mxu1 %v20045_v45 }
0x1d0b   : > { %15220 = vmatpush3.msra.mxu1 %v20045_v45 }
0x1d0c   : > { %15222 = vmatmul.mubr.msk.f32.vlgmr.msra.gmra.mxu1 %vm6604_vm3, %v12735_v51  ;;  %15265 = vmatprep.subr.mxu1 %v9566_v54 }
0x1d0d   : > { %15266 = vmatpush3.msra.mxu1 %v9566_v54  ;;  %15224 = vmatprep.mubr.msk.f32.mxu1 %vm6604_vm3, %v12736_v56 }
0x1d0e   : > { %15267 = vmatprep.subr.mxu1 %v9565_v57 }
0x1d0f   : > { %15268 = vmatpush3.msra.mxu1 %v9565_v57 }
0x1d10   : > { %15225 = vmatmul.mubr.msk.f32.gmra.mxu1 %vm6604_vm3, %v12737_v7  ;;  %15269 = vmatprep.subr.mxu1 %v9564_v18  ;;  %v12758_v7 = vld [vmem:[%s21384_s29 + $0x100] sm:$0xff] }
0x1d11   : > { %15270 = vmatpush3.msra.mxu1 %v9564_v18 }
0x1d12   : > { %15271 = vmatprep.subr.mxu1 %v9563_v30 }
0x1d13   : > { %15272 = vmatpush3.msra.mxu1 %v9563_v30 }
0x1d14   : > { %15279 = vmatprep.subr.mxu1 %v20001_v52 }
0x1dba   : > { %v15199_v37 = vpop.f32.mrf.mxu1 }
0x1dbb   : > { %v9227_v59 = vadd.f32 %v15199_v37, %v20428_v58 }
0x1dbc   : > { %v9207_v21 = vpop.f32.mrf.mxu1 }
0x1dbd   : > { %v9226_v24 = vadd.f32 %v9207_v21, %v20431_v28  ;;  %v12748_v28 = vld [vmem:[%s21384_s29 + $0xf0] sm:$0xff] }
0x1dbe   : > { %v15202_v3 = vpop.f32.mrf.mxu1 }
0x1dbf   : > { %v9229_v62 = vadd.f32 %v15202_v3, %v20434_v19 }
0x1dc0   : > { %v9217_v48 = vpop.f32.mrf.mxu1 }
0x1dc1   : > { %v9228_v29 = vadd.f32 %v9217_v48, %v20437_v12  ;;  %v8794_v48 = vadd.f32 %v20293_v26, %v20241_v55 }
0x1dcc   : > { %v15223_v40 = vpop.f32.mrf.mxu1 }
0x1dcd   : > { %v9450_v20 = vadd.f32 %v15223_v40, %v20440_v22  ;;  %v9454_v53 = vmul.f32 %v15223_v40, %v15223_v40 }
0x1dce   : > { %v9325_v63 = vpop.f32.mrf.mxu1 }
0x1dcf   : > { %v9458_v42 = vadd.f32 %v9454_v53, %v20443_v0  ;;  %v9449_v32 = vadd.f32 %v9325_v63, %v20446_v49  ;;  %v9453_v50 = vmul.f32 %v9325_v63, %v9325_v63  ;;  %15235 = vmatprep.mubr.msk.f32.mxu0 %vm1331_vm0, %v9325_v63  ;;  %v9236_v53 = vmul.f32 %v20458_v16, %v20458_v16 }
0x1dd0   : > { %v15226_v39 = vpop.f32.mrf.mxu1  ;;  %15236 = vmatmul.mubr.msk.f32.vlgmr.msra.gmra.mxu0 %vm1331_vm0, %v15223_v40  ;;  %v9013_v40 = vadd.f32 %v20375_v13, %v8794_v48 }
0x1dd1   : > { %v9457_v23 = vadd.f32 %v9453_v50, %v20451_v25  ;;  %v9452_v17 = vadd.f32 %v15226_v39, %v20454_v31  ;;  %v9456_v8 = vmul.f32 %v15226_v39, %v15226_v39  ;;  %15242 = vmatpush3.msra.mxu0 %v20001_v52 }
0x1dd2   : > { %15243 = vmatprep.subr.mxu0 %v19999_v35  ;;  %v20523_v27 = vpop.f32.mrf.mxu1 }
0x1dd3   : > { %v9460_v58 = vadd.f32 %v9456_v8, %v20464_v15  ;;  %15244 = vmatpush3.msra.mxu0 %v19999_v35  ;;  %15238 = vmatprep.mubr.msk.f32.mxu0 %vm1331_vm0, %v20523_v27  ;;  %v9455_v50 = vmul.f32 %v20523_v27, %v20523_v27 }
0x1dd4   : > { %15245 = vmatprep.subr.mxu0 %v20011_v11  ;;  %15239 = vmatmul.mubr.msk.f32.gmra.mxu0 %vm1331_vm0, %v15226_v39 }
0x1dd5   : > { %15246 = vmatpush3.msra.mxu0 %v20011_v11  ;;  %15259 = vmatprep.mubr.msk.f32.mxu0 %vm6604_vm3, %v12746_v61 }
0x1dd6   : > { %15247 = vmatprep.subr.mxu0 %v20005_v6 }
0x1dd7   : > { %15248 = vmatpush3.msra.mxu0 %v20005_v6 }
0x1dd8   : > { %15249 = vmatprep.subr.mxu0 %v20023_v47 }
0x1dd9   : > { %15250 = vmatpush3.msra.mxu0 %v20023_v47 }
0x1dda   : > { %15251 = vmatprep.subr.mxu0 %v20021_v46 }
0x1ddb   : > { %15252 = vmatpush3.msra.mxu0 %v20021_v46 }
0x1ddc   : > { %15253 = vmatprep.subr.mxu0 %v20033_v36 }
0x1ddd   : > { %15254 = vmatpush3.msra.mxu0 %v20033_v36 }
0x1dde   : > { %15255 = vmatprep.subr.mxu0 %v20039_v5 }
0x1ddf   : > { %15256 = vmatpush3.msra.mxu0 %v20039_v5 }
0x1de0   : > { %15257 = vmatprep.subr.mxu0 %v20045_v45 }
0x1de1   : > { %15258 = vmatpush3.msra.mxu0 %v20045_v45 }
0x1de2   : > { %15260 = vmatmul.mubr.msk.f32.vlgmr.msra.gmra.mxu0 %vm6604_vm3, %v12747_v33 }
0x1de3   : > { %15262 = vmatprep.mubr.msk.f32.mxu0 %vm6604_vm3, %v12748_v28 }
0x1de6   : > { %15263 = vmatmul.mubr.msk.f32.gmra.mxu0 %vm6604_vm3, %v12749_v4 }
0x1e90   : > { %v15237_v19 = vpop.f32.mrf.mxu0 }
0x1e91   : > { %v9446_v41 = vadd.f32 %v15237_v19, %v9227_v59 }
0x1e92   : > { %v9426_v12 = vpop.f32.mrf.mxu0 }
0x1e93   : > { %v9445_v60 = vadd.f32 %v9426_v12, %v9226_v24 }
0x1e94   : > { %v15240_v22 = vpop.f32.mrf.mxu0 }
0x1e95   : > { %v9448_v9 = vadd.f32 %v15240_v22, %v9229_v62  ;;  %v8798_v62 = vmul.f32 %v20293_v26, %v20293_v26 }
0x1e96   : > { %v9436_v14 = vpop.f32.mrf.mxu0 }
0x1e97   : > { %v9447_v0 = vadd.f32 %v9436_v14, %v9228_v29  ;;  %v9017_v29 = vmul.f32 %v20375_v13, %v20375_v13 }
0x1ea2   : > { %v15261_v49 = vpop.f32.mrf.mxu0 }
0x1ea3   : > { %v20560_v2 = vadd.f32 %v15261_v49, %v9450_v20  ;;  %v9673_v1 = vmul.f32 %v15261_v49, %v15261_v49  ;;  %v8802_v20 = vadd.f32 %v8798_v62, %v20254_v34 }
0x1ea4   : > { %v9544_v25 = vpop.f32.mrf.mxu0 }
0x1ea5   : > { %v20562_v31 = vadd.f32 %v9673_v1, %v9458_v42  ;;  %v20564_v43 = vadd.f32 %v9544_v25, %v9449_v32  ;;  %v9672_v38 = vmul.f32 %v9544_v25, %v9544_v25  ;;  %15273 = vmatprep.mubr.msk.f32.mxu1 %vm1331_vm0, %v9544_v25  ;;  %v9232_v42 = vadd.f32 %v20458_v16, %v9013_v40 }
0x1ea6   : > { %v15264_v15 = vpop.f32.mrf.mxu0  ;;  %15274 = vmatmul.mubr.msk.f32.vlgmr.msra.gmra.mxu1 %vm1331_vm0, %v15261_v49  ;;  %v9021_v32 = vadd.f32 %v9017_v29, %v8802_v20 }
0x1ea7   : > { %v20568_v51 = vadd.f32 %v9672_v38, %v9457_v23  ;;  %v20570_v54 = vadd.f32 %v15264_v15, %v9452_v17  ;;  %v9675_v56 = vmul.f32 %v15264_v15, %v15264_v15  ;;  %15280 = vmatpush3.msra.mxu1 %v20001_v52  ;;  %v12760_v52 = vld [vmem:[%s21384_s29 + $0x110] sm:$0xff]  ;;  %v9451_v55 = vadd.f32 %v20523_v27, %v9232_v42 }
0x1ea8   : > { %15281 = vmatprep.subr.mxu1 %v19999_v35  ;;  %v20574_v57 = vpop.f32.mrf.mxu0  ;;  %v9240_v26 = vadd.f32 %v9236_v53, %v9021_v32 }
0x1ea9   : > { %v20579_v18 = vadd.f32 %v9675_v56, %v9460_v58  ;;  %15282 = vmatpush3.msra.mxu1 %v19999_v35  ;;  %15276 = vmatprep.mubr.msk.f32.mxu1 %vm1331_vm0, %v20574_v57  ;;  %v12759_v35 = vld [vmem:[%s21384_s29 + $0x108] sm:$0xff]  ;;  %v9670_v34 = vadd.f32 %v20574_v57, %v9451_v55  ;;  %v9674_v13 = vmul.f32 %v20574_v57, %v20574_v57 }
0x1eaa   : > { %15283 = vmatprep.subr.mxu1 %v20011_v11  ;;  %15277 = vmatmul.mubr.msk.f32.gmra.mxu1 %vm1331_vm0, %v15264_v15  ;;  %v9459_v8 = vadd.f32 %v9455_v50, %v9240_v26 }
0x1eab   : > { %15284 = vmatpush3.msra.mxu1 %v20011_v11  ;;  %15297 = vmatprep.mubr.msk.f32.mxu1 %vm6604_vm3, %v12758_v7  ;;  %v9785_v11 = vld [vmem:[%s21312_s16 + $0x118] sm:$0xff] }
0x1eac   : > { %15285 = vmatprep.subr.mxu1 %v20005_v6  ;;  %15303 = vmatprep.subr.mxu0 %v9785_v11  ;;  %v9678_v4 = vadd.f32 %v9674_v13, %v9459_v8 }
0x1ead   : > { %15286 = vmatpush3.msra.mxu1 %v20005_v6  ;;  %v12761_v6 = vld [vmem:[%s21384_s29 + $0x118] sm:$0xff]  ;;  %15304 = vmatpush3.msra.mxu0 %v9785_v11 }
0x1eae   : > { %15287 = vmatprep.subr.mxu1 %v20023_v47 }
0x1eaf   : > { %15288 = vmatpush3.msra.mxu1 %v20023_v47  ;;  %v9783_v47 = vld [vmem:[%s21312_s16 + $0x108] sm:$0xff] }
0x1eb0   : > { %15289 = vmatprep.subr.mxu1 %v20021_v46 }
0x1eb1   : > { %15290 = vmatpush3.msra.mxu1 %v20021_v46  ;;  %v9784_v46 = vld [vmem:[%s21312_s16 + $0x110] sm:$0xff] }
0x1eb2   : > { %15291 = vmatprep.subr.mxu1 %v20033_v36  ;;  %15305 = vmatprep.subr.mxu0 %v9784_v46 }
0x1eb3   : > { %15292 = vmatpush3.msra.mxu1 %v20033_v36  ;;  %15306 = vmatpush3.msra.mxu0 %v9784_v46  ;;  %v9782_v36 = vld [vmem:[%s21312_s16 + $0x100] sm:$0xff] }
0x1eb4   : > { %15293 = vmatprep.subr.mxu1 %v20039_v5  ;;  %15307 = vmatprep.subr.mxu0 %v9783_v47 }
0x1eb5   : > { %15294 = vmatpush3.msra.mxu1 %v20039_v5  ;;  %15308 = vmatpush3.msra.mxu0 %v9783_v47 }
0x1eb6   : > { %15295 = vmatprep.subr.mxu1 %v20045_v45  ;;  %15309 = vmatprep.subr.mxu0 %v9782_v36 }
0x1eb7   : > { %15296 = vmatpush3.msra.mxu1 %v20045_v45  ;;  %15310 = vmatpush3.msra.mxu0 %v9782_v36 }
0x1eb8   : > { %15298 = vmatmul.mubr.msk.f32.vlgmr.msra.gmra.mxu1 %vm6604_vm3, %v12759_v35 }
0x1eb9   : > { %15300 = vmatprep.mubr.msk.f32.mxu1 %vm6604_vm3, %v12760_v52 }
0x1ebc   : > { %15301 = vmatmul.mubr.msk.f32.gmra.mxu1 %vm6604_vm3, %v12761_v6 }
0x1f66   : > { %v15275_v5 = vpop.f32.mrf.mxu1 }
0x1f67   : > { %v20624_v45 = vadd.f32 %v15275_v5, %v9446_v41 }
0x1f68   : > { %v9645_v30 = vpop.f32.mrf.mxu1 }
0x1f69   : > { %v20626_v37 = vadd.f32 %v9645_v30, %v9445_v60 }
0x1f6a   : > { %v15278_v59 = vpop.f32.mrf.mxu1 }
0x1f6b   : > { %v20628_v21 = vadd.f32 %v15278_v59, %v9448_v9 }
0x1f6c   : > { %v9655_v24 = vpop.f32.mrf.mxu1 }
0x1f6d   : > { %v20630_v3 = vadd.f32 %v9655_v24, %v9447_v0 }
0x1f78   : > { %v15299_v63 = vpop.f32.mrf.mxu1 }
0x1f79   : > { %v9888_v19 = vadd.f32 %v15299_v63, %v20560_v2  ;;  %v9892_v12 = vmul.f32 %v15299_v63, %v15299_v63 }
0x1f7a   : > { %v9763_v39 = vpop.f32.mrf.mxu1 }
0x1f7b   : > { %15311 = vmatprep.mubr.msk.f32.mxu0 %vm1331_vm0, %v9763_v39  ;;  %v9887_v9 = vadd.f32 %v9763_v39, %v20564_v43  ;;  %v9902_v14 = vsel %vm1331_vm0, %v9888_v19, 0.0  ;;  %v9891_v0 = vmul.f32 %v9763_v39, %v9763_v39  ;;  %v9896_v1 = vadd.f32 %v9892_v12, %v20562_v31 }
0x1f7c   : > { %v15302_v23 = vpop.f32.mrf.mxu1  ;;  %15312 = vmatmul.mubr.msk.f32.vlgmr.msra.gmra.mxu0 %vm1331_vm0, %v15299_v63 }
0x1f7d   : > { %v9890_v16 = vadd.f32 %v15302_v23, %v20570_v54  ;;  %v9894_v17 = vmul.f32 %v15302_v23, %v15302_v23  ;;  %v9899_v2 = vsel %vm1331_vm0, %v9887_v9, 0.0  ;;  %v9918_v25 = vsel %vm1331_vm0, %v9896_v1, 0.0 }
0x1f7e   : > { %v9773_v61 = vpop.f32.mrf.mxu1  ;;  %v9895_v38 = vadd.f32 %v9891_v0, %v20568_v51 }
0x1f7f   : > { %v9889_v58 = vadd.f32 %v9773_v61, %v9670_v34  ;;  %v9893_v33 = vmul.f32 %v9773_v61, %v9773_v61  ;;  %15314 = vmatprep.mubr.msk.f32.mxu0 %vm1331_vm0, %v9773_v61  ;;  %v9908_v27 = vsel %vm1331_vm0, %v9890_v16, 0.0  ;;  %v9898_v28 = vadd.f32 %v9894_v17, %v20579_v18  ;;  %v12770_v34 = vld [vmem:[%s21313_s17] ss:$0 sm:$0xff] }
0x1f80   : > { %9909 = vadd.xlane.f32.xlu0 %v9908_v27  ;;  %15315 = vmatmul.mubr.msk.f32.gmra.mxu0 %vm1331_vm0, %v15302_v23  ;;  %v9915_v15 = vsel %vm1331_vm0, %v9895_v38, 0.0 }
0x1f81   : > { %v9924_v41 = vsel %vm1331_vm0, %v9898_v28, 0.0  ;;  %v9905_v60 = vsel %vm1331_vm0, %v9889_v58, 0.0  ;;  %v9897_v22 = vadd.f32 %v9893_v33, %v9678_v4 }
0x1f82   : > { %9925 = vadd.xlane.f32.xlu1 %v9924_v41 }
0x1f83   : > { %v9921_v49 = vsel %vm1331_vm0, %v9897_v22, 0.0 }
0x1f84   : > { %9906 = vadd.xlane.f32.xlu0 %v9905_v60 }
0x1f86   : > { %9903 = vadd.xlane.f32.xlu1 %v9902_v14 }
0x1f88   : > { %9922 = vadd.xlane.f32.xlu0 %v9921_v49 }
0x1f8a   : > { %9900 = vadd.xlane.f32.xlu1 %v9899_v2 }
0x1f8c   : > { %9919 = vadd.xlane.f32.xlu0 %v9918_v25 }
0x1f90   : > { %9916 = vadd.xlane.f32.xlu0 %v9915_v15 }
0x2009   : > { %v9910_v43 = vpop.xlane.xlu0 %9909 }
0x200a   : > { %v9914_v52 = vmul.f32 0.0034722222, %v9910_v43 }
0x200b   : > { %v9926_v56 = vpop.xlane.xlu1 %9925 }
0x200c   : > { %v9934_v47 = vmul.f32 %v9914_v52, %v9914_v52  ;;  %v9930_v36 = vmul.f32 0.0034722222, %v9926_v56  ;;  %v9959_v58 = vmul.f32 %v12770_v34, %v9914_v52  ;;  %v9977_v52 = vld [vmem:[%s21386_s7] sm:$0xff] }
0x200d   : > { %v9907_v54 = vpop.xlane.xlu0 %9906 }
0x200e   : > { %v9913_v46 = vmul.f32 0.0034722222, %v9907_v54  ;;  %v9938_v48 = vsub.f32 %v9930_v36, %v9934_v47 }
0x200f   : > { %v9904_v7 = vpop.xlane.xlu1 %9903 }
0x2010   : > { %v9912_v5 = vmul.f32 0.0034722222, %v9904_v7  ;;  %v9933_v62 = vmul.f32 %v9913_v46, %v9913_v46  ;;  %v9942_v63 = vmax.f32 %v9938_v48, 0.0  ;;  %v9958_v19 = vmul.f32 %v12770_v34, %v9913_v46  ;;  %v9980_v46 = vld [vmem:[%s21386_s7 + $0x18] sm:$0xff] }
0x2011   : > { %v9923_v57 = vpop.xlane.xlu0 %9922 }
0x2012   : > { %v9929_v30 = vmul.f32 0.0034722222, %v9923_v57  ;;  %v9932_v29 = vmul.f32 %v9912_v5, %v9912_v5  ;;  %v9946_v39 = vadd.f32 1e-05, %v9942_v63  ;;  %v9957_v33 = vmul.f32 %v12770_v34, %v9912_v5 }
0x2013   : > { %v9901_v35 = vpop.xlane.xlu1 %9900 }
0x2014   : > { %v9911_v6 = vmul.f32 0.0034722222, %v9901_v35  ;;  %v9937_v40 = vsub.f32 %v9929_v30, %v9933_v62  ;;  %v9978_v35 = vld [vmem:[%s21386_s7 + $0x8] sm:$0xff] }
0x2015   : > { %v9920_v18 = vpop.xlane.xlu0 %9919 }
0x2016   : > { %v9931_v51 = vmul.f32 %v9911_v6, %v9911_v6  ;;  %v9928_v59 = vmul.f32 0.0034722222, %v9920_v18  ;;  %v9941_v42 = vmax.f32 %v9937_v40, 0.0  ;;  %v9956_v16 = vmul.f32 %v12770_v34, %v9911_v6 }
0x2018   : > { %v9936_v20 = vsub.f32 %v9928_v59, %v9932_v29  ;;  %v9945_v55 = vadd.f32 1e-05, %v9941_v42 }
0x2019   : > { %v9917_v31 = vpop.xlane.xlu0 %9916 }
0x201a   : > { %v9927_v11 = vmul.f32 0.0034722222, %v9917_v31  ;;  %v9940_v32 = vmax.f32 %v9936_v20, 0.0 }
0x201c   : > { %v9935_v24 = vsub.f32 %v9927_v11, %v9931_v51  ;;  %v9944_v26 = vadd.f32 1e-05, %v9940_v32 }
0x201e   : > { %v9939_v53 = vmax.f32 %v9935_v24, 0.0  ;;  %v9979_v24 = vld [vmem:[%s21386_s7 + $0x10] sm:$0xff] }
0x2020   : > { %v9943_v50 = vadd.f32 1e-05, %v9939_v53 }
0x2022   : > { %15805 = vrsqrt.f32 %v9943_v50 }
0x2023   : > { %15807 = vrsqrt.f32 %v9946_v39 }
0x2024   : > { %15809 = vrsqrt.f32 %v9945_v55 }
0x2025   : > { %15811 = vrsqrt.f32 %v9944_v26 }
0x202f   : > { %v15806_v4 = vpop.eup %15805 }
0x2030   : > { %v15808_v14 = vpop.eup %15807 }
0x203c   : > { %v15313_v23 = vpop.f32.mrf.mxu0 }
0x203d   : > { %v9884_v17 = vadd.f32 %v15313_v23, %v20624_v45  ;;  %v12771_v45 = vld [vmem:[%s21313_s17 + $0x1] ss:$0 sm:$0xff] }
0x203e   : > { %v9864_v13 = vpop.f32.mrf.mxu0 }
0x203f   : > { %v9883_v8 = vadd.f32 %v9864_v13, %v20626_v37  ;;  %v9961_v12 = vsub.f32 %v9884_v17, %v9957_v33  ;;  %v15810_v37 = vpop.eup %15809 }
0x2040   : > { %v15316_v61 = vpop.f32.mrf.mxu0  ;;  %v15812_v2 = vpop.eup %15811 }
0x2041   : > { %v9960_v27 = vsub.f32 %v9883_v8, %v9956_v16  ;;  %v9886_v28 = vadd.f32 %v15316_v61, %v20628_v21  ;;  %v9965_v21 = vmul.f32 %v15812_v2, %v9961_v12 }
0x2042   : > { %v9874_v41 = vpop.f32.mrf.mxu0 }
0x2043   : > { %v9964_v60 = vmul.f32 %v15806_v4, %v9960_v27  ;;  %v9963_v22 = vsub.f32 %v9886_v28, %v9959_v58  ;;  %v9885_v9 = vadd.f32 %v9874_v41, %v20630_v3  ;;  %v20687_v3 = vadd.f32 %v12771_v45, %v9965_v21  ;;  %v10261_v41 = vld [vmem:[%s21314_s18 + $0x10] sm:$0xff] }
0x2045   : > { %v20677_v0 = vadd.f32 %v12771_v45, %v9964_v60  ;;  %v9967_v49 = vmul.f32 %v15808_v14, %v9963_v22  ;;  %v9962_v1 = vsub.f32 %v9885_v9, %v9958_v19  ;;  %v10262_v19 = vld [vmem:[%s21314_s18 + $0x18] sm:$0xff]  ;;  %v10260_v14 = vld [vmem:[%s21314_s18 + $0x8] sm:$0xff] }
0x2047   : > { %v20679_v25 = vadd.f32 %v12771_v45, %v9967_v49  ;;  %v9966_v38 = vmul.f32 %v15810_v37, %v9962_v1  ;;  %15325 = vmatprep.mubr.msk.f32.mxu0 %vm1331_vm0, %v20677_v0 }
0x2049   : > { %v20683_v15 = vadd.f32 %v12771_v45, %v9966_v38  ;;  %9991 = vrot.lane.b32.xlu1 %v20679_v25, %s15862_s4  ;;  %v10259_v45 = vld [vmem:[%s21314_s18] sm:$0xff] }
0x204b   : > { %9989 = vrot.lane.b32.xlu0 %v20683_v15, %s15862_s4 }
0x204d   : > { %9987 = vrot.lane.b32.xlu1 %v20687_v3, %s15862_s4 }
0x2051   : > { %9985 = vrot.lane.b32.xlu1 %v20677_v0, %s15862_s4 }
0x2055   : > { %10124 = vrot.lane.b32.xlu1 %v20679_v25, %s21385_s6 }
0x20bb   : > { %v9992_v43 = vpop.permute.xlu1 %9991 }
0x20bc   : > { %15317 = vmatprep.subr.msk.mxu0 %vm1331_vm0, %v9992_v43 }
0x20bd   : > { %15318 = vmatpush3.xpose.msk.msra.mxu0 %vm1331_vm0, %v9992_v43  ;;  %v9990_v54 = vpop.permute.xlu0 %9989 }
0x20be   : > { %15319 = vmatprep.subr.msk.mxu0 %vm1331_vm0, %v9990_v54 }
0x20bf   : > { %v9988_v56 = vpop.permute.xlu1 %9987 }
0x20c1   : > { %15320 = vmatpush3.xpose.msk.msra.mxu0 %vm1331_vm0, %v9990_v54 }
0x20c2   : > { %15321 = vmatprep.subr.msk.mxu0 %vm1331_vm0, %v9988_v56 }
0x20c3   : > { %v9986_v57 = vpop.permute.xlu1 %9985 }
0x20c5   : > { %15322 = vmatpush3.xpose.msk.msra.mxu0 %vm1331_vm0, %v9988_v56 }
0x20c6   : > { %15323 = vmatprep.subr.msk.mxu0 %vm1331_vm0, %v9986_v57 }
0x20c7   : > { %v10125_v7 = vpop.permute.xlu1 %10124 }
0x20c8   : > { %v10133_v18 = vsel %vm1331_vm0, %v10125_v7, 1.0 }
0x20c9   : > { %15324 = vmatpush3.xpose.msk.msra.mxu0 %vm1331_vm0, %v9986_v57  ;;  %15331 = vmatprep.subr.mxu1 %v10133_v18 }
0x20ca   : > { %15332 = vmatpush3.msra.mxu1 %v10133_v18 }
0x20cc   : > { %15326 = vmatmul.mubr.msk.f32.vlgmr.msra.gmra.mxu0 %vm1331_vm0, %v20687_v3 }
0x20cd   : > { %15328 = vmatprep.mubr.msk.f32.mxu0 %vm1331_vm0, %v20683_v15 }
0x20d0   : > { %15329 = vmatmul.mubr.msk.f32.gmra.mxu0 %vm1331_vm0, %v20679_v25 }
0x218c   : > { %v15327_v31 = vpop.f32.mrf.mxu0 }
0x218d   : > { %v10081_v6 = vadd.f32 %v15327_v31, %v9978_v35  ;;  %v12784_v35 = vld [vmem:[%s21315_s19] ss:$0 sm:$0xff] }
0x218e   : > { %v10075_v11 = vpop.f32.mrf.mxu0 }
0x218f   : > { %v10076_v47 = vadd.f32 %v10075_v11, %v9977_v52  ;;  %v10097_v36 = vsel %vm1331_vm0, %v10081_v6, -inf }
0x2190   : > { %10098 = vmax.xlane.f32.xlu1 %v10097_v36  ;;  %v15330_v5 = vpop.f32.mrf.mxu0 }
0x2191   : > { %v10091_v51 = vadd.f32 %v15330_v5, %v9980_v46  ;;  %v10094_v30 = vsel %vm1331_vm0, %v10076_v47, -inf }
0x2192   : > { %v10085_v59 = vpop.f32.mrf.mxu0  ;;  %10095 = vmax.xlane.f32.xlu0 %v10094_v30 }
0x2193   : > { %v10086_v62 = vadd.f32 %v10085_v59, %v9979_v24  ;;  %v10103_v48 = vsel %vm1331_vm0, %v10091_v51, -inf }
0x2195   : > { %v10100_v29 = vsel %vm1331_vm0, %v10086_v62, -inf }
0x2196   : > { %10104 = vmax.xlane.f32.xlu0 %v10103_v48 }
0x219a   : > { %10101 = vmax.xlane.f32.xlu0 %v10100_v29 }
0x21a1   : > { %10120 = vrot.lane.b32.xlu1 %v20687_v3, %s21385_s6 }
0x21a5   : > { %10118 = vrot.lane.b32.xlu1 %v20677_v0, %s21385_s6 }
0x21b0   : > { %10122 = vrot.lane.b32.xlu0 %v20683_v15, %s21385_s6 }
0x2219   : > { %v10099_v40 = vpop.xlane.xlu1 %10098 }
0x221a   : > { %v10107_v20 = vsub.f32 %v10081_v6, %v10099_v40 }
0x221b   : > { %v10096_v53 = vpop.xlane.xlu0 %10095 }
0x221c   : > { %v10106_v63 = vsub.f32 %v10076_v47, %v10096_v53  ;;  %v10112_v42 = vmul.f32 1.442695, %v10107_v20 }
0x221d   : > { %v10121_v55 = vpop.permute.xlu1 %10120 }
0x221e   : > { %v10110_v32 = vmul.f32 1.442695, %v10106_v63  ;;  %v10131_v61 = vsel %vm1331_vm0, %v10121_v55, 1.0 }
0x221f   : > { %v10105_v50 = vpop.xlane.xlu0 %10104 }
0x2220   : > { %15813 = vpow2.f32 %v10110_v32  ;;  %v10109_v39 = vsub.f32 %v10091_v51, %v10105_v50 }
0x2221   : > { %15815 = vpow2.f32 %v10112_v42  ;;  %v10119_v8 = vpop.permute.xlu1 %10118 }
0x2222   : > { %v10116_v34 = vmul.f32 1.442695, %v10109_v39  ;;  %v10130_v58 = vsel %vm1331_vm0, %v10119_v8, 1.0 }
0x2223   : > { %v10102_v26 = vpop.xlane.xlu0 %10101 }
0x2224   : > { %v10108_v23 = vsub.f32 %v10086_v62, %v10102_v26 }
0x2226   : > { %v10114_v13 = vmul.f32 1.442695, %v10108_v23 }
0x2227   : > { %v10123_v16 = vpop.permute.xlu0 %10122 }
0x2228   : > { %15817 = vpow2.f32 %v10114_v13  ;;  %v10132_v17 = vsel %vm1331_vm0, %v10123_v16, 1.0 }
0x2229   : > { %15819 = vpow2.f32 %v10116_v34  ;;  %15333 = vmatprep.subr.mxu1 %v10132_v17 }
0x222a   : > { %15334 = vmatpush3.msra.mxu1 %v10132_v17 }
0x222b   : > { %15335 = vmatprep.subr.mxu1 %v10131_v61 }
0x222c   : > { %15336 = vmatpush3.msra.mxu1 %v10131_v61 }
0x222d   : > { %v15814_v33 = vpop.eup %15813  ;;  %15337 = vmatprep.subr.mxu1 %v10130_v58 }
0x222e   : > { %v15816_v27 = vpop.eup %15815  ;;  %15338 = vmatpush3.msra.mxu1 %v10130_v58  ;;  %15339 = vmatprep.mubr.msk.f32.mxu1 %vm1331_vm0, %v15814_v33 }
0x222f   : > { %15340 = vmatmul.mubr.msk.f32.vlgmr.msra.gmra.mxu1 %vm1331_vm0, %v15816_v27  ;;  %15345 = vmatprep.subr.mxu1 %v10262_v19 }
0x2230   : > { %15346 = vmatpush3.msra.mxu1 %v10262_v19 }
0x2231   : > { %15347 = vmatprep.subr.mxu1 %v10261_v41 }
0x2232   : > { %15348 = vmatpush3.msra.mxu1 %v10261_v41 }
0x2233   : > { %15349 = vmatprep.subr.mxu1 %v10260_v14 }
0x2234   : > { %15350 = vmatpush3.msra.mxu1 %v10260_v14  ;;  %v12789_v14 = vld [vmem:[%s21315_s19 + $0x1] ss:$0 sm:$0xff] }
0x2235   : > { %v15818_v28 = vpop.eup %15817  ;;  %15351 = vmatprep.subr.mxu1 %v10259_v45 }
0x2236   : > { %v15820_v4 = vpop.eup %15819  ;;  %15342 = vmatprep.mubr.msk.f32.mxu1 %vm1331_vm0, %v15818_v28  ;;  %15352 = vmatpush3.msra.mxu1 %v10259_v45 }
0x2237   : > { %15343 = vmatmul.mubr.msk.f32.gmra.mxu1 %vm1331_vm0, %v15820_v4 }
0x22ef   : > { %v15341_v12 = vpop.f32.mrf.mxu1 }
0x22f0   : > { %15821 = vrcp.f32 %v15341_v12 }
0x22f1   : > { %v10212_v60 = vpop.f32.mrf.mxu1 }
0x22f2   : > { %15823 = vrcp.f32 %v10212_v60 }
0x22f7   : > { %v15344_v22 = vpop.f32.mrf.mxu1 }
0x22f8   : > { %15825 = vrcp.f32 %v15344_v22 }
0x22f9   : > { %v10222_v9 = vpop.f32.mrf.mxu1 }
0x22fa   : > { %15827 = vrcp.f32 %v10222_v9 }
0x22fd   : > { %v15822_v37 = vpop.eup %15821 }
0x22fe   : > { %10242 = vperm.xlu1 %15503, %v15822_v37   ;;  %v12790_v37 = vld [vmem:[%s21315_s19 + $0x2] ss:$0 sm:$0xff] }
0x22ff   : > { %v15824_v49 = vpop.eup %15823 }
0x2300   : > { %10237 = vperm.xlu0 %15504, %v15824_v49   ;;  %v10498_v49 = vld [vmem:[%s21314_s18 + $0x38] sm:$0xff] }
0x2301   : > { %15359 = vmatprep.subr.mxu0 %v10498_v49 }
0x2302   : > { %15360 = vmatpush3.msra.mxu0 %v10498_v49 }
0x2305   : > { %v15826_v1 = vpop.eup %15825 }
0x2306   : > { %10252 = vperm.xlu1 %15503, %v15826_v1   ;;  %v10497_v1 = vld [vmem:[%s21314_s18 + $0x30] sm:$0xff] }
0x2307   : > { %v15828_v2 = vpop.eup %15827  ;;  %15361 = vmatprep.subr.mxu0 %v10497_v1 }
0x2308   : > { %10247 = vperm.xlu0 %15504, %v15828_v2   ;;  %15362 = vmatpush3.msra.mxu0 %v10497_v1 }
0x2379   : > { %v10243_v21 = vpop.permute.xlu1 %10242 }
0x237a   : > { %v10256_v54 = vmul.f32 %v15341_v12, %v10243_v21 }
0x237b   : > { %v10238_v38 = vpop.permute.xlu0 %10237 }
0x237c   : > { %v10255_v43 = vmul.f32 %v10238_v38, %v10212_v60 }
0x237e   : > { %15353 = vmatprep.mubr.msk.f32.mxu1 %vm1331_vm0, %v10255_v43 }
0x237f   : > { %15354 = vmatmul.mubr.msk.f32.vlgmr.msra.gmra.mxu1 %vm1331_vm0, %v10256_v54 }
0x2381   : > { %v10253_v56 = vpop.permute.xlu1 %10252 }
0x2382   : > { %v10258_v18 = vmul.f32 %v15344_v22, %v10253_v56 }
0x2383   : > { %v10248_v57 = vpop.permute.xlu0 %10247 }
0x2384   : > { %v10257_v7 = vmul.f32 %v10248_v57, %v10222_v9  ;;  %v10496_v57 = vld [vmem:[%s21314_s18 + $0x28] sm:$0xff] }
0x2385   : > { %15363 = vmatprep.subr.mxu0 %v10496_v57 }
0x2386   : > { %15356 = vmatprep.mubr.msk.f32.mxu1 %vm1331_vm0, %v10257_v7  ;;  %15364 = vmatpush3.msra.mxu0 %v10496_v57 }
0x2387   : > { %15357 = vmatmul.mubr.msk.f32.gmra.mxu1 %vm1331_vm0, %v10258_v18  ;;  %v10495_v18 = vld [vmem:[%s21314_s18 + $0x20] sm:$0xff] }
0x2388   : > { %15365 = vmatprep.subr.mxu0 %v10495_v18 }
0x2389   : > { %15366 = vmatpush3.msra.mxu0 %v10495_v18 }
0x238a   : > { %15387 = vmatprep.subr.mxu0 %v15866_v10 }
0x243f   : > { %v15355_v31 = vpop.f32.mrf.mxu1 }
0x2440   : > { %v10352_v52 = vadd.f32 %v15355_v31, %v12784_v35 }
0x2441   : > { %v10346_v6 = vpop.f32.mrf.mxu1 }
0x2442   : > { %v10347_v11 = vadd.f32 %v12784_v35, %v10346_v6  ;;  %10371 = vrot.lane.b32.xlu1 %v10352_v52, %s21385_s6 }
0x2444   : > { %10369 = vrot.lane.b32.xlu0 %v10347_v11, %s21385_s6 }
0x2447   : > { %v15358_v46 = vpop.f32.mrf.mxu1 }
0x2448   : > { %v10362_v47 = vadd.f32 %v15358_v46, %v12784_v35 }
0x2449   : > { %v10356_v36 = vpop.f32.mrf.mxu1 }
0x244a   : > { %v10357_v5 = vadd.f32 %v12784_v35, %v10356_v36  ;;  %10375 = vrot.lane.b32.xlu1 %v10362_v47, %s21385_s6 }
0x244c   : > { %10373 = vrot.lane.b32.xlu0 %v10357_v5, %s21385_s6 }
0x24b4   : > { %v10372_v51 = vpop.permute.xlu1 %10371 }
0x24b5   : > { %v20765_v30 = vadd.f32 %v10372_v51, %v20687_v3 }
0x24b6   : > { %v10370_v59 = vpop.permute.xlu0 %10369 }
0x24b7   : > { %v20768_v24 = vadd.f32 %v10370_v59, %v20677_v0  ;;  %10393 = vrot.lane.b32.xlu1 %v20765_v30, %s21385_s6 }
0x24b9   : > { %10391 = vrot.lane.b32.xlu0 %v20768_v24, %s21385_s6 }
0x24bc   : > { %v10376_v62 = vpop.permute.xlu1 %10375 }
0x24bd   : > { %v20775_v48 = vadd.f32 %v10376_v62, %v20679_v25 }
0x24be   : > { %v10374_v29 = vpop.permute.xlu0 %10373 }
0x24bf   : > { %v20778_v40 = vadd.f32 %v10374_v29, %v20683_v15  ;;  %10397 = vrot.lane.b32.xlu1 %v20775_v48, %s21385_s6 }
0x24c1   : > { %10395 = vrot.lane.b32.xlu0 %v20778_v40, %s21385_s6 }
0x2529   : > { %v10394_v0 = vpop.permute.xlu1 %10393 }
0x252a   : > { %v10406_v3 = vsel %vm1331_vm0, %v10394_v0, 0.0 }
0x252b   : > { %10407 = vadd.xlane.f32.xlu1 %v10406_v3  ;;  %v10392_v20 = vpop.permute.xlu0 %10391 }
0x252c   : > { %v10403_v53 = vsel %vm1331_vm0, %v10392_v20, 0.0 }
0x252d   : > { %10404 = vadd.xlane.f32.xlu0 %v10403_v53 }
0x2531   : > { %v10398_v42 = vpop.permute.xlu1 %10397 }
0x2532   : > { %v10412_v15 = vsel %vm1331_vm0, %v10398_v42, 0.0 }
0x2533   : > { %v10396_v25 = vpop.permute.xlu0 %10395 }
0x2534   : > { %v10409_v63 = vsel %vm1331_vm0, %v10396_v25, 0.0 }
0x2535   : > { %10410 = vadd.xlane.f32.xlu0 %v10409_v63 }
0x2539   : > { %10413 = vadd.xlane.f32.xlu0 %v10412_v15 }
0x25b4   : > { %v10408_v32 = vpop.xlane.xlu1 %10407 }
0x25b5   : > { %v10416_v50 = vmul.f32 0.03125, %v10408_v32 }
0x25b6   : > { %v10405_v39 = vpop.xlane.xlu0 %10404 }
0x25b7   : > { %v20789_v55 = vsub.f32 %v20765_v30, %v10416_v50  ;;  %v10415_v26 = vmul.f32 0.03125, %v10405_v39 }
0x25b9   : > { %v10424_v23 = vmul.f32 %v20789_v55, %v20789_v55  ;;  %v10419_v34 = vsub.f32 %v20768_v24, %v10415_v26 }
0x25bb   : > { %v10423_v13 = vmul.f32 %v10419_v34, %v10419_v34  ;;  %10433 = vrot.lane.b32.xlu0 %v10424_v23, %s21385_s6 }
0x25bd   : > { %10431 = vrot.lane.b32.xlu1 %v10423_v13, %s21385_s6  ;;  %v10719_v13 = vld [vmem:[%s21314_s18 + $0x50] sm:$0xff] }
0x25be   : > { %v10411_v16 = vpop.xlane.xlu0 %10410 }
0x25bf   : > { %v10417_v17 = vmul.f32 0.03125, %v10411_v16  ;;  %v10718_v16 = vld [vmem:[%s21314_s18 + $0x48] sm:$0xff] }
0x25c1   : > { %v20797_v8 = vsub.f32 %v20778_v40, %v10417_v17  ;;  %v10717_v17 = vld [vmem:[%s21314_s18 + $0x40] sm:$0xff] }
0x25c2   : > { %v10414_v61 = vpop.xlane.xlu0 %10413 }
0x25c3   : > { %v10425_v58 = vmul.f32 %v20797_v8, %v20797_v8  ;;  %v10418_v33 = vmul.f32 0.03125, %v10414_v61 }
0x25c5   : > { %v10422_v27 = vsub.f32 %v20775_v48, %v10418_v33  ;;  %10435 = vrot.lane.b32.xlu1 %v10425_v58, %s21385_s6 }
0x25c7   : > { %v10426_v28 = vmul.f32 %v10422_v27, %v10422_v27 }
0x25c9   : > { %10437 = vrot.lane.b32.xlu1 %v10426_v28, %s21385_s6 }
0x262d   : > { %v10434_v4 = vpop.permute.xlu0 %10433 }
0x262e   : > { %v10446_v19 = vsel %vm1331_vm0, %v10434_v4, 0.0 }
0x262f   : > { %v10432_v41 = vpop.permute.xlu1 %10431  ;;  %10447 = vadd.xlane.f32.xlu1 %v10446_v19 }
0x2630   : > { %v10443_v12 = vsel %vm1331_vm0, %v10432_v41, 0.0 }
0x2631   : > { %10444 = vadd.xlane.f32.xlu0 %v10443_v12 }
0x2637   : > { %v10436_v60 = vpop.permute.xlu1 %10435 }
0x2638   : > { %v10449_v45 = vsel %vm1331_vm0, %v10436_v60, 0.0 }
0x263b   : > { %v10438_v22 = vpop.permute.xlu1 %10437 }
0x263c   : > { %v10452_v9 = vsel %vm1331_vm0, %v10438_v22, 0.0 }
0x263d   : > { %10453 = vadd.xlane.f32.xlu0 %v10452_v9 }
0x2640   : > { %10476 = vrot.lane.b32.xlu1 %v12789_v14, %s21385_s6 }
0x2641   : > { %10450 = vadd.xlane.f32.xlu0 %v10449_v45 }
0x2657   : > { %10488 = vrot.lane.b32.xlu0 %v12790_v37, %s21385_s6 }
0x26b8   : > { %v10448_v2 = vpop.xlane.xlu1 %10447 }
0x26b9   : > { %v10456_v21 = vmul.f32 0.03125, %v10448_v2 }
0x26ba   : > { %v10445_v38 = vpop.xlane.xlu0 %10444 }
0x26bb   : > { %v10460_v43 = vadd.f32 1e-05, %v10456_v21  ;;  %v10455_v54 = vmul.f32 0.03125, %v10445_v38 }
0x26bc   : > { %v10477_v51 = vpop.permute.xlu1 %10476 }
0x26bd   : > { %15829 = vrsqrt.f32 %v10460_v43  ;;  %v10459_v56 = vadd.f32 1e-05, %v10455_v54 }
0x26bf   : > { %15831 = vrsqrt.f32 %v10459_v56 }
0x26c6   : > { %v10454_v7 = vpop.xlane.xlu0 %10453 }
0x26c7   : > { %v10458_v35 = vmul.f32 0.03125, %v10454_v7 }
0x26c9   : > { %v10462_v31 = vadd.f32 1e-05, %v10458_v35 }
0x26ca   : > { %v15830_v52 = vpop.eup %15829  ;;  %v10451_v6 = vpop.xlane.xlu0 %10450 }
0x26cb   : > { %15833 = vrsqrt.f32 %v10462_v31  ;;  %v10457_v11 = vmul.f32 0.03125, %v10451_v6  ;;  %v10468_v36 = vmul.f32 %v15830_v52, %v20789_v55 }
0x26cc   : > { %v15832_v46 = vpop.eup %15831 }
0x26cd   : > { %v10461_v47 = vadd.f32 1e-05, %v10457_v11  ;;  %v10467_v5 = vmul.f32 %v15832_v46, %v10419_v34  ;;  %v10480_v29 = vmul.f32 %v10477_v51, %v10468_v36  ;;  %v10720_v34 = vld [vmem:[%s21314_s18 + $0x58] sm:$0xff] }
0x26ce   : > { %v10489_v62 = vpop.permute.xlu0 %10488  ;;  %15373 = vmatprep.subr.mxu1 %v10720_v34 }
0x26cf   : > { %15835 = vrsqrt.f32 %v10461_v47  ;;  %v10479_v59 = vmul.f32 %v10477_v51, %v10467_v5  ;;  %v10492_v3 = vadd.f32 %v10489_v62, %v10480_v29  ;;  %15374 = vmatpush3.msra.mxu1 %v10720_v34 }
0x26d0   : > { %15375 = vmatprep.subr.mxu1 %v10719_v13 }
0x26d1   : > { %v10491_v0 = vadd.f32 %v10489_v62, %v10479_v59  ;;  %15376 = vmatpush3.msra.mxu1 %v10719_v13 }
0x26d2   : > { %15377 = vmatprep.subr.mxu1 %v10718_v16 }
0x26d3   : > { %10508 = vrot.lane.b32.xlu1 %v10491_v0, %s21385_s6  ;;  %15378 = vmatpush3.msra.mxu1 %v10718_v16 }
0x26d4   : > { %15379 = vmatprep.subr.mxu1 %v10717_v17 }
0x26d5   : > { %15380 = vmatpush3.msra.mxu1 %v10717_v17 }
0x26d6   : > { %15398 = vmatprep.subr.mxu1 %v15866_v10 }
0x26d7   : > { %10510 = vrot.lane.b32.xlu1 %v10492_v3, %s21385_s6 }
0x26d8   : > { %v15834_v20 = vpop.eup %15833 }
0x26d9   : > { %v10470_v53 = vmul.f32 %v15834_v20, %v10422_v27 }
0x26db   : > { %v10482_v25 = vmul.f32 %v10477_v51, %v10470_v53 }
0x26dc   : > { %v15836_v63 = vpop.eup %15835 }
0x26dd   : > { %v10469_v42 = vmul.f32 %v15836_v63, %v20797_v8  ;;  %v10494_v15 = vadd.f32 %v10489_v62, %v10482_v25  ;;  %v12791_v8 = vld [vmem:[%s21315_s19 + $0x3] ss:$0 sm:$0xff] }
0x26df   : > { %v10481_v32 = vmul.f32 %v10477_v51, %v10469_v42  ;;  %10514 = vrot.lane.b32.xlu1 %v10494_v15, %s21385_s6 }
0x26e1   : > { %v10493_v50 = vadd.f32 %v10489_v62, %v10481_v32 }
0x26e3   : > { %10512 = vrot.lane.b32.xlu0 %v10493_v50, %s21385_s6 }
0x2745   : > { %v10509_v39 = vpop.permute.xlu1 %10508 }
0x2746   : > { %15367 = vmatprep.mubr.msk.f32.mxu0 %vm1331_vm0, %v10509_v39 }
0x2749   : > { %v10511_v55 = vpop.permute.xlu1 %10510 }
0x274a   : > { %15368 = vmatmul.mubr.msk.f32.vlgmr.msra.gmra.mxu0 %vm1331_vm0, %v10511_v55 }
0x2751   : > { %v10515_v23 = vpop.permute.xlu1 %10514 }
0x2755   : > { %v10513_v26 = vpop.permute.xlu0 %10512 }
0x2756   : > { %15370 = vmatprep.mubr.msk.f32.mxu0 %vm1331_vm0, %v10513_v26 }
0x2757   : > { %15371 = vmatmul.mubr.msk.f32.gmra.mxu0 %vm1331_vm0, %v10515_v23 }
0x2758   : > { %15395 = vmatprep.mubr.msk.f32.mxu0 %vm15867_vm2, %v15866_v10 }
0x280a   : > { %v15369_v61 = vpop.f32.mrf.mxu0 }
0x280b   : > { %v20857_v58 = vadd.f32 %v15369_v61, %v12791_v8 }
0x280c   : > { %v10590_v33 = vpop.f32.mrf.mxu0 }
0x280d   : > { %v20860_v27 = vmul.f32 0.70710677, %v20857_v58  ;;  %v20862_v28 = vadd.f32 %v12791_v8, %v10590_v33 }
0x280f   : > { %v10626_v4 = vand.u32 2147483647, %v20860_v27  ;;  %v20866_v19 = vmul.f32 0.70710677, %v20862_v28  ;;  %vm10618_vm13 = vcmp.ge.f32.partialorder %v20860_v27, 0.0 }
0x2811   : > { %v10630_v41 = vmul.f32 0.3275911, %v10626_v4  ;;  %v10625_v12 = vand.u32 2147483647, %v20866_v19  ;;  %v10682_v2 = vsub.f32 0.0, %v10626_v4  ;;  %vm10617_vm14 = vcmp.ge.f32.partialorder %v20866_v19, 0.0 }
0x2812   : > { %v10621_v27 = vsel %vm10617_vm14, 1.0, %v21376_v44 }
0x2813   : > { %v10634_v60 = vadd.f32 1.0, %v10630_v41  ;;  %v10629_v22 = vmul.f32 0.3275911, %v10625_v12  ;;  %v10681_v43 = vsub.f32 0.0, %v10625_v12  ;;  %v10686_v57 = vmul.f32 %v10682_v2, %v10626_v4 }
0x2815   : > { %15837 = vrcp.f32 %v10634_v60  ;;  %v10633_v9 = vadd.f32 1.0, %v10629_v22  ;;  %v10685_v31 = vmul.f32 %v10681_v43, %v10625_v12  ;;  %v10691_v11 = vmul.f32 1.442695, %v10686_v57 }
0x2817   : > { %v15372_v14 = vpop.f32.mrf.mxu0  ;;  %15839 = vrcp.f32 %v10633_v9  ;;  %v10689_v5 = vmul.f32 1.442695, %v10685_v31 }
0x2818   : > { %v20869_v45 = vadd.f32 %v15372_v14, %v12791_v8 }
0x2819   : > { %v10600_v37 = vpop.f32.mrf.mxu0 }
0x281a   : > { %v20872_v49 = vmul.f32 0.70710677, %v20869_v45  ;;  %v20874_v1 = vadd.f32 %v12791_v8, %v10600_v37 }
0x281c   : > { %v10628_v21 = vand.u32 2147483647, %v20872_v49  ;;  %v20878_v38 = vmul.f32 0.70710677, %v20874_v1  ;;  %vm10620_vm15 = vcmp.ge.f32.partialorder %v20872_v49, 0.0  ;;  %v10611_v49 = vmul.f32 0.5, %v20874_v1 }
0x281e   : > { %v10632_v54 = vmul.f32 0.3275911, %v10628_v21  ;;  %v10627_v56 = vand.u32 2147483647, %v20878_v38  ;;  %v10684_v62 = vsub.f32 0.0, %v10628_v21  ;;  %vm10619_vm1 = vcmp.ge.f32.partialorder %v20878_v38, 0.0 }
0x2820   : > { %v10636_v7 = vadd.f32 1.0, %v10632_v54  ;;  %v10631_v18 = vmul.f32 0.3275911, %v10627_v56  ;;  %v10683_v20 = vsub.f32 0.0, %v10627_v56  ;;  %v10688_v25 = vmul.f32 %v10684_v62, %v10628_v21 }
0x2821   : > { %v10622_v21 = vsel %vm10618_vm13, 1.0, %v21376_v44 }
0x2822   : > { %v15838_v35 = vpop.eup %15837  ;;  %15841 = vrcp.f32 %v10636_v7  ;;  %v10635_v52 = vadd.f32 1.0, %v10631_v18  ;;  %v10687_v50 = vmul.f32 %v10683_v20, %v10627_v56  ;;  %v10695_v26 = vmul.f32 1.442695, %v10688_v25 }
0x2823   : > { %v10646_v6 = vmul.f32 1.0614054, %v15838_v35  ;;  %v10624_v25 = vsel %vm10620_vm15, 1.0, %v21376_v44 }
0x2824   : > { %v15840_v46 = vpop.eup %15839  ;;  %15843 = vrcp.f32 %v10635_v52  ;;  %v10693_v61 = vmul.f32 1.442695, %v10687_v50 }
0x2825   : > { %v10650_v47 = vadd.f32 -1.4531521, %v10646_v6  ;;  %v10645_v36 = vmul.f32 1.0614054, %v15840_v46  ;;  %15845 = vpow2.f32 %v10691_v11 }
0x2826   : > { %15847 = vpow2.f32 %v10689_v5  ;;  %v10610_v5 = vmul.f32 0.5, %v20857_v58 }
0x2827   : > { %v10654_v51 = vmul.f32 %v15838_v35, %v10650_v47  ;;  %v10649_v59 = vadd.f32 -1.4531521, %v10645_v36  ;;  %15849 = vpow2.f32 %v10695_v26 }
0x2828   : > { %15851 = vpow2.f32 %v10693_v61 }
0x2829   : > { %v10658_v29 = vadd.f32 1.4214138, %v10654_v51  ;;  %v10653_v0 = vmul.f32 %v15840_v46, %v10649_v59 }
0x282b   : > { %v10662_v3 = vmul.f32 %v15838_v35, %v10658_v29  ;;  %v10657_v53 = vadd.f32 1.4214138, %v10653_v0 }
0x282d   : > { %v10666_v63 = vadd.f32 -0.28449672, %v10662_v3  ;;  %v10661_v42 = vmul.f32 %v15840_v46, %v10657_v53 }
0x282f   : > { %v15842_v15 = vpop.eup %15841  ;;  %v10670_v32 = vmul.f32 %v15838_v35, %v10666_v63  ;;  %v10665_v39 = vadd.f32 -0.28449672, %v10661_v42 }
0x2830   : > { %v10648_v55 = vmul.f32 1.0614054, %v15842_v15 }
0x2831   : > { %v10674_v23 = vadd.f32 0.2548296, %v10670_v32  ;;  %v15844_v34 = vpop.eup %15843  ;;  %v10669_v13 = vmul.f32 %v15840_v46, %v10665_v39 }
0x2832   : > { %v10652_v16 = vadd.f32 -1.4531521, %v10648_v55  ;;  %v10647_v8 = vmul.f32 1.0614054, %v15844_v34  ;;  %v15846_v33 = vpop.eup %15845  ;;  %v10612_v55 = vmul.f32 0.5, %v20869_v45 }
0x2833   : > { %v10678_v17 = vmul.f32 %v15838_v35, %v10674_v23  ;;  %v10673_v4 = vadd.f32 0.2548296, %v10669_v13  ;;  %v15848_v14 = vpop.eup %15847 }
0x2834   : > { %v10656_v41 = vmul.f32 %v15842_v15, %v10652_v16  ;;  %v10651_v60 = vadd.f32 -1.4531521, %v10647_v8  ;;  %v15850_v62 = vpop.eup %15849 }
0x2835   : > { %v10698_v12 = vmul.f32 %v15846_v33, %v10678_v17  ;;  %v10677_v22 = vmul.f32 %v15840_v46, %v10673_v4  ;;  %v10609_v46 = vmul.f32 0.5, %v20862_v28  ;;  %v15852_v53 = vpop.eup %15851 }
0x2836   : > { %v10660_v9 = vadd.f32 1.4214138, %v10656_v41  ;;  %v10655_v2 = vmul.f32 %v15844_v34, %v10651_v60 }
0x2837   : > { %v10702_v37 = vsub.f32 1.0, %v10698_v12  ;;  %v10697_v43 = vmul.f32 %v15848_v14, %v10677_v22 }
0x2838   : > { %v10664_v54 = vmul.f32 %v15842_v15, %v10660_v9  ;;  %v10659_v57 = vadd.f32 1.4214138, %v10655_v2  ;;  %v11023_v2 = vld [vmem:[%s21316_s20 + $0x78] sm:$0xff] }
0x2839   : > { %v10706_v56 = vmul.f32 %v10702_v37, %v10622_v21  ;;  %v10701_v7 = vsub.f32 1.0, %v10697_v43  ;;  %v11022_v21 = vld [vmem:[%s21316_s20 + $0x70] sm:$0xff]  ;;  %v11021_v43 = vld [vmem:[%s21316_s20 + $0x68] sm:$0xff] }
0x283a   : > { %v10668_v18 = vadd.f32 -0.28449672, %v10664_v54  ;;  %v10663_v35 = vmul.f32 %v15844_v34, %v10659_v57  ;;  %v11020_v54 = vld [vmem:[%s21316_s20 + $0x60] sm:$0xff]  ;;  %v11018_v57 = vld [vmem:[%s21316_s20 + $0x50] sm:$0xff] }
0x283b   : > { %v10705_v31 = vmul.f32 %v10701_v7, %v10621_v27  ;;  %v10710_v6 = vadd.f32 1.0, %v10706_v56  ;;  %v11019_v56 = vld [vmem:[%s21316_s20 + $0x58] sm:$0xff]  ;;  %v11017_v7 = vld [vmem:[%s21316_s20 + $0x48] sm:$0xff] }
0x283c   : > { %v10672_v52 = vmul.f32 %v15842_v15, %v10668_v18  ;;  %v10667_v11 = vadd.f32 -0.28449672, %v10663_v35  ;;  %v11016_v18 = vld [vmem:[%s21316_s20 + $0x40] sm:$0xff]  ;;  %v10940_v27 = vld [vmem:[%s21316_s20 + $0x38] sm:$0xff]  ;;  %v10939_v35 = vld [vmem:[%s21316_s20 + $0x30] sm:$0xff] }
0x283d   : > { %v10709_v47 = vadd.f32 1.0, %v10705_v31  ;;  %v10714_v29 = vmul.f32 %v10710_v6, %v10610_v5  ;;  %v10938_v31 = vld [vmem:[%s21316_s20 + $0x28] sm:$0xff]  ;;  %v10936_v6 = vld [vmem:[%s21316_s20 + $0x18] sm:$0xff] }
0x283e   : > { %v10676_v36 = vadd.f32 0.2548296, %v10672_v52  ;;  %v10671_v19 = vmul.f32 %v15844_v34, %v10667_v11  ;;  %v10937_v52 = vld [vmem:[%s21316_s20 + $0x20] sm:$0xff]  ;;  %v10935_v11 = vld [vmem:[%s21316_s20 + $0x10] sm:$0xff] }
0x283f   : > { %v10713_v51 = vmul.f32 %v10709_v47, %v10609_v46  ;;  %v10934_v46 = vld [vmem:[%s21316_s20 + $0x8] sm:$0xff]  ;;  %v10933_v47 = vld [vmem:[%s21316_s20] sm:$0xff] }
0x2840   : > { %v10680_v59 = vmul.f32 %v15842_v15, %v10676_v36  ;;  %v10675_v0 = vadd.f32 0.2548296, %v10671_v19  ;;  %v10623_v15 = vsel %vm10619_vm1, 1.0, %v21376_v44  ;;  %v12796_v44 = vld [vmem:[%s21315_s19 + $0x4] ss:$0 sm:$0xff]  ;;  %v11254_v36 = vld [vmem:[%s21316_s20 + $0xb8] sm:$0xff] }
0x2841   : > { %15381 = vmatprep.mubr.msk.f32.mxu1 %vm1331_vm0, %v10713_v51  ;;  %v11253_v51 = vld [vmem:[%s21316_s20 + $0xb0] sm:$0xff] }
0x2842   : > { %v10700_v3 = vmul.f32 %v15850_v62, %v10680_v59  ;;  %v10679_v20 = vmul.f32 %v15844_v34, %v10675_v0  ;;  %15382 = vmatmul.mubr.msk.f32.vlgmr.msra.gmra.mxu1 %vm1331_vm0, %v10714_v29  ;;  %v11252_v59 = vld [vmem:[%s21316_s20 + $0xa8] sm:$0xff]  ;;  %v12806_v0 = vld [vmem:[%s21387_s26 + $0x10] sm:$0xff] }
0x2844   : > { %v10704_v28 = vsub.f32 1.0, %v10700_v3  ;;  %v10699_v58 = vmul.f32 %v15852_v53, %v10679_v20  ;;  %v12809_v3 = vld [vmem:[%s21387_s26 + $0x18] sm:$0xff]  ;;  %v12812_v20 = vld [vmem:[%s21387_s26 + $0x20] sm:$0xff]  ;;  %v12815_v53 = vld [vmem:[%s21387_s26 + $0x28] sm:$0xff] }
0x2846   : > { %v10708_v63 = vmul.f32 %v10704_v28, %v10624_v25  ;;  %v10703_v42 = vsub.f32 1.0, %v10699_v58  ;;  %v12818_v28 = vld [vmem:[%s21387_s26 + $0x30] sm:$0xff]  ;;  %v12821_v25 = vld [vmem:[%s21387_s26 + $0x38] sm:$0xff]  ;;  %v12824_v58 = vld [vmem:[%s21387_s26 + $0x40] sm:$0xff] }
0x2848   : > { %v10707_v32 = vmul.f32 %v10703_v42, %v10623_v15  ;;  %v10712_v50 = vadd.f32 1.0, %v10708_v63  ;;  %v11251_v63 = vld [vmem:[%s21316_s20 + $0xa0] sm:$0xff]  ;;  %v11250_v42 = vld [vmem:[%s21316_s20 + $0x98] sm:$0xff]  ;;  %v11249_v15 = vld [vmem:[%s21316_s20 + $0x90] sm:$0xff] }
0x284a   : > { %v10711_v39 = vadd.f32 1.0, %v10707_v32  ;;  %v10716_v23 = vmul.f32 %v10712_v50, %v10612_v55  ;;  %v11248_v32 = vld [vmem:[%s21316_s20 + $0x88] sm:$0xff]  ;;  %v11247_v50 = vld [vmem:[%s21316_s20 + $0x80] sm:$0xff] }
0x284c   : > { %v10715_v26 = vmul.f32 %v10711_v39, %v10611_v49  ;;  %v11413_v49 = vld [vmem:[%s21316_s20 + $0xf8] sm:$0xff] }
0x284e   : > { %15384 = vmatprep.mubr.msk.f32.mxu1 %vm1331_vm0, %v10715_v26  ;;  %v11412_v26 = vld [vmem:[%s21316_s20 + $0xf0] sm:$0xff] }
0x284f   : > { %15385 = vmatmul.mubr.msk.f32.gmra.mxu1 %vm1331_vm0, %v10716_v23 }
0x2850   : > { %15406 = vmatprep.mubr.msk.f32.mxu1 %vm15867_vm2, %v15866_v10 }
0x2902   : > { %v15383_v38 = vpop.f32.mrf.mxu1 }
0x2903   : > { %v10810_v45 = vadd.f32 %v15383_v38, %v12796_v44  ;;  %v11411_v38 = vld [vmem:[%s21316_s20 + $0xe8] sm:$0xff] }
0x2904   : > { %v10804_v34 = vpop.f32.mrf.mxu1 }
0x2905   : > { %v10805_v8 = vadd.f32 %v12796_v44, %v10804_v34  ;;  %v11410_v34 = vld [vmem:[%s21316_s20 + $0xe0] sm:$0xff] }
0x290f   : > { %v15386_v13 = vpop.f32.mrf.mxu1 }
0x2910   : > { %v10820_v1 = vadd.f32 %v15386_v13, %v12796_v44 }
0x2911   : > { %v10814_v16 = vpop.f32.mrf.mxu1 }
0x2912   : > { %v10815_v17 = vadd.f32 %v12796_v44, %v10814_v16  ;;  %10833 = vrot.lane.b32.xlu0 %v10820_v1, %s21385_s6  ;;  %v11409_v44 = vld [vmem:[%s21316_s20 + $0xd8] sm:$0xff]  ;;  %v11408_v1 = vld [vmem:[%s21316_s20 + $0xd0] sm:$0xff]  ;;  %v11407_v16 = vld [vmem:[%s21316_s20 + $0xc8] sm:$0xff] }
0x2914   : > { %10831 = vrot.lane.b32.xlu1 %v10815_v17, %s21385_s6  ;;  %v11406_v17 = vld [vmem:[%s21316_s20 + $0xc0] sm:$0xff] }
0x2916   : > { %10829 = vrot.lane.b32.xlu0 %v10810_v45, %s21385_s6  ;;  %v11572_v45 = vld [vmem:[%s21316_s20 + $0x138] sm:$0xff] }
0x2918   : > { %10827 = vrot.lane.b32.xlu1 %v10805_v8, %s21385_s6  ;;  %v11571_v8 = vld [vmem:[%s21316_s20 + $0x130] sm:$0xff] }
0x2984   : > { %v10834_v61 = vpop.permute.xlu0 %10833 }
0x2985   : > { %v10842_v33 = vadd.f32 %v10834_v61, %v20775_v48  ;;  %v12802_v48 = vld [vmem:[%s21387_s26 + $0x8] sm:$0xff] }
0x2986   : > { %v10832_v4 = vpop.permute.xlu1 %10831 }
0x2987   : > { %v10841_v41 = vadd.f32 %v10832_v4, %v20778_v40  ;;  %10854 = vrot.lane.b32.xlu0 %v10842_v33, %s21385_s6  ;;  %v10843_v40 = vld [vmem:[%s21387_s26] sm:$0xff]  ;;  %v11570_v33 = vld [vmem:[%s21316_s20 + $0x128] sm:$0xff] }
0x2988   : > { %v10830_v12 = vpop.permute.xlu0 %10829  ;;  %v11569_v4 = vld [vmem:[%s21316_s20 + $0x120] sm:$0xff] }
0x2989   : > { %v10840_v60 = vadd.f32 %v10830_v12, %v20765_v30  ;;  %10852 = vrot.lane.b32.xlu1 %v10841_v41, %s21385_s6  ;;  %v11568_v41 = vld [vmem:[%s21316_s20 + $0x118] sm:$0xff] }
0x298a   : > { %v10828_v22 = vpop.permute.xlu1 %10827 }
0x298b   : > { %v10839_v9 = vadd.f32 %v10828_v22, %v20768_v24  ;;  %10850 = vrot.lane.b32.xlu0 %v10840_v60, %s21385_s6  ;;  %v11567_v60 = vld [vmem:[%s21316_s20 + $0x110] sm:$0xff]  ;;  %v11566_v22 = vld [vmem:[%s21316_s20 + $0x108] sm:$0xff] }
0x298d   : > { %10848 = vrot.lane.b32.xlu1 %v10839_v9, %s21385_s6  ;;  %v11565_v9 = vld [vmem:[%s21316_s20 + $0x100] sm:$0xff]  ;;  %s12830_s6 = sshll.u32 %s21392_s28, 4 }
0x298e   : > { %s683_s1 = scalar_lea.vmem %s21318_s22, %s12830_s6 }
0x29f9   : > { %v20914_v14 = vpop.permute.xlu0 %10854 }
0x29fa   : > { %15388 = vmatpush3.msra.mxu0 %v20914_v14  ;;  %15399 = vmatpush3.msra.mxu1 %v20914_v14 }
0x29fb   : > { %15389 = vmatprep.subr.mxu0 %v15866_v10  ;;  %15400 = vmatprep.subr.mxu1 %v15866_v10  ;;  %v20920_v30 = vpop.permute.xlu1 %10852 }
0x29fc   : > { %15390 = vmatpush3.msra.mxu0 %v20920_v30  ;;  %15401 = vmatpush3.msra.mxu1 %v20920_v30 }
0x29fd   : > { %v20924_v24 = vpop.permute.xlu0 %10850  ;;  %15391 = vmatprep.subr.mxu0 %v15866_v10  ;;  %15402 = vmatprep.subr.mxu1 %v15866_v10 }
0x29fe   : > { %15392 = vmatpush3.msra.mxu0 %v20924_v24  ;;  %15403 = vmatpush3.msra.mxu1 %v20924_v24 }
0x29ff   : > { %15393 = vmatprep.subr.mxu0 %v15866_v10  ;;  %15404 = vmatprep.subr.mxu1 %v15866_v10  ;;  %v20938_v37 = vpop.permute.xlu1 %10848 }
0x2a00   : > { %15394 = vmatpush3.msra.mxu0 %v20938_v37  ;;  %15405 = vmatpush3.msra.mxu1 %v20938_v37 }
0x2a01   : > { %15407 = vmatmul.mubr.msk.f32.vlgmr.msra.gmra.mxu1 %vm1331_vm0, %v12802_v48  ;;  %15396 = vmatmul.mubr.msk.f32.vlgmr.msra.gmra.mxu0 %vm1331_vm0, %v10843_v40  ;;  %v11729_v48 = vld [vmem:[%s21316_s20 + $0x168] sm:$0xff]  ;;  %v11728_v40 = vld [vmem:[%s21316_s20 + $0x160] sm:$0xff] }
0x2a02   : > { %11051 = vmatprep.subr.mxu0 %v11023_v2  ;;  %11091 = vmatprep.mubr.f32.mxu0 %v15866_v10 }
0x2a03   : > { %11052 = vmatpush1.msra.mxu0 %v11022_v21  ;;  %11165 = vmatprep.mubr.f32.mxu1 %v15866_v10  ;;  %v11726_v21 = vld [vmem:[%s21316_s20 + $0x150] sm:$0xff] }
0x2a04   : > { %11053 = vmatprep.subr.mxu0 %v11021_v43  ;;  %11125 = vmatprep.subr.mxu1 %v10940_v27  ;;  %v11725_v43 = vld [vmem:[%s21316_s20 + $0x148] sm:$0xff]  ;;  %v11887_v27 = vld [vmem:[%s21316_s20 + $0x1a0] sm:$0xff] }
0x2a05   : > { %11054 = vmatpush1.msra.mxu0 %v11020_v54  ;;  %11126 = vmatpush1.msra.mxu1 %v10939_v35  ;;  %v11724_v54 = vld [vmem:[%s21316_s20 + $0x140] sm:$0xff]  ;;  %v11886_v35 = vld [vmem:[%s21316_s20 + $0x198] sm:$0xff] }
0x2a06   : > { %11055 = vmatprep.subr.mxu0 %v11019_v56  ;;  %11127 = vmatprep.subr.mxu1 %v10938_v31  ;;  %v11890_v56 = vld [vmem:[%s21316_s20 + $0x1b8] sm:$0xff] }
0x2a07   : > { %11056 = vmatpush1.msra.mxu0 %v11018_v57  ;;  %11128 = vmatpush1.msra.mxu1 %v10937_v52  ;;  %v11889_v57 = vld [vmem:[%s21316_s20 + $0x1b0] sm:$0xff] }
0x2a08   : > { %11057 = vmatprep.subr.mxu0 %v11017_v7  ;;  %11129 = vmatprep.subr.mxu1 %v10936_v6  ;;  %v11885_v52 = vld [vmem:[%s21316_s20 + $0x190] sm:$0xff]  ;;  %v11884_v6 = vld [vmem:[%s21316_s20 + $0x188] sm:$0xff] }
0x2a09   : > { %11058 = vmatpush1.msra.mxu0 %v11016_v18  ;;  %11130 = vmatpush1.msra.mxu1 %v10935_v11  ;;  %v11888_v18 = vld [vmem:[%s21316_s20 + $0x1a8] sm:$0xff]  ;;  %v11883_v11 = vld [vmem:[%s21316_s20 + $0x180] sm:$0xff] }
0x2a0a   : > { %15409 = vmatprep.subr.mxu0 %v15866_v10  ;;  %11131 = vmatprep.subr.mxu1 %v10934_v46  ;;  %v12049_v46 = vld [vmem:[%s21316_s20 + $0x1f8] sm:$0xff] }
0x2a0b   : > { %11132 = vmatpush1.msra.mxu1 %v10933_v47  ;;  %v12048_v47 = vld [vmem:[%s21316_s20 + $0x1f0] sm:$0xff] }
0x2a0c   : > { %11282 = vmatprep.subr.mxu1 %v11254_v36 }
0x2ac1   : > { %v11012_v5 = vpop.f32.mrf.mxu1  ;;  %v10929_v19 = vpop.f32.mrf.mxu0 }
0x2ac2   : > { %12804 = vmatmul.mubr.msk.f32.vlgmr.msra.gmra.mxu0 %vm1331_vm0, %v11012_v5  ;;  %12805 = vmatmul.mubr.msk.f32.vlgmr.msra.gmra.mxu1 %vm1331_vm0, %v10929_v19  ;;  %v12047_v5 = vld [vmem:[%s21316_s20 + $0x1e8] sm:$0xff]  ;;  %v12046_v19 = vld [vmem:[%s21316_s20 + $0x1e0] sm:$0xff] }
0x2ac3   : > { %15410 = vmatpush3.msra.mxu0 %v20914_v14  ;;  %15417 = vmatprep.mubr.msk.f32.mxu0 %vm15867_vm2, %v15866_v10  ;;  %v15408_v62 = vpop.f32.mrf.mxu1  ;;  %v15397_v29 = vpop.f32.mrf.mxu0 }
0x2ac4   : > { %15411 = vmatprep.subr.mxu0 %v15866_v10  ;;  %11283 = vmatpush1.msra.mxu1 %v11253_v51  ;;  %v12045_v51 = vld [vmem:[%s21316_s20 + $0x1d8] sm:$0xff]  ;;  %v12044_v62 = vld [vmem:[%s21316_s20 + $0x1d0] sm:$0xff]  ;;  %v12043_v29 = vld [vmem:[%s21316_s20 + $0x1c8] sm:$0xff] }
0x2ac5   : > { %15412 = vmatpush3.msra.mxu0 %v20920_v30  ;;  %11284 = vmatprep.subr.mxu1 %v11252_v59 }
0x2ac6   : > { %15413 = vmatprep.subr.mxu0 %v15866_v10  ;;  %11322 = vmatprep.mubr.f32.mxu1 %v15866_v10 }
0x2ac7   : > { %15414 = vmatpush3.msra.mxu0 %v20924_v24  ;;  %11285 = vmatpush1.msra.mxu1 %v11251_v63 }
0x2ac8   : > { %15415 = vmatprep.subr.mxu0 %v15866_v10  ;;  %11286 = vmatprep.subr.mxu1 %v11250_v42  ;;  %v12203_v42 = vld [vmem:[%s21316_s20 + $0x210] sm:$0xff] }
0x2ac9   : > { %15416 = vmatpush3.msra.mxu0 %v20938_v37  ;;  %11287 = vmatpush1.msra.mxu1 %v11249_v15  ;;  %v12202_v15 = vld [vmem:[%s21316_s20 + $0x208] sm:$0xff] }
0x2aca   : > { %15418 = vmatmul.mubr.msk.f32.vlgmr.msra.gmra.mxu0 %vm1331_vm0, %v12806_v0  ;;  %15420 = vmatprep.subr.mxu0 %v15866_v10  ;;  %v12042_v0 = vld [vmem:[%s21316_s20 + $0x1c0] sm:$0xff] }
0x2acb   : > { %15421 = vmatpush3.msra.mxu0 %v20914_v14  ;;  %15428 = vmatprep.mubr.msk.f32.mxu0 %vm15867_vm2, %v15866_v10 }
0x2acc   : > { %15422 = vmatprep.subr.mxu0 %v15866_v10  ;;  %11288 = vmatprep.subr.mxu1 %v11248_v32  ;;  %v12201_v32 = vld [vmem:[%s21316_s20 + $0x200] sm:$0xff] }
0x2acd   : > { %15423 = vmatpush3.msra.mxu0 %v20920_v30  ;;  %11289 = vmatpush1.msra.mxu1 %v11247_v50 }
0x2ace   : > { %15424 = vmatprep.subr.mxu0 %v15866_v10  ;;  %11441 = vmatprep.subr.mxu1 %v11413_v49 }
0x2acf   : > { %15425 = vmatpush3.msra.mxu0 %v20924_v24 }
0x2ad0   : > { %15426 = vmatprep.subr.mxu0 %v15866_v10 }
0x2ad1   : > { %15427 = vmatpush3.msra.mxu0 %v20938_v37 }
0x2ad2   : > { %15429 = vmatmul.mubr.msk.f32.vlgmr.msra.gmra.mxu0 %vm1331_vm0, %v12809_v3  ;;  %15431 = vmatprep.subr.mxu0 %v15866_v10  ;;  %v12208_v3 = vld [vmem:[%s21316_s20 + $0x238] sm:$0xff] }
0x2ad3   : > { %15432 = vmatpush3.msra.mxu0 %v20914_v14  ;;  %15439 = vmatprep.mubr.msk.f32.mxu0 %vm15867_vm2, %v15866_v10 }
0x2ad4   : > { %15433 = vmatprep.subr.mxu0 %v15866_v10 }
0x2ad5   : > { %15434 = vmatpush3.msra.mxu0 %v20920_v30 }
0x2ad6   : > { %15435 = vmatprep.subr.mxu0 %v15866_v10 }
0x2ad7   : > { %15436 = vmatpush3.msra.mxu0 %v20924_v24 }
0x2ad8   : > { %15437 = vmatprep.subr.mxu0 %v15866_v10 }
0x2ad9   : > { %15438 = vmatpush3.msra.mxu0 %v20938_v37 }
0x2ada   : > { %15440 = vmatmul.mubr.msk.f32.vlgmr.msra.gmra.mxu0 %vm1331_vm0, %v12812_v20  ;;  %15442 = vmatprep.subr.mxu0 %v15866_v10  ;;  %v12207_v20 = vld [vmem:[%s21316_s20 + $0x230] sm:$0xff] }
0x2adb   : > { %15443 = vmatpush3.msra.mxu0 %v20914_v14  ;;  %15450 = vmatprep.mubr.msk.f32.mxu0 %vm15867_vm2, %v15866_v10 }
0x2adc   : > { %15444 = vmatprep.subr.mxu0 %v15866_v10 }
0x2add   : > { %15445 = vmatpush3.msra.mxu0 %v20920_v30 }
0x2ade   : > { %15446 = vmatprep.subr.mxu0 %v15866_v10 }
0x2adf   : > { %15447 = vmatpush3.msra.mxu0 %v20924_v24 }
0x2ae0   : > { %15448 = vmatprep.subr.mxu0 %v15866_v10 }
0x2ae1   : > { %15449 = vmatpush3.msra.mxu0 %v20938_v37 }
0x2ae2   : > { %15451 = vmatmul.mubr.msk.f32.vlgmr.msra.gmra.mxu0 %vm1331_vm0, %v12815_v53  ;;  %15453 = vmatprep.subr.mxu0 %v15866_v10 }
0x2ae3   : > { %15454 = vmatpush3.msra.mxu0 %v20914_v14  ;;  %15461 = vmatprep.mubr.msk.f32.mxu0 %vm15867_vm2, %v15866_v10 }
0x2ae4   : > { %15455 = vmatprep.subr.mxu0 %v15866_v10 }
0x2ae5   : > { %15456 = vmatpush3.msra.mxu0 %v20920_v30 }
0x2ae6   : > { %15457 = vmatprep.subr.mxu0 %v15866_v10 }
0x2ae7   : > { %15458 = vmatpush3.msra.mxu0 %v20924_v24 }
0x2ae8   : > { %15459 = vmatprep.subr.mxu0 %v15866_v10 }
0x2ae9   : > { %15460 = vmatpush3.msra.mxu0 %v20938_v37 }
0x2aea   : > { %15462 = vmatmul.mubr.msk.f32.vlgmr.msra.gmra.mxu0 %vm1331_vm0, %v12818_v28  ;;  %15464 = vmatprep.subr.mxu0 %v15866_v10  ;;  %v12206_v28 = vld [vmem:[%s21316_s20 + $0x228] sm:$0xff] }
0x2aeb   : > { %15465 = vmatpush3.msra.mxu0 %v20914_v14  ;;  %15472 = vmatprep.mubr.msk.f32.mxu0 %vm15867_vm2, %v15866_v10 }
0x2aec   : > { %15466 = vmatprep.subr.mxu0 %v15866_v10 }
0x2aed   : > { %15467 = vmatpush3.msra.mxu0 %v20920_v30 }
0x2aee   : > { %15468 = vmatprep.subr.mxu0 %v15866_v10 }
0x2aef   : > { %15469 = vmatpush3.msra.mxu0 %v20924_v24 }
0x2af0   : > { %15470 = vmatprep.subr.mxu0 %v15866_v10 }
0x2af1   : > { %15471 = vmatpush3.msra.mxu0 %v20938_v37 }
0x2af2   : > { %15473 = vmatmul.mubr.msk.f32.vlgmr.msra.gmra.mxu0 %vm1331_vm0, %v12821_v25  ;;  %15475 = vmatprep.subr.mxu0 %v15866_v10  ;;  %v12205_v25 = vld [vmem:[%s21316_s20 + $0x220] sm:$0xff] }
0x2af3   : > { %15476 = vmatpush3.msra.mxu0 %v20914_v14  ;;  %15483 = vmatprep.mubr.msk.f32.mxu0 %vm15867_vm2, %v15866_v10  ;;  %v11731_v14 = vld [vmem:[%s21316_s20 + $0x178] sm:$0xff] }
0x2af4   : > { %15477 = vmatprep.subr.mxu0 %v15866_v10 }
0x2af5   : > { %15478 = vmatpush3.msra.mxu0 %v20920_v30  ;;  %v11730_v30 = vld [vmem:[%s21316_s20 + $0x170] sm:$0xff] }
0x2af6   : > { %15479 = vmatprep.subr.mxu0 %v15866_v10 }
0x2af7   : > { %15480 = vmatpush3.msra.mxu0 %v20924_v24 }
0x2af8   : > { %15481 = vmatprep.subr.mxu0 %v15866_v10 }
0x2af9   : > { %15482 = vmatpush3.msra.mxu0 %v20938_v37  ;;  %v11727_v37 = vld [vmem:[%s21316_s20 + $0x158] sm:$0xff] }
0x2afa   : > { %15484 = vmatmul.mubr.msk.f32.vlgmr.msra.gmra.mxu0 %vm1331_vm0, %v12824_v58  ;;  %v12204_v58 = vld [vmem:[%s21316_s20 + $0x218] sm:$0xff] }
0x2b82   : > { %v21122_v39 = vpop.f32.mrf.mxu0  ;;  %v11167_v49 = vpop.f32.mrf.mxu1 }
0x2b84   : > { %v21124_v55 = vpop.f32.mrf.mxu0 }
0x2b8a   : > { %v11243_v23 = vpop.f32.mrf.mxu0 }
0x2b8b   : > { %12808 = vmatmul.mubr.msk.f32.vlgmr.msra.gmra.mxu1 %vm1331_vm0, %v11243_v23 }
0x2b8c   : > { %11442 = vmatpush1.msra.mxu1 %v11412_v26  ;;  %v15419_v13 = vpop.f32.mrf.mxu0  ;;  %11481 = vmatprep.mubr.f32.mxu1 %v15866_v10  ;;  %v11169_v26 = vpop.f32.mrf.mxu1 }
0x2b8d   : > { %11443 = vmatprep.subr.mxu1 %v11411_v38 }
0x2b8e   : > { %11444 = vmatpush1.msra.mxu1 %v11410_v34 }
0x2b8f   : > { %11445 = vmatprep.subr.mxu1 %v11409_v44 }
0x2b90   : > { %11446 = vmatpush1.msra.mxu1 %v11408_v1 }
0x2b91   : > { %11447 = vmatprep.subr.mxu1 %v11407_v16 }
0x2b92   : > { %v11402_v61 = vpop.f32.mrf.mxu0  ;;  %11448 = vmatpush1.msra.mxu1 %v11406_v17 }
0x2b93   : > { %12811 = vmatmul.mubr.msk.f32.vlgmr.msra.gmra.mxu1 %vm1331_vm0, %v11402_v61  ;;  %11600 = vmatprep.subr.mxu1 %v11572_v45  ;;  %v11168_v45 = vadd.f32 %v11167_v49, %v21122_v39  ;;  %v11170_v61 = vadd.f32 %v11169_v26, %v21124_v55  ;;  %v21388_v55 = vld [vmem:[#allocation9_spill] sm:$0xff] }
0x2b94   : > { %11601 = vmatpush1.msra.mxu1 %v11571_v8  ;;  %v15430_v12 = vpop.f32.mrf.mxu0  ;;  %11640 = vmatprep.mubr.f32.mxu1 %v15866_v10 }
0x2b95   : > { %11602 = vmatprep.subr.mxu1 %v11570_v33 }
0x2b96   : > { %11603 = vmatpush1.msra.mxu1 %v11569_v4 }
0x2b97   : > { %11604 = vmatprep.subr.mxu1 %v11568_v41 }
0x2b98   : > { %11605 = vmatpush1.msra.mxu1 %v11567_v60 }
0x2b99   : > { %11606 = vmatprep.subr.mxu1 %v11566_v22 }
0x2b9a   : > { %v11561_v24 = vpop.f32.mrf.mxu0  ;;  %11607 = vmatpush1.msra.mxu1 %v11565_v9 }
0x2b9b   : > { %12814 = vmatmul.mubr.msk.f32.vlgmr.msra.gmra.mxu1 %vm1331_vm0, %v11561_v24  ;;  %11759 = vmatprep.subr.mxu1 %v11731_v14  ;;  %v12285_v24 = vld [vmem:[%s21317_s21] sm:$0x3] }
0x2b9c   : > { %11760 = vmatpush1.msra.mxu1 %v11730_v30  ;;  %v15441_v2 = vpop.f32.mrf.mxu0  ;;  %11799 = vmatprep.mubr.f32.mxu1 %v15866_v10 }
0x2b9d   : > { %11761 = vmatprep.subr.mxu1 %v11729_v48 }
0x2b9e   : > { %11762 = vmatpush1.msra.mxu1 %v11728_v40 }
0x2b9f   : > { %11763 = vmatprep.subr.mxu1 %v11727_v37 }
0x2ba0   : > { %11764 = vmatpush1.msra.mxu1 %v11726_v21  ;;  %v21389_v21 = vsub.s32 0, %v21388_v55 }
0x2ba1   : > { %11765 = vmatprep.subr.mxu1 %v11725_v43 }
0x2ba2   : > { %v11720_v7 = vpop.f32.mrf.mxu0  ;;  %11766 = vmatpush1.msra.mxu1 %v11724_v54  ;;  %v12290_v43 = vrot.slane %v12285_v24, %v21389_v21 }
0x2ba3   : > { %12817 = vmatmul.mubr.msk.f32.vlgmr.msra.gmra.mxu1 %vm1331_vm0, %v11720_v7  ;;  %11918 = vmatprep.subr.mxu1 %v11890_v56  ;;  %v21390_v7 = vsub.s32 1, %v21388_v55 }
0x2ba4   : > { %11919 = vmatpush1.msra.mxu1 %v11889_v57  ;;  %v15452_v31 = vpop.f32.mrf.mxu0  ;;  %11958 = vmatprep.mubr.f32.mxu1 %v15866_v10 }
0x2ba5   : > { %11920 = vmatprep.subr.mxu1 %v11888_v18  ;;  %v12294_v18 = vrot.slane %v12285_v24, %v21390_v7 }
0x2ba6   : > { %11921 = vmatpush1.msra.mxu1 %v11887_v27 }
0x2ba7   : > { %11922 = vmatprep.subr.mxu1 %v11886_v35 }
0x2ba8   : > { %11923 = vmatpush1.msra.mxu1 %v11885_v52 }
0x2ba9   : > { %11924 = vmatprep.subr.mxu1 %v11884_v6 }
0x2baa   : > { %v11879_v36 = vpop.f32.mrf.mxu0  ;;  %11925 = vmatpush1.msra.mxu1 %v11883_v11 }
0x2bab   : > { %12820 = vmatmul.mubr.msk.f32.vlgmr.msra.gmra.mxu1 %vm1331_vm0, %v11879_v36  ;;  %12077 = vmatprep.subr.mxu1 %v12049_v46 }
0x2bac   : > { %12078 = vmatpush1.msra.mxu1 %v12048_v47  ;;  %v15463_v59 = vpop.f32.mrf.mxu0  ;;  %12117 = vmatprep.mubr.f32.mxu1 %v15866_v10 }
0x2bad   : > { %12079 = vmatprep.subr.mxu1 %v12047_v5 }
0x2bae   : > { %12080 = vmatpush1.msra.mxu1 %v12046_v19 }
0x2baf   : > { %12081 = vmatprep.subr.mxu1 %v12045_v51 }
0x2bb0   : > { %12082 = vmatpush1.msra.mxu1 %v12044_v62 }
0x2bb1   : > { %12083 = vmatprep.subr.mxu1 %v12043_v29 }
0x2bb2   : > { %v12038_v53 = vpop.f32.mrf.mxu0  ;;  %12084 = vmatpush1.msra.mxu1 %v12042_v0 }
0x2bb3   : > { %12823 = vmatmul.mubr.msk.f32.vlgmr.msra.gmra.mxu1 %vm1331_vm0, %v12038_v53  ;;  %12236 = vmatprep.subr.mxu1 %v12208_v3 }
0x2bb4   : > { %12237 = vmatpush1.msra.mxu1 %v12207_v20  ;;  %v15474_v63 = vpop.f32.mrf.mxu0  ;;  %12276 = vmatprep.mubr.f32.mxu1 %v15866_v10 }
0x2bb5   : > { %12238 = vmatprep.subr.mxu1 %v12206_v28 }
0x2bb6   : > { %12239 = vmatpush1.msra.mxu1 %v12205_v25 }
0x2bb7   : > { %12240 = vmatprep.subr.mxu1 %v12204_v58 }
0x2bb8   : > { %12241 = vmatpush1.msra.mxu1 %v12203_v42 }
0x2bb9   : > { %12242 = vmatprep.subr.mxu1 %v12202_v15 }
0x2bba   : > { %v12197_v50 = vpop.f32.mrf.mxu0  ;;  %12243 = vmatpush1.msra.mxu1 %v12201_v32 }
0x2bbb   : > { %12826 = vmatmul.mubr.msk.f32.vlgmr.msra.gmra.mxu1 %vm1331_vm0, %v12197_v50 }
0x2bbc   : > { %v15485_v10 = vpop.f32.mrf.mxu0 }
0x2c4b   : > { %v11324_v23 = vpop.f32.mrf.mxu1 }
0x2c4c   : > { %v11329_v33 = vadd.f32 %v11324_v23, %v11168_v45 }
0x2c4d   : > { %v11326_v38 = vpop.f32.mrf.mxu1 }
0x2c4e   : > { %v11330_v4 = vadd.f32 %v11326_v38, %v11170_v61 }
0x2c53   : > { %v11483_v34 = vpop.f32.mrf.mxu1 }
0x2c54   : > { %v11488_v41 = vadd.f32 %v11483_v34, %v11329_v33 }
0x2c55   : > { %v11485_v44 = vpop.f32.mrf.mxu1 }
0x2c56   : > { %v11489_v60 = vadd.f32 %v11485_v44, %v11330_v4 }
0x2c5b   : > { %v11642_v13 = vpop.f32.mrf.mxu1 }
0x2c5c   : > { %v11647_v22 = vadd.f32 %v11642_v13, %v11488_v41 }
0x2c5d   : > { %v11644_v1 = vpop.f32.mrf.mxu1 }
0x2c5e   : > { %v11648_v14 = vadd.f32 %v11644_v1, %v11489_v60 }
0x2c63   : > { %v11801_v16 = vpop.f32.mrf.mxu1 }
0x2c64   : > { %v11806_v30 = vadd.f32 %v11801_v16, %v11647_v22 }
0x2c65   : > { %v11803_v17 = vpop.f32.mrf.mxu1 }
0x2c66   : > { %v11807_v48 = vadd.f32 %v11803_v17, %v11648_v14 }
0x2c6b   : > { %v11960_v8 = vpop.f32.mrf.mxu1 }
0x2c6c   : > { %v11965_v40 = vadd.f32 %v11960_v8, %v11806_v30 }
0x2c6d   : > { %v11962_v12 = vpop.f32.mrf.mxu1 }
0x2c6e   : > { %v11966_v37 = vadd.f32 %v11962_v12, %v11807_v48 }
0x2c73   : > { %v12119_v9 = vpop.f32.mrf.mxu1 }
0x2c74   : > { %v12124_v2 = vadd.f32 %v12119_v9, %v11965_v40 }
0x2c75   : > { %v12121_v39 = vpop.f32.mrf.mxu1 }
0x2c76   : > { %v12125_v56 = vadd.f32 %v12121_v39, %v11966_v37 }
0x2c7b   : > { %v12278_v54 = vpop.f32.mrf.mxu1 }
0x2c7c   : > { %v12283_v57 = vadd.f32 %v12278_v54, %v12124_v2 }
0x2c7d   : > { %v12280_v27 = vpop.f32.mrf.mxu1 }
0x2c7e   : > { %v12297_v35 = vadd.f32 %v12290_v43, %v12283_v57  ;;  %v12284_v31 = vadd.f32 %v12280_v27, %v12125_v56 }
0x2c80   : > { %12299 = vst [vmem:[%s683_s1] sm:$0xff] %v12297_v35  ;;  %v12298_v52 = vadd.f32 %v12294_v18, %v12284_v31 }
0x2c82   : > { %12300 = vst [vmem:[%s683_s1 + $0x8] sm:$0xff] %v12298_v52 }
0x2c83 PF: > { %s32_s3 = sadd.s32 1, %s15859_s3  }
0x2c84   : > { %p29_p4 = scmp.ge.s32.totalorder %s32_s3, 4  }
0x2c86   :  { %31 = sbr.rel (!%p29_p4) target bundleno = 9 (0x9), region = 162 }

</bundles_post_ra>
